<compile_context>
chip_gen: v7x
topology: tpu7x:2x2x1
jax: 0.10.0
libtpu: 0.0.40
codegen_flags: <defaults>
</compile_context>

<pallas_src>
import functools

import jax
import jax.numpy as jnp
from jax.experimental import pallas as pl
from jax.experimental.pallas import tpu as pltpu


def _round_up(x, m):
    return (x + m - 1) // m * m


VMEM_LIMIT_BYTES = 32 * 1024 * 1024

CONV1_K, CONV1_S = 8, 4
CONV2_K, CONV2_S = 4, 2
CONV3_K, CONV3_S = 3, 1
C1_OUT, C2_OUT, C3_OUT = 32, 64, 64
FC_HIDDEN = 512


# ---------------------------------------------------------------------------
# Fused forward kernel: conv1 -> conv2 -> conv3 -> fc1 -> fc2 for one image.
# ---------------------------------------------------------------------------
def _dqn_fused_kernel(p1_ref, w1_ref, b1_ref, w2_ref, b2_ref, w3_ref, b3_ref,
                      fc1w_ref, fc1b_ref, fc2w_ref, fc2b_ref,
                      out_ref,
                      a1_ref, p2_ref, a2_ref, p3_ref, a3_ref, flat_ref,
                      *, dims):
    Ho1, Wo1, Ho2, Wo2, Ho3, Wo3 = dims
    Hh, Wh = Ho1 // CONV2_S, Wo1 // CONV2_S
    bf16, f32 = jnp.bfloat16, jnp.float32

    # ---- conv1: one MXU matmul over the pre-gathered (phase-major) patches.
    h1 = jnp.dot(p1_ref[...], w1_ref[...], preferred_element_type=f32)
    a1_ref[...] = jnp.maximum(h1 + b1_ref[...], 0.0)

    # ---- conv2 (4x4, stride 2): in-VMEM im2col.  conv1's output rows are
    # phase-major w.r.t. the stride-2 grid, so every patch strip is a
    # contiguous, unit-stride row slice of a1 (no strided VMEM access).
    for i in range(CONV2_K):
        for j in range(CONV2_K):
            g = (i % CONV2_S) * CONV2_S + (j % CONV2_S)   # phase block
            a, b = i // CONV2_S, j // CONV2_S
            c0 = (i * CONV2_K + j) * C1_OUT
            for oh in range(Ho2):
                rs = g * (Hh * Wh) + (oh + a) * Wh + b
                p2_ref[oh * Wo2:(oh + 1) * Wo2, c0:c0 + C1_OUT] = (
                    a1_ref[rs:rs + Wo2, :])
    h2 = jnp.dot(p2_ref[...].astype(bf16), w2_ref[...],
                 preferred_element_type=f32)
    a2_ref[...] = jnp.maximum(h2 + b2_ref[...], 0.0)

    # ---- conv3 (3x3, stride 1): in-VMEM im2col with contiguous strips.
    for i in range(CONV3_K):
        for j in range(CONV3_K):
            c0 = (i * CONV3_K + j) * C2_OUT
            for oh in range(Ho3):
                rs = (oh + i) * Wo2 + j
                p3_ref[oh * Wo3:(oh + 1) * Wo3, c0:c0 + C2_OUT] = (
                    a2_ref[rs:rs + Wo3, :])
    h3 = jnp.dot(p3_ref[...].astype(bf16), w3_ref[...],
                 preferred_element_type=f32)
    a3_ref[...] = jnp.maximum(h3 + b3_ref[...], 0.0)

    # ---- flatten (NHWC order; fc1 weight rows were pre-permuted to match the
    # PyTorch NCHW .view(N, -1) semantics).  Pure lane-offset stores, no
    # sublane->lane relayout.
    for p in range(Ho3 * Wo3):
        flat_ref[0:1, p * C3_OUT:(p + 1) * C3_OUT] = a3_ref[p:p + 1, :]

    # ---- fc1 + ReLU + fc2; hidden activation never leaves VMEM/vregs.
    # Broadcast the single flat row to 8 rows so the MXU sees a full sublane
    # tile (avoids an M=1 matmul).
    lhs = jnp.broadcast_to(flat_ref[...], (8, flat_ref.shape[1])).astype(bf16)
    h = jnp.dot(lhs, fc1w_ref[...], preferred_element_type=f32) + fc1b_ref[...]
    h = jnp.maximum(h, 0.0)
    acts = jnp.dot(h.astype(bf16), fc2w_ref[...],
                   preferred_element_type=f32) + fc2b_ref[...]
    out_ref[...] = acts[0:1, :].reshape(1, 1, acts.shape[-1])


def dqn_forward_fused(p1, prep, *, conv_dims, out_pad):
    """p1: (B*Ho1*Wo1, K1) bf16 conv1 patches (phase-major rows per image)."""
    Ho1, Wo1, Ho2, Wo2, Ho3, Wo3 = conv_dims
    M1, K1 = Ho1 * Wo1, prep["w1"].shape[0]
    B = p1.shape[0] // M1
    fc_in = prep["fc1_w"].shape[0]

    def w_spec(arr):  # weights/biases: constant block index -> VMEM-resident
        return pl.BlockSpec(arr.shape, lambda b: (0, 0))

    kernel = functools.partial(_dqn_fused_kernel, dims=conv_dims)
    out = pl.pallas_call(
        kernel,
        out_shape=jax.ShapeDtypeStruct((B, 1, out_pad), jnp.float32),
        grid=(B,),
        in_specs=[
            pl.BlockSpec((M1, K1), lambda b: (b, 0)),   # per-image conv1 patches
            w_spec(prep["w1"]), w_spec(prep["b1"]),
            w_spec(prep["w2"]), w_spec(prep["b2"]),
            w_spec(prep["w3"]), w_spec(prep["b3"]),
            w_spec(prep["fc1_w"]), w_spec(prep["fc1_b"]),
            w_spec(prep["fc2_w"]), w_spec(prep["fc2_b"]),
        ],
        out_specs=pl.BlockSpec((1, 1, out_pad), lambda b: (b, 0, 0)),
        scratch_shapes=[
            pltpu.VMEM((Ho1 * Wo1, C1_OUT), jnp.float32),                        # a1
            pltpu.VMEM((Ho2 * Wo2, CONV2_K * CONV2_K * C1_OUT), jnp.float32),    # p2
            pltpu.VMEM((Ho2 * Wo2, C2_OUT), jnp.float32),                        # a2
            pltpu.VMEM((Ho3 * Wo3, CONV3_K * CONV3_K * C2_OUT), jnp.float32),    # p3
            pltpu.VMEM((Ho3 * Wo3, C3_OUT), jnp.float32),                        # a3
            pltpu.VMEM((1, fc_in), jnp.float32),                                 # flat
        ],
        compiler_params=pltpu.CompilerParams(
            dimension_semantics=("parallel",),      # images are independent
            vmem_limit_bytes=VMEM_LIMIT_BYTES,
        ),
    )(p1, prep["w1"], prep["b1"], prep["w2"], prep["b2"],
      prep["w3"], prep["b3"], prep["fc1_w"], prep["fc1_b"],
      prep["fc2_w"], prep["fc2_b"])
    return out.reshape(B, out_pad)


# ---------------------------------------------------------------------------
# Wrapper-side prep of the raw input (the only remaining XLA pass).
# ---------------------------------------------------------------------------
def _conv1_patches(state_nchw, dtype):
    """NCHW input -> conv1 im2col patches with rows in stride-2 phase-major
    order (so the fused kernel's conv2 reads only contiguous row strips)."""
    B, C, H, W = state_nchw.shape
    k, s, s2 = CONV1_K, CONV1_S, CONV2_S
    Ho, Wo = (H - k) // s + 1, (W - k) // s + 1
    assert Ho % s2 == 0 and Wo % s2 == 0, "conv1 output must tile conv2 stride"
    x = jnp.transpose(state_nchw, (0, 2, 3, 1)).astype(dtype)       # NHWC
    cols = []
    for i in range(k):
        for j in range(k):
            cols.append(x[:, i:i + s * Ho:s, j:j + s * Wo:s, :])
    p = jnp.concatenate(cols, axis=-1)                              # (B,Ho,Wo,k*k*C)
    p = p.reshape(B, Ho // s2, s2, Wo // s2, s2, k * k * C)
    p = jnp.transpose(p, (0, 2, 4, 1, 3, 5))                        # (b,ph,pw,u,v,f)
    return p.reshape(B * Ho * Wo, k * k * C)


@functools.partial(jax.jit, static_argnames=("n_actions",))
def dqn_forward(state_nchw, prep, *, n_actions):
    B, C, H, W = state_nchw.shape
    Ho1, Wo1 = (H - CONV1_K) // CONV1_S + 1, (W - CONV1_K) // CONV1_S + 1
    Ho2, Wo2 = (Ho1 - CONV2_K) // CONV2_S + 1, (Wo1 - CONV2_K) // CONV2_S + 1
    Ho3, Wo3 = Ho2 - CONV3_K + 1, Wo2 - CONV3_K + 1
    assert prep["fc1_w"].shape[0] == Ho3 * Wo3 * C3_OUT

    p1 = _conv1_patches(state_nchw, prep["w1"].dtype)
    out_pad = prep["fc2_w"].shape[1]
    actions = dqn_forward_fused(
        p1, prep, conv_dims=(Ho1, Wo1, Ho2, Wo2, Ho3, Wo3), out_pad=out_pad)
    return actions[:, :n_actions]


# ---------------------------------------------------------------------------
# Parameters: PyTorch-layout init + one-time kernel-layout preparation
# ---------------------------------------------------------------------------
def init_params(key, input_dims, n_actions):
    c_in, H, W = input_dims
    h1, w1 = (H - CONV1_K) // CONV1_S + 1, (W - CONV1_K) // CONV1_S + 1
    h2, w2 = (h1 - CONV2_K) // CONV2_S + 1, (w1 - CONV2_K) // CONV2_S + 1
    h3, w3 = h2 - CONV3_K + 1, w2 - CONV3_K + 1
    fc_in = C3_OUT * h3 * w3

    ks = jax.random.split(key, 10)
    s = 0.05
    return {
        "w1": s * jax.random.normal(ks[0], (C1_OUT, c_in, CONV1_K, CONV1_K), jnp.float32),
        "b1": s * jax.random.normal(ks[1], (C1_OUT,), jnp.float32),
        "w2": s * jax.random.normal(ks[2], (C2_OUT, C1_OUT, CONV2_K, CONV2_K), jnp.float32),
        "b2": s * jax.random.normal(ks[3], (C2_OUT,), jnp.float32),
        "w3": s * jax.random.normal(ks[4], (C3_OUT, C2_OUT, CONV3_K, CONV3_K), jnp.float32),
        "b3": s * jax.random.normal(ks[5], (C3_OUT,), jnp.float32),
        "fc1_w": s * jax.random.normal(ks[6], (FC_HIDDEN, fc_in), jnp.float32),
        "fc1_b": s * jax.random.normal(ks[7], (FC_HIDDEN,), jnp.float32),
        "fc2_w": s * jax.random.normal(ks[8], (n_actions, FC_HIDDEN), jnp.float32),
        "fc2_b": s * jax.random.normal(ks[9], (n_actions,), jnp.float32),
    }


def prepare_params(raw, input_dims, compute_dtype=jnp.bfloat16):
    """One-time layout prep: all transposes / reorders / padding hoisted here."""
    _, H, W = input_dims
    h1, w1 = (H - CONV1_K) // CONV1_S + 1, (W - CONV1_K) // CONV1_S + 1
    h2, w2 = (h1 - CONV2_K) // CONV2_S + 1, (w1 - CONV2_K) // CONV2_S + 1
    h3, w3 = h2 - CONV3_K + 1, w2 - CONV3_K + 1

    def conv_w(w_pt):  # (C_out, C_in, kh, kw) -> (kh*kw*C_in, C_out)
        c_out, c_in, kh, kw = w_pt.shape
        return (jnp.transpose(w_pt, (2, 3, 1, 0))
                .reshape(kh * kw * c_in, c_out).astype(compute_dtype))

    # fc1: permute input columns from NCHW-flatten (c,h,w) to the kernel's
    # NHWC-flatten (h,w,c) of the conv3 output.
    fc1 = raw["fc1_w"].reshape(FC_HIDDEN, C3_OUT, h3, w3)
    fc1 = jnp.transpose(fc1, (0, 2, 3, 1)).reshape(FC_HIDDEN, C3_OUT * h3 * w3)

    # fc2: pad output lanes to 128 once so the kernel's HBM store is lane-dense.
    n_act = raw["fc2_w"].shape[0]
    n_pad = _round_up(n_act, 128)
    fc2_w = jnp.zeros((FC_HIDDEN, n_pad), compute_dtype).at[:, :n_act].set(
        raw["fc2_w"].T.astype(compute_dtype))
    fc2_b = jnp.zeros((1, n_pad), jnp.float32).at[0, :n_act].set(
        raw["fc2_b"].astype(jnp.float32))

    return {
        "w1": conv_w(raw["w1"]), "b1": raw["b1"].reshape(1, -1).astype(jnp.float32),
        "w2": conv_w(raw["w2"]), "b2": raw["b2"].reshape(1, -1).astype(jnp.float32),
        "w3": conv_w(raw["w3"]), "b3": raw["b3"].reshape(1, -1).astype(jnp.float32),
        "fc1_w": fc1.T.astype(compute_dtype),
        "fc1_b": raw["fc1_b"].reshape(1, -1).astype(jnp.float32),
        "fc2_w": fc2_w,
        "fc2_b": fc2_b,
    }


# ---------------------------------------------------------------------------
# Pure-XLA reference (same bf16 rounding points as the kernel) for validation.
# ---------------------------------------------------------------------------
def reference_forward(state_nchw, raw):
    bf16, f32 = jnp.bfloat16, jnp.float32

    def conv(x, w, b, stride):
        y = jax.lax.conv_general_dilated(
            x.astype(bf16), w.astype(bf16), (stride, stride), "VALID",
            dimension_numbers=("NCHW", "OIHW", "NCHW"),
            preferred_element_type=f32)
        return jnp.maximum(y + b[None, :, None, None], 0.0)

    x = conv(state_nchw, raw["w1"], raw["b1"], CONV1_S)
    x = conv(x, raw["w2"], raw["b2"], CONV2_S)
    x = conv(x, raw["w3"], raw["b3"], CONV3_S)
    flat = x.reshape(x.shape[0], -1)
    h = jnp.dot(flat.astype(bf16), raw["fc1_w"].astype(bf16).T,
                preferred_element_type=f32) + raw["fc1_b"]
    h = jnp.maximum(h, 0.0)
    return (jnp.dot(h.astype(bf16), raw["fc2_w"].astype(bf16).T,
                    preferred_element_type=f32) + raw["fc2_b"])


if __name__ == "__main__":
    batch = 4
    n_actions = 6
    input_dims = (4, 68, 68)   # conv spatial 16 -> 7 -> 5, fc_in = 1600

    key = jax.random.PRNGKey(0)
    pkey, xkey = jax.random.split(key)
    raw_params = init_params(pkey, input_dims, n_actions)
    prep = prepare_params(raw_params, input_dims, compute_dtype=jnp.bfloat16)
    state = jax.random.normal(xkey, (batch,) + input_dims, jnp.float32)

    actions = dqn_forward(state, prep, n_actions=n_actions)
    actions = jax.block_until_ready(actions)
    assert actions.shape == (batch, n_actions), actions.shape
    assert actions.dtype == jnp.float32

    ref = reference_forward(state, raw_params)
    err = float(jnp.max(jnp.abs(actions - ref)))
    assert err < 2e-2, f"max |pallas - reference| = {err}"

    print("KERNEL_OK")
</pallas_src>

<mosaic_0001>
module attributes {stable_mosaic.version = 11 : i64} {
  func.func @_dqn_fused_kernel(%arg0: i32, %arg1: memref<256x256xbf16, #tpu.memory_space<vmem>>, %arg2: memref<256x32xbf16, #tpu.memory_space<vmem>>, %arg3: memref<1x32xf32, #tpu.memory_space<vmem>>, %arg4: memref<512x64xbf16, #tpu.memory_space<vmem>>, %arg5: memref<1x64xf32, #tpu.memory_space<vmem>>, %arg6: memref<576x64xbf16, #tpu.memory_space<vmem>>, %arg7: memref<1x64xf32, #tpu.memory_space<vmem>>, %arg8: memref<1600x512xbf16, #tpu.memory_space<vmem>>, %arg9: memref<1x512xf32, #tpu.memory_space<vmem>>, %arg10: memref<512x128xbf16, #tpu.memory_space<vmem>>, %arg11: memref<1x128xf32, #tpu.memory_space<vmem>>, %arg12: memref<1x1x128xf32, #tpu.memory_space<vmem>>, %arg13: memref<256x32xf32, #tpu.memory_space<vmem>>, %arg14: memref<49x512xf32, #tpu.memory_space<vmem>>, %arg15: memref<49x64xf32, #tpu.memory_space<vmem>>, %arg16: memref<25x576xf32, #tpu.memory_space<vmem>>, %arg17: memref<25x64xf32, #tpu.memory_space<vmem>>, %arg18: memref<1x1600xf32, #tpu.memory_space<vmem>>) attributes {dimension_semantics = [#tpu.dimension_semantics<parallel>], iteration_bounds = array<i64: 4>, scalar_prefetch = 0 : i64, scratch_operands = 6 : i64, tpu.core_type = #tpu.core_type<tc>, window_params = [{transform_indices = @transform_0, window_bounds = array<i64: 256, 256>}, {pipeline_mode = #tpu.pipeline_mode<synchronous>, transform_indices = @transform_1, window_bounds = array<i64: 256, 32>}, {pipeline_mode = #tpu.pipeline_mode<synchronous>, transform_indices = @transform_2, window_bounds = array<i64: 1, 32>}, {pipeline_mode = #tpu.pipeline_mode<synchronous>, transform_indices = @transform_3, window_bounds = array<i64: 512, 64>}, {pipeline_mode = #tpu.pipeline_mode<synchronous>, transform_indices = @transform_4, window_bounds = array<i64: 1, 64>}, {pipeline_mode = #tpu.pipeline_mode<synchronous>, transform_indices = @transform_5, window_bounds = array<i64: 576, 64>}, {pipeline_mode = #tpu.pipeline_mode<synchronous>, transform_indices = @transform_6, window_bounds = array<i64: 1, 64>}, {pipeline_mode = #tpu.pipeline_mode<synchronous>, transform_indices = @transform_7, window_bounds = array<i64: 1600, 512>}, {pipeline_mode = #tpu.pipeline_mode<synchronous>, transform_indices = @transform_8, window_bounds = array<i64: 1, 512>}, {pipeline_mode = #tpu.pipeline_mode<synchronous>, transform_indices = @transform_9, window_bounds = array<i64: 512, 128>}, {pipeline_mode = #tpu.pipeline_mode<synchronous>, transform_indices = @transform_10, window_bounds = array<i64: 1, 128>}, {transform_indices = @transform_11, window_bounds = array<i64: 1, 1, 128>}]} {
    %c0 = arith.constant 0 : index
    %c0_0 = arith.constant 0 : index
    %0 = vector.load %arg1[%c0, %c0_0] : memref<256x256xbf16, #tpu.memory_space<vmem>>, vector<256x256xbf16>
    %c0_1 = arith.constant 0 : index
    %c0_2 = arith.constant 0 : index
    %1 = vector.load %arg2[%c0_1, %c0_2] : memref<256x32xbf16, #tpu.memory_space<vmem>>, vector<256x32xbf16>
    %cst = arith.constant dense<0.000000e+00> : vector<256x32xf32>
    %2 = tpu.matmul %0, %1, %cst {dimension_numbers = #tpu.dot_dimension_numbers<[1], [0], [0], [1], [0, 0, 1, 1], [], []>} : vector<256x256xbf16>, vector<256x32xbf16>, vector<256x32xf32> -> vector<256x32xf32>
    %c0_3 = arith.constant 0 : index
    %c0_4 = arith.constant 0 : index
    %3 = vector.load %arg3[%c0_3, %c0_4] : memref<1x32xf32, #tpu.memory_space<vmem>>, vector<1x32xf32>
    %4 = vector.broadcast %3 : vector<1x32xf32> to vector<256x32xf32>
    %5 = arith.addf %2, %4 : vector<256x32xf32>
    %cst_5 = arith.constant 0.000000e+00 : f32
    %6 = vector.broadcast %cst_5 : f32 to vector<256x32xf32>
    %7 = arith.maximumf %5, %6 : vector<256x32xf32>
    %c0_6 = arith.constant 0 : index
    %c0_7 = arith.constant 0 : index
    %8 = vector.load %arg13[%c0_6, %c0_7] : memref<256x32xf32, #tpu.memory_space<vmem>>, vector<256x32xf32>
    tpu.vector_store %arg13[%c0_6, %c0_7], %7 {strides = array<i32>} : memref<256x32xf32, #tpu.memory_space<vmem>>, vector<256x32xf32>,
    %c0_8 = arith.constant 0 : index
    %c0_9 = arith.constant 0 : index
    %9 = vector.load %arg13[%c0_8, %c0_9] : memref<256x32xf32, #tpu.memory_space<vmem>>, vector<7x32xf32>
    %c0_10 = arith.constant 0 : index
    %c0_11 = arith.constant 0 : index
    %10 = vector.load %arg14[%c0_10, %c0_11] : memref<49x512xf32, #tpu.memory_space<vmem>>, vector<7x32xf32>
    tpu.vector_store %arg14[%c0_10, %c0_11], %9 {strides = array<i32>} : memref<49x512xf32, #tpu.memory_space<vmem>>, vector<7x32xf32>,
    %c8 = arith.constant 8 : index
    %c0_12 = arith.constant 0 : index
    %11 = vector.load %arg13[%c8, %c0_12] : memref<256x32xf32, #tpu.memory_space<vmem>>, vector<7x32xf32>
    %c7 = arith.constant 7 : index
    %c0_13 = arith.constant 0 : index
    %12 = vector.load %arg14[%c7, %c0_13] : memref<49x512xf32, #tpu.memory_space<vmem>>, vector<7x32xf32>
    tpu.vector_store %arg14[%c7, %c0_13], %11 {strides = array<i32>} : memref<49x512xf32, #tpu.memory_space<vmem>>, vector<7x32xf32>,
    %c16 = arith.constant 16 : index
    %c0_14 = arith.constant 0 : index
    %13 = vector.load %arg13[%c16, %c0_14] : memref<256x32xf32, #tpu.memory_space<vmem>>, vector<7x32xf32>
    %c14 = arith.constant 14 : index
    %c0_15 = arith.constant 0 : index
    %14 = vector.load %arg14[%c14, %c0_15] : memref<49x512xf32, #tpu.memory_space<vmem>>, vector<7x32xf32>
    tpu.vector_store %arg14[%c14, %c0_15], %13 {strides = array<i32>} : memref<49x512xf32, #tpu.memory_space<vmem>>, vector<7x32xf32>,
    %c24 = arith.constant 24 : index
    %c0_16 = arith.constant 0 : index
    %15 = vector.load %arg13[%c24, %c0_16] : memref<256x32xf32, #tpu.memory_space<vmem>>, vector<7x32xf32>
    %c21 = arith.constant 21 : index
    %c0_17 = arith.constant 0 : index
    %16 = vector.load %arg14[%c21, %c0_17] : memref<49x512xf32, #tpu.memory_space<vmem>>, vector<7x32xf32>
    tpu.vector_store %arg14[%c21, %c0_17], %15 {strides = array<i32>} : memref<49x512xf32, #tpu.memory_space<vmem>>, vector<7x32xf32>,
    %c32 = arith.constant 32 : index
    %c0_18 = arith.constant 0 : index
    %17 = vector.load %arg13[%c32, %c0_18] : memref<256x32xf32, #tpu.memory_space<vmem>>, vector<7x32xf32>
    %c28 = arith.constant 28 : index
    %c0_19 = arith.constant 0 : index
    %18 = vector.load %arg14[%c28, %c0_19] : memref<49x512xf32, #tpu.memory_space<vmem>>, vector<7x32xf32>
    tpu.vector_store %arg14[%c28, %c0_19], %17 {strides = array<i32>} : memref<49x512xf32, #tpu.memory_space<vmem>>, vector<7x32xf32>,
    %c40 = arith.constant 40 : index
    %c0_20 = arith.constant 0 : index
    %19 = vector.load %arg13[%c40, %c0_20] : memref<256x32xf32, #tpu.memory_space<vmem>>, vector<7x32xf32>
    %c35 = arith.constant 35 : index
    %c0_21 = arith.constant 0 : index
    %20 = vector.load %arg14[%c35, %c0_21] : memref<49x512xf32, #tpu.memory_space<vmem>>, vector<7x32xf32>
    tpu.vector_store %arg14[%c35, %c0_21], %19 {strides = array<i32>} : memref<49x512xf32, #tpu.memory_space<vmem>>, vector<7x32xf32>,
    %c48 = arith.constant 48 : index
    %c0_22 = arith.constant 0 : index
    %21 = vector.load %arg13[%c48, %c0_22] : memref<256x32xf32, #tpu.memory_space<vmem>>, vector<7x32xf32>
    %c42 = arith.constant 42 : index
    %c0_23 = arith.constant 0 : index
    %22 = vector.load %arg14[%c42, %c0_23] : memref<49x512xf32, #tpu.memory_space<vmem>>, vector<7x32xf32>
    tpu.vector_store %arg14[%c42, %c0_23], %21 {strides = array<i32>} : memref<49x512xf32, #tpu.memory_space<vmem>>, vector<7x32xf32>,
    %c64 = arith.constant 64 : index
    %c0_24 = arith.constant 0 : index
    %23 = vector.load %arg13[%c64, %c0_24] : memref<256x32xf32, #tpu.memory_space<vmem>>, vector<7x32xf32>
    %c0_25 = arith.constant 0 : index
    %c32_26 = arith.constant 32 : index
    %24 = vector.load %arg14[%c0_25, %c32_26] : memref<49x512xf32, #tpu.memory_space<vmem>>, vector<7x32xf32>
    tpu.vector_store %arg14[%c0_25, %c32_26], %23 {strides = array<i32>} : memref<49x512xf32, #tpu.memory_space<vmem>>, vector<7x32xf32>,
    %c72 = arith.constant 72 : index
    %c0_27 = arith.constant 0 : index
    %25 = vector.load %arg13[%c72, %c0_27] : memref<256x32xf32, #tpu.memory_space<vmem>>, vector<7x32xf32>
    %c7_28 = arith.constant 7 : index
    %c32_29 = arith.constant 32 : index
    %26 = vector.load %arg14[%c7_28, %c32_29] : memref<49x512xf32, #tpu.memory_space<vmem>>, vector<7x32xf32>
    tpu.vector_store %arg14[%c7_28, %c32_29], %25 {strides = array<i32>} : memref<49x512xf32, #tpu.memory_space<vmem>>, vector<7x32xf32>,
    %c80 = arith.constant 80 : index
    %c0_30 = arith.constant 0 : index
    %27 = vector.load %arg13[%c80, %c0_30] : memref<256x32xf32, #tpu.memory_space<vmem>>, vector<7x32xf32>
    %c14_31 = arith.constant 14 : index
    %c32_32 = arith.constant 32 : index
    %28 = vector.load %arg14[%c14_31, %c32_32] : memref<49x512xf32, #tpu.memory_space<vmem>>, vector<7x32xf32>
    tpu.vector_store %arg14[%c14_31, %c32_32], %27 {strides = array<i32>} : memref<49x512xf32, #tpu.memory_space<vmem>>, vector<7x32xf32>,
    %c88 = arith.constant 88 : index
    %c0_33 = arith.constant 0 : index
    %29 = vector.load %arg13[%c88, %c0_33] : memref<256x32xf32, #tpu.memory_space<vmem>>, vector<7x32xf32>
    %c21_34 = arith.constant 21 : index
    %c32_35 = arith.constant 32 : index
    %30 = vector.load %arg14[%c21_34, %c32_35] : memref<49x512xf32, #tpu.memory_space<vmem>>, vector<7x32xf32>
    tpu.vector_store %arg14[%c21_34, %c32_35], %29 {strides = array<i32>} : memref<49x512xf32, #tpu.memory_space<vmem>>, vector<7x32xf32>,
    %c96 = arith.constant 96 : index
    %c0_36 = arith.constant 0 : index
    %31 = vector.load %arg13[%c96, %c0_36] : memref<256x32xf32, #tpu.memory_space<vmem>>, vector<7x32xf32>
    %c28_37 = arith.constant 28 : index
    %c32_38 = arith.constant 32 : index
    %32 = vector.load %arg14[%c28_37, %c32_38] : memref<49x512xf32, #tpu.memory_space<vmem>>, vector<7x32xf32>
    tpu.vector_store %arg14[%c28_37, %c32_38], %31 {strides = array<i32>} : memref<49x512xf32, #tpu.memory_space<vmem>>, vector<7x32xf32>,
    %c104 = arith.constant 104 : index
    %c0_39 = arith.constant 0 : index
    %33 = vector.load %arg13[%c104, %c0_39] : memref<256x32xf32, #tpu.memory_space<vmem>>, vector<7x32xf32>
    %c35_40 = arith.constant 35 : index
    %c32_41 = arith.constant 32 : index
    %34 = vector.load %arg14[%c35_40, %c32_41] : memref<49x512xf32, #tpu.memory_space<vmem>>, vector<7x32xf32>
    tpu.vector_store %arg14[%c35_40, %c32_41], %33 {strides = array<i32>} : memref<49x512xf32, #tpu.memory_space<vmem>>, vector<7x32xf32>,
    %c112 = arith.constant 112 : index
    %c0_42 = arith.constant 0 : index
    %35 = vector.load %arg13[%c112, %c0_42] : memref<256x32xf32, #tpu.memory_space<vmem>>, vector<7x32xf32>
    %c42_43 = arith.constant 42 : index
    %c32_44 = arith.constant 32 : index
    %36 = vector.load %arg14[%c42_43, %c32_44] : memref<49x512xf32, #tpu.memory_space<vmem>>, vector<7x32xf32>
    tpu.vector_store %arg14[%c42_43, %c32_44], %35 {strides = array<i32>} : memref<49x512xf32, #tpu.memory_space<vmem>>, vector<7x32xf32>,
    %c1 = arith.constant 1 : index
    %c0_45 = arith.constant 0 : index
    %37 = vector.load %arg13[%c1, %c0_45] : memref<256x32xf32, #tpu.memory_space<vmem>>, vector<7x32xf32>
    %c0_46 = arith.constant 0 : index
    %c64_47 = arith.constant 64 : index
    %38 = vector.load %arg14[%c0_46, %c64_47] : memref<49x512xf32, #tpu.memory_space<vmem>>, vector<7x32xf32>
    tpu.vector_store %arg14[%c0_46, %c64_47], %37 {strides = array<i32>} : memref<49x512xf32, #tpu.memory_space<vmem>>, vector<7x32xf32>,
    %c9 = arith.constant 9 : index
    %c0_48 = arith.constant 0 : index
    %39 = vector.load %arg13[%c9, %c0_48] : memref<256x32xf32, #tpu.memory_space<vmem>>, vector<7x32xf32>
    %c7_49 = arith.constant 7 : index
    %c64_50 = arith.constant 64 : index
    %40 = vector.load %arg14[%c7_49, %c64_50] : memref<49x512xf32, #tpu.memory_space<vmem>>, vector<7x32xf32>
    tpu.vector_store %arg14[%c7_49, %c64_50], %39 {strides = array<i32>} : memref<49x512xf32, #tpu.memory_space<vmem>>, vector<7x32xf32>,
    %c17 = arith.constant 17 : index
    %c0_51 = arith.constant 0 : index
    %41 = vector.load %arg13[%c17, %c0_51] : memref<256x32xf32, #tpu.memory_space<vmem>>, vector<7x32xf32>
    %c14_52 = arith.constant 14 : index
    %c64_53 = arith.constant 64 : index
    %42 = vector.load %arg14[%c14_52, %c64_53] : memref<49x512xf32, #tpu.memory_space<vmem>>, vector<7x32xf32>
    tpu.vector_store %arg14[%c14_52, %c64_53], %41 {strides = array<i32>} : memref<49x512xf32, #tpu.memory_space<vmem>>, vector<7x32xf32>,
    %c25 = arith.constant 25 : index
    %c0_54 = arith.constant 0 : index
    %43 = vector.load %arg13[%c25, %c0_54] : memref<256x32xf32, #tpu.memory_space<vmem>>, vector<7x32xf32>
    %c21_55 = arith.constant 21 : index
    %c64_56 = arith.constant 64 : index
    %44 = vector.load %arg14[%c21_55, %c64_56] : memref<49x512xf32, #tpu.memory_space<vmem>>, vector<7x32xf32>
    tpu.vector_store %arg14[%c21_55, %c64_56], %43 {strides = array<i32>} : memref<49x512xf32, #tpu.memory_space<vmem>>, vector<7x32xf32>,
    %c33 = arith.constant 33 : index
    %c0_57 = arith.constant 0 : index
    %45 = vector.load %arg13[%c33, %c0_57] : memref<256x32xf32, #tpu.memory_space<vmem>>, vector<7x32xf32>
    %c28_58 = arith.constant 28 : index
    %c64_59 = arith.constant 64 : index
    %46 = vector.load %arg14[%c28_58, %c64_59] : memref<49x512xf32, #tpu.memory_space<vmem>>, vector<7x32xf32>
    tpu.vector_store %arg14[%c28_58, %c64_59], %45 {strides = array<i32>} : memref<49x512xf32, #tpu.memory_space<vmem>>, vector<7x32xf32>,
    %c41 = arith.constant 41 : index
    %c0_60 = arith.constant 0 : index
    %47 = vector.load %arg13[%c41, %c0_60] : memref<256x32xf32, #tpu.memory_space<vmem>>, vector<7x32xf32>
    %c35_61 = arith.constant 35 : index
    %c64_62 = arith.constant 64 : index
    %48 = vector.load %arg14[%c35_61, %c64_62] : memref<49x512xf32, #tpu.memory_space<vmem>>, vector<7x32xf32>
    tpu.vector_store %arg14[%c35_61, %c64_62], %47 {strides = array<i32>} : memref<49x512xf32, #tpu.memory_space<vmem>>, vector<7x32xf32>,
    %c49 = arith.constant 49 : index
    %c0_63 = arith.constant 0 : index
    %49 = vector.load %arg13[%c49, %c0_63] : memref<256x32xf32, #tpu.memory_space<vmem>>, vector<7x32xf32>
    %c42_64 = arith.constant 42 : index
    %c64_65 = arith.constant 64 : index
    %50 = vector.load %arg14[%c42_64, %c64_65] : memref<49x512xf32, #tpu.memory_space<vmem>>, vector<7x32xf32>
    tpu.vector_store %arg14[%c42_64, %c64_65], %49 {strides = array<i32>} : memref<49x512xf32, #tpu.memory_space<vmem>>, vector<7x32xf32>,
    %c65 = arith.constant 65 : index
    %c0_66 = arith.constant 0 : index
    %51 = vector.load %arg13[%c65, %c0_66] : memref<256x32xf32, #tpu.memory_space<vmem>>, vector<7x32xf32>
    %c0_67 = arith.constant 0 : index
    %c96_68 = arith.constant 96 : index
    %52 = vector.load %arg14[%c0_67, %c96_68] : memref<49x512xf32, #tpu.memory_space<vmem>>, vector<7x32xf32>
    tpu.vector_store %arg14[%c0_67, %c96_68], %51 {strides = array<i32>} : memref<49x512xf32, #tpu.memory_space<vmem>>, vector<7x32xf32>,
    %c73 = arith.constant 73 : index
    %c0_69 = arith.constant 0 : index
    %53 = vector.load %arg13[%c73, %c0_69] : memref<256x32xf32, #tpu.memory_space<vmem>>, vector<7x32xf32>
    %c7_70 = arith.constant 7 : index
    %c96_71 = arith.constant 96 : index
    %54 = vector.load %arg14[%c7_70, %c96_71] : memref<49x512xf32, #tpu.memory_space<vmem>>, vector<7x32xf32>
    tpu.vector_store %arg14[%c7_70, %c96_71], %53 {strides = array<i32>} : memref<49x512xf32, #tpu.memory_space<vmem>>, vector<7x32xf32>,
    %c81 = arith.constant 81 : index
    %c0_72 = arith.constant 0 : index
    %55 = vector.load %arg13[%c81, %c0_72] : memref<256x32xf32, #tpu.memory_space<vmem>>, vector<7x32xf32>
    %c14_73 = arith.constant 14 : index
    %c96_74 = arith.constant 96 : index
    %56 = vector.load %arg14[%c14_73, %c96_74] : memref<49x512xf32, #tpu.memory_space<vmem>>, vector<7x32xf32>
    tpu.vector_store %arg14[%c14_73, %c96_74], %55 {strides = array<i32>} : memref<49x512xf32, #tpu.memory_space<vmem>>, vector<7x32xf32>,
    %c89 = arith.constant 89 : index
    %c0_75 = arith.constant 0 : index
    %57 = vector.load %arg13[%c89, %c0_75] : memref<256x32xf32, #tpu.memory_space<vmem>>, vector<7x32xf32>
    %c21_76 = arith.constant 21 : index
    %c96_77 = arith.constant 96 : index
    %58 = vector.load %arg14[%c21_76, %c96_77] : memref<49x512xf32, #tpu.memory_space<vmem>>, vector<7x32xf32>
    tpu.vector_store %arg14[%c21_76, %c96_77], %57 {strides = array<i32>} : memref<49x512xf32, #tpu.memory_space<vmem>>, vector<7x32xf32>,
    %c97 = arith.constant 97 : index
    %c0_78 = arith.constant 0 : index
    %59 = vector.load %arg13[%c97, %c0_78] : memref<256x32xf32, #tpu.memory_space<vmem>>, vector<7x32xf32>
    %c28_79 = arith.constant 28 : index
    %c96_80 = arith.constant 96 : index
    %60 = vector.load %arg14[%c28_79, %c96_80] : memref<49x512xf32, #tpu.memory_space<vmem>>, vector<7x32xf32>
    tpu.vector_store %arg14[%c28_79, %c96_80], %59 {strides = array<i32>} : memref<49x512xf32, #tpu.memory_space<vmem>>, vector<7x32xf32>,
    %c105 = arith.constant 105 : index
    %c0_81 = arith.constant 0 : index
    %61 = vector.load %arg13[%c105, %c0_81] : memref<256x32xf32, #tpu.memory_space<vmem>>, vector<7x32xf32>
    %c35_82 = arith.constant 35 : index
    %c96_83 = arith.constant 96 : index
    %62 = vector.load %arg14[%c35_82, %c96_83] : memref<49x512xf32, #tpu.memory_space<vmem>>, vector<7x32xf32>
    tpu.vector_store %arg14[%c35_82, %c96_83], %61 {strides = array<i32>} : memref<49x512xf32, #tpu.memory_space<vmem>>, vector<7x32xf32>,
    %c113 = arith.constant 113 : index
    %c0_84 = arith.constant 0 : index
    %63 = vector.load %arg13[%c113, %c0_84] : memref<256x32xf32, #tpu.memory_space<vmem>>, vector<7x32xf32>
    %c42_85 = arith.constant 42 : index
    %c96_86 = arith.constant 96 : index
    %64 = vector.load %arg14[%c42_85, %c96_86] : memref<49x512xf32, #tpu.memory_space<vmem>>, vector<7x32xf32>
    tpu.vector_store %arg14[%c42_85, %c96_86], %63 {strides = array<i32>} : memref<49x512xf32, #tpu.memory_space<vmem>>, vector<7x32xf32>,
    %c128 = arith.constant 128 : index
    %c0_87 = arith.constant 0 : index
    %65 = vector.load %arg13[%c128, %c0_87] : memref<256x32xf32, #tpu.memory_space<vmem>>, vector<7x32xf32>
    %c0_88 = arith.constant 0 : index
    %c128_89 = arith.constant 128 : index
    %66 = vector.load %arg14[%c0_88, %c128_89] : memref<49x512xf32, #tpu.memory_space<vmem>>, vector<7x32xf32>
    tpu.vector_store %arg14[%c0_88, %c128_89], %65 {strides = array<i32>} : memref<49x512xf32, #tpu.memory_space<vmem>>, vector<7x32xf32>,
    %c136 = arith.constant 136 : index
    %c0_90 = arith.constant 0 : index
    %67 = vector.load %arg13[%c136, %c0_90] : memref<256x32xf32, #tpu.memory_space<vmem>>, vector<7x32xf32>
    %c7_91 = arith.constant 7 : index
    %c128_92 = arith.constant 128 : index
    %68 = vector.load %arg14[%c7_91, %c128_92] : memref<49x512xf32, #tpu.memory_space<vmem>>, vector<7x32xf32>
    tpu.vector_store %arg14[%c7_91, %c128_92], %67 {strides = array<i32>} : memref<49x512xf32, #tpu.memory_space<vmem>>, vector<7x32xf32>,
    %c144 = arith.constant 144 : index
    %c0_93 = arith.constant 0 : index
    %69 = vector.load %arg13[%c144, %c0_93] : memref<256x32xf32, #tpu.memory_space<vmem>>, vector<7x32xf32>
    %c14_94 = arith.constant 14 : index
    %c128_95 = arith.constant 128 : index
    %70 = vector.load %arg14[%c14_94, %c128_95] : memref<49x512xf32, #tpu.memory_space<vmem>>, vector<7x32xf32>
    tpu.vector_store %arg14[%c14_94, %c128_95], %69 {strides = array<i32>} : memref<49x512xf32, #tpu.memory_space<vmem>>, vector<7x32xf32>,
    %c152 = arith.constant 152 : index
    %c0_96 = arith.constant 0 : index
    %71 = vector.load %arg13[%c152, %c0_96] : memref<256x32xf32, #tpu.memory_space<vmem>>, vector<7x32xf32>
    %c21_97 = arith.constant 21 : index
    %c128_98 = arith.constant 128 : index
    %72 = vector.load %arg14[%c21_97, %c128_98] : memref<49x512xf32, #tpu.memory_space<vmem>>, vector<7x32xf32>
    tpu.vector_store %arg14[%c21_97, %c128_98], %71 {strides = array<i32>} : memref<49x512xf32, #tpu.memory_space<vmem>>, vector<7x32xf32>,
    %c160 = arith.constant 160 : index
    %c0_99 = arith.constant 0 : index
    %73 = vector.load %arg13[%c160, %c0_99] : memref<256x32xf32, #tpu.memory_space<vmem>>, vector<7x32xf32>
    %c28_100 = arith.constant 28 : index
    %c128_101 = arith.constant 128 : index
    %74 = vector.load %arg14[%c28_100, %c128_101] : memref<49x512xf32, #tpu.memory_space<vmem>>, vector<7x32xf32>
    tpu.vector_store %arg14[%c28_100, %c128_101], %73 {strides = array<i32>} : memref<49x512xf32, #tpu.memory_space<vmem>>, vector<7x32xf32>,
    %c168 = arith.constant 168 : index
    %c0_102 = arith.constant 0 : index
    %75 = vector.load %arg13[%c168, %c0_102] : memref<256x32xf32, #tpu.memory_space<vmem>>, vector<7x32xf32>
    %c35_103 = arith.constant 35 : index
    %c128_104 = arith.constant 128 : index
    %76 = vector.load %arg14[%c35_103, %c128_104] : memref<49x512xf32, #tpu.memory_space<vmem>>, vector<7x32xf32>
    tpu.vector_store %arg14[%c35_103, %c128_104], %75 {strides = array<i32>} : memref<49x512xf32, #tpu.memory_space<vmem>>, vector<7x32xf32>,
    %c176 = arith.constant 176 : index
    %c0_105 = arith.constant 0 : index
    %77 = vector.load %arg13[%c176, %c0_105] : memref<256x32xf32, #tpu.memory_space<vmem>>, vector<7x32xf32>
    %c42_106 = arith.constant 42 : index
    %c128_107 = arith.constant 128 : index
    %78 = vector.load %arg14[%c42_106, %c128_107] : memref<49x512xf32, #tpu.memory_space<vmem>>, vector<7x32xf32>
    tpu.vector_store %arg14[%c42_106, %c128_107], %77 {strides = array<i32>} : memref<49x512xf32, #tpu.memory_space<vmem>>, vector<7x32xf32>,
    %c192 = arith.constant 192 : index
    %c0_108 = arith.constant 0 : index
    %79 = vector.load %arg13[%c192, %c0_108] : memref<256x32xf32, #tpu.memory_space<vmem>>, vector<7x32xf32>
    %c0_109 = arith.constant 0 : index
    %c160_110 = arith.constant 160 : index
    %80 = vector.load %arg14[%c0_109, %c160_110] : memref<49x512xf32, #tpu.memory_space<vmem>>, vector<7x32xf32>
    tpu.vector_store %arg14[%c0_109, %c160_110], %79 {strides = array<i32>} : memref<49x512xf32, #tpu.memory_space<vmem>>, vector<7x32xf32>,
    %c200 = arith.constant 200 : index
    %c0_111 = arith.constant 0 : index
    %81 = vector.load %arg13[%c200, %c0_111] : memref<256x32xf32, #tpu.memory_space<vmem>>, vector<7x32xf32>
    %c7_112 = arith.constant 7 : index
    %c160_113 = arith.constant 160 : index
    %82 = vector.load %arg14[%c7_112, %c160_113] : memref<49x512xf32, #tpu.memory_space<vmem>>, vector<7x32xf32>
    tpu.vector_store %arg14[%c7_112, %c160_113], %81 {strides = array<i32>} : memref<49x512xf32, #tpu.memory_space<vmem>>, vector<7x32xf32>,
    %c208 = arith.constant 208 : index
    %c0_114 = arith.constant 0 : index
    %83 = vector.load %arg13[%c208, %c0_114] : memref<256x32xf32, #tpu.memory_space<vmem>>, vector<7x32xf32>
    %c14_115 = arith.constant 14 : index
    %c160_116 = arith.constant 160 : index
    %84 = vector.load %arg14[%c14_115, %c160_116] : memref<49x512xf32, #tpu.memory_space<vmem>>, vector<7x32xf32>
    tpu.vector_store %arg14[%c14_115, %c160_116], %83 {strides = array<i32>} : memref<49x512xf32, #tpu.memory_space<vmem>>, vector<7x32xf32>,
    %c216 = arith.constant 216 : index
    %c0_117 = arith.constant 0 : index
    %85 = vector.load %arg13[%c216, %c0_117] : memref<256x32xf32, #tpu.memory_space<vmem>>, vector<7x32xf32>
    %c21_118 = arith.constant 21 : index
    %c160_119 = arith.constant 160 : index
    %86 = vector.load %arg14[%c21_118, %c160_119] : memref<49x512xf32, #tpu.memory_space<vmem>>, vector<7x32xf32>
    tpu.vector_store %arg14[%c21_118, %c160_119], %85 {strides = array<i32>} : memref<49x512xf32, #tpu.memory_space<vmem>>, vector<7x32xf32>,
    %c224 = arith.constant 224 : index
    %c0_120 = arith.constant 0 : index
    %87 = vector.load %arg13[%c224, %c0_120] : memref<256x32xf32, #tpu.memory_space<vmem>>, vector<7x32xf32>
    %c28_121 = arith.constant 28 : index
    %c160_122 = arith.constant 160 : index
    %88 = vector.load %arg14[%c28_121, %c160_122] : memref<49x512xf32, #tpu.memory_space<vmem>>, vector<7x32xf32>
    tpu.vector_store %arg14[%c28_121, %c160_122], %87 {strides = array<i32>} : memref<49x512xf32, #tpu.memory_space<vmem>>, vector<7x32xf32>,
    %c232 = arith.constant 232 : index
    %c0_123 = arith.constant 0 : index
    %89 = vector.load %arg13[%c232, %c0_123] : memref<256x32xf32, #tpu.memory_space<vmem>>, vector<7x32xf32>
    %c35_124 = arith.constant 35 : index
    %c160_125 = arith.constant 160 : index
    %90 = vector.load %arg14[%c35_124, %c160_125] : memref<49x512xf32, #tpu.memory_space<vmem>>, vector<7x32xf32>
    tpu.vector_store %arg14[%c35_124, %c160_125], %89 {strides = array<i32>} : memref<49x512xf32, #tpu.memory_space<vmem>>, vector<7x32xf32>,
    %c240 = arith.constant 240 : index
    %c0_126 = arith.constant 0 : index
    %91 = vector.load %arg13[%c240, %c0_126] : memref<256x32xf32, #tpu.memory_space<vmem>>, vector<7x32xf32>
    %c42_127 = arith.constant 42 : index
    %c160_128 = arith.constant 160 : index
    %92 = vector.load %arg14[%c42_127, %c160_128] : memref<49x512xf32, #tpu.memory_space<vmem>>, vector<7x32xf32>
    tpu.vector_store %arg14[%c42_127, %c160_128], %91 {strides = array<i32>} : memref<49x512xf32, #tpu.memory_space<vmem>>, vector<7x32xf32>,
    %c129 = arith.constant 129 : index
    %c0_129 = arith.constant 0 : index
    %93 = vector.load %arg13[%c129, %c0_129] : memref<256x32xf32, #tpu.memory_space<vmem>>, vector<7x32xf32>
    %c0_130 = arith.constant 0 : index
    %c192_131 = arith.constant 192 : index
    %94 = vector.load %arg14[%c0_130, %c192_131] : memref<49x512xf32, #tpu.memory_space<vmem>>, vector<7x32xf32>
    tpu.vector_store %arg14[%c0_130, %c192_131], %93 {strides = array<i32>} : memref<49x512xf32, #tpu.memory_space<vmem>>, vector<7x32xf32>,
    %c137 = arith.constant 137 : index
    %c0_132 = arith.constant 0 : index
    %95 = vector.load %arg13[%c137, %c0_132] : memref<256x32xf32, #tpu.memory_space<vmem>>, vector<7x32xf32>
    %c7_133 = arith.constant 7 : index
    %c192_134 = arith.constant 192 : index
    %96 = vector.load %arg14[%c7_133, %c192_134] : memref<49x512xf32, #tpu.memory_space<vmem>>, vector<7x32xf32>
    tpu.vector_store %arg14[%c7_133, %c192_134], %95 {strides = array<i32>} : memref<49x512xf32, #tpu.memory_space<vmem>>, vector<7x32xf32>,
    %c145 = arith.constant 145 : index
    %c0_135 = arith.constant 0 : index
    %97 = vector.load %arg13[%c145, %c0_135] : memref<256x32xf32, #tpu.memory_space<vmem>>, vector<7x32xf32>
    %c14_136 = arith.constant 14 : index
    %c192_137 = arith.constant 192 : index
    %98 = vector.load %arg14[%c14_136, %c192_137] : memref<49x512xf32, #tpu.memory_space<vmem>>, vector<7x32xf32>
    tpu.vector_store %arg14[%c14_136, %c192_137], %97 {strides = array<i32>} : memref<49x512xf32, #tpu.memory_space<vmem>>, vector<7x32xf32>,
    %c153 = arith.constant 153 : index
    %c0_138 = arith.constant 0 : index
    %99 = vector.load %arg13[%c153, %c0_138] : memref<256x32xf32, #tpu.memory_space<vmem>>, vector<7x32xf32>
    %c21_139 = arith.constant 21 : index
    %c192_140 = arith.constant 192 : index
    %100 = vector.load %arg14[%c21_139, %c192_140] : memref<49x512xf32, #tpu.memory_space<vmem>>, vector<7x32xf32>
    tpu.vector_store %arg14[%c21_139, %c192_140], %99 {strides = array<i32>} : memref<49x512xf32, #tpu.memory_space<vmem>>, vector<7x32xf32>,
    %c161 = arith.constant 161 : index
    %c0_141 = arith.constant 0 : index
    %101 = vector.load %arg13[%c161, %c0_141] : memref<256x32xf32, #tpu.memory_space<vmem>>, vector<7x32xf32>
    %c28_142 = arith.constant 28 : index
    %c192_143 = arith.constant 192 : index
    %102 = vector.load %arg14[%c28_142, %c192_143] : memref<49x512xf32, #tpu.memory_space<vmem>>, vector<7x32xf32>
    tpu.vector_store %arg14[%c28_142, %c192_143], %101 {strides = array<i32>} : memref<49x512xf32, #tpu.memory_space<vmem>>, vector<7x32xf32>,
    %c169 = arith.constant 169 : index
    %c0_144 = arith.constant 0 : index
    %103 = vector.load %arg13[%c169, %c0_144] : memref<256x32xf32, #tpu.memory_space<vmem>>, vector<7x32xf32>
    %c35_145 = arith.constant 35 : index
    %c192_146 = arith.constant 192 : index
    %104 = vector.load %arg14[%c35_145, %c192_146] : memref<49x512xf32, #tpu.memory_space<vmem>>, vector<7x32xf32>
    tpu.vector_store %arg14[%c35_145, %c192_146], %103 {strides = array<i32>} : memref<49x512xf32, #tpu.memory_space<vmem>>, vector<7x32xf32>,
    %c177 = arith.constant 177 : index
    %c0_147 = arith.constant 0 : index
    %105 = vector.load %arg13[%c177, %c0_147] : memref<256x32xf32, #tpu.memory_space<vmem>>, vector<7x32xf32>
    %c42_148 = arith.constant 42 : index
    %c192_149 = arith.constant 192 : index
    %106 = vector.load %arg14[%c42_148, %c192_149] : memref<49x512xf32, #tpu.memory_space<vmem>>, vector<7x32xf32>
    tpu.vector_store %arg14[%c42_148, %c192_149], %105 {strides = array<i32>} : memref<49x512xf32, #tpu.memory_space<vmem>>, vector<7x32xf32>,
    %c193 = arith.constant 193 : index
    %c0_150 = arith.constant 0 : index
    %107 = vector.load %arg13[%c193, %c0_150] : memref<256x32xf32, #tpu.memory_space<vmem>>, vector<7x32xf32>
    %c0_151 = arith.constant 0 : index
    %c224_152 = arith.constant 224 : index
    %108 = vector.load %arg14[%c0_151, %c224_152] : memref<49x512xf32, #tpu.memory_space<vmem>>, vector<7x32xf32>
    tpu.vector_store %arg14[%c0_151, %c224_152], %107 {strides = array<i32>} : memref<49x512xf32, #tpu.memory_space<vmem>>, vector<7x32xf32>,
    %c201 = arith.constant 201 : index
    %c0_153 = arith.constant 0 : index
    %109 = vector.load %arg13[%c201, %c0_153] : memref<256x32xf32, #tpu.memory_space<vmem>>, vector<7x32xf32>
    %c7_154 = arith.constant 7 : index
    %c224_155 = arith.constant 224 : index
    %110 = vector.load %arg14[%c7_154, %c224_155] : memref<49x512xf32, #tpu.memory_space<vmem>>, vector<7x32xf32>
    tpu.vector_store %arg14[%c7_154, %c224_155], %109 {strides = array<i32>} : memref<49x512xf32, #tpu.memory_space<vmem>>, vector<7x32xf32>,
    %c209 = arith.constant 209 : index
    %c0_156 = arith.constant 0 : index
    %111 = vector.load %arg13[%c209, %c0_156] : memref<256x32xf32, #tpu.memory_space<vmem>>, vector<7x32xf32>
    %c14_157 = arith.constant 14 : index
    %c224_158 = arith.constant 224 : index
    %112 = vector.load %arg14[%c14_157, %c224_158] : memref<49x512xf32, #tpu.memory_space<vmem>>, vector<7x32xf32>
    tpu.vector_store %arg14[%c14_157, %c224_158], %111 {strides = array<i32>} : memref<49x512xf32, #tpu.memory_space<vmem>>, vector<7x32xf32>,
    %c217 = arith.constant 217 : index
    %c0_159 = arith.constant 0 : index
    %113 = vector.load %arg13[%c217, %c0_159] : memref<256x32xf32, #tpu.memory_space<vmem>>, vector<7x32xf32>
    %c21_160 = arith.constant 21 : index
    %c224_161 = arith.constant 224 : index
    %114 = vector.load %arg14[%c21_160, %c224_161] : memref<49x512xf32, #tpu.memory_space<vmem>>, vector<7x32xf32>
    tpu.vector_store %arg14[%c21_160, %c224_161], %113 {strides = array<i32>} : memref<49x512xf32, #tpu.memory_space<vmem>>, vector<7x32xf32>,
    %c225 = arith.constant 225 : index
    %c0_162 = arith.constant 0 : index
    %115 = vector.load %arg13[%c225, %c0_162] : memref<256x32xf32, #tpu.memory_space<vmem>>, vector<7x32xf32>
    %c28_163 = arith.constant 28 : index
    %c224_164 = arith.constant 224 : index
    %116 = vector.load %arg14[%c28_163, %c224_164] : memref<49x512xf32, #tpu.memory_space<vmem>>, vector<7x32xf32>
    tpu.vector_store %arg14[%c28_163, %c224_164], %115 {strides = array<i32>} : memref<49x512xf32, #tpu.memory_space<vmem>>, vector<7x32xf32>,
    %c233 = arith.constant 233 : index
    %c0_165 = arith.constant 0 : index
    %117 = vector.load %arg13[%c233, %c0_165] : memref<256x32xf32, #tpu.memory_space<vmem>>, vector<7x32xf32>
    %c35_166 = arith.constant 35 : index
    %c224_167 = arith.constant 224 : index
    %118 = vector.load %arg14[%c35_166, %c224_167] : memref<49x512xf32, #tpu.memory_space<vmem>>, vector<7x32xf32>
    tpu.vector_store %arg14[%c35_166, %c224_167], %117 {strides = array<i32>} : memref<49x512xf32, #tpu.memory_space<vmem>>, vector<7x32xf32>,
    %c241 = arith.constant 241 : index
    %c0_168 = arith.constant 0 : index
    %119 = vector.load %arg13[%c241, %c0_168] : memref<256x32xf32, #tpu.memory_space<vmem>>, vector<7x32xf32>
    %c42_169 = arith.constant 42 : index
    %c224_170 = arith.constant 224 : index
    %120 = vector.load %arg14[%c42_169, %c224_170] : memref<49x512xf32, #tpu.memory_space<vmem>>, vector<7x32xf32>
    tpu.vector_store %arg14[%c42_169, %c224_170], %119 {strides = array<i32>} : memref<49x512xf32, #tpu.memory_space<vmem>>, vector<7x32xf32>,
    %c8_171 = arith.constant 8 : index
    %c0_172 = arith.constant 0 : index
    %121 = vector.load %arg13[%c8_171, %c0_172] : memref<256x32xf32, #tpu.memory_space<vmem>>, vector<7x32xf32>
    %c0_173 = arith.constant 0 : index
    %c256 = arith.constant 256 : index
    %122 = vector.load %arg14[%c0_173, %c256] : memref<49x512xf32, #tpu.memory_space<vmem>>, vector<7x32xf32>
    tpu.vector_store %arg14[%c0_173, %c256], %121 {strides = array<i32>} : memref<49x512xf32, #tpu.memory_space<vmem>>, vector<7x32xf32>,
    %c16_174 = arith.constant 16 : index
    %c0_175 = arith.constant 0 : index
    %123 = vector.load %arg13[%c16_174, %c0_175] : memref<256x32xf32, #tpu.memory_space<vmem>>, vector<7x32xf32>
    %c7_176 = arith.constant 7 : index
    %c256_177 = arith.constant 256 : index
    %124 = vector.load %arg14[%c7_176, %c256_177] : memref<49x512xf32, #tpu.memory_space<vmem>>, vector<7x32xf32>
    tpu.vector_store %arg14[%c7_176, %c256_177], %123 {strides = array<i32>} : memref<49x512xf32, #tpu.memory_space<vmem>>, vector<7x32xf32>,
    %c24_178 = arith.constant 24 : index
    %c0_179 = arith.constant 0 : index
    %125 = vector.load %arg13[%c24_178, %c0_179] : memref<256x32xf32, #tpu.memory_space<vmem>>, vector<7x32xf32>
    %c14_180 = arith.constant 14 : index
    %c256_181 = arith.constant 256 : index
    %126 = vector.load %arg14[%c14_180, %c256_181] : memref<49x512xf32, #tpu.memory_space<vmem>>, vector<7x32xf32>
    tpu.vector_store %arg14[%c14_180, %c256_181], %125 {strides = array<i32>} : memref<49x512xf32, #tpu.memory_space<vmem>>, vector<7x32xf32>,
    %c32_182 = arith.constant 32 : index
    %c0_183 = arith.constant 0 : index
    %127 = vector.load %arg13[%c32_182, %c0_183] : memref<256x32xf32, #tpu.memory_space<vmem>>, vector<7x32xf32>
    %c21_184 = arith.constant 21 : index
    %c256_185 = arith.constant 256 : index
    %128 = vector.load %arg14[%c21_184, %c256_185] : memref<49x512xf32, #tpu.memory_space<vmem>>, vector<7x32xf32>
    tpu.vector_store %arg14[%c21_184, %c256_185], %127 {strides = array<i32>} : memref<49x512xf32, #tpu.memory_space<vmem>>, vector<7x32xf32>,
    %c40_186 = arith.constant 40 : index
    %c0_187 = arith.constant 0 : index
    %129 = vector.load %arg13[%c40_186, %c0_187] : memref<256x32xf32, #tpu.memory_space<vmem>>, vector<7x32xf32>
    %c28_188 = arith.constant 28 : index
    %c256_189 = arith.constant 256 : index
    %130 = vector.load %arg14[%c28_188, %c256_189] : memref<49x512xf32, #tpu.memory_space<vmem>>, vector<7x32xf32>
    tpu.vector_store %arg14[%c28_188, %c256_189], %129 {strides = array<i32>} : memref<49x512xf32, #tpu.memory_space<vmem>>, vector<7x32xf32>,
    %c48_190 = arith.constant 48 : index
    %c0_191 = arith.constant 0 : index
    %131 = vector.load %arg13[%c48_190, %c0_191] : memref<256x32xf32, #tpu.memory_space<vmem>>, vector<7x32xf32>
    %c35_192 = arith.constant 35 : index
    %c256_193 = arith.constant 256 : index
    %132 = vector.load %arg14[%c35_192, %c256_193] : memref<49x512xf32, #tpu.memory_space<vmem>>, vector<7x32xf32>
    tpu.vector_store %arg14[%c35_192, %c256_193], %131 {strides = array<i32>} : memref<49x512xf32, #tpu.memory_space<vmem>>, vector<7x32xf32>,
    %c56 = arith.constant 56 : index
    %c0_194 = arith.constant 0 : index
    %133 = vector.load %arg13[%c56, %c0_194] : memref<256x32xf32, #tpu.memory_space<vmem>>, vector<7x32xf32>
    %c42_195 = arith.constant 42 : index
    %c256_196 = arith.constant 256 : index
    %134 = vector.load %arg14[%c42_195, %c256_196] : memref<49x512xf32, #tpu.memory_space<vmem>>, vector<7x32xf32>
    tpu.vector_store %arg14[%c42_195, %c256_196], %133 {strides = array<i32>} : memref<49x512xf32, #tpu.memory_space<vmem>>, vector<7x32xf32>,
    %c72_197 = arith.constant 72 : index
    %c0_198 = arith.constant 0 : index
    %135 = vector.load %arg13[%c72_197, %c0_198] : memref<256x32xf32, #tpu.memory_space<vmem>>, vector<7x32xf32>
    %c0_199 = arith.constant 0 : index
    %c288 = arith.constant 288 : index
    %136 = vector.load %arg14[%c0_199, %c288] : memref<49x512xf32, #tpu.memory_space<vmem>>, vector<7x32xf32>
    tpu.vector_store %arg14[%c0_199, %c288], %135 {strides = array<i32>} : memref<49x512xf32, #tpu.memory_space<vmem>>, vector<7x32xf32>,
    %c80_200 = arith.constant 80 : index
    %c0_201 = arith.constant 0 : index
    %137 = vector.load %arg13[%c80_200, %c0_201] : memref<256x32xf32, #tpu.memory_space<vmem>>, vector<7x32xf32>
    %c7_202 = arith.constant 7 : index
    %c288_203 = arith.constant 288 : index
    %138 = vector.load %arg14[%c7_202, %c288_203] : memref<49x512xf32, #tpu.memory_space<vmem>>, vector<7x32xf32>
    tpu.vector_store %arg14[%c7_202, %c288_203], %137 {strides = array<i32>} : memref<49x512xf32, #tpu.memory_space<vmem>>, vector<7x32xf32>,
    %c88_204 = arith.constant 88 : index
    %c0_205 = arith.constant 0 : index
    %139 = vector.load %arg13[%c88_204, %c0_205] : memref<256x32xf32, #tpu.memory_space<vmem>>, vector<7x32xf32>
    %c14_206 = arith.constant 14 : index
    %c288_207 = arith.constant 288 : index
    %140 = vector.load %arg14[%c14_206, %c288_207] : memref<49x512xf32, #tpu.memory_space<vmem>>, vector<7x32xf32>
    tpu.vector_store %arg14[%c14_206, %c288_207], %139 {strides = array<i32>} : memref<49x512xf32, #tpu.memory_space<vmem>>, vector<7x32xf32>,
    %c96_208 = arith.constant 96 : index
    %c0_209 = arith.constant 0 : index
    %141 = vector.load %arg13[%c96_208, %c0_209] : memref<256x32xf32, #tpu.memory_space<vmem>>, vector<7x32xf32>
    %c21_210 = arith.constant 21 : index
    %c288_211 = arith.constant 288 : index
    %142 = vector.load %arg14[%c21_210, %c288_211] : memref<49x512xf32, #tpu.memory_space<vmem>>, vector<7x32xf32>
    tpu.vector_store %arg14[%c21_210, %c288_211], %141 {strides = array<i32>} : memref<49x512xf32, #tpu.memory_space<vmem>>, vector<7x32xf32>,
    %c104_212 = arith.constant 104 : index
    %c0_213 = arith.constant 0 : index
    %143 = vector.load %arg13[%c104_212, %c0_213] : memref<256x32xf32, #tpu.memory_space<vmem>>, vector<7x32xf32>
    %c28_214 = arith.constant 28 : index
    %c288_215 = arith.constant 288 : index
    %144 = vector.load %arg14[%c28_214, %c288_215] : memref<49x512xf32, #tpu.memory_space<vmem>>, vector<7x32xf32>
    tpu.vector_store %arg14[%c28_214, %c288_215], %143 {strides = array<i32>} : memref<49x512xf32, #tpu.memory_space<vmem>>, vector<7x32xf32>,
    %c112_216 = arith.constant 112 : index
    %c0_217 = arith.constant 0 : index
    %145 = vector.load %arg13[%c112_216, %c0_217] : memref<256x32xf32, #tpu.memory_space<vmem>>, vector<7x32xf32>
    %c35_218 = arith.constant 35 : index
    %c288_219 = arith.constant 288 : index
    %146 = vector.load %arg14[%c35_218, %c288_219] : memref<49x512xf32, #tpu.memory_space<vmem>>, vector<7x32xf32>
    tpu.vector_store %arg14[%c35_218, %c288_219], %145 {strides = array<i32>} : memref<49x512xf32, #tpu.memory_space<vmem>>, vector<7x32xf32>,
    %c120 = arith.constant 120 : index
    %c0_220 = arith.constant 0 : index
    %147 = vector.load %arg13[%c120, %c0_220] : memref<256x32xf32, #tpu.memory_space<vmem>>, vector<7x32xf32>
    %c42_221 = arith.constant 42 : index
    %c288_222 = arith.constant 288 : index
    %148 = vector.load %arg14[%c42_221, %c288_222] : memref<49x512xf32, #tpu.memory_space<vmem>>, vector<7x32xf32>
    tpu.vector_store %arg14[%c42_221, %c288_222], %147 {strides = array<i32>} : memref<49x512xf32, #tpu.memory_space<vmem>>, vector<7x32xf32>,
    %c9_223 = arith.constant 9 : index
    %c0_224 = arith.constant 0 : index
    %149 = vector.load %arg13[%c9_223, %c0_224] : memref<256x32xf32, #tpu.memory_space<vmem>>, vector<7x32xf32>
    %c0_225 = arith.constant 0 : index
    %c320 = arith.constant 320 : index
    %150 = vector.load %arg14[%c0_225, %c320] : memref<49x512xf32, #tpu.memory_space<vmem>>, vector<7x32xf32>
    tpu.vector_store %arg14[%c0_225, %c320], %149 {strides = array<i32>} : memref<49x512xf32, #tpu.memory_space<vmem>>, vector<7x32xf32>,
    %c17_226 = arith.constant 17 : index
    %c0_227 = arith.constant 0 : index
    %151 = vector.load %arg13[%c17_226, %c0_227] : memref<256x32xf32, #tpu.memory_space<vmem>>, vector<7x32xf32>
    %c7_228 = arith.constant 7 : index
    %c320_229 = arith.constant 320 : index
    %152 = vector.load %arg14[%c7_228, %c320_229] : memref<49x512xf32, #tpu.memory_space<vmem>>, vector<7x32xf32>
    tpu.vector_store %arg14[%c7_228, %c320_229], %151 {strides = array<i32>} : memref<49x512xf32, #tpu.memory_space<vmem>>, vector<7x32xf32>,
    %c25_230 = arith.constant 25 : index
    %c0_231 = arith.constant 0 : index
    %153 = vector.load %arg13[%c25_230, %c0_231] : memref<256x32xf32, #tpu.memory_space<vmem>>, vector<7x32xf32>
    %c14_232 = arith.constant 14 : index
    %c320_233 = arith.constant 320 : index
    %154 = vector.load %arg14[%c14_232, %c320_233] : memref<49x512xf32, #tpu.memory_space<vmem>>, vector<7x32xf32>
    tpu.vector_store %arg14[%c14_232, %c320_233], %153 {strides = array<i32>} : memref<49x512xf32, #tpu.memory_space<vmem>>, vector<7x32xf32>,
    %c33_234 = arith.constant 33 : index
    %c0_235 = arith.constant 0 : index
    %155 = vector.load %arg13[%c33_234, %c0_235] : memref<256x32xf32, #tpu.memory_space<vmem>>, vector<7x32xf32>
    %c21_236 = arith.constant 21 : index
    %c320_237 = arith.constant 320 : index
    %156 = vector.load %arg14[%c21_236, %c320_237] : memref<49x512xf32, #tpu.memory_space<vmem>>, vector<7x32xf32>
    tpu.vector_store %arg14[%c21_236, %c320_237], %155 {strides = array<i32>} : memref<49x512xf32, #tpu.memory_space<vmem>>, vector<7x32xf32>,
    %c41_238 = arith.constant 41 : index
    %c0_239 = arith.constant 0 : index
    %157 = vector.load %arg13[%c41_238, %c0_239] : memref<256x32xf32, #tpu.memory_space<vmem>>, vector<7x32xf32>
    %c28_240 = arith.constant 28 : index
    %c320_241 = arith.constant 320 : index
    %158 = vector.load %arg14[%c28_240, %c320_241] : memref<49x512xf32, #tpu.memory_space<vmem>>, vector<7x32xf32>
    tpu.vector_store %arg14[%c28_240, %c320_241], %157 {strides = array<i32>} : memref<49x512xf32, #tpu.memory_space<vmem>>, vector<7x32xf32>,
    %c49_242 = arith.constant 49 : index
    %c0_243 = arith.constant 0 : index
    %159 = vector.load %arg13[%c49_242, %c0_243] : memref<256x32xf32, #tpu.memory_space<vmem>>, vector<7x32xf32>
    %c35_244 = arith.constant 35 : index
    %c320_245 = arith.constant 320 : index
    %160 = vector.load %arg14[%c35_244, %c320_245] : memref<49x512xf32, #tpu.memory_space<vmem>>, vector<7x32xf32>
    tpu.vector_store %arg14[%c35_244, %c320_245], %159 {strides = array<i32>} : memref<49x512xf32, #tpu.memory_space<vmem>>, vector<7x32xf32>,
    %c57 = arith.constant 57 : index
    %c0_246 = arith.constant 0 : index
    %161 = vector.load %arg13[%c57, %c0_246] : memref<256x32xf32, #tpu.memory_space<vmem>>, vector<7x32xf32>
    %c42_247 = arith.constant 42 : index
    %c320_248 = arith.constant 320 : index
    %162 = vector.load %arg14[%c42_247, %c320_248] : memref<49x512xf32, #tpu.memory_space<vmem>>, vector<7x32xf32>
    tpu.vector_store %arg14[%c42_247, %c320_248], %161 {strides = array<i32>} : memref<49x512xf32, #tpu.memory_space<vmem>>, vector<7x32xf32>,
    %c73_249 = arith.constant 73 : index
    %c0_250 = arith.constant 0 : index
    %163 = vector.load %arg13[%c73_249, %c0_250] : memref<256x32xf32, #tpu.memory_space<vmem>>, vector<7x32xf32>
    %c0_251 = arith.constant 0 : index
    %c352 = arith.constant 352 : index
    %164 = vector.load %arg14[%c0_251, %c352] : memref<49x512xf32, #tpu.memory_space<vmem>>, vector<7x32xf32>
    tpu.vector_store %arg14[%c0_251, %c352], %163 {strides = array<i32>} : memref<49x512xf32, #tpu.memory_space<vmem>>, vector<7x32xf32>,
    %c81_252 = arith.constant 81 : index
    %c0_253 = arith.constant 0 : index
    %165 = vector.load %arg13[%c81_252, %c0_253] : memref<256x32xf32, #tpu.memory_space<vmem>>, vector<7x32xf32>
    %c7_254 = arith.constant 7 : index
    %c352_255 = arith.constant 352 : index
    %166 = vector.load %arg14[%c7_254, %c352_255] : memref<49x512xf32, #tpu.memory_space<vmem>>, vector<7x32xf32>
    tpu.vector_store %arg14[%c7_254, %c352_255], %165 {strides = array<i32>} : memref<49x512xf32, #tpu.memory_space<vmem>>, vector<7x32xf32>,
    %c89_256 = arith.constant 89 : index
    %c0_257 = arith.constant 0 : index
    %167 = vector.load %arg13[%c89_256, %c0_257] : memref<256x32xf32, #tpu.memory_space<vmem>>, vector<7x32xf32>
    %c14_258 = arith.constant 14 : index
    %c352_259 = arith.constant 352 : index
    %168 = vector.load %arg14[%c14_258, %c352_259] : memref<49x512xf32, #tpu.memory_space<vmem>>, vector<7x32xf32>
    tpu.vector_store %arg14[%c14_258, %c352_259], %167 {strides = array<i32>} : memref<49x512xf32, #tpu.memory_space<vmem>>, vector<7x32xf32>,
    %c97_260 = arith.constant 97 : index
    %c0_261 = arith.constant 0 : index
    %169 = vector.load %arg13[%c97_260, %c0_261] : memref<256x32xf32, #tpu.memory_space<vmem>>, vector<7x32xf32>
    %c21_262 = arith.constant 21 : index
    %c352_263 = arith.constant 352 : index
    %170 = vector.load %arg14[%c21_262, %c352_263] : memref<49x512xf32, #tpu.memory_space<vmem>>, vector<7x32xf32>
    tpu.vector_store %arg14[%c21_262, %c352_263], %169 {strides = array<i32>} : memref<49x512xf32, #tpu.memory_space<vmem>>, vector<7x32xf32>,
    %c105_264 = arith.constant 105 : index
    %c0_265 = arith.constant 0 : index
    %171 = vector.load %arg13[%c105_264, %c0_265] : memref<256x32xf32, #tpu.memory_space<vmem>>, vector<7x32xf32>
    %c28_266 = arith.constant 28 : index
    %c352_267 = arith.constant 352 : index
    %172 = vector.load %arg14[%c28_266, %c352_267] : memref<49x512xf32, #tpu.memory_space<vmem>>, vector<7x32xf32>
    tpu.vector_store %arg14[%c28_266, %c352_267], %171 {strides = array<i32>} : memref<49x512xf32, #tpu.memory_space<vmem>>, vector<7x32xf32>,
    %c113_268 = arith.constant 113 : index
    %c0_269 = arith.constant 0 : index
    %173 = vector.load %arg13[%c113_268, %c0_269] : memref<256x32xf32, #tpu.memory_space<vmem>>, vector<7x32xf32>
    %c35_270 = arith.constant 35 : index
    %c352_271 = arith.constant 352 : index
    %174 = vector.load %arg14[%c35_270, %c352_271] : memref<49x512xf32, #tpu.memory_space<vmem>>, vector<7x32xf32>
    tpu.vector_store %arg14[%c35_270, %c352_271], %173 {strides = array<i32>} : memref<49x512xf32, #tpu.memory_space<vmem>>, vector<7x32xf32>,
    %c121 = arith.constant 121 : index
    %c0_272 = arith.constant 0 : index
    %175 = vector.load %arg13[%c121, %c0_272] : memref<256x32xf32, #tpu.memory_space<vmem>>, vector<7x32xf32>
    %c42_273 = arith.constant 42 : index
    %c352_274 = arith.constant 352 : index
    %176 = vector.load %arg14[%c42_273, %c352_274] : memref<49x512xf32, #tpu.memory_space<vmem>>, vector<7x32xf32>
    tpu.vector_store %arg14[%c42_273, %c352_274], %175 {strides = array<i32>} : memref<49x512xf32, #tpu.memory_space<vmem>>, vector<7x32xf32>,
    %c136_275 = arith.constant 136 : index
    %c0_276 = arith.constant 0 : index
    %177 = vector.load %arg13[%c136_275, %c0_276] : memref<256x32xf32, #tpu.memory_space<vmem>>, vector<7x32xf32>
    %c0_277 = arith.constant 0 : index
    %c384 = arith.constant 384 : index
    %178 = vector.load %arg14[%c0_277, %c384] : memref<49x512xf32, #tpu.memory_space<vmem>>, vector<7x32xf32>
    tpu.vector_store %arg14[%c0_277, %c384], %177 {strides = array<i32>} : memref<49x512xf32, #tpu.memory_space<vmem>>, vector<7x32xf32>,
    %c144_278 = arith.constant 144 : index
    %c0_279 = arith.constant 0 : index
    %179 = vector.load %arg13[%c144_278, %c0_279] : memref<256x32xf32, #tpu.memory_space<vmem>>, vector<7x32xf32>
    %c7_280 = arith.constant 7 : index
    %c384_281 = arith.constant 384 : index
    %180 = vector.load %arg14[%c7_280, %c384_281] : memref<49x512xf32, #tpu.memory_space<vmem>>, vector<7x32xf32>
    tpu.vector_store %arg14[%c7_280, %c384_281], %179 {strides = array<i32>} : memref<49x512xf32, #tpu.memory_space<vmem>>, vector<7x32xf32>,
    %c152_282 = arith.constant 152 : index
    %c0_283 = arith.constant 0 : index
    %181 = vector.load %arg13[%c152_282, %c0_283] : memref<256x32xf32, #tpu.memory_space<vmem>>, vector<7x32xf32>
    %c14_284 = arith.constant 14 : index
    %c384_285 = arith.constant 384 : index
    %182 = vector.load %arg14[%c14_284, %c384_285] : memref<49x512xf32, #tpu.memory_space<vmem>>, vector<7x32xf32>
    tpu.vector_store %arg14[%c14_284, %c384_285], %181 {strides = array<i32>} : memref<49x512xf32, #tpu.memory_space<vmem>>, vector<7x32xf32>,
    %c160_286 = arith.constant 160 : index
    %c0_287 = arith.constant 0 : index
    %183 = vector.load %arg13[%c160_286, %c0_287] : memref<256x32xf32, #tpu.memory_space<vmem>>, vector<7x32xf32>
    %c21_288 = arith.constant 21 : index
    %c384_289 = arith.constant 384 : index
    %184 = vector.load %arg14[%c21_288, %c384_289] : memref<49x512xf32, #tpu.memory_space<vmem>>, vector<7x32xf32>
    tpu.vector_store %arg14[%c21_288, %c384_289], %183 {strides = array<i32>} : memref<49x512xf32, #tpu.memory_space<vmem>>, vector<7x32xf32>,
    %c168_290 = arith.constant 168 : index
    %c0_291 = arith.constant 0 : index
    %185 = vector.load %arg13[%c168_290, %c0_291] : memref<256x32xf32, #tpu.memory_space<vmem>>, vector<7x32xf32>
    %c28_292 = arith.constant 28 : index
    %c384_293 = arith.constant 384 : index
    %186 = vector.load %arg14[%c28_292, %c384_293] : memref<49x512xf32, #tpu.memory_space<vmem>>, vector<7x32xf32>
    tpu.vector_store %arg14[%c28_292, %c384_293], %185 {strides = array<i32>} : memref<49x512xf32, #tpu.memory_space<vmem>>, vector<7x32xf32>,
    %c176_294 = arith.constant 176 : index
    %c0_295 = arith.constant 0 : index
    %187 = vector.load %arg13[%c176_294, %c0_295] : memref<256x32xf32, #tpu.memory_space<vmem>>, vector<7x32xf32>
    %c35_296 = arith.constant 35 : index
    %c384_297 = arith.constant 384 : index
    %188 = vector.load %arg14[%c35_296, %c384_297] : memref<49x512xf32, #tpu.memory_space<vmem>>, vector<7x32xf32>
    tpu.vector_store %arg14[%c35_296, %c384_297], %187 {strides = array<i32>} : memref<49x512xf32, #tpu.memory_space<vmem>>, vector<7x32xf32>,
    %c184 = arith.constant 184 : index
    %c0_298 = arith.constant 0 : index
    %189 = vector.load %arg13[%c184, %c0_298] : memref<256x32xf32, #tpu.memory_space<vmem>>, vector<7x32xf32>
    %c42_299 = arith.constant 42 : index
    %c384_300 = arith.constant 384 : index
    %190 = vector.load %arg14[%c42_299, %c384_300] : memref<49x512xf32, #tpu.memory_space<vmem>>, vector<7x32xf32>
    tpu.vector_store %arg14[%c42_299, %c384_300], %189 {strides = array<i32>} : memref<49x512xf32, #tpu.memory_space<vmem>>, vector<7x32xf32>,
    %c200_301 = arith.constant 200 : index
    %c0_302 = arith.constant 0 : index
    %191 = vector.load %arg13[%c200_301, %c0_302] : memref<256x32xf32, #tpu.memory_space<vmem>>, vector<7x32xf32>
    %c0_303 = arith.constant 0 : index
    %c416 = arith.constant 416 : index
    %192 = vector.load %arg14[%c0_303, %c416] : memref<49x512xf32, #tpu.memory_space<vmem>>, vector<7x32xf32>
    tpu.vector_store %arg14[%c0_303, %c416], %191 {strides = array<i32>} : memref<49x512xf32, #tpu.memory_space<vmem>>, vector<7x32xf32>,
    %c208_304 = arith.constant 208 : index
    %c0_305 = arith.constant 0 : index
    %193 = vector.load %arg13[%c208_304, %c0_305] : memref<256x32xf32, #tpu.memory_space<vmem>>, vector<7x32xf32>
    %c7_306 = arith.constant 7 : index
    %c416_307 = arith.constant 416 : index
    %194 = vector.load %arg14[%c7_306, %c416_307] : memref<49x512xf32, #tpu.memory_space<vmem>>, vector<7x32xf32>
    tpu.vector_store %arg14[%c7_306, %c416_307], %193 {strides = array<i32>} : memref<49x512xf32, #tpu.memory_space<vmem>>, vector<7x32xf32>,
    %c216_308 = arith.constant 216 : index
    %c0_309 = arith.constant 0 : index
    %195 = vector.load %arg13[%c216_308, %c0_309] : memref<256x32xf32, #tpu.memory_space<vmem>>, vector<7x32xf32>
    %c14_310 = arith.constant 14 : index
    %c416_311 = arith.constant 416 : index
    %196 = vector.load %arg14[%c14_310, %c416_311] : memref<49x512xf32, #tpu.memory_space<vmem>>, vector<7x32xf32>
    tpu.vector_store %arg14[%c14_310, %c416_311], %195 {strides = array<i32>} : memref<49x512xf32, #tpu.memory_space<vmem>>, vector<7x32xf32>,
    %c224_312 = arith.constant 224 : index
    %c0_313 = arith.constant 0 : index
    %197 = vector.load %arg13[%c224_312, %c0_313] : memref<256x32xf32, #tpu.memory_space<vmem>>, vector<7x32xf32>
    %c21_314 = arith.constant 21 : index
    %c416_315 = arith.constant 416 : index
    %198 = vector.load %arg14[%c21_314, %c416_315] : memref<49x512xf32, #tpu.memory_space<vmem>>, vector<7x32xf32>
    tpu.vector_store %arg14[%c21_314, %c416_315], %197 {strides = array<i32>} : memref<49x512xf32, #tpu.memory_space<vmem>>, vector<7x32xf32>,
    %c232_316 = arith.constant 232 : index
    %c0_317 = arith.constant 0 : index
    %199 = vector.load %arg13[%c232_316, %c0_317] : memref<256x32xf32, #tpu.memory_space<vmem>>, vector<7x32xf32>
    %c28_318 = arith.constant 28 : index
    %c416_319 = arith.constant 416 : index
    %200 = vector.load %arg14[%c28_318, %c416_319] : memref<49x512xf32, #tpu.memory_space<vmem>>, vector<7x32xf32>
    tpu.vector_store %arg14[%c28_318, %c416_319], %199 {strides = array<i32>} : memref<49x512xf32, #tpu.memory_space<vmem>>, vector<7x32xf32>,
    %c240_320 = arith.constant 240 : index
    %c0_321 = arith.constant 0 : index
    %201 = vector.load %arg13[%c240_320, %c0_321] : memref<256x32xf32, #tpu.memory_space<vmem>>, vector<7x32xf32>
    %c35_322 = arith.constant 35 : index
    %c416_323 = arith.constant 416 : index
    %202 = vector.load %arg14[%c35_322, %c416_323] : memref<49x512xf32, #tpu.memory_space<vmem>>, vector<7x32xf32>
    tpu.vector_store %arg14[%c35_322, %c416_323], %201 {strides = array<i32>} : memref<49x512xf32, #tpu.memory_space<vmem>>, vector<7x32xf32>,
    %c248 = arith.constant 248 : index
    %c0_324 = arith.constant 0 : index
    %203 = vector.load %arg13[%c248, %c0_324] : memref<256x32xf32, #tpu.memory_space<vmem>>, vector<7x32xf32>
    %c42_325 = arith.constant 42 : index
    %c416_326 = arith.constant 416 : index
    %204 = vector.load %arg14[%c42_325, %c416_326] : memref<49x512xf32, #tpu.memory_space<vmem>>, vector<7x32xf32>
    tpu.vector_store %arg14[%c42_325, %c416_326], %203 {strides = array<i32>} : memref<49x512xf32, #tpu.memory_space<vmem>>, vector<7x32xf32>,
    %c137_327 = arith.constant 137 : index
    %c0_328 = arith.constant 0 : index
    %205 = vector.load %arg13[%c137_327, %c0_328] : memref<256x32xf32, #tpu.memory_space<vmem>>, vector<7x32xf32>
    %c0_329 = arith.constant 0 : index
    %c448 = arith.constant 448 : index
    %206 = vector.load %arg14[%c0_329, %c448] : memref<49x512xf32, #tpu.memory_space<vmem>>, vector<7x32xf32>
    tpu.vector_store %arg14[%c0_329, %c448], %205 {strides = array<i32>} : memref<49x512xf32, #tpu.memory_space<vmem>>, vector<7x32xf32>,
    %c145_330 = arith.constant 145 : index
    %c0_331 = arith.constant 0 : index
    %207 = vector.load %arg13[%c145_330, %c0_331] : memref<256x32xf32, #tpu.memory_space<vmem>>, vector<7x32xf32>
    %c7_332 = arith.constant 7 : index
    %c448_333 = arith.constant 448 : index
    %208 = vector.load %arg14[%c7_332, %c448_333] : memref<49x512xf32, #tpu.memory_space<vmem>>, vector<7x32xf32>
    tpu.vector_store %arg14[%c7_332, %c448_333], %207 {strides = array<i32>} : memref<49x512xf32, #tpu.memory_space<vmem>>, vector<7x32xf32>,
    %c153_334 = arith.constant 153 : index
    %c0_335 = arith.constant 0 : index
    %209 = vector.load %arg13[%c153_334, %c0_335] : memref<256x32xf32, #tpu.memory_space<vmem>>, vector<7x32xf32>
    %c14_336 = arith.constant 14 : index
    %c448_337 = arith.constant 448 : index
    %210 = vector.load %arg14[%c14_336, %c448_337] : memref<49x512xf32, #tpu.memory_space<vmem>>, vector<7x32xf32>
    tpu.vector_store %arg14[%c14_336, %c448_337], %209 {strides = array<i32>} : memref<49x512xf32, #tpu.memory_space<vmem>>, vector<7x32xf32>,
    %c161_338 = arith.constant 161 : index
    %c0_339 = arith.constant 0 : index
    %211 = vector.load %arg13[%c161_338, %c0_339] : memref<256x32xf32, #tpu.memory_space<vmem>>, vector<7x32xf32>
    %c21_340 = arith.constant 21 : index
    %c448_341 = arith.constant 448 : index
    %212 = vector.load %arg14[%c21_340, %c448_341] : memref<49x512xf32, #tpu.memory_space<vmem>>, vector<7x32xf32>
    tpu.vector_store %arg14[%c21_340, %c448_341], %211 {strides = array<i32>} : memref<49x512xf32, #tpu.memory_space<vmem>>, vector<7x32xf32>,
    %c169_342 = arith.constant 169 : index
    %c0_343 = arith.constant 0 : index
    %213 = vector.load %arg13[%c169_342, %c0_343] : memref<256x32xf32, #tpu.memory_space<vmem>>, vector<7x32xf32>
    %c28_344 = arith.constant 28 : index
    %c448_345 = arith.constant 448 : index
    %214 = vector.load %arg14[%c28_344, %c448_345] : memref<49x512xf32, #tpu.memory_space<vmem>>, vector<7x32xf32>
    tpu.vector_store %arg14[%c28_344, %c448_345], %213 {strides = array<i32>} : memref<49x512xf32, #tpu.memory_space<vmem>>, vector<7x32xf32>,
    %c177_346 = arith.constant 177 : index
    %c0_347 = arith.constant 0 : index
    %215 = vector.load %arg13[%c177_346, %c0_347] : memref<256x32xf32, #tpu.memory_space<vmem>>, vector<7x32xf32>
    %c35_348 = arith.constant 35 : index
    %c448_349 = arith.constant 448 : index
    %216 = vector.load %arg14[%c35_348, %c448_349] : memref<49x512xf32, #tpu.memory_space<vmem>>, vector<7x32xf32>
    tpu.vector_store %arg14[%c35_348, %c448_349], %215 {strides = array<i32>} : memref<49x512xf32, #tpu.memory_space<vmem>>, vector<7x32xf32>,
    %c185 = arith.constant 185 : index
    %c0_350 = arith.constant 0 : index
    %217 = vector.load %arg13[%c185, %c0_350] : memref<256x32xf32, #tpu.memory_space<vmem>>, vector<7x32xf32>
    %c42_351 = arith.constant 42 : index
    %c448_352 = arith.constant 448 : index
    %218 = vector.load %arg14[%c42_351, %c448_352] : memref<49x512xf32, #tpu.memory_space<vmem>>, vector<7x32xf32>
    tpu.vector_store %arg14[%c42_351, %c448_352], %217 {strides = array<i32>} : memref<49x512xf32, #tpu.memory_space<vmem>>, vector<7x32xf32>,
    %c201_353 = arith.constant 201 : index
    %c0_354 = arith.constant 0 : index
    %219 = vector.load %arg13[%c201_353, %c0_354] : memref<256x32xf32, #tpu.memory_space<vmem>>, vector<7x32xf32>
    %c0_355 = arith.constant 0 : index
    %c480 = arith.constant 480 : index
    %220 = vector.load %arg14[%c0_355, %c480] : memref<49x512xf32, #tpu.memory_space<vmem>>, vector<7x32xf32>
    tpu.vector_store %arg14[%c0_355, %c480], %219 {strides = array<i32>} : memref<49x512xf32, #tpu.memory_space<vmem>>, vector<7x32xf32>,
    %c209_356 = arith.constant 209 : index
    %c0_357 = arith.constant 0 : index
    %221 = vector.load %arg13[%c209_356, %c0_357] : memref<256x32xf32, #tpu.memory_space<vmem>>, vector<7x32xf32>
    %c7_358 = arith.constant 7 : index
    %c480_359 = arith.constant 480 : index
    %222 = vector.load %arg14[%c7_358, %c480_359] : memref<49x512xf32, #tpu.memory_space<vmem>>, vector<7x32xf32>
    tpu.vector_store %arg14[%c7_358, %c480_359], %221 {strides = array<i32>} : memref<49x512xf32, #tpu.memory_space<vmem>>, vector<7x32xf32>,
    %c217_360 = arith.constant 217 : index
    %c0_361 = arith.constant 0 : index
    %223 = vector.load %arg13[%c217_360, %c0_361] : memref<256x32xf32, #tpu.memory_space<vmem>>, vector<7x32xf32>
    %c14_362 = arith.constant 14 : index
    %c480_363 = arith.constant 480 : index
    %224 = vector.load %arg14[%c14_362, %c480_363] : memref<49x512xf32, #tpu.memory_space<vmem>>, vector<7x32xf32>
    tpu.vector_store %arg14[%c14_362, %c480_363], %223 {strides = array<i32>} : memref<49x512xf32, #tpu.memory_space<vmem>>, vector<7x32xf32>,
    %c225_364 = arith.constant 225 : index
    %c0_365 = arith.constant 0 : index
    %225 = vector.load %arg13[%c225_364, %c0_365] : memref<256x32xf32, #tpu.memory_space<vmem>>, vector<7x32xf32>
    %c21_366 = arith.constant 21 : index
    %c480_367 = arith.constant 480 : index
    %226 = vector.load %arg14[%c21_366, %c480_367] : memref<49x512xf32, #tpu.memory_space<vmem>>, vector<7x32xf32>
    tpu.vector_store %arg14[%c21_366, %c480_367], %225 {strides = array<i32>} : memref<49x512xf32, #tpu.memory_space<vmem>>, vector<7x32xf32>,
    %c233_368 = arith.constant 233 : index
    %c0_369 = arith.constant 0 : index
    %227 = vector.load %arg13[%c233_368, %c0_369] : memref<256x32xf32, #tpu.memory_space<vmem>>, vector<7x32xf32>
    %c28_370 = arith.constant 28 : index
    %c480_371 = arith.constant 480 : index
    %228 = vector.load %arg14[%c28_370, %c480_371] : memref<49x512xf32, #tpu.memory_space<vmem>>, vector<7x32xf32>
    tpu.vector_store %arg14[%c28_370, %c480_371], %227 {strides = array<i32>} : memref<49x512xf32, #tpu.memory_space<vmem>>, vector<7x32xf32>,
    %c241_372 = arith.constant 241 : index
    %c0_373 = arith.constant 0 : index
    %229 = vector.load %arg13[%c241_372, %c0_373] : memref<256x32xf32, #tpu.memory_space<vmem>>, vector<7x32xf32>
    %c35_374 = arith.constant 35 : index
    %c480_375 = arith.constant 480 : index
    %230 = vector.load %arg14[%c35_374, %c480_375] : memref<49x512xf32, #tpu.memory_space<vmem>>, vector<7x32xf32>
    tpu.vector_store %arg14[%c35_374, %c480_375], %229 {strides = array<i32>} : memref<49x512xf32, #tpu.memory_space<vmem>>, vector<7x32xf32>,
    %c249 = arith.constant 249 : index
    %c0_376 = arith.constant 0 : index
    %231 = vector.load %arg13[%c249, %c0_376] : memref<256x32xf32, #tpu.memory_space<vmem>>, vector<7x32xf32>
    %c42_377 = arith.constant 42 : index
    %c480_378 = arith.constant 480 : index
    %232 = vector.load %arg14[%c42_377, %c480_378] : memref<49x512xf32, #tpu.memory_space<vmem>>, vector<7x32xf32>
    tpu.vector_store %arg14[%c42_377, %c480_378], %231 {strides = array<i32>} : memref<49x512xf32, #tpu.memory_space<vmem>>, vector<7x32xf32>,
    %c0_379 = arith.constant 0 : index
    %c0_380 = arith.constant 0 : index
    %233 = vector.load %arg14[%c0_379, %c0_380] : memref<49x512xf32, #tpu.memory_space<vmem>>, vector<49x512xf32>
    %234 = arith.truncf %233 : vector<49x512xf32> to vector<49x512xbf16>
    %c0_381 = arith.constant 0 : index
    %c0_382 = arith.constant 0 : index
    %235 = vector.load %arg4[%c0_381, %c0_382] : memref<512x64xbf16, #tpu.memory_space<vmem>>, vector<512x64xbf16>
    %cst_383 = arith.constant dense<0.000000e+00> : vector<49x64xf32>
    %236 = tpu.matmul %234, %235, %cst_383 {dimension_numbers = #tpu.dot_dimension_numbers<[1], [0], [0], [1], [0, 0, 1, 1], [], []>} : vector<49x512xbf16>, vector<512x64xbf16>, vector<49x64xf32> -> vector<49x64xf32>
    %c0_384 = arith.constant 0 : index
    %c0_385 = arith.constant 0 : index
    %237 = vector.load %arg5[%c0_384, %c0_385] : memref<1x64xf32, #tpu.memory_space<vmem>>, vector<1x64xf32>
    %238 = vector.broadcast %237 : vector<1x64xf32> to vector<49x64xf32>
    %239 = arith.addf %236, %238 : vector<49x64xf32>
    %cst_386 = arith.constant 0.000000e+00 : f32
    %240 = vector.broadcast %cst_386 : f32 to vector<49x64xf32>
    %241 = arith.maximumf %239, %240 : vector<49x64xf32>
    %c0_387 = arith.constant 0 : index
    %c0_388 = arith.constant 0 : index
    %242 = vector.load %arg15[%c0_387, %c0_388] : memref<49x64xf32, #tpu.memory_space<vmem>>, vector<49x64xf32>
    tpu.vector_store %arg15[%c0_387, %c0_388], %241 {strides = array<i32>} : memref<49x64xf32, #tpu.memory_space<vmem>>, vector<49x64xf32>,
    %c0_389 = arith.constant 0 : index
    %c0_390 = arith.constant 0 : index
    %243 = vector.load %arg15[%c0_389, %c0_390] : memref<49x64xf32, #tpu.memory_space<vmem>>, vector<5x64xf32>
    %c0_391 = arith.constant 0 : index
    %c0_392 = arith.constant 0 : index
    %244 = vector.load %arg16[%c0_391, %c0_392] : memref<25x576xf32, #tpu.memory_space<vmem>>, vector<5x64xf32>
    tpu.vector_store %arg16[%c0_391, %c0_392], %243 {strides = array<i32>} : memref<25x576xf32, #tpu.memory_space<vmem>>, vector<5x64xf32>,
    %c7_393 = arith.constant 7 : index
    %c0_394 = arith.constant 0 : index
    %245 = vector.load %arg15[%c7_393, %c0_394] : memref<49x64xf32, #tpu.memory_space<vmem>>, vector<5x64xf32>
    %c5 = arith.constant 5 : index
    %c0_395 = arith.constant 0 : index
    %246 = vector.load %arg16[%c5, %c0_395] : memref<25x576xf32, #tpu.memory_space<vmem>>, vector<5x64xf32>
    tpu.vector_store %arg16[%c5, %c0_395], %245 {strides = array<i32>} : memref<25x576xf32, #tpu.memory_space<vmem>>, vector<5x64xf32>,
    %c14_396 = arith.constant 14 : index
    %c0_397 = arith.constant 0 : index
    %247 = vector.load %arg15[%c14_396, %c0_397] : memref<49x64xf32, #tpu.memory_space<vmem>>, vector<5x64xf32>
    %c10 = arith.constant 10 : index
    %c0_398 = arith.constant 0 : index
    %248 = vector.load %arg16[%c10, %c0_398] : memref<25x576xf32, #tpu.memory_space<vmem>>, vector<5x64xf32>
    tpu.vector_store %arg16[%c10, %c0_398], %247 {strides = array<i32>} : memref<25x576xf32, #tpu.memory_space<vmem>>, vector<5x64xf32>,
    %c21_399 = arith.constant 21 : index
    %c0_400 = arith.constant 0 : index
    %249 = vector.load %arg15[%c21_399, %c0_400] : memref<49x64xf32, #tpu.memory_space<vmem>>, vector<5x64xf32>
    %c15 = arith.constant 15 : index
    %c0_401 = arith.constant 0 : index
    %250 = vector.load %arg16[%c15, %c0_401] : memref<25x576xf32, #tpu.memory_space<vmem>>, vector<5x64xf32>
    tpu.vector_store %arg16[%c15, %c0_401], %249 {strides = array<i32>} : memref<25x576xf32, #tpu.memory_space<vmem>>, vector<5x64xf32>,
    %c28_402 = arith.constant 28 : index
    %c0_403 = arith.constant 0 : index
    %251 = vector.load %arg15[%c28_402, %c0_403] : memref<49x64xf32, #tpu.memory_space<vmem>>, vector<5x64xf32>
    %c20 = arith.constant 20 : index
    %c0_404 = arith.constant 0 : index
    %252 = vector.load %arg16[%c20, %c0_404] : memref<25x576xf32, #tpu.memory_space<vmem>>, vector<5x64xf32>
    tpu.vector_store %arg16[%c20, %c0_404], %251 {strides = array<i32>} : memref<25x576xf32, #tpu.memory_space<vmem>>, vector<5x64xf32>,
    %c1_405 = arith.constant 1 : index
    %c0_406 = arith.constant 0 : index
    %253 = vector.load %arg15[%c1_405, %c0_406] : memref<49x64xf32, #tpu.memory_space<vmem>>, vector<5x64xf32>
    %c0_407 = arith.constant 0 : index
    %c64_408 = arith.constant 64 : index
    %254 = vector.load %arg16[%c0_407, %c64_408] : memref<25x576xf32, #tpu.memory_space<vmem>>, vector<5x64xf32>
    tpu.vector_store %arg16[%c0_407, %c64_408], %253 {strides = array<i32>} : memref<25x576xf32, #tpu.memory_space<vmem>>, vector<5x64xf32>,
    %c8_409 = arith.constant 8 : index
    %c0_410 = arith.constant 0 : index
    %255 = vector.load %arg15[%c8_409, %c0_410] : memref<49x64xf32, #tpu.memory_space<vmem>>, vector<5x64xf32>
    %c5_411 = arith.constant 5 : index
    %c64_412 = arith.constant 64 : index
    %256 = vector.load %arg16[%c5_411, %c64_412] : memref<25x576xf32, #tpu.memory_space<vmem>>, vector<5x64xf32>
    tpu.vector_store %arg16[%c5_411, %c64_412], %255 {strides = array<i32>} : memref<25x576xf32, #tpu.memory_space<vmem>>, vector<5x64xf32>,
    %c15_413 = arith.constant 15 : index
    %c0_414 = arith.constant 0 : index
    %257 = vector.load %arg15[%c15_413, %c0_414] : memref<49x64xf32, #tpu.memory_space<vmem>>, vector<5x64xf32>
    %c10_415 = arith.constant 10 : index
    %c64_416 = arith.constant 64 : index
    %258 = vector.load %arg16[%c10_415, %c64_416] : memref<25x576xf32, #tpu.memory_space<vmem>>, vector<5x64xf32>
    tpu.vector_store %arg16[%c10_415, %c64_416], %257 {strides = array<i32>} : memref<25x576xf32, #tpu.memory_space<vmem>>, vector<5x64xf32>,
    %c22 = arith.constant 22 : index
    %c0_417 = arith.constant 0 : index
    %259 = vector.load %arg15[%c22, %c0_417] : memref<49x64xf32, #tpu.memory_space<vmem>>, vector<5x64xf32>
    %c15_418 = arith.constant 15 : index
    %c64_419 = arith.constant 64 : index
    %260 = vector.load %arg16[%c15_418, %c64_419] : memref<25x576xf32, #tpu.memory_space<vmem>>, vector<5x64xf32>
    tpu.vector_store %arg16[%c15_418, %c64_419], %259 {strides = array<i32>} : memref<25x576xf32, #tpu.memory_space<vmem>>, vector<5x64xf32>,
    %c29 = arith.constant 29 : index
    %c0_420 = arith.constant 0 : index
    %261 = vector.load %arg15[%c29, %c0_420] : memref<49x64xf32, #tpu.memory_space<vmem>>, vector<5x64xf32>
    %c20_421 = arith.constant 20 : index
    %c64_422 = arith.constant 64 : index
    %262 = vector.load %arg16[%c20_421, %c64_422] : memref<25x576xf32, #tpu.memory_space<vmem>>, vector<5x64xf32>
    tpu.vector_store %arg16[%c20_421, %c64_422], %261 {strides = array<i32>} : memref<25x576xf32, #tpu.memory_space<vmem>>, vector<5x64xf32>,
    %c2 = arith.constant 2 : index
    %c0_423 = arith.constant 0 : index
    %263 = vector.load %arg15[%c2, %c0_423] : memref<49x64xf32, #tpu.memory_space<vmem>>, vector<5x64xf32>
    %c0_424 = arith.constant 0 : index
    %c128_425 = arith.constant 128 : index
    %264 = vector.load %arg16[%c0_424, %c128_425] : memref<25x576xf32, #tpu.memory_space<vmem>>, vector<5x64xf32>
    tpu.vector_store %arg16[%c0_424, %c128_425], %263 {strides = array<i32>} : memref<25x576xf32, #tpu.memory_space<vmem>>, vector<5x64xf32>,
    %c9_426 = arith.constant 9 : index
    %c0_427 = arith.constant 0 : index
    %265 = vector.load %arg15[%c9_426, %c0_427] : memref<49x64xf32, #tpu.memory_space<vmem>>, vector<5x64xf32>
    %c5_428 = arith.constant 5 : index
    %c128_429 = arith.constant 128 : index
    %266 = vector.load %arg16[%c5_428, %c128_429] : memref<25x576xf32, #tpu.memory_space<vmem>>, vector<5x64xf32>
    tpu.vector_store %arg16[%c5_428, %c128_429], %265 {strides = array<i32>} : memref<25x576xf32, #tpu.memory_space<vmem>>, vector<5x64xf32>,
    %c16_430 = arith.constant 16 : index
    %c0_431 = arith.constant 0 : index
    %267 = vector.load %arg15[%c16_430, %c0_431] : memref<49x64xf32, #tpu.memory_space<vmem>>, vector<5x64xf32>
    %c10_432 = arith.constant 10 : index
    %c128_433 = arith.constant 128 : index
    %268 = vector.load %arg16[%c10_432, %c128_433] : memref<25x576xf32, #tpu.memory_space<vmem>>, vector<5x64xf32>
    tpu.vector_store %arg16[%c10_432, %c128_433], %267 {strides = array<i32>} : memref<25x576xf32, #tpu.memory_space<vmem>>, vector<5x64xf32>,
    %c23 = arith.constant 23 : index
    %c0_434 = arith.constant 0 : index
    %269 = vector.load %arg15[%c23, %c0_434] : memref<49x64xf32, #tpu.memory_space<vmem>>, vector<5x64xf32>
    %c15_435 = arith.constant 15 : index
    %c128_436 = arith.constant 128 : index
    %270 = vector.load %arg16[%c15_435, %c128_436] : memref<25x576xf32, #tpu.memory_space<vmem>>, vector<5x64xf32>
    tpu.vector_store %arg16[%c15_435, %c128_436], %269 {strides = array<i32>} : memref<25x576xf32, #tpu.memory_space<vmem>>, vector<5x64xf32>,
    %c30 = arith.constant 30 : index
    %c0_437 = arith.constant 0 : index
    %271 = vector.load %arg15[%c30, %c0_437] : memref<49x64xf32, #tpu.memory_space<vmem>>, vector<5x64xf32>
    %c20_438 = arith.constant 20 : index
    %c128_439 = arith.constant 128 : index
    %272 = vector.load %arg16[%c20_438, %c128_439] : memref<25x576xf32, #tpu.memory_space<vmem>>, vector<5x64xf32>
    tpu.vector_store %arg16[%c20_438, %c128_439], %271 {strides = array<i32>} : memref<25x576xf32, #tpu.memory_space<vmem>>, vector<5x64xf32>,
    %c7_440 = arith.constant 7 : index
    %c0_441 = arith.constant 0 : index
    %273 = vector.load %arg15[%c7_440, %c0_441] : memref<49x64xf32, #tpu.memory_space<vmem>>, vector<5x64xf32>
    %c0_442 = arith.constant 0 : index
    %c192_443 = arith.constant 192 : index
    %274 = vector.load %arg16[%c0_442, %c192_443] : memref<25x576xf32, #tpu.memory_space<vmem>>, vector<5x64xf32>
    tpu.vector_store %arg16[%c0_442, %c192_443], %273 {strides = array<i32>} : memref<25x576xf32, #tpu.memory_space<vmem>>, vector<5x64xf32>,
    %c14_444 = arith.constant 14 : index
    %c0_445 = arith.constant 0 : index
    %275 = vector.load %arg15[%c14_444, %c0_445] : memref<49x64xf32, #tpu.memory_space<vmem>>, vector<5x64xf32>
    %c5_446 = arith.constant 5 : index
    %c192_447 = arith.constant 192 : index
    %276 = vector.load %arg16[%c5_446, %c192_447] : memref<25x576xf32, #tpu.memory_space<vmem>>, vector<5x64xf32>
    tpu.vector_store %arg16[%c5_446, %c192_447], %275 {strides = array<i32>} : memref<25x576xf32, #tpu.memory_space<vmem>>, vector<5x64xf32>,
    %c21_448 = arith.constant 21 : index
    %c0_449 = arith.constant 0 : index
    %277 = vector.load %arg15[%c21_448, %c0_449] : memref<49x64xf32, #tpu.memory_space<vmem>>, vector<5x64xf32>
    %c10_450 = arith.constant 10 : index
    %c192_451 = arith.constant 192 : index
    %278 = vector.load %arg16[%c10_450, %c192_451] : memref<25x576xf32, #tpu.memory_space<vmem>>, vector<5x64xf32>
    tpu.vector_store %arg16[%c10_450, %c192_451], %277 {strides = array<i32>} : memref<25x576xf32, #tpu.memory_space<vmem>>, vector<5x64xf32>,
    %c28_452 = arith.constant 28 : index
    %c0_453 = arith.constant 0 : index
    %279 = vector.load %arg15[%c28_452, %c0_453] : memref<49x64xf32, #tpu.memory_space<vmem>>, vector<5x64xf32>
    %c15_454 = arith.constant 15 : index
    %c192_455 = arith.constant 192 : index
    %280 = vector.load %arg16[%c15_454, %c192_455] : memref<25x576xf32, #tpu.memory_space<vmem>>, vector<5x64xf32>
    tpu.vector_store %arg16[%c15_454, %c192_455], %279 {strides = array<i32>} : memref<25x576xf32, #tpu.memory_space<vmem>>, vector<5x64xf32>,
    %c35_456 = arith.constant 35 : index
    %c0_457 = arith.constant 0 : index
    %281 = vector.load %arg15[%c35_456, %c0_457] : memref<49x64xf32, #tpu.memory_space<vmem>>, vector<5x64xf32>
    %c20_458 = arith.constant 20 : index
    %c192_459 = arith.constant 192 : index
    %282 = vector.load %arg16[%c20_458, %c192_459] : memref<25x576xf32, #tpu.memory_space<vmem>>, vector<5x64xf32>
    tpu.vector_store %arg16[%c20_458, %c192_459], %281 {strides = array<i32>} : memref<25x576xf32, #tpu.memory_space<vmem>>, vector<5x64xf32>,
    %c8_460 = arith.constant 8 : index
    %c0_461 = arith.constant 0 : index
    %283 = vector.load %arg15[%c8_460, %c0_461] : memref<49x64xf32, #tpu.memory_space<vmem>>, vector<5x64xf32>
    %c0_462 = arith.constant 0 : index
    %c256_463 = arith.constant 256 : index
    %284 = vector.load %arg16[%c0_462, %c256_463] : memref<25x576xf32, #tpu.memory_space<vmem>>, vector<5x64xf32>
    tpu.vector_store %arg16[%c0_462, %c256_463], %283 {strides = array<i32>} : memref<25x576xf32, #tpu.memory_space<vmem>>, vector<5x64xf32>,
    %c15_464 = arith.constant 15 : index
    %c0_465 = arith.constant 0 : index
    %285 = vector.load %arg15[%c15_464, %c0_465] : memref<49x64xf32, #tpu.memory_space<vmem>>, vector<5x64xf32>
    %c5_466 = arith.constant 5 : index
    %c256_467 = arith.constant 256 : index
    %286 = vector.load %arg16[%c5_466, %c256_467] : memref<25x576xf32, #tpu.memory_space<vmem>>, vector<5x64xf32>
    tpu.vector_store %arg16[%c5_466, %c256_467], %285 {strides = array<i32>} : memref<25x576xf32, #tpu.memory_space<vmem>>, vector<5x64xf32>,
    %c22_468 = arith.constant 22 : index
    %c0_469 = arith.constant 0 : index
    %287 = vector.load %arg15[%c22_468, %c0_469] : memref<49x64xf32, #tpu.memory_space<vmem>>, vector<5x64xf32>
    %c10_470 = arith.constant 10 : index
    %c256_471 = arith.constant 256 : index
    %288 = vector.load %arg16[%c10_470, %c256_471] : memref<25x576xf32, #tpu.memory_space<vmem>>, vector<5x64xf32>
    tpu.vector_store %arg16[%c10_470, %c256_471], %287 {strides = array<i32>} : memref<25x576xf32, #tpu.memory_space<vmem>>, vector<5x64xf32>,
    %c29_472 = arith.constant 29 : index
    %c0_473 = arith.constant 0 : index
    %289 = vector.load %arg15[%c29_472, %c0_473] : memref<49x64xf32, #tpu.memory_space<vmem>>, vector<5x64xf32>
    %c15_474 = arith.constant 15 : index
    %c256_475 = arith.constant 256 : index
    %290 = vector.load %arg16[%c15_474, %c256_475] : memref<25x576xf32, #tpu.memory_space<vmem>>, vector<5x64xf32>
    tpu.vector_store %arg16[%c15_474, %c256_475], %289 {strides = array<i32>} : memref<25x576xf32, #tpu.memory_space<vmem>>, vector<5x64xf32>,
    %c36 = arith.constant 36 : index
    %c0_476 = arith.constant 0 : index
    %291 = vector.load %arg15[%c36, %c0_476] : memref<49x64xf32, #tpu.memory_space<vmem>>, vector<5x64xf32>
    %c20_477 = arith.constant 20 : index
    %c256_478 = arith.constant 256 : index
    %292 = vector.load %arg16[%c20_477, %c256_478] : memref<25x576xf32, #tpu.memory_space<vmem>>, vector<5x64xf32>
    tpu.vector_store %arg16[%c20_477, %c256_478], %291 {strides = array<i32>} : memref<25x576xf32, #tpu.memory_space<vmem>>, vector<5x64xf32>,
    %c9_479 = arith.constant 9 : index
    %c0_480 = arith.constant 0 : index
    %293 = vector.load %arg15[%c9_479, %c0_480] : memref<49x64xf32, #tpu.memory_space<vmem>>, vector<5x64xf32>
    %c0_481 = arith.constant 0 : index
    %c320_482 = arith.constant 320 : index
    %294 = vector.load %arg16[%c0_481, %c320_482] : memref<25x576xf32, #tpu.memory_space<vmem>>, vector<5x64xf32>
    tpu.vector_store %arg16[%c0_481, %c320_482], %293 {strides = array<i32>} : memref<25x576xf32, #tpu.memory_space<vmem>>, vector<5x64xf32>,
    %c16_483 = arith.constant 16 : index
    %c0_484 = arith.constant 0 : index
    %295 = vector.load %arg15[%c16_483, %c0_484] : memref<49x64xf32, #tpu.memory_space<vmem>>, vector<5x64xf32>
    %c5_485 = arith.constant 5 : index
    %c320_486 = arith.constant 320 : index
    %296 = vector.load %arg16[%c5_485, %c320_486] : memref<25x576xf32, #tpu.memory_space<vmem>>, vector<5x64xf32>
    tpu.vector_store %arg16[%c5_485, %c320_486], %295 {strides = array<i32>} : memref<25x576xf32, #tpu.memory_space<vmem>>, vector<5x64xf32>,
    %c23_487 = arith.constant 23 : index
    %c0_488 = arith.constant 0 : index
    %297 = vector.load %arg15[%c23_487, %c0_488] : memref<49x64xf32, #tpu.memory_space<vmem>>, vector<5x64xf32>
    %c10_489 = arith.constant 10 : index
    %c320_490 = arith.constant 320 : index
    %298 = vector.load %arg16[%c10_489, %c320_490] : memref<25x576xf32, #tpu.memory_space<vmem>>, vector<5x64xf32>
    tpu.vector_store %arg16[%c10_489, %c320_490], %297 {strides = array<i32>} : memref<25x576xf32, #tpu.memory_space<vmem>>, vector<5x64xf32>,
    %c30_491 = arith.constant 30 : index
    %c0_492 = arith.constant 0 : index
    %299 = vector.load %arg15[%c30_491, %c0_492] : memref<49x64xf32, #tpu.memory_space<vmem>>, vector<5x64xf32>
    %c15_493 = arith.constant 15 : index
    %c320_494 = arith.constant 320 : index
    %300 = vector.load %arg16[%c15_493, %c320_494] : memref<25x576xf32, #tpu.memory_space<vmem>>, vector<5x64xf32>
    tpu.vector_store %arg16[%c15_493, %c320_494], %299 {strides = array<i32>} : memref<25x576xf32, #tpu.memory_space<vmem>>, vector<5x64xf32>,
    %c37 = arith.constant 37 : index
    %c0_495 = arith.constant 0 : index
    %301 = vector.load %arg15[%c37, %c0_495] : memref<49x64xf32, #tpu.memory_space<vmem>>, vector<5x64xf32>
    %c20_496 = arith.constant 20 : index
    %c320_497 = arith.constant 320 : index
    %302 = vector.load %arg16[%c20_496, %c320_497] : memref<25x576xf32, #tpu.memory_space<vmem>>, vector<5x64xf32>
    tpu.vector_store %arg16[%c20_496, %c320_497], %301 {strides = array<i32>} : memref<25x576xf32, #tpu.memory_space<vmem>>, vector<5x64xf32>,
    %c14_498 = arith.constant 14 : index
    %c0_499 = arith.constant 0 : index
    %303 = vector.load %arg15[%c14_498, %c0_499] : memref<49x64xf32, #tpu.memory_space<vmem>>, vector<5x64xf32>
    %c0_500 = arith.constant 0 : index
    %c384_501 = arith.constant 384 : index
    %304 = vector.load %arg16[%c0_500, %c384_501] : memref<25x576xf32, #tpu.memory_space<vmem>>, vector<5x64xf32>
    tpu.vector_store %arg16[%c0_500, %c384_501], %303 {strides = array<i32>} : memref<25x576xf32, #tpu.memory_space<vmem>>, vector<5x64xf32>,
    %c21_502 = arith.constant 21 : index
    %c0_503 = arith.constant 0 : index
    %305 = vector.load %arg15[%c21_502, %c0_503] : memref<49x64xf32, #tpu.memory_space<vmem>>, vector<5x64xf32>
    %c5_504 = arith.constant 5 : index
    %c384_505 = arith.constant 384 : index
    %306 = vector.load %arg16[%c5_504, %c384_505] : memref<25x576xf32, #tpu.memory_space<vmem>>, vector<5x64xf32>
    tpu.vector_store %arg16[%c5_504, %c384_505], %305 {strides = array<i32>} : memref<25x576xf32, #tpu.memory_space<vmem>>, vector<5x64xf32>,
    %c28_506 = arith.constant 28 : index
    %c0_507 = arith.constant 0 : index
    %307 = vector.load %arg15[%c28_506, %c0_507] : memref<49x64xf32, #tpu.memory_space<vmem>>, vector<5x64xf32>
    %c10_508 = arith.constant 10 : index
    %c384_509 = arith.constant 384 : index
    %308 = vector.load %arg16[%c10_508, %c384_509] : memref<25x576xf32, #tpu.memory_space<vmem>>, vector<5x64xf32>
    tpu.vector_store %arg16[%c10_508, %c384_509], %307 {strides = array<i32>} : memref<25x576xf32, #tpu.memory_space<vmem>>, vector<5x64xf32>,
    %c35_510 = arith.constant 35 : index
    %c0_511 = arith.constant 0 : index
    %309 = vector.load %arg15[%c35_510, %c0_511] : memref<49x64xf32, #tpu.memory_space<vmem>>, vector<5x64xf32>
    %c15_512 = arith.constant 15 : index
    %c384_513 = arith.constant 384 : index
    %310 = vector.load %arg16[%c15_512, %c384_513] : memref<25x576xf32, #tpu.memory_space<vmem>>, vector<5x64xf32>
    tpu.vector_store %arg16[%c15_512, %c384_513], %309 {strides = array<i32>} : memref<25x576xf32, #tpu.memory_space<vmem>>, vector<5x64xf32>,
    %c42_514 = arith.constant 42 : index
    %c0_515 = arith.constant 0 : index
    %311 = vector.load %arg15[%c42_514, %c0_515] : memref<49x64xf32, #tpu.memory_space<vmem>>, vector<5x64xf32>
    %c20_516 = arith.constant 20 : index
    %c384_517 = arith.constant 384 : index
    %312 = vector.load %arg16[%c20_516, %c384_517] : memref<25x576xf32, #tpu.memory_space<vmem>>, vector<5x64xf32>
    tpu.vector_store %arg16[%c20_516, %c384_517], %311 {strides = array<i32>} : memref<25x576xf32, #tpu.memory_space<vmem>>, vector<5x64xf32>,
    %c15_518 = arith.constant 15 : index
    %c0_519 = arith.constant 0 : index
    %313 = vector.load %arg15[%c15_518, %c0_519] : memref<49x64xf32, #tpu.memory_space<vmem>>, vector<5x64xf32>
    %c0_520 = arith.constant 0 : index
    %c448_521 = arith.constant 448 : index
    %314 = vector.load %arg16[%c0_520, %c448_521] : memref<25x576xf32, #tpu.memory_space<vmem>>, vector<5x64xf32>
    tpu.vector_store %arg16[%c0_520, %c448_521], %313 {strides = array<i32>} : memref<25x576xf32, #tpu.memory_space<vmem>>, vector<5x64xf32>,
    %c22_522 = arith.constant 22 : index
    %c0_523 = arith.constant 0 : index
    %315 = vector.load %arg15[%c22_522, %c0_523] : memref<49x64xf32, #tpu.memory_space<vmem>>, vector<5x64xf32>
    %c5_524 = arith.constant 5 : index
    %c448_525 = arith.constant 448 : index
    %316 = vector.load %arg16[%c5_524, %c448_525] : memref<25x576xf32, #tpu.memory_space<vmem>>, vector<5x64xf32>
    tpu.vector_store %arg16[%c5_524, %c448_525], %315 {strides = array<i32>} : memref<25x576xf32, #tpu.memory_space<vmem>>, vector<5x64xf32>,
    %c29_526 = arith.constant 29 : index
    %c0_527 = arith.constant 0 : index
    %317 = vector.load %arg15[%c29_526, %c0_527] : memref<49x64xf32, #tpu.memory_space<vmem>>, vector<5x64xf32>
    %c10_528 = arith.constant 10 : index
    %c448_529 = arith.constant 448 : index
    %318 = vector.load %arg16[%c10_528, %c448_529] : memref<25x576xf32, #tpu.memory_space<vmem>>, vector<5x64xf32>
    tpu.vector_store %arg16[%c10_528, %c448_529], %317 {strides = array<i32>} : memref<25x576xf32, #tpu.memory_space<vmem>>, vector<5x64xf32>,
    %c36_530 = arith.constant 36 : index
    %c0_531 = arith.constant 0 : index
    %319 = vector.load %arg15[%c36_530, %c0_531] : memref<49x64xf32, #tpu.memory_space<vmem>>, vector<5x64xf32>
    %c15_532 = arith.constant 15 : index
    %c448_533 = arith.constant 448 : index
    %320 = vector.load %arg16[%c15_532, %c448_533] : memref<25x576xf32, #tpu.memory_space<vmem>>, vector<5x64xf32>
    tpu.vector_store %arg16[%c15_532, %c448_533], %319 {strides = array<i32>} : memref<25x576xf32, #tpu.memory_space<vmem>>, vector<5x64xf32>,
    %c43 = arith.constant 43 : index
    %c0_534 = arith.constant 0 : index
    %321 = vector.load %arg15[%c43, %c0_534] : memref<49x64xf32, #tpu.memory_space<vmem>>, vector<5x64xf32>
    %c20_535 = arith.constant 20 : index
    %c448_536 = arith.constant 448 : index
    %322 = vector.load %arg16[%c20_535, %c448_536] : memref<25x576xf32, #tpu.memory_space<vmem>>, vector<5x64xf32>
    tpu.vector_store %arg16[%c20_535, %c448_536], %321 {strides = array<i32>} : memref<25x576xf32, #tpu.memory_space<vmem>>, vector<5x64xf32>,
    %c16_537 = arith.constant 16 : index
    %c0_538 = arith.constant 0 : index
    %323 = vector.load %arg15[%c16_537, %c0_538] : memref<49x64xf32, #tpu.memory_space<vmem>>, vector<5x64xf32>
    %c0_539 = arith.constant 0 : index
    %c512 = arith.constant 512 : index
    %324 = vector.load %arg16[%c0_539, %c512] : memref<25x576xf32, #tpu.memory_space<vmem>>, vector<5x64xf32>
    tpu.vector_store %arg16[%c0_539, %c512], %323 {strides = array<i32>} : memref<25x576xf32, #tpu.memory_space<vmem>>, vector<5x64xf32>,
    %c23_540 = arith.constant 23 : index
    %c0_541 = arith.constant 0 : index
    %325 = vector.load %arg15[%c23_540, %c0_541] : memref<49x64xf32, #tpu.memory_space<vmem>>, vector<5x64xf32>
    %c5_542 = arith.constant 5 : index
    %c512_543 = arith.constant 512 : index
    %326 = vector.load %arg16[%c5_542, %c512_543] : memref<25x576xf32, #tpu.memory_space<vmem>>, vector<5x64xf32>
    tpu.vector_store %arg16[%c5_542, %c512_543], %325 {strides = array<i32>} : memref<25x576xf32, #tpu.memory_space<vmem>>, vector<5x64xf32>,
    %c30_544 = arith.constant 30 : index
    %c0_545 = arith.constant 0 : index
    %327 = vector.load %arg15[%c30_544, %c0_545] : memref<49x64xf32, #tpu.memory_space<vmem>>, vector<5x64xf32>
    %c10_546 = arith.constant 10 : index
    %c512_547 = arith.constant 512 : index
    %328 = vector.load %arg16[%c10_546, %c512_547] : memref<25x576xf32, #tpu.memory_space<vmem>>, vector<5x64xf32>
    tpu.vector_store %arg16[%c10_546, %c512_547], %327 {strides = array<i32>} : memref<25x576xf32, #tpu.memory_space<vmem>>, vector<5x64xf32>,
    %c37_548 = arith.constant 37 : index
    %c0_549 = arith.constant 0 : index
    %329 = vector.load %arg15[%c37_548, %c0_549] : memref<49x64xf32, #tpu.memory_space<vmem>>, vector<5x64xf32>
    %c15_550 = arith.constant 15 : index
    %c512_551 = arith.constant 512 : index
    %330 = vector.load %arg16[%c15_550, %c512_551] : memref<25x576xf32, #tpu.memory_space<vmem>>, vector<5x64xf32>
    tpu.vector_store %arg16[%c15_550, %c512_551], %329 {strides = array<i32>} : memref<25x576xf32, #tpu.memory_space<vmem>>, vector<5x64xf32>,
    %c44 = arith.constant 44 : index
    %c0_552 = arith.constant 0 : index
    %331 = vector.load %arg15[%c44, %c0_552] : memref<49x64xf32, #tpu.memory_space<vmem>>, vector<5x64xf32>
    %c20_553 = arith.constant 20 : index
    %c512_554 = arith.constant 512 : index
    %332 = vector.load %arg16[%c20_553, %c512_554] : memref<25x576xf32, #tpu.memory_space<vmem>>, vector<5x64xf32>
    tpu.vector_store %arg16[%c20_553, %c512_554], %331 {strides = array<i32>} : memref<25x576xf32, #tpu.memory_space<vmem>>, vector<5x64xf32>,
    %c0_555 = arith.constant 0 : index
    %c0_556 = arith.constant 0 : index
    %333 = vector.load %arg16[%c0_555, %c0_556] : memref<25x576xf32, #tpu.memory_space<vmem>>, vector<25x576xf32>
    %334 = arith.truncf %333 : vector<25x576xf32> to vector<25x576xbf16>
    %c0_557 = arith.constant 0 : index
    %c0_558 = arith.constant 0 : index
    %335 = vector.load %arg6[%c0_557, %c0_558] : memref<576x64xbf16, #tpu.memory_space<vmem>>, vector<576x64xbf16>
    %cst_559 = arith.constant dense<0.000000e+00> : vector<25x64xf32>
    %336 = tpu.matmul %334, %335, %cst_559 {dimension_numbers = #tpu.dot_dimension_numbers<[1], [0], [0], [1], [0, 0, 1, 1], [], []>} : vector<25x576xbf16>, vector<576x64xbf16>, vector<25x64xf32> -> vector<25x64xf32>
    %c0_560 = arith.constant 0 : index
    %c0_561 = arith.constant 0 : index
    %337 = vector.load %arg7[%c0_560, %c0_561] : memref<1x64xf32, #tpu.memory_space<vmem>>, vector<1x64xf32>
    %338 = vector.broadcast %337 : vector<1x64xf32> to vector<25x64xf32>
    %339 = arith.addf %336, %338 : vector<25x64xf32>
    %cst_562 = arith.constant 0.000000e+00 : f32
    %340 = vector.broadcast %cst_562 : f32 to vector<25x64xf32>
    %341 = arith.maximumf %339, %340 : vector<25x64xf32>
    %c0_563 = arith.constant 0 : index
    %c0_564 = arith.constant 0 : index
    %342 = vector.load %arg17[%c0_563, %c0_564] : memref<25x64xf32, #tpu.memory_space<vmem>>, vector<25x64xf32>
    tpu.vector_store %arg17[%c0_563, %c0_564], %341 {strides = array<i32>} : memref<25x64xf32, #tpu.memory_space<vmem>>, vector<25x64xf32>,
    %c0_565 = arith.constant 0 : index
    %c0_566 = arith.constant 0 : index
    %343 = vector.load %arg17[%c0_565, %c0_566] : memref<25x64xf32, #tpu.memory_space<vmem>>, vector<1x64xf32>
    %c0_567 = arith.constant 0 : index
    %c0_568 = arith.constant 0 : index
    %344 = vector.load %arg18[%c0_567, %c0_568] : memref<1x1600xf32, #tpu.memory_space<vmem>>, vector<1x64xf32>
    tpu.vector_store %arg18[%c0_567, %c0_568], %343 {strides = array<i32>} : memref<1x1600xf32, #tpu.memory_space<vmem>>, vector<1x64xf32>,
    %c1_569 = arith.constant 1 : index
    %c0_570 = arith.constant 0 : index
    %345 = vector.load %arg17[%c1_569, %c0_570] : memref<25x64xf32, #tpu.memory_space<vmem>>, vector<1x64xf32>
    %c0_571 = arith.constant 0 : index
    %c64_572 = arith.constant 64 : index
    %346 = vector.load %arg18[%c0_571, %c64_572] : memref<1x1600xf32, #tpu.memory_space<vmem>>, vector<1x64xf32>
    tpu.vector_store %arg18[%c0_571, %c64_572], %345 {strides = array<i32>} : memref<1x1600xf32, #tpu.memory_space<vmem>>, vector<1x64xf32>,
    %c2_573 = arith.constant 2 : index
    %c0_574 = arith.constant 0 : index
    %347 = vector.load %arg17[%c2_573, %c0_574] : memref<25x64xf32, #tpu.memory_space<vmem>>, vector<1x64xf32>
    %c0_575 = arith.constant 0 : index
    %c128_576 = arith.constant 128 : index
    %348 = vector.load %arg18[%c0_575, %c128_576] : memref<1x1600xf32, #tpu.memory_space<vmem>>, vector<1x64xf32>
    tpu.vector_store %arg18[%c0_575, %c128_576], %347 {strides = array<i32>} : memref<1x1600xf32, #tpu.memory_space<vmem>>, vector<1x64xf32>,
    %c3 = arith.constant 3 : index
    %c0_577 = arith.constant 0 : index
    %349 = vector.load %arg17[%c3, %c0_577] : memref<25x64xf32, #tpu.memory_space<vmem>>, vector<1x64xf32>
    %c0_578 = arith.constant 0 : index
    %c192_579 = arith.constant 192 : index
    %350 = vector.load %arg18[%c0_578, %c192_579] : memref<1x1600xf32, #tpu.memory_space<vmem>>, vector<1x64xf32>
    tpu.vector_store %arg18[%c0_578, %c192_579], %349 {strides = array<i32>} : memref<1x1600xf32, #tpu.memory_space<vmem>>, vector<1x64xf32>,
    %c4 = arith.constant 4 : index
    %c0_580 = arith.constant 0 : index
    %351 = vector.load %arg17[%c4, %c0_580] : memref<25x64xf32, #tpu.memory_space<vmem>>, vector<1x64xf32>
    %c0_581 = arith.constant 0 : index
    %c256_582 = arith.constant 256 : index
    %352 = vector.load %arg18[%c0_581, %c256_582] : memref<1x1600xf32, #tpu.memory_space<vmem>>, vector<1x64xf32>
    tpu.vector_store %arg18[%c0_581, %c256_582], %351 {strides = array<i32>} : memref<1x1600xf32, #tpu.memory_space<vmem>>, vector<1x64xf32>,
    %c5_583 = arith.constant 5 : index
    %c0_584 = arith.constant 0 : index
    %353 = vector.load %arg17[%c5_583, %c0_584] : memref<25x64xf32, #tpu.memory_space<vmem>>, vector<1x64xf32>
    %c0_585 = arith.constant 0 : index
    %c320_586 = arith.constant 320 : index
    %354 = vector.load %arg18[%c0_585, %c320_586] : memref<1x1600xf32, #tpu.memory_space<vmem>>, vector<1x64xf32>
    tpu.vector_store %arg18[%c0_585, %c320_586], %353 {strides = array<i32>} : memref<1x1600xf32, #tpu.memory_space<vmem>>, vector<1x64xf32>,
    %c6 = arith.constant 6 : index
    %c0_587 = arith.constant 0 : index
    %355 = vector.load %arg17[%c6, %c0_587] : memref<25x64xf32, #tpu.memory_space<vmem>>, vector<1x64xf32>
    %c0_588 = arith.constant 0 : index
    %c384_589 = arith.constant 384 : index
    %356 = vector.load %arg18[%c0_588, %c384_589] : memref<1x1600xf32, #tpu.memory_space<vmem>>, vector<1x64xf32>
    tpu.vector_store %arg18[%c0_588, %c384_589], %355 {strides = array<i32>} : memref<1x1600xf32, #tpu.memory_space<vmem>>, vector<1x64xf32>,
    %c7_590 = arith.constant 7 : index
    %c0_591 = arith.constant 0 : index
    %357 = vector.load %arg17[%c7_590, %c0_591] : memref<25x64xf32, #tpu.memory_space<vmem>>, vector<1x64xf32>
    %c0_592 = arith.constant 0 : index
    %c448_593 = arith.constant 448 : index
    %358 = vector.load %arg18[%c0_592, %c448_593] : memref<1x1600xf32, #tpu.memory_space<vmem>>, vector<1x64xf32>
    tpu.vector_store %arg18[%c0_592, %c448_593], %357 {strides = array<i32>} : memref<1x1600xf32, #tpu.memory_space<vmem>>, vector<1x64xf32>,
    %c8_594 = arith.constant 8 : index
    %c0_595 = arith.constant 0 : index
    %359 = vector.load %arg17[%c8_594, %c0_595] : memref<25x64xf32, #tpu.memory_space<vmem>>, vector<1x64xf32>
    %c0_596 = arith.constant 0 : index
    %c512_597 = arith.constant 512 : index
    %360 = vector.load %arg18[%c0_596, %c512_597] : memref<1x1600xf32, #tpu.memory_space<vmem>>, vector<1x64xf32>
    tpu.vector_store %arg18[%c0_596, %c512_597], %359 {strides = array<i32>} : memref<1x1600xf32, #tpu.memory_space<vmem>>, vector<1x64xf32>,
    %c9_598 = arith.constant 9 : index
    %c0_599 = arith.constant 0 : index
    %361 = vector.load %arg17[%c9_598, %c0_599] : memref<25x64xf32, #tpu.memory_space<vmem>>, vector<1x64xf32>
    %c0_600 = arith.constant 0 : index
    %c576 = arith.constant 576 : index
    %362 = vector.load %arg18[%c0_600, %c576] : memref<1x1600xf32, #tpu.memory_space<vmem>>, vector<1x64xf32>
    tpu.vector_store %arg18[%c0_600, %c576], %361 {strides = array<i32>} : memref<1x1600xf32, #tpu.memory_space<vmem>>, vector<1x64xf32>,
    %c10_601 = arith.constant 10 : index
    %c0_602 = arith.constant 0 : index
    %363 = vector.load %arg17[%c10_601, %c0_602] : memref<25x64xf32, #tpu.memory_space<vmem>>, vector<1x64xf32>
    %c0_603 = arith.constant 0 : index
    %c640 = arith.constant 640 : index
    %364 = vector.load %arg18[%c0_603, %c640] : memref<1x1600xf32, #tpu.memory_space<vmem>>, vector<1x64xf32>
    tpu.vector_store %arg18[%c0_603, %c640], %363 {strides = array<i32>} : memref<1x1600xf32, #tpu.memory_space<vmem>>, vector<1x64xf32>,
    %c11 = arith.constant 11 : index
    %c0_604 = arith.constant 0 : index
    %365 = vector.load %arg17[%c11, %c0_604] : memref<25x64xf32, #tpu.memory_space<vmem>>, vector<1x64xf32>
    %c0_605 = arith.constant 0 : index
    %c704 = arith.constant 704 : index
    %366 = vector.load %arg18[%c0_605, %c704] : memref<1x1600xf32, #tpu.memory_space<vmem>>, vector<1x64xf32>
    tpu.vector_store %arg18[%c0_605, %c704], %365 {strides = array<i32>} : memref<1x1600xf32, #tpu.memory_space<vmem>>, vector<1x64xf32>,
    %c12 = arith.constant 12 : index
    %c0_606 = arith.constant 0 : index
    %367 = vector.load %arg17[%c12, %c0_606] : memref<25x64xf32, #tpu.memory_space<vmem>>, vector<1x64xf32>
    %c0_607 = arith.constant 0 : index
    %c768 = arith.constant 768 : index
    %368 = vector.load %arg18[%c0_607, %c768] : memref<1x1600xf32, #tpu.memory_space<vmem>>, vector<1x64xf32>
    tpu.vector_store %arg18[%c0_607, %c768], %367 {strides = array<i32>} : memref<1x1600xf32, #tpu.memory_space<vmem>>, vector<1x64xf32>,
    %c13 = arith.constant 13 : index
    %c0_608 = arith.constant 0 : index
    %369 = vector.load %arg17[%c13, %c0_608] : memref<25x64xf32, #tpu.memory_space<vmem>>, vector<1x64xf32>
    %c0_609 = arith.constant 0 : index
    %c832 = arith.constant 832 : index
    %370 = vector.load %arg18[%c0_609, %c832] : memref<1x1600xf32, #tpu.memory_space<vmem>>, vector<1x64xf32>
    tpu.vector_store %arg18[%c0_609, %c832], %369 {strides = array<i32>} : memref<1x1600xf32, #tpu.memory_space<vmem>>, vector<1x64xf32>,
    %c14_610 = arith.constant 14 : index
    %c0_611 = arith.constant 0 : index
    %371 = vector.load %arg17[%c14_610, %c0_611] : memref<25x64xf32, #tpu.memory_space<vmem>>, vector<1x64xf32>
    %c0_612 = arith.constant 0 : index
    %c896 = arith.constant 896 : index
    %372 = vector.load %arg18[%c0_612, %c896] : memref<1x1600xf32, #tpu.memory_space<vmem>>, vector<1x64xf32>
    tpu.vector_store %arg18[%c0_612, %c896], %371 {strides = array<i32>} : memref<1x1600xf32, #tpu.memory_space<vmem>>, vector<1x64xf32>,
    %c15_613 = arith.constant 15 : index
    %c0_614 = arith.constant 0 : index
    %373 = vector.load %arg17[%c15_613, %c0_614] : memref<25x64xf32, #tpu.memory_space<vmem>>, vector<1x64xf32>
    %c0_615 = arith.constant 0 : index
    %c960 = arith.constant 960 : index
    %374 = vector.load %arg18[%c0_615, %c960] : memref<1x1600xf32, #tpu.memory_space<vmem>>, vector<1x64xf32>
    tpu.vector_store %arg18[%c0_615, %c960], %373 {strides = array<i32>} : memref<1x1600xf32, #tpu.memory_space<vmem>>, vector<1x64xf32>,
    %c16_616 = arith.constant 16 : index
    %c0_617 = arith.constant 0 : index
    %375 = vector.load %arg17[%c16_616, %c0_617] : memref<25x64xf32, #tpu.memory_space<vmem>>, vector<1x64xf32>
    %c0_618 = arith.constant 0 : index
    %c1024 = arith.constant 1024 : index
    %376 = vector.load %arg18[%c0_618, %c1024] : memref<1x1600xf32, #tpu.memory_space<vmem>>, vector<1x64xf32>
    tpu.vector_store %arg18[%c0_618, %c1024], %375 {strides = array<i32>} : memref<1x1600xf32, #tpu.memory_space<vmem>>, vector<1x64xf32>,
    %c17_619 = arith.constant 17 : index
    %c0_620 = arith.constant 0 : index
    %377 = vector.load %arg17[%c17_619, %c0_620] : memref<25x64xf32, #tpu.memory_space<vmem>>, vector<1x64xf32>
    %c0_621 = arith.constant 0 : index
    %c1088 = arith.constant 1088 : index
    %378 = vector.load %arg18[%c0_621, %c1088] : memref<1x1600xf32, #tpu.memory_space<vmem>>, vector<1x64xf32>
    tpu.vector_store %arg18[%c0_621, %c1088], %377 {strides = array<i32>} : memref<1x1600xf32, #tpu.memory_space<vmem>>, vector<1x64xf32>,
    %c18 = arith.constant 18 : index
    %c0_622 = arith.constant 0 : index
    %379 = vector.load %arg17[%c18, %c0_622] : memref<25x64xf32, #tpu.memory_space<vmem>>, vector<1x64xf32>
    %c0_623 = arith.constant 0 : index
    %c1152 = arith.constant 1152 : index
    %380 = vector.load %arg18[%c0_623, %c1152] : memref<1x1600xf32, #tpu.memory_space<vmem>>, vector<1x64xf32>
    tpu.vector_store %arg18[%c0_623, %c1152], %379 {strides = array<i32>} : memref<1x1600xf32, #tpu.memory_space<vmem>>, vector<1x64xf32>,
    %c19 = arith.constant 19 : index
    %c0_624 = arith.constant 0 : index
    %381 = vector.load %arg17[%c19, %c0_624] : memref<25x64xf32, #tpu.memory_space<vmem>>, vector<1x64xf32>
    %c0_625 = arith.constant 0 : index
    %c1216 = arith.constant 1216 : index
    %382 = vector.load %arg18[%c0_625, %c1216] : memref<1x1600xf32, #tpu.memory_space<vmem>>, vector<1x64xf32>
    tpu.vector_store %arg18[%c0_625, %c1216], %381 {strides = array<i32>} : memref<1x1600xf32, #tpu.memory_space<vmem>>, vector<1x64xf32>,
    %c20_626 = arith.constant 20 : index
    %c0_627 = arith.constant 0 : index
    %383 = vector.load %arg17[%c20_626, %c0_627] : memref<25x64xf32, #tpu.memory_space<vmem>>, vector<1x64xf32>
    %c0_628 = arith.constant 0 : index
    %c1280 = arith.constant 1280 : index
    %384 = vector.load %arg18[%c0_628, %c1280] : memref<1x1600xf32, #tpu.memory_space<vmem>>, vector<1x64xf32>
    tpu.vector_store %arg18[%c0_628, %c1280], %383 {strides = array<i32>} : memref<1x1600xf32, #tpu.memory_space<vmem>>, vector<1x64xf32>,
    %c21_629 = arith.constant 21 : index
    %c0_630 = arith.constant 0 : index
    %385 = vector.load %arg17[%c21_629, %c0_630] : memref<25x64xf32, #tpu.memory_space<vmem>>, vector<1x64xf32>
    %c0_631 = arith.constant 0 : index
    %c1344 = arith.constant 1344 : index
    %386 = vector.load %arg18[%c0_631, %c1344] : memref<1x1600xf32, #tpu.memory_space<vmem>>, vector<1x64xf32>
    tpu.vector_store %arg18[%c0_631, %c1344], %385 {strides = array<i32>} : memref<1x1600xf32, #tpu.memory_space<vmem>>, vector<1x64xf32>,
    %c22_632 = arith.constant 22 : index
    %c0_633 = arith.constant 0 : index
    %387 = vector.load %arg17[%c22_632, %c0_633] : memref<25x64xf32, #tpu.memory_space<vmem>>, vector<1x64xf32>
    %c0_634 = arith.constant 0 : index
    %c1408 = arith.constant 1408 : index
    %388 = vector.load %arg18[%c0_634, %c1408] : memref<1x1600xf32, #tpu.memory_space<vmem>>, vector<1x64xf32>
    tpu.vector_store %arg18[%c0_634, %c1408], %387 {strides = array<i32>} : memref<1x1600xf32, #tpu.memory_space<vmem>>, vector<1x64xf32>,
    %c23_635 = arith.constant 23 : index
    %c0_636 = arith.constant 0 : index
    %389 = vector.load %arg17[%c23_635, %c0_636] : memref<25x64xf32, #tpu.memory_space<vmem>>, vector<1x64xf32>
    %c0_637 = arith.constant 0 : index
    %c1472 = arith.constant 1472 : index
    %390 = vector.load %arg18[%c0_637, %c1472] : memref<1x1600xf32, #tpu.memory_space<vmem>>, vector<1x64xf32>
    tpu.vector_store %arg18[%c0_637, %c1472], %389 {strides = array<i32>} : memref<1x1600xf32, #tpu.memory_space<vmem>>, vector<1x64xf32>,
    %c24_638 = arith.constant 24 : index
    %c0_639 = arith.constant 0 : index
    %391 = vector.load %arg17[%c24_638, %c0_639] : memref<25x64xf32, #tpu.memory_space<vmem>>, vector<1x64xf32>
    %c0_640 = arith.constant 0 : index
    %c1536 = arith.constant 1536 : index
    %392 = vector.load %arg18[%c0_640, %c1536] : memref<1x1600xf32, #tpu.memory_space<vmem>>, vector<1x64xf32>
    tpu.vector_store %arg18[%c0_640, %c1536], %391 {strides = array<i32>} : memref<1x1600xf32, #tpu.memory_space<vmem>>, vector<1x64xf32>,
    %c0_641 = arith.constant 0 : index
    %c0_642 = arith.constant 0 : index
    %393 = vector.load %arg18[%c0_641, %c0_642] : memref<1x1600xf32, #tpu.memory_space<vmem>>, vector<1x1600xf32>
    %394 = vector.shape_cast %393 : vector<1x1600xf32> to vector<1x1600xf32>
    %395 = vector.broadcast %394 : vector<1x1600xf32> to vector<8x1600xf32>
    %396 = arith.truncf %395 : vector<8x1600xf32> to vector<8x1600xbf16>
    %c0_643 = arith.constant 0 : index
    %c0_644 = arith.constant 0 : index
    %397 = vector.load %arg8[%c0_643, %c0_644] : memref<1600x512xbf16, #tpu.memory_space<vmem>>, vector<1600x512xbf16>
    %cst_645 = arith.constant dense<0.000000e+00> : vector<8x512xf32>
    %398 = tpu.matmul %396, %397, %cst_645 {dimension_numbers = #tpu.dot_dimension_numbers<[1], [0], [0], [1], [0, 0, 1, 1], [], []>} : vector<8x1600xbf16>, vector<1600x512xbf16>, vector<8x512xf32> -> vector<8x512xf32>
    %c0_646 = arith.constant 0 : index
    %c0_647 = arith.constant 0 : index
    %399 = vector.load %arg9[%c0_646, %c0_647] : memref<1x512xf32, #tpu.memory_space<vmem>>, vector<1x512xf32>
    %400 = vector.broadcast %399 : vector<1x512xf32> to vector<8x512xf32>
    %401 = arith.addf %398, %400 : vector<8x512xf32>
    %cst_648 = arith.constant 0.000000e+00 : f32
    %402 = vector.broadcast %cst_648 : f32 to vector<8x512xf32>
    %403 = arith.maximumf %401, %402 : vector<8x512xf32>
    %404 = arith.truncf %403 : vector<8x512xf32> to vector<8x512xbf16>
    %c0_649 = arith.constant 0 : index
    %c0_650 = arith.constant 0 : index
    %405 = vector.load %arg10[%c0_649, %c0_650] : memref<512x128xbf16, #tpu.memory_space<vmem>>, vector<512x128xbf16>
    %cst_651 = arith.constant dense<0.000000e+00> : vector<8x128xf32>
    %406 = tpu.matmul %404, %405, %cst_651 {dimension_numbers = #tpu.dot_dimension_numbers<[1], [0], [0], [1], [0, 0, 1, 1], [], []>} : vector<8x512xbf16>, vector<512x128xbf16>, vector<8x128xf32> -> vector<8x128xf32>
    %c0_652 = arith.constant 0 : index
    %c0_653 = arith.constant 0 : index
    %407 = vector.load %arg11[%c0_652, %c0_653] : memref<1x128xf32, #tpu.memory_space<vmem>>, vector<1x128xf32>
    %408 = vector.broadcast %407 : vector<1x128xf32> to vector<8x128xf32>
    %409 = arith.addf %406, %408 : vector<8x128xf32>
    %410 = vector.extract_strided_slice %409 {offsets = [0, 0], sizes = [1, 128], strides = [1, 1]} : vector<8x128xf32> to vector<1x128xf32>
    %411 = vector.shape_cast %410 : vector<1x128xf32> to vector<1x1x128xf32>
    %c0_654 = arith.constant 0 : index
    %c0_655 = arith.constant 0 : index
    %c0_656 = arith.constant 0 : index
    %412 = vector.load %arg12[%c0_654, %c0_655, %c0_656] : memref<1x1x128xf32, #tpu.memory_space<vmem>>, vector<1x1x128xf32>
    tpu.vector_store %arg12[%c0_654, %c0_655, %c0_656], %411 {strides = array<i32>} : memref<1x1x128xf32, #tpu.memory_space<vmem>>, vector<1x1x128xf32>,
    return
  }
  func.func @transform_0(%arg0: i32) -> (i32, i32) {
    %c0_i32 = arith.constant 0 : i32
    %c0_i32_0 = arith.constant 0 : i32
    return %arg0, %c0_i32 : i32, i32
  }
  func.func @transform_1(%arg0: i32) -> (i32, i32) {
    %c0_i32 = arith.constant 0 : i32
    %c0_i32_0 = arith.constant 0 : i32
    %c0_i32_1 = arith.constant 0 : i32
    return %c0_i32, %c0_i32_0 : i32, i32
  }
  func.func @transform_2(%arg0: i32) -> (i32, i32) {
    %c0_i32 = arith.constant 0 : i32
    %c0_i32_0 = arith.constant 0 : i32
    %c0_i32_1 = arith.constant 0 : i32
    return %c0_i32, %c0_i32_0 : i32, i32
  }
  func.func @transform_3(%arg0: i32) -> (i32, i32) {
    %c0_i32 = arith.constant 0 : i32
    %c0_i32_0 = arith.constant 0 : i32
    %c0_i32_1 = arith.constant 0 : i32
    return %c0_i32, %c0_i32_0 : i32, i32
  }
  func.func @transform_4(%arg0: i32) -> (i32, i32) {
    %c0_i32 = arith.constant 0 : i32
    %c0_i32_0 = arith.constant 0 : i32
    %c0_i32_1 = arith.constant 0 : i32
    return %c0_i32, %c0_i32_0 : i32, i32
  }
  func.func @transform_5(%arg0: i32) -> (i32, i32) {
    %c0_i32 = arith.constant 0 : i32
    %c0_i32_0 = arith.constant 0 : i32
    %c0_i32_1 = arith.constant 0 : i32
    return %c0_i32, %c0_i32_0 : i32, i32
  }
  func.func @transform_6(%arg0: i32) -> (i32, i32) {
    %c0_i32 = arith.constant 0 : i32
    %c0_i32_0 = arith.constant 0 : i32
    %c0_i32_1 = arith.constant 0 : i32
    return %c0_i32, %c0_i32_0 : i32, i32
  }
  func.func @transform_7(%arg0: i32) -> (i32, i32) {
    %c0_i32 = arith.constant 0 : i32
    %c0_i32_0 = arith.constant 0 : i32
    %c0_i32_1 = arith.constant 0 : i32
    return %c0_i32, %c0_i32_0 : i32, i32
  }
  func.func @transform_8(%arg0: i32) -> (i32, i32) {
    %c0_i32 = arith.constant 0 : i32
    %c0_i32_0 = arith.constant 0 : i32
    %c0_i32_1 = arith.constant 0 : i32
    return %c0_i32, %c0_i32_0 : i32, i32
  }
  func.func @transform_9(%arg0: i32) -> (i32, i32) {
    %c0_i32 = arith.constant 0 : i32
    %c0_i32_0 = arith.constant 0 : i32
    %c0_i32_1 = arith.constant 0 : i32
    return %c0_i32, %c0_i32_0 : i32, i32
  }
  func.func @transform_10(%arg0: i32) -> (i32, i32) {
    %c0_i32 = arith.constant 0 : i32
    %c0_i32_0 = arith.constant 0 : i32
    %c0_i32_1 = arith.constant 0 : i32
    return %c0_i32, %c0_i32_0 : i32, i32
  }
  func.func @transform_11(%arg0: i32) -> (i32, i32, i32) {
    %c0_i32 = arith.constant 0 : i32
    %c0_i32_0 = arith.constant 0 : i32
    %c0_i32_1 = arith.constant 0 : i32
    return %arg0, %c0_i32, %c0_i32_0 : i32, i32, i32
  }
}

</mosaic_0001>

<bundles_post_ra>
// kernel: dqn_forward.1
= control target key start
LH: loop header
LB: loop body
LE: loop exit
PB: predicated region body
PF: predicated region fallthrough
CT: control target
= control target key end

     0   :  { %16 = vsyncpa [#allocation9], 0  ;;  %s11049_s0 = inlined_call_operand.vmem [shape: bf16[1024,256], index: 0, kind: input, shape index: {}]   ;;  %s11050_s1 = inlined_call_operand.vmem [shape: bf16[256,32], index: 1, kind: input, shape index: {}]   ;;  %s11051_s2 = inlined_call_operand.vmem [shape: f32[1,32], index: 2, kind: input, shape index: {}]   ;;  %s11052_s3 = inlined_call_operand.vmem [shape: bf16[512,64], index: 3, kind: input, shape index: {}]   ;;  %s11053_s4 = inlined_call_operand.vmem [shape: f32[1,64], index: 4, kind: input, shape index: {}]   ;;  %s11054_s5 = inlined_call_operand.vmem [shape: bf16[576,64], index: 5, kind: input, shape index: {}]   ;;  %s11055_s6 = inlined_call_operand.vmem [shape: f32[1,64], index: 6, kind: input, shape index: {}]   ;;  %s11056_s7 = inlined_call_operand.vmem [shape: bf16[1600,512], index: 7, kind: input, shape index: {}]   ;;  %s11057_s8 = inlined_call_operand.vmem [shape: f32[1,512], index: 8, kind: input, shape index: {}]   ;;  %s11058_s9 = inlined_call_operand.vmem [shape: bf16[512,128], index: 9, kind: input, shape index: {}]   ;;  %s11059_s10 = inlined_call_operand.vmem [shape: f32[1,128], index: 10, kind: input, shape index: {}]   ;;  %s11060_s11 = inlined_call_operand.hbm [shape: f32[4,1,128], index: 11, kind: output, shape index: {}]  }
   0x1   :  { %18 = vsyncpa [#allocation9 + $0x1], 0  ;;  %s8674_s17 = smov 0   ;;  %s8676_s18 = smov 0  }
   0x2   :  { %s8678_s19 = smov 0   ;;  %s8680_s20 = smov 0  }
   0x3 LB: > { %s8695_s21 = sadd.s32 4294967295, %s8606_s20   ;;  %s6794_s22 = sadd.s32 4294967294, %s8606_s20   ;;  %s8606_s20 = sphi %s8680_s20, %s11175_s20   ;;  %s8602_s19 = sphi %s8678_s19, %s11174_s19   ;;  %s8598_s18 = sphi %s8676_s18, %s11173_s18   ;;  %s8594_s17 = sphi %s8674_s17, %s11172_s17  }
   0x4   : > { %s8699_s23 = sadd.s32 1, %s8606_s20   ;;  %s267_s24 = sadd.s32 1, %s8602_s19 }
   0x5   : > { %s264_s25 = ssub.s32 %s8606_s20, %s8699_s23  ;;  %p277_p0 = scmp.ne.s32.totalorder %s8602_s19, %s8598_s18 }
   0x6   : > { %p265_p1 = scmp.eq.s32.totalorder %s264_s25, 0  ;;  %p278_p2 = scmp.eq.s32.totalorder %s8695_s21, 3 }
   0x7   : > { %p283_p3 = scmp.ne.s32.totalorder %s8598_s18, %s8594_s17  ;;  %p284_p4 = scmp.eq.s32.totalorder %s6794_s22, 3 }
   0x8   : > { %s8710_s26 = scalar_select %p265_p1, %s8602_s19, %s267_s24  }
   0x9   : > { %p8712_p5 = por %p278_p2, %p277_p0  ;;  %p8716_p6 = por %p284_p4, %p283_p3 }
   0xa   : > { %11091 = sst [smem:[#allocation11_spill]] %s8710_s26  ;;  %p6797_p7 = scmp.ge.s32.totalorder %s8606_s20, 1 }
   0xb   : > { %p342_p8 = scmp.lt.s32.totalorder %s8606_s20, 5 }
   0xd   : > { %p343_p9 = pnand %p6797_p7, %p342_p8 }
   0xe   : > { %v7779_v0 = vld [vmem:[%s11050_s1 + $0x40] sm:$0xff] (!%p343_p9)   ;;  %s6798_s12 = sshll.u32 (!%p343_p9), %s8695_s21, 5  ;;  %v7781_v2 = vld [vmem:[%s11050_s1 + $0x48] sm:$0xff] (!%p343_p9)   ;;  %v7783_v4 = vld [vmem:[%s11050_s1 + $0x50] sm:$0xff] (!%p343_p9)   ;;  %vm910_vm0 = vcmask (!%p343_p9), 261120   ;;  %vm944_vm1 = vcmask (!%p343_p9), 260096  }
   0xf   : > { %346 = sbr.rel (%p343_p9) target bundleno = 2199 (0x897), region = 64  ;;  %v7780_v1 = vld [vmem:[%s11050_s1] sm:$0xff] (!%p343_p9)   ;;  %7373 = vmatprep.subr.bf16.mxu0 (!%p343_p9), %v7779_v0  ;;  %v7782_v3 = vld [vmem:[%s11050_s1 + $0x8] sm:$0xff] (!%p343_p9)   ;;  %p383_p10 = scmp.lt.s32.totalorder (!%p343_p9), %s6798_s12, 127  ;;  %v7784_v5 = vld [vmem:[%s11050_s1 + $0x10] sm:$0xff] (!%p343_p9)   ;;  %vm950_vm2 = vcmask (!%p343_p9), 261127  }
  0x10   : > { %7374 = vmatpush3.bf16.msra.mxu0 (!%p343_p9), %v7780_v1  ;;  %v7785_v6 = vld [vmem:[%s11050_s1 + $0x58] sm:$0xff] (!%p343_p9)   ;;  %v7787_v8 = vld [vmem:[%s11050_s1 + $0x60] sm:$0xff] (!%p343_p9)   ;;  %v7789_v10 = vld [vmem:[%s11050_s1 + $0x68] sm:$0xff] (!%p343_p9)   ;;  %vm952_vm3 = vcmask (!%p343_p9), 259072   ;;  %vm958_vm4 = vcmask (!%p343_p9), 261126   ;;  %vm960_vm5 = vcmask (!%p343_p9), 258048  }
  0x11   : > { %7375 = vmatprep.subr.bf16.mxu0 (!%p343_p9), %v7781_v2  ;;  %v7786_v7 = vld [vmem:[%s11050_s1 + $0x18] sm:$0xff] (!%p343_p9)   ;;  %v7788_v9 = vld [vmem:[%s11050_s1 + $0x20] sm:$0xff] (!%p343_p9)   ;;  %v7790_v12 = vld [vmem:[%s11050_s1 + $0x28] sm:$0xff] (!%p343_p9)   ;;  %vm966_vm6 = vcmask (!%p343_p9), 261125   ;;  %vm968_vm7 = vcmask (!%p343_p9), 257024   ;;  %vm982_vm8 = vcmask (!%p343_p9), 261123  }
  0x12   : > { %v7791_v13 = vld [vmem:[%s11050_s1 + $0x70] sm:$0xff] (!%p343_p9)   ;;  %v7793_v15 = vld [vmem:[%s11050_s1 + $0x78] sm:$0xff] (!%p343_p9)   ;;  %v8811_v49 = vld [vmem:[%s11051_s2] ss:$0 sm:$0xff] (!%p343_p9)  ;;  %vm984_vm9 = vcmask (!%p343_p9), 254976   ;;  %vm974_vm10 = vcmask (!%p343_p9), 261124  }
  0x13   : > { %v7792_v14 = vld [vmem:[%s11050_s1 + $0x30] sm:$0xff] (!%p343_p9)   ;;  %v7794_v16 = vld [vmem:[%s11050_s1 + $0x38] sm:$0xff] (!%p343_p9)   ;;  %vm976_vm11 = vcmask (!%p343_p9), 256000   ;;  %vm990_vm12 = vcmask (!%p343_p9), 261122   ;;  %vm992_vm13 = vcmask (!%p343_p9), 253952   ;;  %s8609_s26 = smov (!%p343_p9), 32  }
  0x14   : > { %7376 = vmatpush3.bf16.msra.mxu0 (!%p343_p9), %v7782_v3  ;;  %vm999_vm14 = vcmask (!%p343_p9), 522496   ;;  %vm1066_vm15 = vcmask (!%p343_p9), 784896   ;;  %s8613_s16 = smov (!%p343_p9), [#allocation8]  }
  0x15   : > { %7377 = vmatprep.subr.bf16.mxu0 (!%p343_p9), %v7783_v4  ;;  %s8548_s22 = sshll.u32 (!%p343_p9), %s8613_s16, 4  ;;  %s8549_s22 = int_to_ptr.vmem [resolvable:$false] %s8548_s22 }
  0x16   : > { %s11177_s12 = smov (!%p383_p10, %s6798_s12), 127  ;;  %s8550_s25 = scalar_lea.vmem %s8549_s22, 32 }
  0x17   : > { %s7372_s24 = sshll.u32 %s11177_s12, 3  ;;  %s380_s12 = sand.u32 1, %s8598_s18  }
  0x18   : > { %7378 = vmatpush3.bf16.msra.mxu0 %v7784_v5  ;;  %s8753_s13 = scalar_lea.vmem %s11049_s0, %s7372_s24  ;;  %s8610_s24 = smov 96  }
  0x19   : > { %7379 = vmatprep.subr.bf16.mxu0 %v7785_v6  ;;  %v7797_v11 = vld [vmem:[%s8753_s13 + $0x4] ss:$8 sps:$4 sm:$0xff]   ;;  %v7795_v17 = vld [vmem:[%s8753_s13] ss:$8 sps:$4 sm:$0xff]   ;;  %v7798_v18 = vld [vmem:[%s8753_s13 + $0x14] ss:$8 sps:$4 sm:$0xff]  }
  0x1a   : > { %749 = vmatprep.mubr.bf16.mxu0 %v7797_v11  ;;  %v7800_v19 = vld [vmem:[%s8753_s13 + $0x10] ss:$8 sps:$4 sm:$0xff]   ;;  %v7801_v20 = vld [vmem:[%s8753_s13 + $0x24] ss:$8 sps:$4 sm:$0xff]   ;;  %v7803_v21 = vld [vmem:[%s8753_s13 + $0x20] ss:$8 sps:$4 sm:$0xff]  }
  0x1b   : > { %v7804_v22 = vld [vmem:[%s8753_s13 + $0x34] ss:$8 sps:$4 sm:$0xff]   ;;  %v7806_v23 = vld [vmem:[%s8753_s13 + $0x30] ss:$8 sps:$4 sm:$0xff]   ;;  %v7807_v24 = vld [vmem:[%s8753_s13 + $0x44] ss:$8 sps:$4 sm:$0xff]  }
  0x1c   : > { %7380 = vmatpush3.bf16.msra.mxu0 %v7786_v7  ;;  %v7809_v25 = vld [vmem:[%s8753_s13 + $0x40] ss:$8 sps:$4 sm:$0xff]   ;;  %v7810_v26 = vld [vmem:[%s8753_s13 + $0x54] ss:$8 sps:$4 sm:$0xff]   ;;  %v7812_v27 = vld [vmem:[%s8753_s13 + $0x50] ss:$8 sps:$4 sm:$0xff]  }
  0x1d   : > { %7381 = vmatprep.subr.bf16.mxu0 %v7787_v8  ;;  %v7813_v28 = vld [vmem:[%s8753_s13 + $0x64] ss:$8 sps:$4 sm:$0xff]   ;;  %v7815_v29 = vld [vmem:[%s8753_s13 + $0x60] ss:$8 sps:$4 sm:$0xff]   ;;  %v7816_v30 = vld [vmem:[%s8753_s13 + $0x74] ss:$8 sps:$4 sm:$0xff]  }
  0x1e   : > { %v7818_v31 = vld [vmem:[%s8753_s13 + $0x70] ss:$8 sps:$4 sm:$0xff]   ;;  %v7819_v32 = vld [vmem:[%s8753_s13 + $0x84] ss:$8 sps:$4 sm:$0xff]   ;;  %v7821_v33 = vld [vmem:[%s8753_s13 + $0x80] ss:$8 sps:$4 sm:$0xff]  }
  0x1f   : > { %v7822_v34 = vld [vmem:[%s8753_s13 + $0x94] ss:$8 sps:$4 sm:$0xff]   ;;  %v7824_v35 = vld [vmem:[%s8753_s13 + $0x90] ss:$8 sps:$4 sm:$0xff]   ;;  %v7825_v36 = vld [vmem:[%s8753_s13 + $0xa4] ss:$8 sps:$4 sm:$0xff]  }
  0x20   : > { %7382 = vmatpush3.bf16.msra.mxu0 %v7788_v9  ;;  %v7827_v37 = vld [vmem:[%s8753_s13 + $0xa0] ss:$8 sps:$4 sm:$0xff]   ;;  %v7828_v38 = vld [vmem:[%s8753_s13 + $0xb4] ss:$8 sps:$4 sm:$0xff]   ;;  %v7830_v39 = vld [vmem:[%s8753_s13 + $0xb0] ss:$8 sps:$4 sm:$0xff]  }
  0x21   : > { %7383 = vmatprep.subr.bf16.mxu0 %v7789_v10  ;;  %v7831_v40 = vld [vmem:[%s8753_s13 + $0xc4] ss:$8 sps:$4 sm:$0xff]   ;;  %v7833_v41 = vld [vmem:[%s8753_s13 + $0xc0] ss:$8 sps:$4 sm:$0xff]   ;;  %v7834_v42 = vld [vmem:[%s8753_s13 + $0xd4] ss:$8 sps:$4 sm:$0xff]  }
  0x22   : > { %v7836_v43 = vld [vmem:[%s8753_s13 + $0xd0] ss:$8 sps:$4 sm:$0xff]   ;;  %v7837_v44 = vld [vmem:[%s8753_s13 + $0xe4] ss:$8 sps:$4 sm:$0xff]   ;;  %v7839_v45 = vld [vmem:[%s8753_s13 + $0xe0] ss:$8 sps:$4 sm:$0xff]  }
  0x23   : > { %v7840_v46 = vld [vmem:[%s8753_s13 + $0xf4] ss:$8 sps:$4 sm:$0xff]   ;;  %v7842_v47 = vld [vmem:[%s8753_s13 + $0xf0] ss:$8 sps:$4 sm:$0xff]   ;;  %s8608_s13 = smov 64   ;;  %s381_s29 = scalar_lea.vmem [#allocation8], %s380_s12 }
  0x24   : > { %7384 = vmatpush3.bf16.msra.mxu0 %v7790_v12  ;;  %s6739_s30 = sshll.u32 %s381_s29, 4  ;;  %s6727_s15 = scalar_lea.sflag [#allocation9], %s380_s12  ;;  %s11009_s30 = int_to_ptr.vmem [resolvable:$true] %s6739_s30 }
  0x25   : > { %7385 = vmatprep.subr.bf16.mxu0 %v7791_v13  ;;  %p8551_p0 = scmp.lt.s32.totalorder %s11009_s30, %s8549_s22 }
  0x28   : > { %7386 = vmatpush3.bf16.msra.mxu0 %v7792_v14 }
  0x29   : > { %7387 = vmatprep.subr.bf16.mxu0 %v7793_v15 }
  0x2c   : > { %7388 = vmatpush3.bf16.msra.mxu0 %v7794_v16 }
  0x2f   : > { %750 = vmatmul.mubr.bf16.vlgmr.msra.gmra.mrb[0].mxu0 %v7795_v17 }
  0x30   : > { %757 = vmatprep.mubr.bf16.mxu0 %v7798_v18 }
  0x37   : > { %758 = vmatmul.mubr.bf16.gmra.mrb[4].mxu0 %v7800_v19 }
  0x38   : > { %765 = vmatprep.mubr.bf16.mxu0 %v7801_v20 }
  0x3f   : > { %766 = vmatmul.mubr.bf16.gmra.mrb[8].mxu0 %v7803_v21 }
  0x40   : > { %773 = vmatprep.mubr.bf16.mxu0 %v7804_v22 }
  0x47   : > { %774 = vmatmul.mubr.bf16.gmra.mrb[12].mxu0 %v7806_v23 }
  0x48   : > { %781 = vmatprep.mubr.bf16.mxu0 %v7807_v24 }
  0x4f   : > { %782 = vmatmul.mubr.bf16.gmra.mrb[16].mxu0 %v7809_v25 }
  0x50   : > { %789 = vmatprep.mubr.bf16.mxu0 %v7810_v26 }
  0x57   : > { %790 = vmatmul.mubr.bf16.gmra.mrb[20].mxu0 %v7812_v27 }
  0x58   : > { %797 = vmatprep.mubr.bf16.mxu0 %v7813_v28 }
  0x5f   : > { %798 = vmatmul.mubr.bf16.gmra.mrb[24].mxu0 %v7815_v29 }
  0x60   : > { %805 = vmatprep.mubr.bf16.mxu0 %v7816_v30 }
  0x67   : > { %806 = vmatmul.mubr.bf16.gmra.mrb[28].mxu0 %v7818_v31 }
  0x68   : > { %813 = vmatprep.mubr.bf16.mxu0 %v7819_v32 }
  0x6f   : > { %814 = vmatmul.mubr.bf16.gmra.mrb[32].mxu0 %v7821_v33 }
  0x70   : > { %821 = vmatprep.mubr.bf16.mxu0 %v7822_v34 }
  0x77   : > { %822 = vmatmul.mubr.bf16.gmra.mrb[36].mxu0 %v7824_v35 }
  0x78   : > { %829 = vmatprep.mubr.bf16.mxu0 %v7825_v36 }
  0x7f   : > { %830 = vmatmul.mubr.bf16.gmra.mrb[40].mxu0 %v7827_v37 }
  0x80   : > { %837 = vmatprep.mubr.bf16.mxu0 %v7828_v38 }
  0x87   : > { %838 = vmatmul.mubr.bf16.gmra.mrb[44].mxu0 %v7830_v39 }
  0x88   : > { %845 = vmatprep.mubr.bf16.mxu0 %v7831_v40 }
  0x8f   : > { %846 = vmatmul.mubr.bf16.gmra.mrb[48].mxu0 %v7833_v41 }
  0x90   : > { %853 = vmatprep.mubr.bf16.mxu0 %v7834_v42 }
  0x97   : > { %854 = vmatmul.mubr.bf16.gmra.mrb[52].mxu0 %v7836_v43 }
  0x98   : > { %861 = vmatprep.mubr.bf16.mxu0 %v7837_v44 }
  0x9f   : > { %862 = vmatmul.mubr.bf16.gmra.mrb[56].mxu0 %v7839_v45 }
  0xa0   : > { %869 = vmatprep.mubr.bf16.mxu0 %v7840_v46 }
  0xa7   : > { %870 = vmatmul.mubr.bf16.gmra.mrb[60].mxu0 %v7842_v47 }
 0x102   : > { %v7389_v48 = vpop.f32.mrb[0].mxu0 }
 0x103   : > { %v7390_v50 = vpop.f32.mrb[1].mxu0 }
 0x104   : > { %v7391_v51 = vadd.f32 %v7390_v50, %v7389_v48  ;;  %v7392_v52 = vpop.f32.mrb[2].mxu0 }
 0x105   : > { %v7393_v53 = vpop.f32.mrb[3].mxu0 }
 0x106   : > { %v752_v54 = vadd.f32 %v7391_v51, %v8811_v49  ;;  %v7394_v55 = vadd.f32 %v7393_v53, %v7392_v52 }
 0x108   : > { %v878_v56 = vmax.f32 %v752_v54, 0.0  ;;  %v755_v57 = vadd.f32 %v7394_v55, %v8811_v49 }
 0x10a   : > { %911 = vst.msk [vmem:[#allocation2] sm:$0xff] %vm910_vm0, %v878_v56  ;;  %v879_v58 = vmax.f32 %v755_v57, 0.0  ;;  %v7395_v59 = vpop.f32.mrb[4].mxu0 }
 0x10b   : > { %v7396_v60 = vpop.f32.mrb[5].mxu0 }
 0x10c   : > { %912 = vst.msk [vmem:[#allocation2 + $0x8] sm:$0xff] %vm910_vm0, %v879_v58  ;;  %v7397_v61 = vadd.f32 %v7396_v60, %v7395_v59  ;;  %v7398_v62 = vpop.f32.mrb[6].mxu0 }
 0x10d   : > { %v7399_v63 = vpop.f32.mrb[7].mxu0 }
 0x10e   : > { %v760_v0 = vadd.f32 %v7397_v61, %v8811_v49  ;;  %v7400_v1 = vadd.f32 %v7399_v63, %v7398_v62 }
 0x110   : > { %v880_v2 = vmax.f32 %v760_v0, 0.0  ;;  %v763_v3 = vadd.f32 %v7400_v1, %v8811_v49 }
 0x111   : > { %v1061_v4 = vld [vmem:[#allocation2 + $0x1] sm:$0x7f] }
 0x112   : > { %v943_v5 = vld [vmem:[#allocation2] sm:$0x7f]  ;;  %913 = vst.msk [vmem:[#allocation2 + $0x10] sm:$0xff] %vm910_vm0, %v880_v2  ;;  %v881_v6 = vmax.f32 %v763_v3, 0.0  ;;  %v7401_v7 = vpop.f32.mrb[8].mxu0  ;;  %1063 = vrot.lane.b32.xlu1 %v1061_v4, %s8608_s13 }
 0x113   : > { %945 = vst.msk [vmem:[#allocation3] sm:$0x7f] %vm944_vm1, %v943_v5  ;;  %v7402_v8 = vpop.f32.mrb[9].mxu0  ;;  %v1068_v9 = vld [vmem:[#allocation2 + $0x9] sm:$0x7f] }
 0x114   : > { %914 = vst.msk [vmem:[#allocation2 + $0x18] sm:$0xff] %vm910_vm0, %v881_v6  ;;  %v7403_v10 = vadd.f32 %v7402_v8, %v7401_v7  ;;  %v7404_v11 = vpop.f32.mrb[10].mxu0  ;;  %v1070_v12 = vrot.slane %v1068_v9, 1  ;;  %v946_v13 = vld [vmem:[#allocation2 + $0x8] sm:$0x7f] }
 0x115   : > { %v1395_v14 = vld [vmem:[#allocation2 + $0x8] sm:$0x7f]  ;;  %v7405_v15 = vpop.f32.mrb[11].mxu0  ;;  %v948_v17 = vrot.slane %v946_v13, 1 }
 0x116   : > { %v1487_v16 = vld [vmem:[#allocation2 + $0x9] sm:$0x7f]  ;;  %1396 = vst.msk [vmem:[#allocation3 + $0x10] sm:$0x7f] %vm944_vm1, %v1395_v14  ;;  %v768_v18 = vadd.f32 %v7403_v10, %v8811_v49  ;;  %v7406_v19 = vadd.f32 %v7405_v15, %v7404_v11  ;;  %1071 = vrot.lane.b32.xlu0 %v1070_v12, %s8608_s13 }
 0x117   : > { %1489 = vrot.lane.b32.xlu1 %v1487_v16, %s8608_s13  ;;  %951 = vst.msk [vmem:[#allocation3] sm:$0x80] %vm950_vm2, %v948_v17 }
 0x118   : > { %953 = vst.msk [vmem:[#allocation3 + $0x20] sm:$0x3f] %vm952_vm3, %v948_v17  ;;  %v882_v20 = vmax.f32 %v768_v18, 0.0  ;;  %v771_v21 = vadd.f32 %v7406_v19, %v8811_v49 }
 0x119   : > { %v1493_v22 = vld [vmem:[#allocation2 + $0x11] sm:$0x7f] }
 0x11a   : > { %v1078_v23 = vld [vmem:[#allocation2 + $0x11] sm:$0x7f]  ;;  %915 = vst.msk [vmem:[#allocation2 + $0x20] sm:$0xff] %vm910_vm0, %v882_v20  ;;  %v883_v25 = vmax.f32 %v771_v21, 0.0  ;;  %v7407_v26 = vpop.f32.mrb[12].mxu0  ;;  %v1495_v27 = vrot.slane %v1493_v22, 1 }
 0x11b   : > { %v1397_v24 = vld [vmem:[#allocation2 + $0x10] sm:$0x7f]  ;;  %v1080_v28 = vrot.slane %v1078_v23, 2  ;;  %v7408_v30 = vpop.f32.mrb[13].mxu0  ;;  %v1088_v31 = vld [vmem:[#allocation2 + $0x19] sm:$0x7f] }
 0x11c   : > { %v1399_v29 = vrot.slane %v1397_v24, 1  ;;  %v1501_v32 = vld [vmem:[#allocation2 + $0x19] sm:$0x7f]  ;;  %916 = vst.msk [vmem:[#allocation2 + $0x28] sm:$0xff] %vm910_vm0, %v883_v25  ;;  %v7409_v33 = vadd.f32 %v7408_v30, %v7407_v26  ;;  %v7410_v34 = vpop.f32.mrb[14].mxu0  ;;  %1496 = vrot.lane.b32.xlu0 %v1495_v27, %s8608_s13  ;;  %v1090_v35 = vrot.slane %v1088_v31, 3 }
 0x11d   : > { %1081 = vrot.lane.b32.xlu1 %v1080_v28, %s8608_s13  ;;  %v1503_v36 = vrot.slane %v1501_v32, 2  ;;  %v954_v37 = vld [vmem:[#allocation2 + $0x10] sm:$0x7f]  ;;  %v7411_v38 = vpop.f32.mrb[15].mxu0  ;;  %v962_v40 = vld [vmem:[#allocation2 + $0x18] sm:$0x7f] }
 0x11e   : > { %1401 = vst.msk [vmem:[#allocation3 + $0x10] sm:$0x80] %vm950_vm2, %v1399_v29  ;;  %v956_v39 = vrot.slane %v954_v37, 2  ;;  %v1403_v41 = vld [vmem:[#allocation2 + $0x18] sm:$0x7f]  ;;  %v776_v42 = vadd.f32 %v7409_v33, %v8811_v49  ;;  %v7412_v43 = vadd.f32 %v7411_v38, %v7410_v34  ;;  %v964_v44 = vrot.slane %v962_v40, 3 }
 0x11f   : > { %1402 = vst.msk [vmem:[#allocation3 + $0x30] sm:$0x3f] %vm952_vm3, %v1399_v29  ;;  %v1405_v45 = vrot.slane %v1403_v41, 2 }
 0x120   : > { %959 = vst.msk [vmem:[#allocation3 + $0x20] sm:$0xc0] %vm958_vm4, %v956_v39  ;;  %v884_v46 = vmax.f32 %v776_v42, 0.0  ;;  %v779_v47 = vadd.f32 %v7412_v43, %v8811_v49  ;;  %1091 = vrot.lane.b32.xlu0 %v1090_v35, %s8608_s13 }
 0x121   : > { %961 = vst.msk [vmem:[#allocation3 + $0x40] sm:$0x1f] %vm960_vm5, %v956_v39  ;;  %1504 = vrot.lane.b32.xlu1 %v1503_v36, %s8608_s13  ;;  %1408 = vst.msk [vmem:[#allocation3 + $0x50] sm:$0x1f] %vm960_vm5, %v1405_v45  ;;  %v1098_v48 = vld [vmem:[#allocation2 + $0x21] sm:$0x7f] }
 0x122   : > { %967 = vst.msk [vmem:[#allocation3 + $0x40] sm:$0xe0] %vm966_vm6, %v964_v44  ;;  %v1409_v50 = vld [vmem:[#allocation2 + $0x20] sm:$0x7f]  ;;  %v885_v51 = vmax.f32 %v779_v47, 0.0  ;;  %v7413_v52 = vpop.f32.mrb[16].mxu0 }
 0x123   : > { %969 = vst.msk [vmem:[#allocation3 + $0x60] sm:$0xf] %vm968_vm7, %v964_v44  ;;  %v1100_v53 = vrot.slane %v1098_v48, 4  ;;  %v7414_v54 = vpop.f32.mrb[17].mxu0  ;;  %v1108_v55 = vld [vmem:[#allocation2 + $0x29] sm:$0x7f] }
 0x124   : > { %1407 = vst.msk [vmem:[#allocation3 + $0x30] sm:$0xc0] %vm958_vm4, %v1405_v45  ;;  %v1411_v56 = vrot.slane %v1409_v50, 3  ;;  %v7415_v57 = vadd.f32 %v7414_v54, %v7413_v52  ;;  %v7416_v58 = vpop.f32.mrb[18].mxu0  ;;  %v1110_v59 = vrot.slane %v1108_v55, 5 }
 0x125   : > { %917 = vst.msk [vmem:[#allocation2 + $0x30] sm:$0xff] %vm910_vm0, %v884_v46  ;;  %918 = vst.msk [vmem:[#allocation2 + $0x38] sm:$0xff] %vm910_vm0, %v885_v51  ;;  %1101 = vrot.lane.b32.xlu1 %v1100_v53, %s8608_s13  ;;  %v978_v60 = vld [vmem:[#allocation2 + $0x28] sm:$0x7f]  ;;  %v7417_v61 = vpop.f32.mrb[19].mxu0 }
 0x126   : > { %1413 = vst.msk [vmem:[#allocation3 + $0x50] sm:$0xe0] %vm966_vm6, %v1411_v56  ;;  %v980_v62 = vrot.slane %v978_v60, 5  ;;  %v970_v63 = vld [vmem:[#allocation2 + $0x20] sm:$0x7f]  ;;  %v784_v1 = vadd.f32 %v7415_v57, %v8811_v49  ;;  %v7418_v2 = vadd.f32 %v7417_v61, %v7416_v58  ;;  %1111 = vrot.lane.b32.xlu0 %v1110_v59, %s8608_s13 }
 0x127   : > { %1414 = vst.msk [vmem:[#allocation3 + $0x70] sm:$0xf] %vm968_vm7, %v1411_v56  ;;  %v1415_v0 = vld [vmem:[#allocation2 + $0x28] sm:$0x7f]  ;;  %v972_v3 = vrot.slane %v970_v63, 4 }
 0x128   : > { %983 = vst.msk [vmem:[#allocation3 + $0x80] sm:$0xf8] %vm982_vm8, %v980_v62  ;;  %v1417_v4 = vrot.slane %v1415_v0, 4  ;;  %v886_v5 = vmax.f32 %v784_v1, 0.0  ;;  %v787_v6 = vadd.f32 %v7418_v2, %v8811_v49 }
 0x129   : > { %985 = vst.msk [vmem:[#allocation3 + $0xa0] sm:$0x3] %vm984_vm9, %v980_v62 }
 0x12a   : > { %975 = vst.msk [vmem:[#allocation3 + $0x60] sm:$0xf0] %vm974_vm10, %v972_v3  ;;  %1419 = vst.msk [vmem:[#allocation3 + $0x70] sm:$0xf0] %vm974_vm10, %v1417_v4  ;;  %v887_v8 = vmax.f32 %v787_v6, 0.0  ;;  %v7419_v9 = vpop.f32.mrb[20].mxu0 }
 0x12b   : > { %977 = vst.msk [vmem:[#allocation3 + $0x80] sm:$0x7] %vm976_vm11, %v972_v3  ;;  %1420 = vst.msk [vmem:[#allocation3 + $0x90] sm:$0x7] %vm976_vm11, %v1417_v4  ;;  %v7420_v11 = vpop.f32.mrb[21].mxu0 }
 0x12c   : > { %v1118_v7 = vld [vmem:[#allocation2 + $0x31] sm:$0x7f]  ;;  %919 = vst.msk [vmem:[#allocation2 + $0x40] sm:$0xff] %vm910_vm0, %v886_v5  ;;  %920 = vst.msk [vmem:[#allocation2 + $0x48] sm:$0xff] %vm910_vm0, %v887_v8  ;;  %v7421_v12 = vadd.f32 %v7420_v11, %v7419_v9  ;;  %v7422_v13 = vpop.f32.mrb[22].mxu0 }
 0x12d   : > { %v1120_v10 = vrot.slane %v1118_v7, 6  ;;  %v986_v14 = vld [vmem:[#allocation2 + $0x30] sm:$0x7f]  ;;  %v1427_v15 = vld [vmem:[#allocation2 + $0x38] sm:$0x7f]  ;;  %v7423_v16 = vpop.f32.mrb[23].mxu0 }
 0x12e   : > { %v988_v17 = vrot.slane %v986_v14, 6  ;;  %v1429_v18 = vrot.slane %v1427_v15, 6  ;;  %v1421_v19 = vld [vmem:[#allocation2 + $0x30] sm:$0x7f]  ;;  %v792_v20 = vadd.f32 %v7421_v12, %v8811_v49  ;;  %v7424_v21 = vadd.f32 %v7423_v16, %v7422_v13 }
 0x12f   : > { %1121 = vrot.lane.b32.xlu1 %v1120_v10, %s8608_s13  ;;  %v1423_v22 = vrot.slane %v1421_v19, 5 }
 0x130   : > { %991 = vst.msk [vmem:[#allocation3 + $0xa0] sm:$0xfc] %vm990_vm12, %v988_v17  ;;  %1431 = vst.msk [vmem:[#allocation3 + $0xb0] sm:$0xfc] %vm990_vm12, %v1429_v18  ;;  %v888_v23 = vmax.f32 %v792_v20, 0.0  ;;  %v795_v24 = vadd.f32 %v7424_v21, %v8811_v49 }
 0x131   : > { %993 = vst.msk [vmem:[#allocation3 + $0xc0] sm:$0x1] %vm992_vm13, %v988_v17  ;;  %1432 = vst.msk [vmem:[#allocation3 + $0xd0] sm:$0x1] %vm992_vm13, %v1429_v18 }
 0x132   : > { %1425 = vst.msk [vmem:[#allocation3 + $0x90] sm:$0xf8] %vm982_vm8, %v1423_v22  ;;  %v889_v26 = vmax.f32 %v795_v24, 0.0  ;;  %v7425_v27 = vpop.f32.mrb[24].mxu0 }
 0x133   : > { %1426 = vst.msk [vmem:[#allocation3 + $0xb0] sm:$0x3] %vm984_vm9, %v1423_v22  ;;  %v994_v25 = vld [vmem:[#allocation2 + $0x40] sm:$0x7f]  ;;  %v7426_v28 = vpop.f32.mrb[25].mxu0 }
 0x134   : > { %921 = vst.msk [vmem:[#allocation2 + $0x50] sm:$0xff] %vm910_vm0, %v888_v23  ;;  %996 = vrot.lane.b32.xlu1 %v994_v25, %s8609_s26  ;;  %v1001_v29 = vld [vmem:[#allocation2 + $0x48] sm:$0x7f]  ;;  %922 = vst.msk [vmem:[#allocation2 + $0x58] sm:$0xff] %vm910_vm0, %v889_v26  ;;  %v7427_v30 = vadd.f32 %v7426_v28, %v7425_v27  ;;  %v7428_v31 = vpop.f32.mrb[26].mxu0 }
 0x135   : > { %v1003_v32 = vrot.slane %v1001_v29, 1  ;;  %v7429_v33 = vpop.f32.mrb[27].mxu0  ;;  %v1128_v34 = vld [vmem:[#allocation2 + $0x41] sm:$0x7f]  ;;  %v1135_v35 = vld [vmem:[#allocation2 + $0x49] sm:$0x7f] }
 0x136   : > { %v800_v36 = vadd.f32 %v7427_v30, %v8811_v49  ;;  %v7430_v37 = vadd.f32 %v7429_v33, %v7428_v31  ;;  %v1137_v40 = vrot.slane %v1135_v35, 1  ;;  %v1433_v41 = vld [vmem:[#allocation2 + $0x48] sm:$0x7f] }
 0x137   : > { %1004 = vrot.lane.b32.xlu0 %v1003_v32, %s8609_s26  ;;  %v1541_v50 = vld [vmem:[#allocation2 + $0x49] sm:$0x7f] }
 0x138   : > { %1130 = vrot.lane.b32.xlu1 %v1128_v34, %s8610_s24  ;;  %v890_v38 = vmax.f32 %v800_v36, 0.0  ;;  %v803_v39 = vadd.f32 %v7430_v37, %v8811_v49 }
 0x13a   : > { %923 = vst.msk [vmem:[#allocation2 + $0x60] sm:$0xff] %vm910_vm0, %v890_v38  ;;  %v891_v43 = vmax.f32 %v803_v39, 0.0  ;;  %v7431_v44 = vpop.f32.mrb[28].mxu0 }
 0x13b   : > { %v1439_v42 = vld [vmem:[#allocation2 + $0x50] sm:$0x7f]  ;;  %1138 = vrot.lane.b32.xlu0 %v1137_v40, %s8610_s24  ;;  %v7432_v46 = vpop.f32.mrb[29].mxu0  ;;  %v1021_v60 = vld [vmem:[#allocation2 + $0x58] sm:$0x7f] }
 0x13c   : > { %1435 = vrot.lane.b32.xlu1 %v1433_v41, %s8609_s26  ;;  %v1441_v45 = vrot.slane %v1439_v42, 1  ;;  %924 = vst.msk [vmem:[#allocation2 + $0x68] sm:$0xff] %vm910_vm0, %v891_v43  ;;  %v7433_v47 = vadd.f32 %v7432_v46, %v7431_v44  ;;  %v7434_v48 = vpop.f32.mrb[30].mxu0  ;;  %v1547_v52 = vld [vmem:[#allocation2 + $0x51] sm:$0x7f]  ;;  %v1023_v3 = vrot.slane %v1021_v60, 3 }
 0x13d   : > { %v7435_v51 = vpop.f32.mrb[31].mxu0  ;;  %v1011_v53 = vld [vmem:[#allocation2 + $0x50] sm:$0x7f]  ;;  %v1549_v58 = vrot.slane %v1547_v52, 1  ;;  %v1155_v6 = vld [vmem:[#allocation2 + $0x59] sm:$0x7f] }
 0x13e   : > { %v808_v54 = vadd.f32 %v7433_v47, %v8811_v49  ;;  %v7436_v55 = vadd.f32 %v7435_v51, %v7434_v48  ;;  %v1013_v59 = vrot.slane %v1011_v53, 2  ;;  %v1145_v61 = vld [vmem:[#allocation2 + $0x51] sm:$0x7f]  ;;  %v1447_v7 = vld [vmem:[#allocation2 + $0x58] sm:$0x7f]  ;;  %v1157_v12 = vrot.slane %v1155_v6, 3 }
 0x13f   : > { %1442 = vrot.lane.b32.xlu0 %v1441_v45, %s8609_s26  ;;  %v1147_v4 = vrot.slane %v1145_v61, 2  ;;  %v1449_v13 = vrot.slane %v1447_v7, 2  ;;  %v1555_v15 = vld [vmem:[#allocation2 + $0x59] sm:$0x7f] }
 0x140   : > { %1543 = vrot.lane.b32.xlu1 %v1541_v50, %s8610_s24  ;;  %v892_v56 = vmax.f32 %v808_v54, 0.0  ;;  %v811_v57 = vadd.f32 %v7436_v55, %v8811_v49  ;;  %v1557_v22 = vrot.slane %v1555_v15, 2 }
 0x141   : > { %v1455_v14 = vld [vmem:[#allocation2 + $0x60] sm:$0x7f] }
 0x142   : > { %925 = vst.msk [vmem:[#allocation2 + $0x70] sm:$0xff] %vm910_vm0, %v892_v56  ;;  %v893_v62 = vmax.f32 %v811_v57, 0.0  ;;  %v7437_v63 = vpop.f32.mrb[32].mxu0  ;;  %v1457_v21 = vrot.slane %v1455_v14, 3  ;;  %v1031_v25 = vld [vmem:[#allocation2 + $0x60] sm:$0x7f] }
 0x143   : > { %1550 = vrot.lane.b32.xlu0 %v1549_v58, %s8610_s24  ;;  %v7438_v0 = vpop.f32.mrb[33].mxu0  ;;  %v1041_v24 = vld [vmem:[#allocation2 + $0x68] sm:$0x7f]  ;;  %v1033_v31 = vrot.slane %v1031_v25, 4  ;;  %v1165_v33 = vld [vmem:[#allocation2 + $0x61] sm:$0x7f] }
 0x144   : > { %1014 = vrot.lane.b32.xlu1 %v1013_v59, %s8609_s26  ;;  %926 = vst.msk [vmem:[#allocation2 + $0x78] sm:$0xff] %vm910_vm0, %v893_v62  ;;  %v7439_v1 = vadd.f32 %v7438_v0, %v7437_v63  ;;  %v7440_v2 = vpop.f32.mrb[34].mxu0  ;;  %v1043_v30 = vrot.slane %v1041_v24, 5  ;;  %v1175_v32 = vld [vmem:[#allocation2 + $0x69] sm:$0x7f]  ;;  %v1167_v41 = vrot.slane %v1165_v33, 4 }
 0x145   : > { %v7441_v5 = vpop.f32.mrb[35].mxu0  ;;  %v1177_v40 = vrot.slane %v1175_v32, 5  ;;  %v1463_v44 = vld [vmem:[#allocation2 + $0x68] sm:$0x7f] }
 0x146   : > { %v816_v8 = vadd.f32 %v7439_v1, %v8811_v49  ;;  %v7442_v9 = vadd.f32 %v7441_v5, %v7440_v2  ;;  %v1465_v52 = vrot.slane %v1463_v44, 4 }
 0x147   : > { %1024 = vrot.lane.b32.xlu0 %v1023_v3, %s8609_s26 }
 0x148   : > { %1148 = vrot.lane.b32.xlu1 %v1147_v4, %s8610_s24  ;;  %v894_v10 = vmax.f32 %v816_v8, 0.0  ;;  %v819_v11 = vadd.f32 %v7442_v9, %v8811_v49 }
 0x149   : > { %v1051_v54 = vld [vmem:[#allocation2 + $0x70] sm:$0x7f] }
 0x14a   : > { %927 = vst.msk [vmem:[#allocation2 + $0x80] sm:$0xff] %vm910_vm0, %v894_v10  ;;  %v895_v16 = vmax.f32 %v819_v11, 0.0  ;;  %v7443_v17 = vpop.f32.mrb[36].mxu0  ;;  %v1185_v61 = vld [vmem:[#allocation2 + $0x71] sm:$0x7f]  ;;  %v1053_v0 = vrot.slane %v1051_v54, 6 }
 0x14b   : > { %1158 = vrot.lane.b32.xlu0 %v1157_v12, %s8610_s24  ;;  %v7444_v18 = vpop.f32.mrb[37].mxu0  ;;  %v1187_v14 = vrot.slane %v1185_v61, 6 }
 0x14c   : > { %1450 = vrot.lane.b32.xlu1 %v1449_v13, %s8609_s26  ;;  %928 = vst.msk [vmem:[#allocation2 + $0x88] sm:$0xff] %vm910_vm0, %v895_v16  ;;  %v7445_v19 = vadd.f32 %v7444_v18, %v7443_v17  ;;  %v7446_v20 = vpop.f32.mrb[38].mxu0 }
 0x14d   : > { %v7447_v23 = vpop.f32.mrb[39].mxu0 }
 0x14e   : > { %v824_v26 = vadd.f32 %v7445_v19, %v8811_v49  ;;  %v7448_v27 = vadd.f32 %v7447_v23, %v7446_v20 }
 0x14f   : > { %1458 = vrot.lane.b32.xlu0 %v1457_v21, %s8609_s26 }
 0x150   : > { %1558 = vrot.lane.b32.xlu1 %v1557_v22, %s8610_s24  ;;  %v896_v28 = vmax.f32 %v824_v26, 0.0  ;;  %v827_v29 = vadd.f32 %v7448_v27, %v8811_v49 }
 0x151   : > { %v1195_v34 = vld [vmem:[#allocation2 + $0x80] sm:$0x7f] }
 0x152   : > { %929 = vst.msk [vmem:[#allocation2 + $0x90] sm:$0xff] %vm910_vm0, %v896_v28  ;;  %v897_v35 = vmax.f32 %v827_v29, 0.0  ;;  %v7449_v36 = vpop.f32.mrb[40].mxu0  ;;  %v1287_v53 = vld [vmem:[#allocation2 + $0x81] sm:$0x7f] }
 0x153   : > { %1044 = vrot.lane.b32.xlu0 %v1043_v30, %s8609_s26  ;;  %1196 = vst.msk [vmem:[#allocation3 + $0x8] sm:$0x7f] %vm944_vm1, %v1195_v34  ;;  %v7450_v37 = vpop.f32.mrb[41].mxu0  ;;  %v1595_v42 = vld [vmem:[#allocation2 + $0x88] sm:$0x7f]  ;;  %v7843_v28 = vld [vmem:[%s11052_s3 + $0x40] sm:$0xff]  }
 0x154   : > { %1034 = vrot.lane.b32.xlu1 %v1033_v31, %s8609_s26  ;;  %930 = vst.msk [vmem:[#allocation2 + $0x98] sm:$0xff] %vm910_vm0, %v897_v35  ;;  %v7451_v38 = vadd.f32 %v7450_v37, %v7449_v36  ;;  %v7452_v39 = vpop.f32.mrb[42].mxu0  ;;  %v1197_v45 = vld [vmem:[#allocation2 + $0x88] sm:$0x7f]  ;;  %7485 = vmatprep.subr.bf16.mxu1 %v7843_v28 }
 0x155   : > { %v7453_v43 = vpop.f32.mrb[43].mxu0  ;;  %1596 = vst.msk [vmem:[#allocation3 + $0x18] sm:$0x7f] %vm944_vm1, %v1595_v42  ;;  %v1199_v48 = vrot.slane %v1197_v45, 1  ;;  %v1687_v60 = vld [vmem:[#allocation2 + $0x89] sm:$0x7f] }
 0x156   : > { %v832_v46 = vadd.f32 %v7451_v38, %v8811_v49  ;;  %v7454_v47 = vadd.f32 %v7453_v43, %v7452_v39  ;;  %v1293_v16 = vld [vmem:[#allocation2 + $0x89] sm:$0x7f]  ;;  %vm11065_vm1 = vcmask 521472  }
 0x157   : > { %1178 = vrot.lane.b32.xlu0 %v1177_v40, %s8610_s24  ;;  %1201 = vst.msk [vmem:[#allocation3 + $0x8] sm:$0x80] %vm950_vm2, %v1199_v48  ;;  %v1295_v27 = vrot.slane %v1293_v16, 1 }
 0x158   : > { %1168 = vrot.lane.b32.xlu1 %v1167_v41, %s8610_s24  ;;  %v898_v50 = vmax.f32 %v832_v46, 0.0  ;;  %v835_v51 = vadd.f32 %v7454_v47, %v8811_v49  ;;  %1202 = vst.msk [vmem:[#allocation3 + $0x28] sm:$0x3f] %vm952_vm3, %v1199_v48  ;;  %v7844_v47 = vld [vmem:[%s11052_s3] sm:$0xff]   ;;  %v7845_v48 = vld [vmem:[%s11052_s3 + $0x48] sm:$0xff]  }
 0x159   : > { %v1203_v55 = vld [vmem:[#allocation2 + $0x90] sm:$0x7f]  ;;  %7486 = vmatpush3.bf16.msra.mxu1 %v7844_v47 }
 0x15a   : > { %931 = vst.msk [vmem:[#allocation2 + $0xa0] sm:$0xff] %vm910_vm0, %v898_v50  ;;  %v899_v56 = vmax.f32 %v835_v51, 0.0  ;;  %v7455_v57 = vpop.f32.mrb[44].mxu0  ;;  %v1205_v58 = vrot.slane %v1203_v55, 2  ;;  %v1301_v1 = vld [vmem:[#allocation2 + $0x91] sm:$0x7f]  ;;  %7487 = vmatprep.subr.bf16.mxu1 %v7845_v48 }
 0x15b   : > { %1289 = vrot.lane.b32.xlu0 %v1287_v53, %s8608_s13  ;;  %v7456_v59 = vpop.f32.mrb[45].mxu0  ;;  %v1597_v2 = vld [vmem:[#allocation2 + $0x90] sm:$0x7f]  ;;  %v1209_v5 = vld [vmem:[#allocation2 + $0x98] sm:$0x7f]  ;;  %v1303_v13 = vrot.slane %v1301_v1, 2 }
 0x15c   : > { %1466 = vrot.lane.b32.xlu1 %v1465_v52, %s8609_s26  ;;  %932 = vst.msk [vmem:[#allocation2 + $0xa8] sm:$0xff] %vm910_vm0, %v899_v56  ;;  %v7457_v62 = vadd.f32 %v7456_v59, %v7455_v57  ;;  %v7458_v63 = vpop.f32.mrb[46].mxu0  ;;  %v1599_v4 = vrot.slane %v1597_v2, 1  ;;  %v1603_v6 = vld [vmem:[#allocation2 + $0x98] sm:$0x7f]  ;;  %v1211_v9 = vrot.slane %v1209_v5, 3 }
 0x15d   : > { %1207 = vst.msk [vmem:[#allocation3 + $0x28] sm:$0xc0] %vm958_vm4, %v1205_v58  ;;  %v7459_v3 = vpop.f32.mrb[47].mxu0  ;;  %v1605_v10 = vrot.slane %v1603_v6, 2  ;;  %v1309_v15 = vld [vmem:[#allocation2 + $0x99] sm:$0x7f] }
 0x15e   : > { %1208 = vst.msk [vmem:[#allocation3 + $0x48] sm:$0x1f] %vm960_vm5, %v1205_v58  ;;  %v840_v7 = vadd.f32 %v7457_v62, %v8811_v49  ;;  %v7460_v8 = vadd.f32 %v7459_v3, %v7458_v63  ;;  %v1701_v22 = vld [vmem:[#allocation2 + $0x99] sm:$0x7f]  ;;  %v1693_v23 = vld [vmem:[#allocation2 + $0x91] sm:$0x7f] }
 0x15f   : > { %1689 = vrot.lane.b32.xlu0 %v1687_v60, %s8608_s13  ;;  %1601 = vst.msk [vmem:[#allocation3 + $0x18] sm:$0x80] %vm950_vm2, %v1599_v4  ;;  %v1311_v26 = vrot.slane %v1309_v15, 3  ;;  %v1695_v38 = vrot.slane %v1693_v23, 1  ;;  %v1703_v41 = vrot.slane %v1701_v22, 2  ;;  %v7846_v62 = vld [vmem:[%s11052_s3 + $0x8] sm:$0xff]  }
 0x160   : > { %1054 = vrot.lane.b32.xlu1 %v1053_v0, %s8609_s26  ;;  %1602 = vst.msk [vmem:[#allocation3 + $0x38] sm:$0x3f] %vm952_vm3, %v1599_v4  ;;  %v900_v11 = vmax.f32 %v840_v7, 0.0  ;;  %v843_v12 = vadd.f32 %v7460_v8, %v8811_v49  ;;  %v7847_v63 = vld [vmem:[%s11052_s3 + $0x50] sm:$0xff]   ;;  %7488 = vmatpush3.bf16.msra.mxu1 %v7846_v62  ;;  %v7851_v22 = vld [vmem:[%s11052_s3 + $0x60] sm:$0xff]   ;;  %vm1133_vm2 = vcmask 1047296  }
 0x161   : > { %1213 = vst.msk [vmem:[#allocation3 + $0x48] sm:$0xe0] %vm966_vm6, %v1211_v9  ;;  %v1215_v17 = vld [vmem:[#allocation2 + $0xa0] sm:$0x7f]  ;;  %7489 = vmatprep.subr.bf16.mxu1 %v7847_v63  ;;  %vm11064_vm3 = vcmask 785927  }
 0x162   : > { %1214 = vst.msk [vmem:[#allocation3 + $0x68] sm:$0xf] %vm968_vm7, %v1211_v9  ;;  %v901_v18 = vmax.f32 %v843_v12, 0.0  ;;  %v7461_v19 = vpop.f32.mrb[48].mxu0  ;;  %v1217_v20 = vrot.slane %v1215_v17, 4 }
 0x163   : > { %1607 = vst.msk [vmem:[#allocation3 + $0x38] sm:$0xc0] %vm958_vm4, %v1605_v10  ;;  %1304 = vrot.lane.b32.xlu0 %v1303_v13, %s8608_s13  ;;  %v7462_v21 = vpop.f32.mrb[49].mxu0  ;;  %v1615_v29 = vld [vmem:[#allocation2 + $0xa8] sm:$0x7f]  ;;  %vm11063_vm4 = vcmask 783872  }
 0x164   : > { %1608 = vst.msk [vmem:[#allocation3 + $0x58] sm:$0x1f] %vm960_vm5, %v1605_v10  ;;  %1188 = vrot.lane.b32.xlu1 %v1187_v14, %s8610_s24  ;;  %v7463_v24 = vadd.f32 %v7462_v21, %v7461_v19  ;;  %v7464_v25 = vpop.f32.mrb[50].mxu0  ;;  %v1617_v31 = vrot.slane %v1615_v29, 4  ;;  %v1609_v32 = vld [vmem:[#allocation2 + $0xa0] sm:$0x7f] }
 0x165   : > { %933 = vst.msk [vmem:[#allocation2 + $0xb0] sm:$0xff] %vm910_vm0, %v900_v11  ;;  %934 = vst.msk [vmem:[#allocation2 + $0xb8] sm:$0xff] %vm910_vm0, %v901_v18  ;;  %v7465_v30 = vpop.f32.mrb[51].mxu0  ;;  %v1221_v33 = vld [vmem:[#allocation2 + $0xa8] sm:$0x7f]  ;;  %v1611_v36 = vrot.slane %v1609_v32, 3 }
 0x166   : > { %1219 = vst.msk [vmem:[#allocation3 + $0x68] sm:$0xf0] %vm974_vm10, %v1217_v20  ;;  %v848_v34 = vadd.f32 %v7463_v24, %v8811_v49  ;;  %v7466_v35 = vadd.f32 %v7465_v30, %v7464_v25  ;;  %v1223_v37 = vrot.slane %v1221_v33, 5  ;;  %1619 = vst.msk [vmem:[#allocation3 + $0x78] sm:$0xf0] %vm974_vm10, %v1617_v31  ;;  %v7848_v10 = vld [vmem:[%s11052_s3 + $0x10] sm:$0xff]  }
 0x167   : > { %1220 = vst.msk [vmem:[#allocation3 + $0x88] sm:$0x7] %vm976_vm11, %v1217_v20  ;;  %1312 = vrot.lane.b32.xlu0 %v1311_v26, %s8608_s13  ;;  %1620 = vst.msk [vmem:[#allocation3 + $0x98] sm:$0x7] %vm976_vm11, %v1617_v31  ;;  %v1709_v42 = vld [vmem:[#allocation2 + $0xa1] sm:$0x7f]  ;;  %7490 = vmatpush3.bf16.msra.mxu1 %v7848_v10 }
 0x168   : > { %1296 = vrot.lane.b32.xlu1 %v1295_v27, %s8608_s13  ;;  %v902_v39 = vmax.f32 %v848_v34, 0.0  ;;  %v851_v40 = vadd.f32 %v7466_v35, %v8811_v49  ;;  %v1317_v43 = vld [vmem:[#allocation2 + $0xa1] sm:$0x7f]  ;;  %1613 = vst.msk [vmem:[#allocation3 + $0x58] sm:$0xe0] %vm966_vm6, %v1611_v36  ;;  %v1711_v51 = vrot.slane %v1709_v42, 3 }
 0x169   : > { %1614 = vst.msk [vmem:[#allocation3 + $0x78] sm:$0xf] %vm968_vm7, %v1611_v36  ;;  %v1319_v52 = vrot.slane %v1317_v43, 4  ;;  %v1325_v56 = vld [vmem:[#allocation2 + $0xa9] sm:$0x7f]  ;;  %v7849_v11 = vld [vmem:[%s11052_s3 + $0x58] sm:$0xff]  }
 0x16a   : > { %1225 = vst.msk [vmem:[#allocation3 + $0x88] sm:$0xf8] %vm982_vm8, %v1223_v37  ;;  %v903_v45 = vmax.f32 %v851_v40, 0.0  ;;  %v7467_v46 = vpop.f32.mrb[52].mxu0  ;;  %v1717_v60 = vld [vmem:[#allocation2 + $0xa9] sm:$0x7f]  ;;  %7491 = vmatprep.subr.bf16.mxu1 %v7849_v11 }
 0x16b   : > { %1226 = vst.msk [vmem:[#allocation3 + $0xa8] sm:$0x3] %vm984_vm9, %v1223_v37  ;;  %1704 = vrot.lane.b32.xlu0 %v1703_v41, %s8608_s13  ;;  %v7468_v50 = vpop.f32.mrb[53].mxu0  ;;  %v1327_v4 = vrot.slane %v1325_v56, 5  ;;  %v1719_v5 = vrot.slane %v1717_v60, 4  ;;  %v7850_v21 = vld [vmem:[%s11052_s3 + $0x18] sm:$0xff]  }
 0x16c   : > { %v1227_v44 = vld [vmem:[#allocation2 + $0xb0] sm:$0x7f]  ;;  %935 = vst.msk [vmem:[#allocation2 + $0xc0] sm:$0xff] %vm910_vm0, %v902_v39  ;;  %1696 = vrot.lane.b32.xlu1 %v1695_v38, %s8608_s13  ;;  %v1627_v54 = vld [vmem:[#allocation2 + $0xb8] sm:$0x7f]  ;;  %936 = vst.msk [vmem:[#allocation2 + $0xc8] sm:$0xff] %vm910_vm0, %v903_v45  ;;  %v7469_v55 = vadd.f32 %v7468_v50, %v7467_v46  ;;  %7492 = vmatpush3.bf16.msra.mxu1 %v7850_v21 }
 0x16d   : > { %v1229_v53 = vrot.slane %v1227_v44, 6  ;;  %v7470_v57 = vpop.f32.mrb[54].mxu0  ;;  %v1629_v58 = vrot.slane %v1627_v54, 6  ;;  %v1621_v59 = vld [vmem:[#allocation2 + $0xb0] sm:$0x7f]  ;;  %7493 = vmatprep.subr.bf16.mxu1 %v7851_v22  ;;  %v7852_v33 = vld [vmem:[%s11052_s3 + $0x20] sm:$0xff]  }
 0x16e   : > { %v7471_v61 = vpop.f32.mrb[55].mxu0  ;;  %v1623_v0 = vrot.slane %v1621_v59, 5  ;;  %v856_v1 = vadd.f32 %v7469_v55, %v8811_v49  ;;  %v1333_v7 = vld [vmem:[#allocation2 + $0xb1] sm:$0x7f]  ;;  %v7853_v36 = vld [vmem:[%s11052_s3 + $0x68] sm:$0xff]   ;;  %v7857_v55 = vld [vmem:[%s11052_s3 + $0x78] sm:$0xff]  }
 0x16f   : > { %1231 = vst.msk [vmem:[#allocation3 + $0xa8] sm:$0xfc] %vm990_vm12, %v1229_v53  ;;  %1712 = vrot.lane.b32.xlu0 %v1711_v51, %s8608_s13  ;;  %v7472_v2 = vadd.f32 %v7471_v61, %v7470_v57  ;;  %1631 = vst.msk [vmem:[#allocation3 + $0xb8] sm:$0xfc] %vm990_vm12, %v1629_v58  ;;  %v1335_v14 = vrot.slane %v1333_v7, 6  ;;  %v7854_v42 = vld [vmem:[%s11052_s3 + $0x28] sm:$0xff]  }
 0x170   : > { %1232 = vst.msk [vmem:[#allocation3 + $0xc8] sm:$0x1] %vm992_vm13, %v1229_v53  ;;  %1320 = vrot.lane.b32.xlu1 %v1319_v52, %s8608_s13  ;;  %1632 = vst.msk [vmem:[#allocation3 + $0xd8] sm:$0x1] %vm992_vm13, %v1629_v58  ;;  %v904_v3 = vmax.f32 %v856_v1, 0.0  ;;  %7494 = vmatpush3.bf16.msra.mxu1 %v7852_v33  ;;  %v7855_v44 = vld [vmem:[%s11052_s3 + $0x70] sm:$0xff]  }
 0x171   : > { %1625 = vst.msk [vmem:[#allocation3 + $0x98] sm:$0xf8] %vm982_vm8, %v1623_v0  ;;  %v859_v6 = vadd.f32 %v7472_v2, %v8811_v49  ;;  %7495 = vmatprep.subr.bf16.mxu1 %v7853_v36  ;;  %v7858_v60 = vld [vmem:[%s11052_s3 + $0x38] sm:$0xff]   ;;  %vm11062_vm5 = vcmask 1048327   ;;  %vm11061_vm6 = vcmask 1046272   ;;  %vm11090_vm7 = vcmask 523526  }
 0x172   : > { %1626 = vst.msk [vmem:[#allocation3 + $0xb8] sm:$0x3] %vm984_vm9, %v1623_v0  ;;  %v7473_v9 = vpop.f32.mrb[56].mxu0  ;;  %v1479_v36 = vld [vmem:[#allocation2 + $0x78] sm:$0x7f]  ;;  %vm11073_vm8 = vcmask 520448  }
 0x173   : > { %937 = vst.msk [vmem:[#allocation2 + $0xd0] sm:$0xff] %vm910_vm0, %v904_v3  ;;  %1328 = vrot.lane.b32.xlu0 %v1327_v4, %s8608_s13  ;;  %v905_v8 = vmax.f32 %v859_v6, 0.0  ;;  %v1233_v12 = vld [vmem:[#allocation2 + $0xc0] sm:$0x7f]  ;;  %v7474_v13 = vpop.f32.mrb[57].mxu0  ;;  %vm11072_vm9 = vcmask 785926  }
 0x174   : > { %1720 = vrot.lane.b32.xlu1 %v1719_v5, %s8608_s13  ;;  %v7475_v15 = vadd.f32 %v7474_v13, %v7473_v9  ;;  %v7476_v16 = vpop.f32.mrb[58].mxu0  ;;  %v1347_v17 = vld [vmem:[#allocation2 + $0xc9] sm:$0x7f]  ;;  %v1341_v26 = vld [vmem:[#allocation2 + $0xc1] sm:$0x7f]  ;;  %7496 = vmatpush3.bf16.msra.mxu1 %v7854_v42  ;;  %vm11071_vm10 = vcmask 782848  }
 0x175   : > { %938 = vst.msk [vmem:[#allocation2 + $0xd8] sm:$0xff] %vm910_vm0, %v905_v8  ;;  %v7477_v18 = vpop.f32.mrb[59].mxu0  ;;  %v1349_v24 = vrot.slane %v1347_v17, 1  ;;  %v1633_v37 = vld [vmem:[#allocation2 + $0xc8] sm:$0x7f]  ;;  %7497 = vmatprep.subr.bf16.mxu1 %v7855_v44  ;;  %v7859_v9 = vld [vmem:[%s11052_s3 + $0xc0] sm:$0xff]  }
 0x176   : > { %v864_v19 = vadd.f32 %v7475_v15, %v8811_v49  ;;  %v7478_v20 = vadd.f32 %v7477_v18, %v7476_v16  ;;  %v1741_v47 = vld [vmem:[#allocation2 + $0xc9] sm:$0x7f]  ;;  %v1733_v42 = vld [vmem:[#allocation2 + $0xb9] sm:$0x7f]  ;;  %vm11075_vm11 = vcmask 523525   ;;  %vm11074_vm12 = vcmask 519424  }
 0x177   : > { %1235 = vrot.lane.b32.xlu0 %v1233_v12, %s8609_s26  ;;  %v1239_v48 = vld [vmem:[#allocation2 + $0xc8] sm:$0x7f]  ;;  %vm1151_vm13 = vcmask 1048326  }
 0x178   : > { %1336 = vrot.lane.b32.xlu1 %v1335_v14, %s8608_s13  ;;  %v906_v23 = vmax.f32 %v864_v19, 0.0  ;;  %v867_v25 = vadd.f32 %v7478_v20, %v8811_v49  ;;  %v1241_v54 = vrot.slane %v1239_v48, 1  ;;  %v1517_v18 = vld [vmem:[#allocation2 + $0x29] sm:$0x7f]  ;;  %v1533_v48 = vld [vmem:[#allocation2 + $0x39] sm:$0x7f] }
 0x179   : > { %v1519_v22 = vrot.slane %v1517_v18, 4 }
 0x17a   : > { %v1247_v27 = vld [vmem:[#allocation2 + $0xd0] sm:$0x7f]  ;;  %939 = vst.msk [vmem:[#allocation2 + $0xe0] sm:$0xff] %vm910_vm0, %v906_v23  ;;  %v907_v29 = vmax.f32 %v867_v25, 0.0  ;;  %v7479_v30 = vpop.f32.mrb[60].mxu0 }
 0x17b   : > { %1343 = vrot.lane.b32.xlu0 %v1341_v26, %s8610_s24  ;;  %v1249_v28 = vrot.slane %v1247_v27, 2  ;;  %v1639_v31 = vld [vmem:[#allocation2 + $0xd0] sm:$0x7f]  ;;  %v7480_v32 = vpop.f32.mrb[61].mxu0 }
 0x17c   : > { %1350 = vrot.lane.b32.xlu1 %v1349_v24, %s8610_s24  ;;  %940 = vst.msk [vmem:[#allocation2 + $0xe8] sm:$0xff] %vm910_vm0, %v907_v29  ;;  %v7481_v34 = vadd.f32 %v7480_v32, %v7479_v30  ;;  %v7482_v35 = vpop.f32.mrb[62].mxu0  ;;  %v1641_v39 = vrot.slane %v1639_v31, 1  ;;  %v1747_v43 = vld [vmem:[#allocation2 + $0xd1] sm:$0x7f] }
 0x17d   : > { %v7483_v38 = vpop.f32.mrb[63].mxu0  ;;  %v1749_v50 = vrot.slane %v1747_v43, 1  ;;  %v1355_v52 = vld [vmem:[#allocation2 + $0xd1] sm:$0x7f]  ;;  %v1255_v61 = vld [vmem:[#allocation2 + $0xd8] sm:$0x7f] }
 0x17e   : > { %v872_v40 = vadd.f32 %v7481_v34, %v8811_v49  ;;  %v7484_v41 = vadd.f32 %v7483_v38, %v7482_v35  ;;  %v1357_v57 = vrot.slane %v1355_v52, 2  ;;  %v1257_v1 = vrot.slane %v1255_v61, 3  ;;  %v1363_v2 = vld [vmem:[#allocation2 + $0xd9] sm:$0x7f]  ;;  %v1571_v30 = vld [vmem:[#allocation2 + $0x69] sm:$0x7f] }
 0x17f   : > { %1635 = vrot.lane.b32.xlu0 %v1633_v37, %s8609_s26  ;;  %v1365_v6 = vrot.slane %v1363_v2, 3  ;;  %v1647_v7 = vld [vmem:[#allocation2 + $0xd8] sm:$0x7f]  ;;  %v1573_v34 = vrot.slane %v1571_v30, 4  ;;  %v1509_v35 = vld [vmem:[#allocation2 + $0x21] sm:$0x7f] }
 0x180   : > { %1250 = vrot.lane.b32.xlu1 %v1249_v28, %s8609_s26  ;;  %v908_v45 = vmax.f32 %v872_v40, 0.0  ;;  %v875_v46 = vadd.f32 %v7484_v41, %v8811_v49  ;;  %v7856_v49 = vld [vmem:[%s11052_s3 + $0x30] sm:$0xff]   ;;  %v1649_v11 = vrot.slane %v1647_v7, 2  ;;  %v1755_v12 = vld [vmem:[#allocation2 + $0xd9] sm:$0x7f]  ;;  %v1481_v40 = vrot.slane %v1479_v36, 6 }
 0x181   : > { %v1263_v53 = vld [vmem:[#allocation2 + $0xe0] sm:$0x7f]  ;;  %7498 = vmatpush3.bf16.msra.mxu1 %v7856_v49  ;;  %v1757_v16 = vrot.slane %v1755_v12, 2  ;;  %v1587_v2 = vld [vmem:[#allocation2 + $0x79] sm:$0x7f] }
 0x182   : > { %941 = vst.msk [vmem:[#allocation2 + $0xf0] sm:$0xff] %vm910_vm0, %v908_v45  ;;  %v909_v51 = vmax.f32 %v875_v46, 0.0  ;;  %v1265_v58 = vrot.slane %v1263_v53, 4  ;;  %v1371_v59 = vld [vmem:[#allocation2 + $0xe1] sm:$0x7f]  ;;  %7499 = vmatprep.subr.bf16.mxu1 %v7857_v55  ;;  %v1735_v46 = vrot.slane %v1733_v42, 6 }
 0x183   : > { %1743 = vrot.lane.b32.xlu0 %v1741_v47, %s8610_s24  ;;  %v1373_v62 = vrot.slane %v1371_v59, 4  ;;  %v1663_v63 = vld [vmem:[#allocation2 + $0xe8] sm:$0x7f]  ;;  %v1655_v17 = vld [vmem:[#allocation2 + $0xe0] sm:$0x7f]  ;;  %v1535_v53 = vrot.slane %v1533_v48, 6 }
 0x184   : > { %1642 = vrot.lane.b32.xlu1 %v1641_v39, %s8609_s26  ;;  %942 = vst.msk [vmem:[#allocation2 + $0xf8] sm:$0xff] %vm910_vm0, %v909_v51  ;;  %v9025_v56 = vpop.permute.xlu1 %1063  ;;  %v1665_v3 = vrot.slane %v1663_v63, 4  ;;  %v1657_v21 = vrot.slane %v1655_v17, 3  ;;  %v1271_v23 = vld [vmem:[#allocation2 + $0xe8] sm:$0x7f]  ;;  %vm11070_vm0 = vcmask 523527  }
 0x185   : > { %7500 = vmatpush3.bf16.msra.mxu1 %v7858_v60  ;;  %v1771_v24 = vld [vmem:[#allocation2 + $0xe9] sm:$0x7f]  ;;  %v1273_v27 = vrot.slane %v1271_v23, 5  ;;  %v1511_v39 = vrot.slane %v1509_v35, 3  ;;  %v1763_v41 = vld [vmem:[#allocation2 + $0xe1] sm:$0x7f] }
 0x186   : > { %7525 = vmatprep.subr.bf16.mxu1 %v7859_v9  ;;  %v1773_v28 = vrot.slane %v1771_v24, 4  ;;  %v1379_v29 = vld [vmem:[#allocation2 + $0xe9] sm:$0x7f]  ;;  %v1765_v45 = vrot.slane %v1763_v41, 3  ;;  %v1563_v47 = vld [vmem:[#allocation2 + $0x61] sm:$0x7f] }
 0x187   : > { %1242 = vrot.lane.b32.xlu0 %v1241_v54, %s8609_s26  ;;  %v1381_v33 = vrot.slane %v1379_v29, 5  ;;  %v1565_v52 = vrot.slane %v1563_v47, 3  ;;  %v1471_v54 = vld [vmem:[#allocation2 + $0x70] sm:$0x7f] }
 0x188   : > { %1750 = vrot.lane.b32.xlu1 %v1749_v50, %s8610_s24  ;;  %v1072_v13 = vpop.permute.xlu0 %1071  ;;  %v1725_v59 = vld [vmem:[#allocation2 + $0xb1] sm:$0x7f] }
 0x189   : > { %v9034_v0 = vpop.permute.xlu1 %1489  ;;  %v1279_v4 = vld [vmem:[#allocation2 + $0xf0] sm:$0x7f]  ;;  %v1727_v63 = vrot.slane %v1725_v59, 5  ;;  %v7862_v59 = vld [vmem:[%s11052_s3 + $0x88] sm:$0xff]  }
 0x18a   : > { %v1281_v8 = vrot.slane %v1279_v4, 6  ;;  %v1387_v10 = vld [vmem:[#allocation2 + $0xf1] sm:$0x7f] }
 0x18b   : > { %1358 = vrot.lane.b32.xlu0 %v1357_v57, %s8610_s24  ;;  %v1389_v15 = vrot.slane %v1387_v10, 6  ;;  %v1679_v49 = vld [vmem:[#allocation2 + $0xf8] sm:$0x7f]  ;;  %v1473_v57 = vrot.slane %v1471_v54, 5  ;;  %v1671_v7 = vld [vmem:[#allocation2 + $0xf0] sm:$0x7f] }
 0x18c   : > { %1266 = vrot.lane.b32.xlu1 %v1265_v58, %s8609_s26  ;;  %v1681_v58 = vrot.slane %v1679_v49, 6  ;;  %v1787_v60 = vld [vmem:[#allocation2 + $0xf9] sm:$0x7f]  ;;  %v1673_v10 = vrot.slane %v1671_v7, 5  ;;  %v7860_v49 = vld [vmem:[%s11052_s3 + $0x80] sm:$0xff]  }
 0x18e   : > { %v9049_v19 = vpop.permute.xlu0 %1496 }
 0x18f   : > { %1258 = vrot.lane.b32.xlu0 %v1257_v1, %s8609_s26  ;;  %v9038_v5 = vpop.permute.xlu1 %1081  ;;  %v1525_v1 = vld [vmem:[#allocation2 + $0x31] sm:$0x7f] }
 0x190   : > { %1374 = vrot.lane.b32.xlu1 %v1373_v62, %s8610_s24 }
 0x192   : > { %v9057_v25 = vpop.permute.xlu0 %1091 }
 0x193   : > { %1366 = vrot.lane.b32.xlu0 %v1365_v6, %s8610_s24  ;;  %v9045_v14 = vpop.permute.xlu1 %1504  ;;  %v1589_v6 = vrot.slane %v1587_v2, 6 }
 0x194   : > { %1666 = vrot.lane.b32.xlu1 %v1665_v3, %s8609_s26 }
 0x197   : > { %1650 = vrot.lane.b32.xlu0 %v1649_v11, %s8609_s26  ;;  %v9053_v20 = vpop.permute.xlu1 %1101  ;;  %v1779_v11 = vld [vmem:[#allocation2 + $0xf1] sm:$0x7f] }
 0x198   : > { %1282 = vrot.lane.b32.xlu1 %v1281_v8, %s8609_s26  ;;  %v9063_v31 = vpop.permute.xlu0 %1111 }
 0x19b   : > { %1758 = vrot.lane.b32.xlu0 %v1757_v16, %s8610_s24 }
 0x19c   : > { %1390 = vrot.lane.b32.xlu1 %v1389_v15, %s8610_s24  ;;  %v1579_v15 = vld [vmem:[#allocation2 + $0x71] sm:$0x7f] }
 0x19d   : > { %v1581_v18 = vrot.slane %v1579_v15, 5 }
 0x19f   : > { %1658 = vrot.lane.b32.xlu0 %v1657_v21, %s8609_s26 }
 0x1a0   : > { %1520 = vrot.lane.b32.xlu1 %v1519_v22, %s8608_s13 }
 0x1a1   : > { %v9059_v26 = vpop.permute.xlu1 %1121 }
 0x1a3   : > { %1274 = vrot.lane.b32.xlu0 %v1273_v27, %s8609_s26 }
 0x1a4   : > { %1774 = vrot.lane.b32.xlu1 %v1773_v28, %s8610_s24 }
 0x1a6   : > { %v997_v32 = vpop.permute.xlu1 %996 }
 0x1a7   : > { %1000 = vst.msk [vmem:[#allocation3] sm:$0x7f] %vm999_vm14, %v997_v32  ;;  %1382 = vrot.lane.b32.xlu0 %v1381_v33, %s8610_s24 }
 0x1a8   : > { %1574 = vrot.lane.b32.xlu1 %v1573_v34, %s8610_s24  ;;  %1067 = vst.msk [vmem:[#allocation3] sm:$0x7f] %vm1066_vm15, %v9025_v56 }
 0x1a9   : > { %v1005_v37 = vpop.permute.xlu0 %1004 }
 0x1aa   : > { %v1131_v38 = vpop.permute.xlu1 %1130  ;;  %1008 = vst.msk [vmem:[#allocation3] sm:$0x80] %vm11070_vm0, %v1005_v37 }
 0x1ab   : > { %1010 = vst.msk [vmem:[#allocation3 + $0x20] sm:$0x3f] %vm11065_vm1, %v1005_v37  ;;  %1512 = vrot.lane.b32.xlu0 %v1511_v39, %s8608_s13 }
 0x1ac   : > { %1134 = vst.msk [vmem:[#allocation3] sm:$0x7f] %vm1133_vm2, %v1131_v38  ;;  %1482 = vrot.lane.b32.xlu1 %v1481_v40, %s8609_s26 }
 0x1ad   : > { %1075 = vst.msk [vmem:[#allocation3] sm:$0x80] %vm11064_vm3, %v1072_v13  ;;  %v1139_v43 = vpop.permute.xlu0 %1138 }
 0x1ae   : > { %1077 = vst.msk [vmem:[#allocation3 + $0x20] sm:$0x3f] %vm11063_vm4, %v1072_v13  ;;  %v1436_v44 = vpop.permute.xlu1 %1435 }
 0x1af   : > { %1142 = vst.msk [vmem:[#allocation3] sm:$0x80] %vm11062_vm5, %v1139_v43  ;;  %1766 = vrot.lane.b32.xlu0 %v1765_v45, %s8610_s24 }
 0x1b0   : > { %1144 = vst.msk [vmem:[#allocation3 + $0x20] sm:$0x3f] %vm11061_vm6, %v1139_v43  ;;  %1736 = vrot.lane.b32.xlu1 %v1735_v46, %s8608_s13 }
 0x1b1   : > { %1438 = vst.msk [vmem:[#allocation3 + $0x10] sm:$0x7f] %vm999_vm14, %v1436_v44  ;;  %v1443_v50 = vpop.permute.xlu0 %1442 }
 0x1b2   : > { %1492 = vst.msk [vmem:[#allocation3 + $0x10] sm:$0x7f] %vm1066_vm15, %v9034_v0  ;;  %v1544_v51 = vpop.permute.xlu1 %1543  ;;  %v1789_v0 = vrot.slane %v1787_v60, 6  ;;  %v7863_v60 = vld [vmem:[%s11052_s3 + $0xd0] sm:$0xff]  }
 0x1b3   : > { %1445 = vst.msk [vmem:[#allocation3 + $0x10] sm:$0x80] %vm11070_vm0, %v1443_v50  ;;  %1566 = vrot.lane.b32.xlu0 %v1565_v52, %s8610_s24  ;;  %vm11079_vm0 = vcmask 785923  }
 0x1b4   : > { %1446 = vst.msk [vmem:[#allocation3 + $0x30] sm:$0x3f] %vm11065_vm1, %v1443_v50  ;;  %1536 = vrot.lane.b32.xlu1 %v1535_v53, %s8608_s13  ;;  %vm11066_vm1 = vcmask 1044224  }
 0x1b5   : > { %1546 = vst.msk [vmem:[#allocation3 + $0x10] sm:$0x7f] %vm1133_vm2, %v1544_v51  ;;  %v1551_v55 = vpop.permute.xlu0 %1550 }
 0x1b6   : > { %1499 = vst.msk [vmem:[#allocation3 + $0x10] sm:$0x80] %vm11064_vm3, %v9049_v19  ;;  %v1015_v56 = vpop.permute.xlu1 %1014  ;;  %vm11067_vm3 = vcmask 1048325   ;;  %v1795_v54 = vld [vmem:[#allocation3] sm:$0xff] }
 0x1b7   : > { %1500 = vst.msk [vmem:[#allocation3 + $0x30] sm:$0x3f] %vm11063_vm4, %v9049_v19  ;;  %1474 = vrot.lane.b32.xlu0 %v1473_v57, %s8609_s26  ;;  %vm11068_vm4 = vcmask 781824  }
 0x1b8   : > { %1553 = vst.msk [vmem:[#allocation3 + $0x10] sm:$0x80] %vm11062_vm5, %v1551_v55  ;;  %1682 = vrot.lane.b32.xlu1 %v1681_v58, %s8609_s26  ;;  %vm11069_vm5 = vcmask 785925  }
 0x1b9   : > { %1554 = vst.msk [vmem:[#allocation3 + $0x30] sm:$0x3f] %vm11061_vm6, %v1551_v55  ;;  %vm1153_vm6 = vcmask 1045248   ;;  %v1025_v61 = vpop.permute.xlu0 %1024 }
 0x1ba   : > { %1018 = vst.msk [vmem:[#allocation3 + $0x20] sm:$0xc0] %vm11090_vm7, %v1015_v56  ;;  %v1149_v62 = vpop.permute.xlu1 %1148 }
 0x1bb   : > { %1020 = vst.msk [vmem:[#allocation3 + $0x40] sm:$0x1f] %vm11073_vm8, %v1015_v56  ;;  %1728 = vrot.lane.b32.xlu0 %v1727_v63, %s8608_s13  ;;  %v7861_v56 = vld [vmem:[%s11052_s3 + $0xc8] sm:$0xff]  }
 0x1bc   : > { %1085 = vst.msk [vmem:[#allocation3 + $0x20] sm:$0xc0] %vm11072_vm9, %v9038_v5  ;;  %1790 = vrot.lane.b32.xlu1 %v1789_v0, %s8610_s24 }
 0x1bd   : > { %1087 = vst.msk [vmem:[#allocation3 + $0x40] sm:$0x1f] %vm11071_vm10, %v9038_v5  ;;  %v1159_v3 = vpop.permute.xlu0 %1158  ;;  %v1527_v5 = vrot.slane %v1525_v1, 5 }
 0x1be   : > { %1028 = vst.msk [vmem:[#allocation3 + $0x40] sm:$0xe0] %vm11075_vm11, %v1025_v61  ;;  %v1451_v4 = vpop.permute.xlu1 %1450 }
 0x1bf   : > { %1030 = vst.msk [vmem:[#allocation3 + $0x60] sm:$0xf] %vm11074_vm12, %v1025_v61  ;;  %1528 = vrot.lane.b32.xlu0 %v1527_v5, %s8608_s13 }
 0x1c0   : > { %1152 = vst.msk [vmem:[#allocation3 + $0x20] sm:$0xc0] %vm1151_vm13, %v1149_v62  ;;  %1590 = vrot.lane.b32.xlu1 %v1589_v6, %s8610_s24  ;;  %v7865_v6 = vld [vmem:[%s11052_s3 + $0xd8] sm:$0xff]  }
 0x1c1   : > { %1154 = vst.msk [vmem:[#allocation3 + $0x40] sm:$0x1f] %vm1153_vm6, %v1149_v62  ;;  %v1459_v8 = vpop.permute.xlu0 %1458 }
 0x1c2   : > { %1095 = vst.msk [vmem:[#allocation3 + $0x40] sm:$0xe0] %vm11069_vm5, %v9057_v25  ;;  %v1559_v9 = vpop.permute.xlu1 %1558  ;;  %vm1039_vm5 = vcmask 518400  }
 0x1c3   : > { %1097 = vst.msk [vmem:[#allocation3 + $0x60] sm:$0xf] %vm11068_vm4, %v9057_v25  ;;  %1674 = vrot.lane.b32.xlu0 %v1673_v10, %s8609_s26  ;;  %vm1037_vm4 = vcmask 523524   ;;  %v7867_v10 = vld [vmem:[%s11052_s3 + $0xe0] sm:$0xff]  }
 0x1c4   : > { %1162 = vst.msk [vmem:[#allocation3 + $0x40] sm:$0xe0] %vm11067_vm3, %v1159_v3  ;;  %vm11076_vm3 = vcmask 517376  }
 0x1c5   : > { %1164 = vst.msk [vmem:[#allocation3 + $0x60] sm:$0xf] %vm11066_vm1, %v1159_v3  ;;  %vm11077_vm1 = vcmask 523523   ;;  %v1045_v12 = vpop.permute.xlu0 %1044 }
 0x1c6   : > { %1453 = vst.msk [vmem:[#allocation3 + $0x30] sm:$0xc0] %vm11090_vm7, %v1451_v4  ;;  %v1035_v13 = vpop.permute.xlu1 %1034 }
 0x1c7   : > { %1454 = vst.msk [vmem:[#allocation3 + $0x50] sm:$0x1f] %vm11073_vm8, %v1451_v4  ;;  %vm11080_vm8 = vcmask 780800   ;;  %v1799_v47 = vld [vmem:[#allocation3 + $0x20] sm:$0xff]  ;;  %v7864_v4 = vld [vmem:[%s11052_s3 + $0x90] sm:$0xff]  }
 0x1c8   : > { %1507 = vst.msk [vmem:[#allocation3 + $0x30] sm:$0xc0] %vm11072_vm9, %v9045_v14  ;;  %vm11081_vm9 = vcmask 785924   ;;  %v1823_v55 = vpack.c.bf16 %v1799_v47, %v1795_v54 }
 0x1c9   : > { %1508 = vst.msk [vmem:[#allocation3 + $0x50] sm:$0x1f] %vm11071_vm10, %v9045_v14  ;;  %vm11078_vm10 = vcmask 779776   ;;  %v1781_v14 = vrot.slane %v1779_v11, 5  ;;  %v1179_v16 = vpop.permute.xlu0 %1178 }
 0x1ca   : > { %1461 = vst.msk [vmem:[#allocation3 + $0x50] sm:$0xe0] %vm11075_vm11, %v1459_v8  ;;  %vm11082_vm11 = vcmask 1042176   ;;  %v1169_v17 = vpop.permute.xlu1 %1168 }
 0x1cb   : > { %1462 = vst.msk [vmem:[#allocation3 + $0x70] sm:$0xf] %vm11074_vm12, %v1459_v8  ;;  %1782 = vrot.lane.b32.xlu0 %v1781_v14, %s8610_s24  ;;  %vm11083_vm12 = vcmask 1048323   ;;  %v1803_v3 = vld [vmem:[#allocation3 + $0x40] sm:$0xff]  ;;  %v7869_v14 = vld [vmem:[%s11052_s3 + $0xe8] sm:$0xff]  }
 0x1cc   : > { %1561 = vst.msk [vmem:[#allocation3 + $0x30] sm:$0xc0] %vm1151_vm13, %v1559_v9 }
 0x1cd   : > { %1562 = vst.msk [vmem:[#allocation3 + $0x50] sm:$0x1f] %vm1153_vm6, %v1559_v9  ;;  %v1290_v19 = vpop.permute.xlu0 %1289  ;;  %v7866_v9 = vld [vmem:[%s11052_s3 + $0x98] sm:$0xff]  }
 0x1ce   : > { %1048 = vst.msk [vmem:[#allocation3 + $0x80] sm:$0xf8] %vm11077_vm1, %v1045_v12  ;;  %vm1173_vm1 = vcmask 1043200   ;;  %v1467_v21 = vpop.permute.xlu1 %1466 }
 0x1cf   : > { %1050 = vst.msk [vmem:[#allocation3 + $0xa0] sm:$0x3] %vm11076_vm3, %v1045_v12  ;;  %vm1171_vm3 = vcmask 1048324   ;;  %1582 = vrot.lane.b32.xlu0 %v1581_v18, %s8610_s24  ;;  %v7871_v18 = vld [vmem:[%s11052_s3 + $0xf0] sm:$0xff]  }
 0x1d0   : > { %1038 = vst.msk [vmem:[#allocation3 + $0x60] sm:$0xf0] %vm1037_vm4, %v1035_v13  ;;  %1469 = vst.msk [vmem:[#allocation3 + $0x70] sm:$0xf0] %vm1037_vm4, %v1467_v21 }
 0x1d1   : > { %1040 = vst.msk [vmem:[#allocation3 + $0x80] sm:$0x7] %vm1039_vm5, %v1035_v13  ;;  %1470 = vst.msk [vmem:[#allocation3 + $0x90] sm:$0x7] %vm1039_vm5, %v1467_v21  ;;  %v7868_v13 = vld [vmem:[%s11052_s3 + $0xa0] sm:$0xff]  }
 0x1d2   : > { %1115 = vst.msk [vmem:[#allocation3 + $0x80] sm:$0xf8] %vm11079_vm0, %v9063_v31  ;;  %vm11088_vm0 = vcmask 516352   ;;  %v1055_v22 = vpop.permute.xlu1 %1054 }
 0x1d3   : > { %1117 = vst.msk [vmem:[#allocation3 + $0xa0] sm:$0x3] %vm11078_vm10, %v9063_v31  ;;  %vm11089_vm10 = vcmask 523522  }
 0x1d4   : > { %1105 = vst.msk [vmem:[#allocation3 + $0x60] sm:$0xf0] %vm11081_vm9, %v9053_v20  ;;  %vm11086_vm9 = vcmask 778752  }
 0x1d5   : > { %1107 = vst.msk [vmem:[#allocation3 + $0x80] sm:$0x7] %vm11080_vm8, %v9053_v20  ;;  %vm11087_vm8 = vcmask 785922   ;;  %v1690_v20 = vpop.permute.xlu0 %1689 }
 0x1d6   : > { %1182 = vst.msk [vmem:[#allocation3 + $0x80] sm:$0xf8] %vm11083_vm12, %v1179_v16  ;;  %vm11084_vm12 = vcmask 1041152   ;;  %v1189_v24 = vpop.permute.xlu1 %1188 }
 0x1d7   : > { %1184 = vst.msk [vmem:[#allocation3 + $0xa0] sm:$0x3] %vm11082_vm11, %v1179_v16  ;;  %vm11085_vm11 = vcmask 1048322  }
 0x1d8   : > { %1172 = vst.msk [vmem:[#allocation3 + $0x60] sm:$0xf0] %vm1171_vm3, %v1169_v17 }
 0x1d9   : > { %1174 = vst.msk [vmem:[#allocation3 + $0x80] sm:$0x7] %vm1173_vm1, %v1169_v17  ;;  %v1305_v23 = vpop.permute.xlu0 %1304  ;;  %v7870_v17 = vld [vmem:[%s11052_s3 + $0xa8] sm:$0xff]  }
 0x1da   : > { %1058 = vst.msk [vmem:[#allocation3 + $0xa0] sm:$0xfc] %vm11089_vm10, %v1055_v22  ;;  %v1297_v27 = vpop.permute.xlu1 %1296  ;;  %vm11099_vm10 = vcmask 785927  }
 0x1db   : > { %1060 = vst.msk [vmem:[#allocation3 + $0xc0] sm:$0x1] %vm11088_vm0, %v1055_v22  ;;  %vm11098_vm0 = vcmask 521472   ;;  %v7873_v22 = vld [vmem:[%s11052_s3 + $0xf8] sm:$0xff]  }
 0x1dc   : > { %1125 = vst.msk [vmem:[#allocation3 + $0xa0] sm:$0xfc] %vm11087_vm8, %v9059_v26  ;;  %vm11097_vm8 = vcmask 523527  }
 0x1dd   : > { %1127 = vst.msk [vmem:[#allocation3 + $0xc0] sm:$0x1] %vm11086_vm9, %v9059_v26  ;;  %v1313_v25 = vpop.permute.xlu0 %1312  ;;  %vm11096_vm9 = vcmask 782848  }
 0x1de   : > { %1192 = vst.msk [vmem:[#allocation3 + $0xa0] sm:$0xfc] %vm11085_vm11, %v1189_v24  ;;  %v1697_v29 = vpop.permute.xlu1 %1696  ;;  %vm11095_vm11 = vcmask 785926  }
 0x1df   : > { %1194 = vst.msk [vmem:[#allocation3 + $0xc0] sm:$0x1] %vm11084_vm12, %v1189_v24  ;;  %vm11094_vm12 = vcmask 520448   ;;  %v1807_v61 = vld [vmem:[#allocation3 + $0x60] sm:$0xff] }
 0x1e0   : > { %v1827_v5 = vpack.c.bf16 %v1807_v61, %v1803_v3 }
 0x1e1   : > { %v9156_v28 = vpop.permute.xlu0 %1704 }
 0x1e2   : > { %v1321_v31 = vpop.permute.xlu1 %1320 }
 0x1e5   : > { %v9158_v30 = vpop.permute.xlu0 %1712 }
 0x1e6   : > { %v1721_v33 = vpop.permute.xlu1 %1720 }
 0x1e9   : > { %v9160_v32 = vpop.permute.xlu0 %1328 }
 0x1ea   : > { %v9162_v34 = vpop.permute.xlu1 %1336 }
 0x1ed   : > { %v1236_v26 = vpop.permute.xlu0 %1235 }
 0x1ee   : > { %1238 = vst.msk [vmem:[#allocation3 + $0x8] sm:$0x7f] %vm999_vm14, %v1236_v26  ;;  %v1351_v36 = vpop.permute.xlu1 %1350 }
 0x1ef   : > { %1292 = vst.msk [vmem:[#allocation3 + $0x8] sm:$0x7f] %vm1066_vm15, %v1290_v19 }
 0x1f1   : > { %v1344_v35 = vpop.permute.xlu0 %1343 }
 0x1f2   : > { %1346 = vst.msk [vmem:[#allocation3 + $0x8] sm:$0x7f] %vm1133_vm2, %v1344_v35  ;;  %v1251_v38 = vpop.permute.xlu1 %1250 }
 0x1f3   : > { %1253 = vst.msk [vmem:[#allocation3 + $0x28] sm:$0xc0] %vm11090_vm7, %v1251_v38  ;;  %vm11105_vm7 = vmmov %vm11099_vm10 }
 0x1f4   : > { %1254 = vst.msk [vmem:[#allocation3 + $0x48] sm:$0x1f] %vm11094_vm12, %v1251_v38  ;;  %vm11101_vm12 = vmmov %vm11097_vm8 }
 0x1f5   : > { %v1636_v37 = vpop.permute.xlu0 %1635  ;;  %1307 = vst.msk [vmem:[#allocation3 + $0x28] sm:$0xc0] %vm11095_vm11, %v1305_v23  ;;  %vm11103_vm11 = vcmask 1048327  }
 0x1f6   : > { %1638 = vst.msk [vmem:[#allocation3 + $0x18] sm:$0x7f] %vm999_vm14, %v1636_v37  ;;  %v1643_v40 = vpop.permute.xlu1 %1642  ;;  %vm11100_vm14 = vcmask 783872  }
 0x1f7   : > { %1692 = vst.msk [vmem:[#allocation3 + $0x18] sm:$0x7f] %vm1066_vm15, %v1690_v20  ;;  %vm11102_vm15 = vmmov %vm11098_vm0  ;;  %v7872_v20 = vld [vmem:[%s11052_s3 + $0xb0] sm:$0xff]  }
 0x1f8   : > { %1308 = vst.msk [vmem:[#allocation3 + $0x48] sm:$0x1f] %vm11096_vm9, %v1305_v23  ;;  %vm11104_vm9 = vcmask 1046272   ;;  %v1815_v23 = vld [vmem:[#allocation3 + $0xa0] sm:$0xff] }
 0x1f9   : > { %v1744_v39 = vpop.permute.xlu0 %1743  ;;  %1645 = vst.msk [vmem:[#allocation3 + $0x18] sm:$0x80] %vm11097_vm8, %v1643_v40  ;;  %vm11107_vm8 = vmmov %vm11103_vm11 }
 0x1fa   : > { %1746 = vst.msk [vmem:[#allocation3 + $0x18] sm:$0x7f] %vm1133_vm2, %v1744_v39  ;;  %v1751_v42 = vpop.permute.xlu1 %1750  ;;  %vm11106_vm2 = vmmov %vm11100_vm14 }
 0x1fb   : > { %1646 = vst.msk [vmem:[#allocation3 + $0x38] sm:$0x3f] %vm11098_vm0, %v1643_v40  ;;  %vm11108_vm0 = vmmov %vm11104_vm9 }
 0x1fc   : > { %1699 = vst.msk [vmem:[#allocation3 + $0x18] sm:$0x80] %vm11099_vm10, %v1697_v29  ;;  %vm11109_vm10 = vcmask 785924  }
 0x1fd   : > { %1700 = vst.msk [vmem:[#allocation3 + $0x38] sm:$0x3f] %vm11100_vm14, %v1697_v29  ;;  %v1243_v41 = vpop.permute.xlu0 %1242  ;;  %vm11110_vm14 = vcmask 780800  }
 0x1fe   : > { %1245 = vst.msk [vmem:[#allocation3 + $0x8] sm:$0x80] %vm11101_vm12, %v1243_v41  ;;  %v1267_v44 = vpop.permute.xlu1 %1266  ;;  %vm11112_vm12 = vcmask 519424  }
 0x1ff   : > { %1246 = vst.msk [vmem:[#allocation3 + $0x28] sm:$0x3f] %vm11102_vm15, %v1243_v41  ;;  %vm11113_vm15 = vcmask 785925  }
 0x200   : > { %1753 = vst.msk [vmem:[#allocation3 + $0x18] sm:$0x80] %vm11103_vm11, %v1751_v42  ;;  %vm11114_vm11 = vcmask 781824  }
 0x201   : > { %1754 = vst.msk [vmem:[#allocation3 + $0x38] sm:$0x3f] %vm11104_vm9, %v1751_v42  ;;  %v1359_v43 = vpop.permute.xlu0 %1358  ;;  %vm11115_vm9 = vcmask 1048325  }
 0x202   : > { %1299 = vst.msk [vmem:[#allocation3 + $0x8] sm:$0x80] %vm11105_vm7, %v1297_v27  ;;  %v1375_v46 = vpop.permute.xlu1 %1374  ;;  %vm11111_vm7 = vcmask 523525  }
 0x203   : > { %1300 = vst.msk [vmem:[#allocation3 + $0x28] sm:$0x3f] %vm11106_vm2, %v1297_v27  ;;  %vm11116_vm2 = vcmask 1044224  }
 0x204   : > { %1353 = vst.msk [vmem:[#allocation3 + $0x8] sm:$0x80] %vm11107_vm8, %v1351_v36  ;;  %vm11117_vm8 = vmmov %vm11109_vm10 }
 0x205   : > { %1354 = vst.msk [vmem:[#allocation3 + $0x28] sm:$0x3f] %vm11108_vm0, %v1351_v36  ;;  %v1259_v45 = vpop.permute.xlu0 %1258  ;;  %vm11118_vm0 = vmmov %vm11110_vm14  ;;  %v1819_v36 = vld [vmem:[#allocation3 + $0xc0] sm:$0x1] }
 0x206   : > { %1361 = vst.msk [vmem:[#allocation3 + $0x28] sm:$0xc0] %vm1151_vm13, %v1359_v43  ;;  %v1667_v50 = vpop.permute.xlu1 %1666  ;;  %v1835_v40 = vpack.c.bf16 %v1819_v36, %v1819_v36  ;;  %v7876_v36 = vld [vmem:[%s11054_s5] sm:$0xff]  }
 0x207   : > { %1362 = vst.msk [vmem:[#allocation3 + $0x48] sm:$0x1f] %vm1153_vm6, %v1359_v43  ;;  %v1798_v41 = vld [vmem:[#allocation3 + $0x18] sm:$0xff] }
 0x208   : > { %1269 = vst.msk [vmem:[#allocation3 + $0x68] sm:$0xf0] %vm1037_vm4, %v1267_v44  ;;  %1669 = vst.msk [vmem:[#allocation3 + $0x78] sm:$0xf0] %vm1037_vm4, %v1667_v50  ;;  %vm11119_vm4 = vcmask 523526  }
 0x209   : > { %1270 = vst.msk [vmem:[#allocation3 + $0x88] sm:$0x7] %vm1039_vm5, %v1267_v44  ;;  %v1367_v48 = vpop.permute.xlu0 %1366  ;;  %1670 = vst.msk [vmem:[#allocation3 + $0x98] sm:$0x7] %vm1039_vm5, %v1667_v50  ;;  %vm11120_vm5 = vcmask 520448  }
 0x20a   : > { %1323 = vst.msk [vmem:[#allocation3 + $0x68] sm:$0xf0] %vm11109_vm10, %v1321_v31  ;;  %v1283_v58 = vpop.permute.xlu1 %1282  ;;  %vm11121_vm10 = vcmask 523522  }
 0x20b   : > { %1324 = vst.msk [vmem:[#allocation3 + $0x88] sm:$0x7] %vm11110_vm14, %v1321_v31  ;;  %v1796_v51 = vld [vmem:[#allocation3 + $0x8] sm:$0xff]  ;;  %vm11122_vm14 = vcmask 516352   ;;  %v1811_v31 = vld [vmem:[#allocation3 + $0x80] sm:$0xff] }
 0x20c   : > { %1261 = vst.msk [vmem:[#allocation3 + $0x48] sm:$0xe0] %vm11111_vm7, %v1259_v45  ;;  %vm11123_vm7 = vcmask 785926  }
 0x20d   : > { %1262 = vst.msk [vmem:[#allocation3 + $0x68] sm:$0xf] %vm11112_vm12, %v1259_v45  ;;  %v1800_v52 = vld [vmem:[#allocation3 + $0x28] sm:$0xff]  ;;  %v1651_v57 = vpop.permute.xlu0 %1650  ;;  %vm11124_vm12 = vcmask 782848   ;;  %v1801_v45 = vld [vmem:[#allocation3 + $0x30] sm:$0xff] }
 0x20e   : > { %1377 = vst.msk [vmem:[#allocation3 + $0x68] sm:$0xf0] %vm1171_vm3, %v1375_v46  ;;  %v1824_v53 = vpack.c.bf16 %v1800_v52, %v1796_v51  ;;  %v1391_v63 = vpop.permute.xlu1 %1390  ;;  %v1797_v51 = vld [vmem:[#allocation3 + $0x10] sm:$0xff] }
 0x20f   : > { %1378 = vst.msk [vmem:[#allocation3 + $0x88] sm:$0x7] %vm1173_vm1, %v1375_v46  ;;  %v1825_v52 = vpack.c.bf16 %v1801_v45, %v1797_v51 }
 0x210   : > { %1315 = vst.msk [vmem:[#allocation3 + $0x48] sm:$0xe0] %vm11113_vm15, %v1313_v25  ;;  %2134 = vmatprep.mubr.bf16.mxu1 %v1824_v53  ;;  %vm11125_vm15 = vcmask 785922  }
 0x211   : > { %1316 = vst.msk [vmem:[#allocation3 + $0x68] sm:$0xf] %vm11114_vm11, %v1313_v25  ;;  %2135 = vmatmul.mubr.bf16.vlgmr.msra.gmra.mrb[0].mxu1 %v1823_v55  ;;  %vm11126_vm11 = vcmask 778752   ;;  %v1759_v62 = vpop.permute.xlu0 %1758 }
 0x212   : > { %1369 = vst.msk [vmem:[#allocation3 + $0x48] sm:$0xe0] %vm11115_vm9, %v1367_v48  ;;  %7526 = vmatpush3.bf16.msra.mxu1 %v7860_v49  ;;  %vm11127_vm9 = vcmask 1048322   ;;  %v1521_v8 = vpop.permute.xlu1 %1520 }
 0x213   : > { %1370 = vst.msk [vmem:[#allocation3 + $0x68] sm:$0xf] %vm11116_vm2, %v1367_v48  ;;  %7527 = vmatprep.subr.bf16.mxu1 %v7861_v56  ;;  %vm11128_vm2 = vcmask 1041152  }
 0x214   : > { %1723 = vst.msk [vmem:[#allocation3 + $0x78] sm:$0xf0] %vm11117_vm8, %v1721_v33  ;;  %1523 = vst.msk [vmem:[#allocation3 + $0x70] sm:$0xf0] %vm11117_vm8, %v1521_v8 }
 0x215   : > { %1724 = vst.msk [vmem:[#allocation3 + $0x98] sm:$0x7] %vm11118_vm0, %v1721_v33  ;;  %v1659_v7 = vpop.permute.xlu0 %1658  ;;  %1524 = vst.msk [vmem:[#allocation3 + $0x90] sm:$0x7] %vm11118_vm0, %v1521_v8  ;;  %v1831_v33 = vpack.c.bf16 %v1815_v23, %v1811_v31 }
 0x216   : > { %1653 = vst.msk [vmem:[#allocation3 + $0x38] sm:$0xc0] %vm11119_vm4, %v1651_v57  ;;  %7528 = vmatpush3.bf16.msra.mxu1 %v7862_v59  ;;  %vm11131_vm4 = vcmask 785925   ;;  %v1775_v12 = vpop.permute.xlu1 %1774 }
 0x217   : > { %1654 = vst.msk [vmem:[#allocation3 + $0x58] sm:$0x1f] %vm11120_vm5, %v1651_v57  ;;  %7529 = vmatprep.subr.bf16.mxu1 %v7863_v60  ;;  %vm11132_vm5 = vcmask 781824  }
 0x218   : > { %1285 = vst.msk [vmem:[#allocation3 + $0xa8] sm:$0xfc] %vm11121_vm10, %v1283_v58  ;;  %vm11133_vm10 = vcmask 523523  }
 0x219   : > { %1286 = vst.msk [vmem:[#allocation3 + $0xc8] sm:$0x1] %vm11122_vm14, %v1283_v58  ;;  %v1804_v0 = vld [vmem:[#allocation3 + $0x48] sm:$0xff]  ;;  %v1275_v11 = vpop.permute.xlu0 %1274  ;;  %vm11134_vm14 = vcmask 517376  }
 0x21a   : > { %1707 = vst.msk [vmem:[#allocation3 + $0x38] sm:$0xc0] %vm11123_vm7, %v9156_v28  ;;  %v1808_v1 = vld [vmem:[#allocation3 + $0x68] sm:$0xff]  ;;  %7530 = vmatpush3.bf16.msra.mxu1 %v7864_v4  ;;  %vm11135_vm7 = vcmask 785923   ;;  %v1575_v16 = vpop.permute.xlu1 %1574 }
 0x21b   : > { %1708 = vst.msk [vmem:[#allocation3 + $0x58] sm:$0x1f] %vm11124_vm12, %v9156_v28  ;;  %v1828_v2 = vpack.c.bf16 %v1808_v1, %v1804_v0  ;;  %7531 = vmatprep.subr.bf16.mxu1 %v7865_v6  ;;  %vm11136_vm12 = vcmask 779776  }
 0x21c   : > { %1339 = vst.msk [vmem:[#allocation3 + $0xa8] sm:$0xfc] %vm11125_vm15, %v9162_v34  ;;  %vm11137_vm15 = vcmask 1048323  }
 0x21d   : > { %1340 = vst.msk [vmem:[#allocation3 + $0xc8] sm:$0x1] %vm11126_vm11, %v9162_v34  ;;  %2142 = vmatprep.mubr.bf16.mxu1 %v1828_v2  ;;  %v1383_v15 = vpop.permute.xlu0 %1382  ;;  %vm11138_vm11 = vcmask 1042176  }
 0x21e   : > { %1761 = vst.msk [vmem:[#allocation3 + $0x38] sm:$0xc0] %vm1151_vm13, %v1759_v62  ;;  %2143 = vmatmul.mubr.bf16.gmra.mrb[4].mxu1 %v1827_v5  ;;  %vm11130_vm13 = vcmask 519424   ;;  %v1483_v21 = vpop.permute.xlu1 %1482 }
 0x21f   : > { %1762 = vst.msk [vmem:[#allocation3 + $0x58] sm:$0x1f] %vm1153_vm6, %v1759_v62  ;;  %vm11129_vm6 = vcmask 523525   ;;  %7532 = vmatpush3.bf16.msra.mxu1 %v7866_v9 }
 0x220   : > { %1393 = vst.msk [vmem:[#allocation3 + $0xa8] sm:$0xfc] %vm11127_vm9, %v1391_v63  ;;  %7533 = vmatprep.subr.bf16.mxu1 %v7867_v10  ;;  %vm11139_vm9 = vmmov %vm11131_vm4 }
 0x221   : > { %1394 = vst.msk [vmem:[#allocation3 + $0xc8] sm:$0x1] %vm11128_vm2, %v1391_v63  ;;  %v1513_v19 = vpop.permute.xlu0 %1512  ;;  %vm11140_vm2 = vmmov %vm11132_vm5 }
 0x222   : > { %1661 = vst.msk [vmem:[#allocation3 + $0x58] sm:$0xe0] %vm11129_vm6, %v1659_v7  ;;  %vm11141_vm6 = vcmask 523522   ;;  %v1737_v25 = vpop.permute.xlu1 %1736 }
 0x223   : > { %1662 = vst.msk [vmem:[#allocation3 + $0x78] sm:$0xf] %vm11130_vm13, %v1659_v7  ;;  %7534 = vmatpush3.bf16.msra.mxu1 %v7868_v13  ;;  %vm11144_vm13 = vcmask 1044224  }
 0x224   : > { %1715 = vst.msk [vmem:[#allocation3 + $0x58] sm:$0xe0] %vm11131_vm4, %v9158_v30  ;;  %7535 = vmatprep.subr.bf16.mxu1 %v7869_v14  ;;  %vm11146_vm0 = vmmov %vm11144_vm13  ;;  %vm11147_vm4 = vcmask 785922  }
 0x225   : > { %1716 = vst.msk [vmem:[#allocation3 + $0x78] sm:$0xf] %vm11132_vm5, %v9158_v30  ;;  %v1767_v24 = vpop.permute.xlu0 %1766  ;;  %vm11148_vm5 = vcmask 778752   ;;  %v1802_v39 = vld [vmem:[#allocation3 + $0x38] sm:$0xff] }
 0x226   : > { %1277 = vst.msk [vmem:[#allocation3 + $0x88] sm:$0xf8] %vm11133_vm10, %v1275_v11  ;;  %v1537_v35 = vpop.permute.xlu1 %1536  ;;  %v1826_v42 = vpack.c.bf16 %v1802_v39, %v1798_v41 }
 0x227   : > { %1278 = vst.msk [vmem:[#allocation3 + $0xa8] sm:$0x3] %vm11134_vm14, %v1275_v11  ;;  %7536 = vmatpush3.bf16.msra.mxu1 %v7870_v17 }
 0x228   : > { %1777 = vst.msk [vmem:[#allocation3 + $0x78] sm:$0xf0] %vm1171_vm3, %v1775_v12  ;;  %1577 = vst.msk [vmem:[#allocation3 + $0x70] sm:$0xf0] %vm1171_vm3, %v1575_v16  ;;  %vm11142_vm3 = vcmask 516352   ;;  %7537 = vmatprep.subr.bf16.mxu1 %v7871_v18 }
 0x229   : > { %1778 = vst.msk [vmem:[#allocation3 + $0x98] sm:$0x7] %vm1173_vm1, %v1775_v12  ;;  %1578 = vst.msk [vmem:[#allocation3 + $0x90] sm:$0x7] %vm1173_vm1, %v1575_v16  ;;  %v1820_v29 = vld [vmem:[#allocation3 + $0xc8] sm:$0x1]  ;;  %v1567_v34 = vpop.permute.xlu0 %1566 }
 0x22a   : > { %1331 = vst.msk [vmem:[#allocation3 + $0x88] sm:$0xf8] %vm11135_vm7, %v9160_v32  ;;  %vm11143_vm1 = vcmask 1048325   ;;  %v1836_v26 = vpack.c.bf16 %v1820_v29, %v1820_v29  ;;  %v1683_v38 = vpop.permute.xlu1 %1682  ;;  %vm11149_vm7 = vmmov %vm11141_vm6  ;;  %v9324_v29 = vld [vmem:[%s11053_s4] ss:$0 sm:$0xff] }
 0x22b   : > { %1332 = vst.msk [vmem:[#allocation3 + $0xa8] sm:$0x3] %vm11136_vm12, %v9160_v32  ;;  %7538 = vmatpush3.bf16.msra.mxu1 %v7872_v20  ;;  %v7874_v32 = vld [vmem:[%s11052_s3 + $0xb8] sm:$0xff]   ;;  %vm11145_vm8 = vmmov %vm11143_vm1 }
 0x22c   : > { %1385 = vst.msk [vmem:[#allocation3 + $0x88] sm:$0xf8] %vm11137_vm15, %v1383_v15  ;;  %7539 = vmatprep.subr.bf16.mxu1 %v7873_v22  ;;  %vm11150_vm12 = vmmov %vm11142_vm3 }
 0x22d   : > { %1386 = vst.msk [vmem:[#allocation3 + $0xa8] sm:$0x3] %vm11138_vm11, %v1383_v15  ;;  %v1475_v37 = vpop.permute.xlu0 %1474  ;;  %vm11151_vm15 = vmmov %vm11147_vm4 }
 0x22e   : > { %1515 = vst.msk [vmem:[#allocation3 + $0x50] sm:$0xe0] %vm11139_vm9, %v1513_v19  ;;  %vm11152_vm11 = vmmov %vm11148_vm5  ;;  %v1791_v44 = vpop.permute.xlu1 %1790  ;;  %vm11153_vm9 = vcmask 1048322  }
 0x22f   : > { %1516 = vst.msk [vmem:[#allocation3 + $0x70] sm:$0xf] %vm11140_vm2, %v1513_v19  ;;  %7540 = vmatpush3.bf16.msra.mxu1 %v7874_v32  ;;  %vm11154_vm2 = vcmask 1041152  }
 0x230   : > { %1485 = vst.msk [vmem:[#allocation3 + $0xb0] sm:$0xfc] %vm11141_vm6, %v1483_v21  ;;  %vm11155_vm6 = vcmask 785923  }
 0x231   : > { %1486 = vst.msk [vmem:[#allocation3 + $0xd0] sm:$0x1] %vm11142_vm3, %v1483_v21  ;;  %v1729_v43 = vpop.permute.xlu0 %1728  ;;  %vm11156_vm3 = vcmask 779776  }
 0x232   : > { %1769 = vst.msk [vmem:[#allocation3 + $0x58] sm:$0xe0] %vm11143_vm1, %v1767_v24  ;;  %v1591_v47 = vpop.permute.xlu1 %1590  ;;  %vm11157_vm1 = vmmov %vm11153_vm9 }
 0x233   : > { %v1812_v27 = vld [vmem:[#allocation3 + $0x88] sm:$0xff]  ;;  %1770 = vst.msk [vmem:[#allocation3 + $0x78] sm:$0xf] %vm11144_vm13, %v1767_v24  ;;  %vm11158_vm13 = vmmov %vm11154_vm2 }
 0x234   : > { %v1816_v28 = vld [vmem:[#allocation3 + $0xa8] sm:$0xff]  ;;  %1569 = vst.msk [vmem:[#allocation3 + $0x50] sm:$0xe0] %vm11145_vm8, %v1567_v34  ;;  %vm11159_vm8 = vmmov %vm11133_vm10 }
 0x235   : > { %v1832_v30 = vpack.c.bf16 %v1816_v28, %v1812_v27  ;;  %1570 = vst.msk [vmem:[#allocation3 + $0x70] sm:$0xf] %vm11146_vm0, %v1567_v34  ;;  %v1529_v46 = vpop.permute.xlu0 %1528  ;;  %vm11160_vm0 = vmmov %vm11134_vm14 }
 0x236   : > { %1539 = vst.msk [vmem:[#allocation3 + $0xb0] sm:$0xfc] %vm11147_vm4, %v1537_v35  ;;  %vm11161_vm4 = vmmov %vm11155_vm6 }
 0x237   : > { %2150 = vmatprep.mubr.bf16.mxu1 %v1832_v30  ;;  %1540 = vst.msk [vmem:[#allocation3 + $0xd0] sm:$0x1] %vm11148_vm5, %v1537_v35  ;;  %vm11162_vm5 = vmmov %vm11156_vm3  ;;  %v7875_v35 = vld [vmem:[%s11054_s5 + $0x40] sm:$0xff]  }
 0x238   : > { %2151 = vmatmul.mubr.bf16.gmra.mrb[8].mxu1 %v1831_v33  ;;  %1477 = vst.msk [vmem:[#allocation3 + $0x90] sm:$0xf8] %vm11133_vm10, %v1475_v37  ;;  %vm11163_vm10 = vcmask 1048323   ;;  %7565 = vmatprep.subr.bf16.mxu1 %v7875_v35 }
 0x239   : > { %2158 = vmatprep.mubr.bf16.mxu1 %v1836_v26  ;;  %1478 = vst.msk [vmem:[#allocation3 + $0xb0] sm:$0x3] %vm11134_vm14, %v1475_v37  ;;  %v1806_v48 = vld [vmem:[#allocation3 + $0x58] sm:$0xff]  ;;  %v1675_v54 = vpop.permute.xlu0 %1674  ;;  %vm11164_vm14 = vcmask 1042176  }
 0x23a   : > { %1685 = vst.msk [vmem:[#allocation3 + $0xb8] sm:$0xfc] %vm11149_vm7, %v1683_v38  ;;  %v1810_v50 = vld [vmem:[#allocation3 + $0x78] sm:$0xff]  ;;  %vm11165_vm7 = vmmov %vm11163_vm10 }
 0x23b   : > { %1686 = vst.msk [vmem:[#allocation3 + $0xd8] sm:$0x1] %vm11150_vm12, %v1683_v38  ;;  %v1830_v53 = vpack.c.bf16 %v1810_v50, %v1806_v48  ;;  %v1805_v49 = vld [vmem:[#allocation3 + $0x50] sm:$0xff]  ;;  %vm11166_vm12 = vmmov %vm11164_vm14 }
 0x23c   : > { %1739 = vst.msk [vmem:[#allocation3 + $0xb8] sm:$0xfc] %vm11151_vm15, %v1737_v25  ;;  %v1809_v55 = vld [vmem:[#allocation3 + $0x70] sm:$0xff]  ;;  %vm2237_vm15 = vcmask 523264  }
 0x23d   : > { %1740 = vst.msk [vmem:[#allocation3 + $0xd8] sm:$0x1] %vm11152_vm11, %v1737_v25  ;;  %v1783_v56 = vpop.permute.xlu0 %1782  ;;  %v1829_v57 = vpack.c.bf16 %v1809_v55, %v1805_v49  ;;  %vm2247_vm11 = vcmask 520192   ;;  %v7879_v49 = vld [vmem:[%s11054_s5 + $0x50] sm:$0xff]  }
 0x23e   : > { %1793 = vst.msk [vmem:[#allocation3 + $0xb8] sm:$0xfc] %vm11153_vm9, %v1791_v44  ;;  %v7880_v55 = vld [vmem:[%s11054_s5 + $0x10] sm:$0xff]   ;;  %vm2253_vm9 = vcmask 523269  }
 0x23f   : > { %1794 = vst.msk [vmem:[#allocation3 + $0xd8] sm:$0x1] %vm11154_vm2, %v1791_v44  ;;  %vm2255_vm2 = vcmask 517120  }
 0x240   : > { %2159 = vmatmul.mubr.bf16.gmra.mrb[12].mxu1 %v1835_v40  ;;  %1531 = vst.msk [vmem:[#allocation3 + $0x90] sm:$0xf8] %vm11155_vm6, %v1529_v46  ;;  %vm2261_vm6 = vcmask 522242  }
 0x241   : > { %2198 = vmatprep.mubr.bf16.mxu1 %v1826_v42  ;;  %1532 = vst.msk [vmem:[#allocation3 + $0xb0] sm:$0x3] %vm11156_vm3, %v1529_v46  ;;  %v1583_v58 = vpop.permute.xlu0 %1582  ;;  %v7877_v42 = vld [vmem:[%s11054_s5 + $0x48] sm:$0xff]   ;;  %vm2267_vm3 = vcmask 523271  }
 0x242   : > { %1593 = vst.msk [vmem:[#allocation3 + $0xb0] sm:$0xfc] %vm11157_vm1, %v1591_v47  ;;  %vm2269_vm1 = vcmask 519168  }
 0x243   : > { %1594 = vst.msk [vmem:[#allocation3 + $0xd0] sm:$0x1] %vm11158_vm13, %v1591_v47  ;;  %vm2244_vm13 = vcmask 516096  }
 0x244   : > { %1677 = vst.msk [vmem:[#allocation3 + $0x98] sm:$0xf8] %vm11159_vm8, %v1675_v54  ;;  %vm2275_vm8 = vcmask 523268  }
 0x245   : > { %1678 = vst.msk [vmem:[#allocation3 + $0xb8] sm:$0x3] %vm11160_vm0, %v1675_v54  ;;  %vm2283_vm0 = vcmask 1044992  }
 0x246   : > { %1731 = vst.msk [vmem:[#allocation3 + $0x98] sm:$0xf8] %vm11161_vm4, %v1729_v43  ;;  %v1822_v62 = vld [vmem:[#allocation3 + $0xd8] sm:$0x1]  ;;  %vm2291_vm4 = vcmask 1048069  }
 0x247   : > { %1732 = vst.msk [vmem:[#allocation3 + $0xb8] sm:$0x3] %vm11162_vm5, %v1729_v43  ;;  %v1838_v2 = vpack.c.bf16 %v1822_v62, %v1822_v62  ;;  %v7878_v43 = vld [vmem:[%s11054_s5 + $0x8] sm:$0xff]   ;;  %v7881_v62 = vld [vmem:[%s11054_s5 + $0x58] sm:$0xff]   ;;  %vm2293_vm5 = vcmask 1041920  }
 0x248   : > { %2199 = vmatmul.mubr.bf16.vlgmr.msra.gmra.mrb[16].mxu1 %v1825_v52  ;;  %1785 = vst.msk [vmem:[#allocation3 + $0x98] sm:$0xf8] %vm11163_vm10, %v1783_v56  ;;  %vm2301_vm10 = vcmask 1047042  }
 0x249   : > { %2206 = vmatprep.mubr.bf16.mxu1 %v1830_v53  ;;  %1786 = vst.msk [vmem:[#allocation3 + $0xb8] sm:$0x3] %vm11164_vm14, %v1783_v56  ;;  %7566 = vmatpush3.bf16.msra.mxu1 %v7876_v36  ;;  %vm2309_vm14 = vcmask 1048071  }
 0x24a   : > { %1585 = vst.msk [vmem:[#allocation3 + $0x90] sm:$0xf8] %vm11165_vm7, %v1583_v58  ;;  %v1821_v3 = vld [vmem:[#allocation3 + $0xd0] sm:$0x1]  ;;  %7567 = vmatprep.subr.bf16.mxu1 %v7877_v42  ;;  %vm2311_vm7 = vcmask 1043968  }
 0x24b   : > { %1586 = vst.msk [vmem:[#allocation3 + $0xb0] sm:$0x3] %vm11166_vm12, %v1583_v58  ;;  %v1837_v4 = vpack.c.bf16 %v1821_v3, %v1821_v3  ;;  %vm2319_vm12 = vcmask 1048068  }
 0x24d   : > { %7568 = vmatpush3.bf16.msra.mxu1 %v7878_v43 }
 0x24e   : > { %7569 = vmatprep.subr.bf16.mxu1 %v7879_v49 }
 0x24f   : > { %v1814_v59 = vld [vmem:[#allocation3 + $0x98] sm:$0xff] }
 0x250   : > { %2207 = vmatmul.mubr.bf16.gmra.mrb[20].mxu1 %v1829_v57  ;;  %v1818_v60 = vld [vmem:[#allocation3 + $0xb8] sm:$0xff] }
 0x251   : > { %v1834_v61 = vpack.c.bf16 %v1818_v60, %v1814_v59  ;;  %v1813_v63 = vld [vmem:[#allocation3 + $0x90] sm:$0xff]  ;;  %7570 = vmatpush3.bf16.msra.mxu1 %v7880_v55 }
 0x252   : > { %v1817_v0 = vld [vmem:[#allocation3 + $0xb0] sm:$0xff]  ;;  %7571 = vmatprep.subr.bf16.mxu1 %v7881_v62 }
 0x253   : > { %2214 = vmatprep.mubr.bf16.mxu1 %v1834_v61  ;;  %v1833_v1 = vpack.c.bf16 %v1817_v0, %v1813_v63  ;;  %v7882_v0 = vld [vmem:[%s11054_s5 + $0x18] sm:$0xff]  }
 0x255   : > { %7572 = vmatpush3.bf16.msra.mxu1 %v7882_v0  ;;  %v7890_v0 = vld [vmem:[%s11054_s5 + $0x38] sm:$0xff]  }
 0x258   : > { %2215 = vmatmul.mubr.bf16.gmra.mrb[24].mxu1 %v1833_v1 }
 0x259   : > { %2222 = vmatprep.mubr.bf16.mxu1 %v1838_v2 }
 0x260   : > { %2223 = vmatmul.mubr.bf16.gmra.mrb[28].mxu1 %v1837_v4 }
 0x2e4   : > { %v7501_v5 = vpop.f32.mrb[0].mxu1 }
 0x2e5   : > { %v7502_v6 = vpop.f32.mrb[1].mxu1 }
 0x2e6   : > { %v7503_v7 = vadd.f32 %v7502_v6, %v7501_v5  ;;  %v7504_v8 = vpop.f32.mrb[2].mxu1 }
 0x2e7   : > { %v7505_v9 = vpop.f32.mrb[3].mxu1 }
 0x2e8   : > { %v7506_v10 = vadd.f32 %v7505_v9, %v7504_v8  ;;  %v2137_v32 = vadd.f32 %v7503_v7, %v9324_v29  ;;  %v7883_v8 = vld [vmem:[%s11054_s5 + $0x60] sm:$0xff]  }
 0x2e9   : > { %7573 = vmatprep.subr.bf16.mxu1 %v7883_v8 }
 0x2ea   : > { %v2140_v37 = vadd.f32 %v7506_v10, %v9324_v29 }
 0x2f1   : > { %v7507_v11 = vpop.f32.mrb[4].mxu1 }
 0x2f2   : > { %v7508_v12 = vpop.f32.mrb[5].mxu1 }
 0x2f3   : > { %v7509_v13 = vadd.f32 %v7508_v12, %v7507_v11  ;;  %v7510_v14 = vpop.f32.mrb[6].mxu1 }
 0x2f4   : > { %v7511_v15 = vpop.f32.mrb[7].mxu1 }
 0x2f5   : > { %v7512_v16 = vadd.f32 %v7511_v15, %v7510_v14  ;;  %v2145_v47 = vadd.f32 %v7509_v13, %v9324_v29  ;;  %v7884_v14 = vld [vmem:[%s11054_s5 + $0x20] sm:$0xff]  }
 0x2f6   : > { %7574 = vmatpush3.bf16.msra.mxu1 %v7884_v14 }
 0x2f7   : > { %v2148_v52 = vadd.f32 %v7512_v16, %v9324_v29 }
 0x30b   : > { %v7513_v17 = vpop.f32.mrb[8].mxu1 }
 0x30c   : > { %v7514_v18 = vpop.f32.mrb[9].mxu1 }
 0x30d   : > { %v9315_v19 = vadd.f32 %v7514_v18, %v7513_v17  ;;  %v7516_v21 = vpop.f32.mrb[10].mxu1 }
 0x30e   : > { %v7517_v20 = vpop.f32.mrb[11].mxu1 }
 0x30f   : > { %v9317_v22 = vadd.f32 %v7517_v20, %v7516_v21  ;;  %v2153_v11 = vadd.f32 %v9315_v19, %v9324_v29 }
 0x311   : > { %v2156_v16 = vadd.f32 %v9317_v22, %v9324_v29 }
 0x313   : > { %v7519_v23 = vpop.f32.mrb[12].mxu1 }
 0x314   : > { %v7520_v24 = vpop.f32.mrb[13].mxu1 }
 0x315   : > { %v9319_v25 = vadd.f32 %v7520_v24, %v7519_v23  ;;  %v7522_v27 = vpop.f32.mrb[14].mxu1 }
 0x316   : > { %v7523_v28 = vpop.f32.mrb[15].mxu1 }
 0x317   : > { %v2161_v36 = vadd.f32 %v9319_v25, %v9324_v29  ;;  %v7885_v25 = vld [vmem:[%s11054_s5 + $0x68] sm:$0xff]  }
 0x318   : > { %v7886_v29 = vld [vmem:[%s11054_s5 + $0x28] sm:$0xff]   ;;  %7575 = vmatprep.subr.bf16.mxu1 %v7885_v25 }
 0x319   : > { %7576 = vmatpush3.bf16.msra.mxu1 %v7886_v29 }
 0x31b   : > { %v7541_v30 = vpop.f32.mrb[16].mxu1 }
 0x31c   : > { %v7542_v31 = vpop.f32.mrb[17].mxu1 }
 0x31d   : > { %v7543_v33 = vadd.f32 %v7542_v31, %v7541_v30  ;;  %v7544_v26 = vpop.f32.mrb[18].mxu1 }
 0x31e   : > { %v7545_v34 = vpop.f32.mrb[19].mxu1 }
 0x31f   : > { %v2201_v38 = vadd.f32 %v7543_v33, %v2137_v32  ;;  %v7546_v39 = vadd.f32 %v7545_v34, %v7544_v26 }
 0x321   : > { %v2230_v40 = vmax.f32 %v2201_v38, 0.0  ;;  %v2204_v41 = vadd.f32 %v7546_v39, %v2140_v37 }
 0x323   : > { %2238 = vst.msk [vmem:[#allocation4] sm:$0xff] %vm2237_vm15, %v2230_v40  ;;  %v2231_v44 = vmax.f32 %v2204_v41, 0.0  ;;  %v7547_v45 = vpop.f32.mrb[20].mxu1 }
 0x324   : > { %v7548_v46 = vpop.f32.mrb[21].mxu1 }
 0x325   : > { %2239 = vst.msk [vmem:[#allocation4 + $0x8] sm:$0xff] %vm2237_vm15, %v2231_v44  ;;  %v7549_v48 = vadd.f32 %v7548_v46, %v7547_v45  ;;  %v7550_v50 = vpop.f32.mrb[22].mxu1 }
 0x326   : > { %v7551_v51 = vpop.f32.mrb[23].mxu1 }
 0x327   : > { %v2209_v53 = vadd.f32 %v7549_v48, %v2145_v47  ;;  %v7552_v54 = vadd.f32 %v7551_v51, %v7550_v50  ;;  %v7887_v48 = vld [vmem:[%s11054_s5 + $0x70] sm:$0xff]  }
 0x328   : > { %7577 = vmatprep.subr.bf16.mxu1 %v7887_v48 }
 0x329   : > { %v2232_v56 = vmax.f32 %v2209_v53, 0.0  ;;  %v2212_v57 = vadd.f32 %v7552_v54, %v2148_v52  ;;  %v7888_v53 = vld [vmem:[%s11054_s5 + $0x30] sm:$0xff]  }
 0x32a   : > { %v2278_v58 = vld [vmem:[#allocation4 + $0x1] sm:$0x1f]  ;;  %7578 = vmatpush3.bf16.msra.mxu1 %v7888_v53 }
 0x32b   : > { %v2246_v59 = vld [vmem:[#allocation4] sm:$0x1f]  ;;  %2240 = vst.msk [vmem:[#allocation4 + $0x10] sm:$0xff] %vm2237_vm15, %v2232_v56  ;;  %v2233_v61 = vmax.f32 %v2212_v57, 0.0  ;;  %2280 = vrot.lane.b32.xlu0 %v2278_v58, %s8608_s13  ;;  %v7553_v4 = vpop.f32.mrb[24].mxu1  ;;  %v7889_v57 = vld [vmem:[%s11054_s5 + $0x78] sm:$0xff]  }
 0x32c   : > { %v2323_v60 = vld [vmem:[#allocation4 + $0x2] sm:$0x1f]  ;;  %2248 = vst.msk [vmem:[#allocation5] sm:$0x1f] %vm2247_vm11, %v2246_v59  ;;  %v2285_v63 = vld [vmem:[#allocation4 + $0x8] sm:$0x1f]  ;;  %7579 = vmatprep.subr.bf16.mxu1 %v7889_v57 }
 0x32d   : > { %2324 = vst.msk [vmem:[#allocation5 + $0x8] sm:$0x1f] %vm2247_vm11, %v2323_v60  ;;  %v2287_v1 = vrot.slane %v2285_v63, 3  ;;  %v2249_v2 = vld [vmem:[#allocation4 + $0x7] sm:$0x1f]  ;;  %v7554_v9 = vpop.f32.mrb[25].mxu1 }
 0x32e   : > { %2241 = vst.msk [vmem:[#allocation4 + $0x18] sm:$0xff] %vm2237_vm15, %v2233_v61  ;;  %v2325_v3 = vld [vmem:[#allocation4 + $0x9] sm:$0x1f]  ;;  %v2251_v6 = vrot.slane %v2249_v2, 3  ;;  %v7555_v12 = vadd.f32 %v7554_v9, %v7553_v4  ;;  %v7556_v13 = vpop.f32.mrb[26].mxu1  ;;  %v7891_v4 = vld [vmem:[%s11054_s5 + $0xc0] sm:$0xff]   ;;  %7580 = vmatpush3.bf16.msra.mxu1 %v7890_v0 }
 0x32f   : > { %v2348_v5 = vld [vmem:[#allocation4 + $0x7] sm:$0x1f]  ;;  %v2327_v7 = vrot.slane %v2325_v3, 3  ;;  %2288 = vrot.lane.b32.xlu1 %v2287_v1, %s8608_s13  ;;  %v7557_v15 = vpop.f32.mrb[27].mxu1  ;;  %7593 = vmatprep.subr.bf16.mxu1 %v7891_v4 }
 0x330   : > { %2350 = vrot.lane.b32.xlu0 %v2348_v5, %s8608_s13  ;;  %v2385_v10 = vld [vmem:[#allocation4 + $0x8] sm:$0x1f]  ;;  %2254 = vst.msk [vmem:[#allocation5] sm:$0xe0] %vm2253_vm9, %v2251_v6  ;;  %v2217_v17 = vadd.f32 %v7555_v12, %v2153_v11  ;;  %v7558_v18 = vadd.f32 %v7557_v15, %v7556_v13  ;;  %v7892_v0 = vld [vmem:[%s11054_s5 + $0x80] sm:$0xff]  }
 0x331   : > { %2256 = vst.msk [vmem:[#allocation5 + $0x28] sm:$0x3] %vm2255_vm2, %v2251_v6  ;;  %2330 = vst.msk [vmem:[#allocation5 + $0x30] sm:$0x3] %vm2255_vm2, %v2327_v7  ;;  %v2410_v12 = vld [vmem:[#allocation4 + $0x9] sm:$0x1f] }
 0x332   : > { %2329 = vst.msk [vmem:[#allocation5 + $0x8] sm:$0xe0] %vm2253_vm9, %v2327_v7  ;;  %v2354_v19 = vld [vmem:[#allocation4 + $0xe] sm:$0x1f]  ;;  %v2234_v23 = vmax.f32 %v2217_v17, 0.0  ;;  %v2220_v24 = vadd.f32 %v7558_v18, %v2156_v16 }
 0x333   : > { %2386 = vst.msk [vmem:[#allocation5 + $0x10] sm:$0x1f] %vm2247_vm11, %v2385_v10  ;;  %v2356_v21 = vrot.slane %v2354_v19, 3  ;;  %v2509_v20 = vld [vmem:[#allocation4 + $0x10] sm:$0x1f]  ;;  %v7559_v30 = vpop.f32.mrb[28].mxu1 }
 0x334   : > { %2510 = vst.msk [vmem:[#allocation5 + $0x20] sm:$0x1f] %vm2247_vm11, %v2509_v20  ;;  %v2235_v22 = vmax.f32 %v2220_v24, 0.0  ;;  %v2295_v31 = vld [vmem:[#allocation4 + $0xf] sm:$0x1f]  ;;  %v7560_v33 = vpop.f32.mrb[29].mxu1 }
 0x335   : > { %v2362_v27 = vld [vmem:[#allocation4 + $0x15] sm:$0x1f]  ;;  %2357 = vrot.lane.b32.xlu1 %v2356_v21, %s8608_s13  ;;  %2242 = vst.msk [vmem:[#allocation4 + $0x20] sm:$0xff] %vm2237_vm15, %v2234_v23  ;;  %v2331_v34 = vld [vmem:[#allocation4 + $0x10] sm:$0x1f]  ;;  %v7561_v37 = vadd.f32 %v7560_v33, %v7559_v30  ;;  %v7562_v38 = vpop.f32.mrb[30].mxu1 }
 0x336   : > { %v2364_v28 = vrot.slane %v2362_v27, 6  ;;  %v2511_v32 = vld [vmem:[#allocation4 + $0x17] sm:$0x1f]  ;;  %v2257_v35 = vld [vmem:[#allocation4 + $0xe] sm:$0x1f]  ;;  %2243 = vst.msk [vmem:[#allocation4 + $0x28] sm:$0xff] %vm2237_vm15, %v2235_v22 }
 0x337   : > { %v2513_v26 = vrot.slane %v2511_v32, 3  ;;  %v2333_v39 = vrot.slane %v2331_v34, 6  ;;  %v2259_v40 = vrot.slane %v2257_v35, 6  ;;  %v2447_v41 = vld [vmem:[#allocation4 + $0xe] sm:$0x1f]  ;;  %v7563_v42 = vpop.f32.mrb[31].mxu1  ;;  %v2225_v45 = vadd.f32 %v7561_v37, %v2161_v36 }
 0x338   : > { %2365 = vrot.lane.b32.xlu0 %v2364_v28, %s8608_s13  ;;  %v2297_v43 = vrot.slane %v2295_v31, 6  ;;  %2448 = vst.msk [vmem:[#allocation5 + $0x18] sm:$0x1f] %vm2247_vm11, %v2447_v41  ;;  %v2336_v44 = vld [vmem:[#allocation4 + $0x17] sm:$0x1f]  ;;  %vm2321_vm11 = vcmask 1040896  }
 0x339   : > { %2515 = vst.msk [vmem:[#allocation5 + $0x20] sm:$0xe0] %vm2253_vm9, %v2513_v26  ;;  %v2338_v46 = vrot.slane %v2336_v44, 1  ;;  %v2263_v47 = vld [vmem:[#allocation4 + $0x15] sm:$0x1f]  ;;  %v2236_v52 = vmax.f32 %v2225_v45, 0.0 }
 0x33a   : > { %2516 = vst.msk [vmem:[#allocation5 + $0x48] sm:$0x3] %vm2255_vm2, %v2513_v26  ;;  %v2265_v50 = vrot.slane %v2263_v47, 1  ;;  %v2449_v51 = vld [vmem:[#allocation4 + $0x15] sm:$0x1f] }
 0x33b   : > { %2335 = vst.msk [vmem:[#allocation5 + $0x30] sm:$0x7c] %vm2261_vm6, %v2333_v39  ;;  %2262 = vst.msk [vmem:[#allocation5 + $0x28] sm:$0x7c] %vm2261_vm6, %v2259_v40  ;;  %v2451_v54 = vrot.slane %v2449_v51, 3 }
 0x33c   : > { %2298 = vrot.lane.b32.xlu0 %v2297_v43, %s8608_s13  ;;  %2340 = vst.msk [vmem:[#allocation5 + $0x30] sm:$0x80] %vm2267_vm3, %v2338_v46  ;;  %v2387_v49 = vld [vmem:[#allocation4 + $0xf] sm:$0x1f]  ;;  %v2369_v55 = vld [vmem:[#allocation4 + $0x1c] sm:$0x1f] }
 0x33d   : > { %2341 = vst.msk [vmem:[#allocation5 + $0x58] sm:$0xf] %vm2269_vm1, %v2338_v46  ;;  %v2303_v56 = vld [vmem:[#allocation4 + $0x16] sm:$0x1f]  ;;  %2270 = vst.msk [vmem:[#allocation5 + $0x50] sm:$0xf] %vm2269_vm1, %v2265_v50 }
 0x33e   : > { %2268 = vst.msk [vmem:[#allocation5 + $0x28] sm:$0x80] %vm2267_vm3, %v2265_v50  ;;  %v2472_v58 = vld [vmem:[#allocation4 + $0xf] sm:$0x1f]  ;;  %v2371_v59 = vrot.slane %v2369_v55, 1  ;;  %v2389_v61 = vrot.slane %v2387_v49, 3 }
 0x33f   : > { %2245 = vst.msk [vmem:[#allocation4 + $0x30] sm:$0x1] %vm2244_vm13, %v2236_v52  ;;  %v2377_v60 = vld [vmem:[#allocation4 + $0x23] sm:$0x1f]  ;;  %v2305_v62 = vrot.slane %v2303_v56, 1 }
 0x340   : > { %2453 = vst.msk [vmem:[#allocation5 + $0x18] sm:$0xe0] %vm2253_vm9, %v2451_v54  ;;  %2474 = vrot.lane.b32.xlu0 %v2472_v58, %s8608_s13  ;;  %2372 = vrot.lane.b32.xlu1 %v2371_v59, %s8608_s13  ;;  %v2478_v63 = vld [vmem:[#allocation4 + $0x16] sm:$0x1f]  ;;  %2391 = vst.msk [vmem:[#allocation5 + $0x10] sm:$0xe0] %vm2253_vm9, %v2389_v61 }
 0x341   : > { %2454 = vst.msk [vmem:[#allocation5 + $0x40] sm:$0x3] %vm2255_vm2, %v2451_v54  ;;  %2392 = vst.msk [vmem:[#allocation5 + $0x38] sm:$0x3] %vm2255_vm2, %v2389_v61  ;;  %v2379_v1 = vrot.slane %v2377_v60, 4  ;;  %v2480_v13 = vrot.slane %v2478_v63, 3 }
 0x342   : > { %v2517_v2 = vld [vmem:[#allocation4 + $0x1e] sm:$0x1f]  ;;  %v2522_v3 = vld [vmem:[#allocation4 + $0x25] sm:$0x1f]  ;;  %v2393_v11 = vld [vmem:[#allocation4 + $0x16] sm:$0x1f] }
 0x343   : > { %v2519_v5 = vrot.slane %v2517_v2, 6  ;;  %v2524_v6 = vrot.slane %v2522_v3, 1  ;;  %v2342_v7 = vld [vmem:[#allocation4 + $0x1e] sm:$0x1f]  ;;  %v2395_v14 = vrot.slane %v2393_v11, 6  ;;  %v7893_v2 = vld [vmem:[%s11054_s5 + $0xc8] sm:$0xff]  }
 0x344   : > { %v2455_v8 = vld [vmem:[#allocation4 + $0x1c] sm:$0x1f]  ;;  %2380 = vrot.lane.b32.xlu0 %v2379_v1, %s8608_s13  ;;  %v2344_v9 = vrot.slane %v2342_v7, 4  ;;  %2306 = vrot.lane.b32.xlu1 %v2305_v62, %s8608_s13  ;;  %v2466_v16 = vld [vmem:[#allocation4 + $0x2a] sm:$0x1f]  ;;  %v7895_v7 = vld [vmem:[%s11054_s5 + $0xd0] sm:$0xff]  }
 0x345   : > { %v2457_v10 = vrot.slane %v2455_v8, 6  ;;  %2521 = vst.msk [vmem:[#allocation5 + $0x48] sm:$0x7c] %vm2261_vm6, %v2519_v5  ;;  %v2271_v15 = vld [vmem:[#allocation4 + $0x1c] sm:$0x1f]  ;;  %v2468_v19 = vrot.slane %v2466_v16, 4 }
 0x346   : > { %2526 = vst.msk [vmem:[#allocation5 + $0x48] sm:$0x80] %vm2267_vm3, %v2524_v6  ;;  %v2528_v17 = vld [vmem:[#allocation4 + $0x2c] sm:$0x1f]  ;;  %v2273_v18 = vrot.slane %v2271_v15, 4  ;;  %v7897_v11 = vld [vmem:[%s11054_s5 + $0xd8] sm:$0xff]  }
 0x347   : > { %2527 = vst.msk [vmem:[#allocation5 + $0x70] sm:$0xf] %vm2269_vm1, %v2524_v6  ;;  %v2460_v21 = vld [vmem:[#allocation4 + $0x23] sm:$0x1f]  ;;  %v2486_v20 = vld [vmem:[#allocation4 + $0x1d] sm:$0x1f] }
 0x348   : > { %2346 = vst.msk [vmem:[#allocation5 + $0x58] sm:$0xf0] %vm2275_vm8, %v2344_v9  ;;  %v2530_v23 = vrot.slane %v2528_v17, 4  ;;  %v2462_v24 = vrot.slane %v2460_v21, 1  ;;  %v2398_v27 = vld [vmem:[#allocation4 + $0x1d] sm:$0x1f]  ;;  %2412 = vrot.lane.b32.xlu0 %v2410_v12, %s8608_s13  ;;  %2481 = vrot.lane.b32.xlu1 %v2480_v13, %s8608_s13 }
 0x349   : > { %2347 = vst.msk [vmem:[#allocation5 + $0x80] sm:$0x1] %vm2244_vm13, %v2344_v9  ;;  %v2416_v28 = vld [vmem:[#allocation4 + $0x10] sm:$0x1f]  ;;  %2277 = vst.msk [vmem:[#allocation5 + $0x78] sm:$0x1] %vm2244_vm13, %v2273_v18 }
 0x34a   : > { %2459 = vst.msk [vmem:[#allocation5 + $0x40] sm:$0x7c] %vm2261_vm6, %v2457_v10  ;;  %2397 = vst.msk [vmem:[#allocation5 + $0x38] sm:$0x7c] %vm2261_vm6, %v2395_v14  ;;  %v2400_v22 = vrot.slane %v2398_v27, 1  ;;  %v2488_v32 = vrot.slane %v2486_v20, 6 }
 0x34b   : > { %2276 = vst.msk [vmem:[#allocation5 + $0x50] sm:$0xf0] %vm2275_vm8, %v2273_v18  ;;  %2470 = vst.msk [vmem:[#allocation5 + $0x68] sm:$0xf0] %vm2275_vm8, %v2468_v19  ;;  %v2404_v30 = vld [vmem:[#allocation4 + $0x24] sm:$0x1f] }
 0x34c   : > { %2471 = vst.msk [vmem:[#allocation5 + $0x90] sm:$0x1] %vm2244_vm13, %v2468_v19  ;;  %2533 = vst.msk [vmem:[#allocation5 + $0x98] sm:$0x1] %vm2244_vm13, %v2530_v23  ;;  %v2406_v31 = vrot.slane %v2404_v30, 4  ;;  %v2418_v33 = vrot.slane %v2416_v28, 3  ;;  %2489 = vrot.lane.b32.xlu0 %v2488_v32, %s8608_s13 }
 0x34d   : > { %2532 = vst.msk [vmem:[#allocation5 + $0x70] sm:$0xf0] %vm2275_vm8, %v2530_v23  ;;  %v2424_v26 = vld [vmem:[#allocation4 + $0x17] sm:$0x1f]  ;;  %v2313_v34 = vld [vmem:[#allocation4 + $0x1d] sm:$0x1f] }
 0x34e   : > { %2464 = vst.msk [vmem:[#allocation5 + $0x40] sm:$0x80] %vm2267_vm3, %v2462_v24  ;;  %2402 = vst.msk [vmem:[#allocation5 + $0x38] sm:$0x80] %vm2267_vm3, %v2400_v22  ;;  %2419 = vrot.lane.b32.xlu1 %v2418_v33, %s8608_s13  ;;  %v2426_v35 = vrot.slane %v2424_v26, 6  ;;  %v2315_v36 = vrot.slane %v2313_v34, 4 }
 0x34f   : > { %2465 = vst.msk [vmem:[#allocation5 + $0x68] sm:$0xf] %vm2269_vm1, %v2462_v24  ;;  %2403 = vst.msk [vmem:[#allocation5 + $0x60] sm:$0xf] %vm2269_vm1, %v2400_v22  ;;  %v2501_v37 = vld [vmem:[#allocation4 + $0x2b] sm:$0x1f] }
 0x350   : > { %2408 = vst.msk [vmem:[#allocation5 + $0x60] sm:$0xf0] %vm2275_vm8, %v2406_v31  ;;  %2427 = vrot.lane.b32.xlu0 %v2426_v35, %s8608_s13  ;;  %v2493_v38 = vld [vmem:[#allocation4 + $0x24] sm:$0x1f]  ;;  %v2503_v39 = vrot.slane %v2501_v37, 4  ;;  %v7896_v10 = vld [vmem:[%s11054_s5 + $0x90] sm:$0xff]  }
 0x351   : > { %2409 = vst.msk [vmem:[#allocation5 + $0x88] sm:$0x1] %vm2244_vm13, %v2406_v31  ;;  %v2495_v40 = vrot.slane %v2493_v38, 1  ;;  %v2431_v41 = vld [vmem:[#allocation4 + $0x1e] sm:$0x1f]  ;;  %v7894_v6 = vld [vmem:[%s11054_s5 + $0x88] sm:$0xff]  }
 0x352   : > { %2316 = vrot.lane.b32.xlu1 %v2315_v36, %s8608_s13  ;;  %v2433_v42 = vrot.slane %v2431_v41, 1  ;;  %v2439_v43 = vld [vmem:[#allocation4 + $0x25] sm:$0x1f]  ;;  %v7898_v15 = vld [vmem:[%s11054_s5 + $0x98] sm:$0xff]   ;;  %v7903_v28 = vld [vmem:[%s11054_s5 + $0xf0] sm:$0xff]  }
 0x353   : > { %v2441_v44 = vrot.slane %v2439_v43, 4  ;;  %v7899_v17 = vld [vmem:[%s11054_s5 + $0xe0] sm:$0xff]   ;;  %v7901_v24 = vld [vmem:[%s11054_s5 + $0xe8] sm:$0xff]   ;;  %v7904_v22 = vld [vmem:[%s11054_s5 + $0xb0] sm:$0xff]  }
 0x354   : > { %2504 = vrot.lane.b32.xlu0 %v2503_v39, %s8608_s13  ;;  %v7900_v19 = vld [vmem:[%s11054_s5 + $0xa0] sm:$0xff]   ;;  %v7902_v27 = vld [vmem:[%s11054_s5 + $0xa8] sm:$0xff]   ;;  %v7905_v30 = vld [vmem:[%s11054_s5 + $0xf8] sm:$0xff]  }
 0x355   : > { %v7906_v31 = vld [vmem:[%s11054_s5 + $0xb8] sm:$0xff]   ;;  %v7907_v32 = vld [vmem:[%s11054_s5 + $0x100] sm:$0xff]   ;;  %v7908_v37 = vld [vmem:[%s11054_s5 + $0x108] sm:$0xff]  }
 0x356   : > { %2496 = vrot.lane.b32.xlu1 %v2495_v40, %s8608_s13  ;;  %v7909_v39 = vld [vmem:[%s11054_s5 + $0x110] sm:$0xff]  }
 0x35a   : > { %2434 = vrot.lane.b32.xlu1 %v2433_v42, %s8608_s13  ;;  %v2543_v42 = vld [vmem:[#allocation5 + $0x48] sm:$0xff] }
 0x35e   : > { %2442 = vrot.lane.b32.xlu1 %v2441_v44, %s8608_s13  ;;  %v2538_v44 = vld [vmem:[#allocation5 + $0x20] sm:$0xff] }
 0x39d   : > { %v2281_v25 = vpop.permute.xlu0 %2280 }
 0x39e   : > { %2284 = vst.msk [vmem:[#allocation5] sm:$0x1f] %vm2283_vm0, %v2281_v25  ;;  %v7910_v25 = vld [vmem:[%s11054_s5 + $0x118] sm:$0xff]  }
 0x3a1   : > { %v2289_v29 = vpop.permute.xlu1 %2288 }
 0x3a2   : > { %v2351_v45 = vpop.permute.xlu0 %2350  ;;  %2292 = vst.msk [vmem:[#allocation5] sm:$0xe0] %vm2291_vm4, %v2289_v29 }
 0x3a3   : > { %2294 = vst.msk [vmem:[#allocation5 + $0x28] sm:$0x3] %vm2293_vm5, %v2289_v29  ;;  %v2558_v29 = vpack.c.bf16 %v2543_v42, %v2538_v44  ;;  %v6883_v44 = vld [vmem:[%s11055_s6] ss:$0 sm:$0xff] }
 0x3a4   : > { %2353 = vst.msk [vmem:[#allocation5 + $0x8] sm:$0x1f] %vm2283_vm0, %v2351_v45  ;;  %v2548_v45 = vld [vmem:[#allocation5 + $0x70] sm:$0xff] }
 0x3a7   : > { %v2358_v46 = vpop.permute.xlu1 %2357 }
 0x3a8   : > { %2360 = vst.msk [vmem:[#allocation5 + $0x8] sm:$0xe0] %vm2291_vm4, %v2358_v46 }
 0x3a9   : > { %2361 = vst.msk [vmem:[#allocation5 + $0x30] sm:$0x3] %vm2293_vm5, %v2358_v46  ;;  %v2534_v62 = vld [vmem:[#allocation5] sm:$0xff]  ;;  %v2553_v46 = vld [vmem:[#allocation5 + $0x98] sm:$0x1] }
 0x3aa   : > { %v2366_v47 = vpop.permute.xlu0 %2365 }
 0x3ab   : > { %2368 = vst.msk [vmem:[#allocation5 + $0x30] sm:$0x7c] %vm2301_vm10, %v2366_v47  ;;  %v2563_v47 = vpack.c.bf16 %v2553_v46, %v2548_v45 }
 0x3ae   : > { %v2299_v48 = vpop.permute.xlu0 %2298 }
 0x3af   : > { %2302 = vst.msk [vmem:[#allocation5 + $0x28] sm:$0x7c] %vm2301_vm10, %v2299_v48  ;;  %v2535_v55 = vld [vmem:[#allocation5 + $0x8] sm:$0xff] }
 0x3b0   : > { %v7911_v48 = vld [vmem:[%s11056_s7] ss:$16 sps:$4 sm:$0xff]  }
 0x3b2   : > { %v2475_v50 = vpop.permute.xlu0 %2474  ;;  %v2373_v51 = vpop.permute.xlu1 %2372 }
 0x3b3   : > { %2477 = vst.msk [vmem:[#allocation5 + $0x18] sm:$0x1f] %vm2283_vm0, %v2475_v50  ;;  %v7913_v50 = vld [vmem:[%s11056_s7 + $0x4] ss:$16 sps:$4 sm:$0xff]  }
 0x3b4   : > { %2375 = vst.msk [vmem:[#allocation5 + $0x30] sm:$0x80] %vm2309_vm14, %v2373_v51  ;;  %5800 = vmatprep.subr.bf16.mxu0 %v7913_v50 }
 0x3b5   : > { %2376 = vst.msk [vmem:[#allocation5 + $0x58] sm:$0xf] %vm2311_vm7, %v2373_v51  ;;  %5801 = vmatpush1.bf16.msra.mxu0 %v7911_v48  ;;  %v7914_v51 = vld [vmem:[%s11056_s7 + $0x20] ss:$16 sps:$4 sm:$0xff]  }
 0x3b6   : > { %v2381_v52 = vpop.permute.xlu0 %2380  ;;  %v2307_v53 = vpop.permute.xlu1 %2306 }
 0x3b7   : > { %2383 = vst.msk [vmem:[#allocation5 + $0x58] sm:$0xf0] %vm2319_vm12, %v2381_v52 }
 0x3b8   : > { %2384 = vst.msk [vmem:[#allocation5 + $0x80] sm:$0x1] %vm2321_vm11, %v2381_v52  ;;  %v7916_v52 = vld [vmem:[%s11056_s7 + $0x24] ss:$16 sps:$4 sm:$0xff]  }
 0x3b9   : > { %2310 = vst.msk [vmem:[#allocation5 + $0x28] sm:$0x80] %vm2309_vm14, %v2307_v53  ;;  %5802 = vmatprep.subr.bf16.mxu0 %v7916_v52 }
 0x3ba   : > { %2312 = vst.msk [vmem:[#allocation5 + $0x50] sm:$0xf] %vm2311_vm7, %v2307_v53  ;;  %v2413_v54 = vpop.permute.xlu0 %2412  ;;  %v2482_v49 = vpop.permute.xlu1 %2481  ;;  %5803 = vmatpush1.bf16.msra.mxu0 %v7914_v51  ;;  %v7917_v53 = vld [vmem:[%s11056_s7 + $0x40] ss:$16 sps:$4 sm:$0xff]  }
 0x3bb   : > { %2415 = vst.msk [vmem:[#allocation5 + $0x10] sm:$0x1f] %vm2283_vm0, %v2413_v54  ;;  %v2540_v56 = vld [vmem:[#allocation5 + $0x30] sm:$0xff]  ;;  %v7919_v54 = vld [vmem:[%s11056_s7 + $0x44] ss:$16 sps:$4 sm:$0xff]  }
 0x3bc   : > { %2484 = vst.msk [vmem:[#allocation5 + $0x18] sm:$0xe0] %vm2291_vm4, %v2482_v49  ;;  %v2555_v57 = vpack.c.bf16 %v2540_v56, %v2535_v55  ;;  %5804 = vmatprep.subr.bf16.mxu0 %v7919_v54  ;;  %v7920_v55 = vld [vmem:[%s11056_s7 + $0x60] ss:$16 sps:$4 sm:$0xff]   ;;  %v7925_v56 = vld [vmem:[%s11056_s7 + $0x84] ss:$16 sps:$4 sm:$0xff]  }
 0x3bd   : > { %2485 = vst.msk [vmem:[#allocation5 + $0x40] sm:$0x3] %vm2293_vm5, %v2482_v49  ;;  %v7922_v49 = vld [vmem:[%s11056_s7 + $0x64] ss:$16 sps:$4 sm:$0xff]  }
 0x3be   : > { %2897 = vmatprep.mubr.bf16.mxu1 %v2555_v57  ;;  %v2490_v58 = vpop.permute.xlu0 %2489  ;;  %v2545_v59 = vld [vmem:[#allocation5 + $0x58] sm:$0xff]  ;;  %5805 = vmatpush1.bf16.msra.mxu0 %v7917_v53  ;;  %v7935_v57 = vld [vmem:[%s11056_s7 + $0x8] ss:$16 sps:$4 sm:$0xff]  }
 0x3bf   : > { %v2550_v60 = vld [vmem:[#allocation5 + $0x80] sm:$0x1]  ;;  %2492 = vst.msk [vmem:[#allocation5 + $0x40] sm:$0x7c] %vm2301_vm10, %v2490_v58  ;;  %5806 = vmatprep.subr.bf16.mxu0 %v7922_v49  ;;  %v7937_v58 = vld [vmem:[%s11056_s7 + $0xc] ss:$16 sps:$4 sm:$0xff]  }
 0x3c0   : > { %v2420_v61 = vpop.permute.xlu1 %2419  ;;  %v2539_v63 = vld [vmem:[#allocation5 + $0x28] sm:$0xff]  ;;  %v2560_v3 = vpack.c.bf16 %v2550_v60, %v2545_v59  ;;  %v7943_v59 = vld [vmem:[%s11056_s7 + $0x2c] ss:$16 sps:$4 sm:$0xff]  }
 0x3c1   : > { %2422 = vst.msk [vmem:[#allocation5 + $0x10] sm:$0xe0] %vm2291_vm4, %v2420_v61  ;;  %v2554_v1 = vpack.c.bf16 %v2539_v63, %v2534_v62  ;;  %v7923_v60 = vld [vmem:[%s11056_s7 + $0x80] ss:$16 sps:$4 sm:$0xff]   ;;  %v7928_v62 = vld [vmem:[%s11056_s7 + $0xa4] ss:$16 sps:$4 sm:$0xff]  }
 0x3c2   : > { %2423 = vst.msk [vmem:[#allocation5 + $0x38] sm:$0x3] %vm2293_vm5, %v2420_v61  ;;  %v2428_v4 = vpop.permute.xlu0 %2427  ;;  %5807 = vmatpush1.bf16.msra.mxu0 %v7920_v55  ;;  %v7941_v61 = vld [vmem:[%s11056_s7 + $0x28] ss:$16 sps:$4 sm:$0xff]   ;;  %v7946_v63 = vld [vmem:[%s11056_s7 + $0x4c] ss:$16 sps:$4 sm:$0xff]  }
 0x3c3   : > { %2898 = vmatmul.mubr.bf16.vlgmr.msra.gmra.mrb[32].mxu1 %v2554_v1  ;;  %2430 = vst.msk [vmem:[#allocation5 + $0x38] sm:$0x7c] %vm2301_vm10, %v2428_v4  ;;  %v2537_v21 = vld [vmem:[#allocation5 + $0x18] sm:$0xff]  ;;  %5808 = vmatprep.subr.bf16.mxu0 %v7925_v56  ;;  %v7944_v1 = vld [vmem:[%s11056_s7 + $0x48] ss:$16 sps:$4 sm:$0xff]  }
 0x3c4   : > { %7594 = vmatpush3.bf16.msra.mxu1 %v7892_v0  ;;  %v2317_v5 = vpop.permute.xlu1 %2316  ;;  %2905 = vmatprep.mubr.bf16.mxu1 %v2560_v3  ;;  %v7926_v0 = vld [vmem:[%s11056_s7 + $0xa0] ss:$16 sps:$4 sm:$0xff]   ;;  %v7952_v3 = vld [vmem:[%s11056_s7 + $0x6c] ss:$16 sps:$4 sm:$0xff]  }
 0x3c5   : > { %2320 = vst.msk [vmem:[#allocation5 + $0x50] sm:$0xf0] %vm2319_vm12, %v2317_v5  ;;  %7595 = vmatprep.subr.bf16.mxu1 %v7893_v2  ;;  %v7931_v2 = vld [vmem:[%s11056_s7 + $0xc4] ss:$16 sps:$4 sm:$0xff]   ;;  %v7929_v4 = vld [vmem:[%s11056_s7 + $0xc0] ss:$16 sps:$4 sm:$0xff]  }
 0x3c6   : > { %2322 = vst.msk [vmem:[#allocation5 + $0x78] sm:$0x1] %vm2321_vm11, %v2317_v5  ;;  %v2505_v8 = vpop.permute.xlu0 %2504  ;;  %5809 = vmatpush1.bf16.msra.mxu0 %v7923_v60  ;;  %v7950_v5 = vld [vmem:[%s11056_s7 + $0x68] ss:$16 sps:$4 sm:$0xff]  }
 0x3c7   : > { %2507 = vst.msk [vmem:[#allocation5 + $0x68] sm:$0xf0] %vm2319_vm12, %v2505_v8  ;;  %5810 = vmatprep.subr.bf16.mxu0 %v7928_v62 }
 0x3c8   : > { %2508 = vst.msk [vmem:[#allocation5 + $0x90] sm:$0x1] %vm2321_vm11, %v2505_v8  ;;  %7596 = vmatpush3.bf16.msra.mxu1 %v7894_v6  ;;  %v2497_v9 = vpop.permute.xlu1 %2496  ;;  %v2536_v35 = vld [vmem:[#allocation5 + $0x10] sm:$0xff]  ;;  %v7934_v6 = vld [vmem:[%s11056_s7 + $0xe4] ss:$16 sps:$4 sm:$0xff]  }
 0x3c9   : > { %2499 = vst.msk [vmem:[#allocation5 + $0x40] sm:$0x80] %vm2309_vm14, %v2497_v9  ;;  %7597 = vmatprep.subr.bf16.mxu1 %v7895_v7  ;;  %v7955_v7 = vld [vmem:[%s11056_s7 + $0x8c] ss:$16 sps:$4 sm:$0xff]   ;;  %v7932_v8 = vld [vmem:[%s11056_s7 + $0xe0] ss:$16 sps:$4 sm:$0xff]  }
 0x3ca   : > { %2500 = vst.msk [vmem:[#allocation5 + $0x68] sm:$0xf] %vm2311_vm7, %v2497_v9  ;;  %5811 = vmatpush1.bf16.msra.mxu0 %v7926_v0  ;;  %v7953_v9 = vld [vmem:[%s11056_s7 + $0x88] ss:$16 sps:$4 sm:$0xff]  }
 0x3cb   : > { %5812 = vmatprep.subr.bf16.mxu0 %v7931_v2 }
 0x3cc   : > { %7598 = vmatpush3.bf16.msra.mxu1 %v7896_v10  ;;  %v2435_v12 = vpop.permute.xlu1 %2434  ;;  %v2544_v13 = vld [vmem:[#allocation5 + $0x50] sm:$0xff]  ;;  %v7940_v10 = vld [vmem:[%s11056_s7 + $0x104] ss:$16 sps:$4 sm:$0xff]  }
 0x3cd   : > { %v2549_v14 = vld [vmem:[#allocation5 + $0x78] sm:$0x1]  ;;  %2437 = vst.msk [vmem:[#allocation5 + $0x38] sm:$0x80] %vm2309_vm14, %v2435_v12  ;;  %7599 = vmatprep.subr.bf16.mxu1 %v7897_v11  ;;  %v7961_v11 = vld [vmem:[%s11056_s7 + $0xac] ss:$16 sps:$4 sm:$0xff]  }
 0x3ce   : > { %2438 = vst.msk [vmem:[#allocation5 + $0x60] sm:$0xf] %vm2311_vm7, %v2435_v12  ;;  %v2559_v16 = vpack.c.bf16 %v2549_v14, %v2544_v13  ;;  %5813 = vmatpush1.bf16.msra.mxu0 %v7929_v4  ;;  %v7938_v12 = vld [vmem:[%s11056_s7 + $0x100] ss:$16 sps:$4 sm:$0xff]   ;;  %v7959_v13 = vld [vmem:[%s11056_s7 + $0xa8] ss:$16 sps:$4 sm:$0xff]   ;;  %v3021_v4 = vlaneseq }
 0x3cf   : > { %v2552_v34 = vld [vmem:[#allocation5 + $0x90] sm:$0x1]  ;;  %5814 = vmatprep.subr.bf16.mxu0 %v7934_v6  ;;  %v7949_v14 = vld [vmem:[%s11056_s7 + $0x124] ss:$16 sps:$4 sm:$0xff]  }
 0x3d0   : > { %2906 = vmatmul.mubr.bf16.gmra.mrb[36].mxu1 %v2559_v16  ;;  %v2443_v18 = vpop.permute.xlu1 %2442  ;;  %v2542_v20 = vld [vmem:[#allocation5 + $0x40] sm:$0xff]  ;;  %v7947_v16 = vld [vmem:[%s11056_s7 + $0x120] ss:$16 sps:$4 sm:$0xff]   ;;  %vm9715_vm9 = vcmp.lt.s32.totalorder %v3021_v4, 64  ;;  %vm3045_vm2 = vcmp.ge.s32.totalorder %v3021_v4, 64  ;;  %vm3046_vm6 = vcmp.lt.s32.totalorder %v3021_v4, 128 }
 0x3d1   : > { %7600 = vmatpush3.bf16.msra.mxu1 %v7898_v15  ;;  %2445 = vst.msk [vmem:[#allocation5 + $0x60] sm:$0xf0] %vm2319_vm12, %v2443_v18  ;;  %v2557_v23 = vpack.c.bf16 %v2542_v20, %v2537_v21  ;;  %v2547_v26 = vld [vmem:[#allocation5 + $0x68] sm:$0xff]  ;;  %v7964_v15 = vld [vmem:[%s11056_s7 + $0xcc] ss:$16 sps:$4 sm:$0xff]   ;;  %vm9813_vm3 = vmand %vm3045_vm2, %vm3046_vm6 }
 0x3d2   : > { %2446 = vst.msk [vmem:[#allocation5 + $0x88] sm:$0x1] %vm2321_vm11, %v2443_v18  ;;  %7601 = vmatprep.subr.bf16.mxu1 %v7899_v17  ;;  %v2562_v38 = vpack.c.bf16 %v2552_v34, %v2547_v26  ;;  %5815 = vmatpush1.bf16.msra.mxu0 %v7932_v8  ;;  %v7962_v17 = vld [vmem:[%s11056_s7 + $0xc8] ss:$16 sps:$4 sm:$0xff]   ;;  %v7958_v18 = vld [vmem:[%s11056_s7 + $0x144] ss:$16 sps:$4 sm:$0xff]  }
 0x3d3   : > { %2946 = vmatprep.mubr.bf16.mxu1 %v2557_v23  ;;  %5816 = vmatprep.subr.bf16.mxu0 %v7940_v10  ;;  %v7956_v21 = vld [vmem:[%s11056_s7 + $0x140] ss:$16 sps:$4 sm:$0xff]   ;;  %v7968_v20 = vld [vmem:[%s11056_s7 + $0xe8] ss:$16 sps:$4 sm:$0xff]   ;;  %v7967_v23 = vld [vmem:[%s11056_s7 + $0x164] ss:$16 sps:$4 sm:$0xff]  }
 0x3d4   : > { %v2541_v33 = vld [vmem:[#allocation5 + $0x38] sm:$0xff] }
 0x3d5   : > { %7602 = vmatpush3.bf16.msra.mxu1 %v7900_v19  ;;  %v2556_v36 = vpack.c.bf16 %v2541_v33, %v2536_v35  ;;  %v7970_v19 = vld [vmem:[%s11056_s7 + $0xec] ss:$16 sps:$4 sm:$0xff]  }
 0x3d6   : > { %7603 = vmatprep.subr.bf16.mxu1 %v7901_v24  ;;  %5817 = vmatpush1.bf16.msra.mxu0 %v7938_v12  ;;  %v7973_v24 = vld [vmem:[%s11056_s7 + $0x10c] ss:$16 sps:$4 sm:$0xff]   ;;  %v7980_v12 = vld [vmem:[%s11056_s7 + $0x148] ss:$16 sps:$4 sm:$0xff]  }
 0x3d7   : > { %5818 = vmatprep.subr.bf16.mxu0 %v7949_v14 }
 0x3d8   : > { %v2546_v40 = vld [vmem:[#allocation5 + $0x60] sm:$0xff] }
 0x3d9   : > { %7604 = vmatpush3.bf16.msra.mxu1 %v7902_v27  ;;  %v2551_v41 = vld [vmem:[#allocation5 + $0x88] sm:$0x1] }
 0x3da   : > { %7605 = vmatprep.subr.bf16.mxu1 %v7903_v28  ;;  %v2561_v43 = vpack.c.bf16 %v2551_v41, %v2546_v40  ;;  %5819 = vmatpush1.bf16.msra.mxu0 %v7947_v16  ;;  %v7965_v27 = vld [vmem:[%s11056_s7 + $0x160] ss:$16 sps:$4 sm:$0xff]   ;;  %v7971_v28 = vld [vmem:[%s11056_s7 + $0x108] ss:$16 sps:$4 sm:$0xff]   ;;  %v7985_v16 = vld [vmem:[%s11056_s7 + $0x1a4] ss:$16 sps:$4 sm:$0xff]  }
 0x3db   : > { %5820 = vmatprep.subr.bf16.mxu0 %v7958_v18 }
 0x3dd   : > { %7606 = vmatpush3.bf16.msra.mxu1 %v7904_v22  ;;  %v7976_v22 = vld [vmem:[%s11056_s7 + $0x184] ss:$16 sps:$4 sm:$0xff]  }
 0x3de   : > { %7607 = vmatprep.subr.bf16.mxu1 %v7905_v30  ;;  %5821 = vmatpush1.bf16.msra.mxu0 %v7956_v21  ;;  %v7979_v30 = vld [vmem:[%s11056_s7 + $0x12c] ss:$16 sps:$4 sm:$0xff]   ;;  %v7986_v21 = vld [vmem:[%s11056_s7 + $0x168] ss:$16 sps:$4 sm:$0xff]  }
 0x3df   : > { %5822 = vmatprep.subr.bf16.mxu0 %v7967_v23 }
 0x3e1   : > { %7608 = vmatpush3.bf16.msra.mxu1 %v7906_v31  ;;  %v7974_v31 = vld [vmem:[%s11056_s7 + $0x180] ss:$16 sps:$4 sm:$0xff]  }
 0x3e2   : > { %7671 = vmatprep.subr.bf16.mxu1 %v7907_v32  ;;  %5823 = vmatpush1.bf16.msra.mxu0 %v7965_v27 }
 0x3e3   : > { %5824 = vmatprep.subr.bf16.mxu0 %v7976_v22 }
 0x3e4   : > { %2947 = vmatmul.mubr.bf16.vlgmr.msra.gmra.mrb[40].mxu1 %v2556_v36 }
 0x3e5   : > { %2954 = vmatprep.mubr.bf16.mxu1 %v2562_v38  ;;  %7672 = vmatpush3.bf16.msra.mxu1 %v7907_v32  ;;  %v7977_v32 = vld [vmem:[%s11056_s7 + $0x128] ss:$16 sps:$4 sm:$0xff]  }
 0x3e6   : > { %7673 = vmatprep.subr.bf16.mxu1 %v7908_v37  ;;  %5825 = vmatpush1.bf16.msra.mxu0 %v7974_v31 }
 0x3e7   : > { %5826 = vmatprep.subr.bf16.mxu0 %v7985_v16 }
 0x3e9   : > { %7674 = vmatpush3.bf16.msra.mxu1 %v7908_v37 }
 0x3ea   : > { %7675 = vmatprep.subr.bf16.mxu1 %v7909_v39 }
 0x3ec   : > { %2955 = vmatmul.mubr.bf16.gmra.mrb[44].mxu1 %v2561_v43 }
 0x3ed   : > { %7676 = vmatpush3.bf16.msra.mxu1 %v7909_v39  ;;  %7679 = vmatprep.mubr.msk.bf16.mxu1 %vm2237_vm15, %v2558_v29 }
 0x3ee   : > { %7677 = vmatprep.subr.bf16.mxu1 %v7910_v25 }
 0x3f1   : > { %7678 = vmatpush3.bf16.msra.mxu1 %v7910_v25 }
 0x3f2   : > { %6087 = vmatprep.subr.bf16.mxu1 %v7937_v58 }
 0x3f4   : > { %7680 = vmatmul.mubr.msk.bf16.vlgmr.msra.gmra.mrb[48].mxu1 %vm2237_vm15, %v2563_v47 }
 0x3f5   : > { %6088 = vmatpush1.bf16.msra.mxu1 %v7935_v57 }
 0x3f6   : > { %6089 = vmatprep.subr.bf16.mxu1 %v7943_v59 }
 0x3f9   : > { %6090 = vmatpush1.bf16.msra.mxu1 %v7941_v61 }
 0x3fa   : > { %6091 = vmatprep.subr.bf16.mxu1 %v7946_v63 }
 0x3fd   : > { %6092 = vmatpush1.bf16.msra.mxu1 %v7944_v1 }
 0x3fe   : > { %6093 = vmatprep.subr.bf16.mxu1 %v7952_v3 }
 0x401   : > { %6094 = vmatpush1.bf16.msra.mxu1 %v7950_v5  ;;  %v8611_v5 = vmov 1966171168  }
 0x402   : > { %6095 = vmatprep.subr.bf16.mxu1 %v7955_v7  ;;  %v3036_v6 = vunpack.c.l.s4 %v8611_v5 }
 0x405   : > { %6096 = vmatpush1.bf16.msra.mxu1 %v7953_v9 }
 0x406   : > { %6097 = vmatprep.subr.bf16.mxu1 %v7961_v11 }
 0x409   : > { %6098 = vmatpush1.bf16.msra.mxu1 %v7959_v13  ;;  %v7982_v13 = vld [vmem:[%s11056_s7 + $0x14c] ss:$16 sps:$4 sm:$0xff]  }
 0x40a   : > { %6099 = vmatprep.subr.bf16.mxu1 %v7964_v15  ;;  %v7983_v15 = vld [vmem:[%s11056_s7 + $0x1a0] ss:$16 sps:$4 sm:$0xff]  }
 0x40b   : > { %5827 = vmatpush1.bf16.msra.mxu0 %v7983_v15 }
 0x40d   : > { %6100 = vmatpush1.bf16.msra.mxu1 %v7962_v17  ;;  %v9701_v17 = vshrl.u32 %v3021_v4, 7 }
 0x40e   : > { %6101 = vmatprep.subr.bf16.mxu1 %v7970_v19  ;;  %v3037_v19 = vunpack.c.0.s8 %v3036_v6 }
 0x410   : > { %v9712_v23 = vsub.s32 %v3037_v19, %v9701_v17 }
 0x411   : > { %6102 = vmatpush1.bf16.msra.mxu1 %v7968_v20  ;;  %v7988_v20 = vld [vmem:[%s11056_s7 + $0x16c] ss:$16 sps:$4 sm:$0xff]  }
 0x412   : > { %6103 = vmatprep.subr.bf16.mxu1 %v7973_v24  ;;  %v9838_v24 = vsub.s32 1, %v9701_v17 }
 0x415   : > { %6104 = vmatpush1.bf16.msra.mxu1 %v7971_v28 }
 0x416   : > { %6105 = vmatprep.subr.bf16.mxu1 %v7979_v30 }
 0x419   : > { %6106 = vmatpush1.bf16.msra.mxu1 %v7977_v32 }
 0x41a   : > { %6107 = vmatprep.subr.bf16.mxu1 %v7982_v13 }
 0x41d   : > { %6108 = vmatpush1.bf16.msra.mxu1 %v7980_v12  ;;  %v8064_v12 = vld [vmem:[%s11056_s7 + $0x328] ss:$16 sps:$4 sm:$0xff]  }
 0x41e   : > { %6109 = vmatprep.subr.bf16.mxu1 %v7988_v20 }
 0x421   : > { %6110 = vmatpush1.bf16.msra.mxu1 %v7986_v21 }
 0x496   : > { %v7581_v33 = vpop.f32.mrb[32].mxu1 }
 0x497   : > { %v7582_v26 = vpop.f32.mrb[33].mxu1 }
 0x498   : > { %v7583_v34 = vadd.f32 %v7582_v26, %v7581_v33  ;;  %v7584_v35 = vpop.f32.mrb[34].mxu1 }
 0x499   : > { %v7585_v36 = vpop.f32.mrb[35].mxu1 }
 0x49a   : > { %v7586_v37 = vadd.f32 %v7585_v36, %v7584_v35  ;;  %v2900_v45 = vadd.f32 %v7583_v34, %v6883_v44 }
 0x49c   : > { %v2903_v50 = vadd.f32 %v7586_v37, %v6883_v44 }
 0x4a3   : > { %v7587_v38 = vpop.f32.mrb[36].mxu1 }
 0x4a4   : > { %v7588_v39 = vpop.f32.mrb[37].mxu1 }
 0x4a5   : > { %v7589_v40 = vadd.f32 %v7588_v39, %v7587_v38  ;;  %v7590_v41 = vpop.f32.mrb[38].mxu1  ;;  %v7989_v39 = vld [vmem:[%s11056_s7 + $0x188] ss:$16 sps:$4 sm:$0xff]  }
 0x4a6   : > { %v7591_v42 = vpop.f32.mrb[39].mxu1 }
 0x4a7   : > { %v7592_v43 = vadd.f32 %v7591_v42, %v7590_v41  ;;  %v2908_v55 = vadd.f32 %v7589_v40, %v6883_v44 }
 0x4a9   : > { %v2911_v59 = vadd.f32 %v7592_v43, %v6883_v44  ;;  %v7991_v44 = vld [vmem:[%s11056_s7 + $0x18c] ss:$16 sps:$4 sm:$0xff]  }
 0x4aa   : > { %6111 = vmatprep.subr.bf16.mxu1 %v7991_v44  ;;  %v8024_v44 = vld [vmem:[%s11056_s7 + $0x24c] ss:$16 sps:$4 sm:$0xff]  }
 0x4ab   : > { %6112 = vmatpush1.bf16.msra.mxu1 %v7989_v39  ;;  %v8018_v39 = vld [vmem:[%s11056_s7 + $0x22c] ss:$16 sps:$4 sm:$0xff]  }
 0x4b7   : > { %v7609_v25 = vpop.f32.mrb[40].mxu1 }
 0x4b8   : > { %v7610_v29 = vpop.f32.mrb[41].mxu1 }
 0x4b9   : > { %v7611_v46 = vadd.f32 %v7610_v29, %v7609_v25  ;;  %v7612_v47 = vpop.f32.mrb[42].mxu1  ;;  %v7992_v25 = vld [vmem:[%s11056_s7 + $0x1c0] ss:$16 sps:$4 sm:$0xff]  }
 0x4ba   : > { %v7613_v48 = vpop.f32.mrb[43].mxu1 }
 0x4bb   : > { %v7614_v51 = vadd.f32 %v7613_v48, %v7612_v47  ;;  %v2949_v52 = vadd.f32 %v7611_v46, %v2900_v45  ;;  %v7994_v46 = vld [vmem:[%s11056_s7 + $0x1c4] ss:$16 sps:$4 sm:$0xff]  }
 0x4bc   : > { %5828 = vmatprep.subr.bf16.mxu0 %v7994_v46  ;;  %v8019_v46 = vld [vmem:[%s11056_s7 + $0x240] ss:$16 sps:$4 sm:$0xff]  }
 0x4bd   : > { %v2952_v53 = vadd.f32 %v7614_v51, %v2903_v50  ;;  %5829 = vmatpush1.bf16.msra.mxu0 %v7992_v25  ;;  %v3315_v25 = vsub.s32 4, %v9701_v17 }
 0x4bf   : > { %v7615_v54 = vpop.f32.mrb[44].mxu1 }
 0x4c0   : > { %v7616_v49 = vpop.f32.mrb[45].mxu1 }
 0x4c1   : > { %v7617_v56 = vadd.f32 %v7616_v49, %v7615_v54  ;;  %v7618_v57 = vpop.f32.mrb[46].mxu1 }
 0x4c2   : > { %v7619_v58 = vpop.f32.mrb[47].mxu1 }
 0x4c3   : > { %v7620_v60 = vadd.f32 %v7619_v58, %v7618_v57  ;;  %v2957_v61 = vadd.f32 %v7617_v56, %v2908_v55  ;;  %v8000_v57 = vld [vmem:[%s11056_s7 + $0x1cc] ss:$16 sps:$4 sm:$0xff]   ;;  %v8001_v58 = vld [vmem:[%s11056_s7 + $0x1e0] ss:$16 sps:$4 sm:$0xff]  }
 0x4c5   : > { %v2960_v62 = vadd.f32 %v7620_v60, %v2911_v59  ;;  %v8003_v59 = vld [vmem:[%s11056_s7 + $0x1e4] ss:$16 sps:$4 sm:$0xff]  }
 0x4c6   : > { %5830 = vmatprep.subr.bf16.mxu0 %v8003_v59  ;;  %v8040_v59 = vld [vmem:[%s11056_s7 + $0x2a8] ss:$16 sps:$4 sm:$0xff]  }
 0x4c7   : > { %v7681_v63 = vpop.f32.mrb[48].mxu1  ;;  %5831 = vmatpush1.bf16.msra.mxu0 %v8001_v58  ;;  %v8037_v58 = vld [vmem:[%s11056_s7 + $0x2a0] ss:$16 sps:$4 sm:$0xff]  }
 0x4c8   : > { %v3006_v0 = vadd.f32 %v7681_v63, %v2957_v61  ;;  %v2997_v1 = vpop.f32.mrb[49].mxu1  ;;  %v7998_v61 = vld [vmem:[%s11056_s7 + $0x1c8] ss:$16 sps:$4 sm:$0xff]  }
 0x4c9   : > { %v2998_v2 = vadd.f32 %v2997_v1, %v2949_v52  ;;  %v7682_v3 = vpop.f32.mrb[50].mxu1  ;;  %v7995_v52 = vld [vmem:[%s11056_s7 + $0x1a8] ss:$16 sps:$4 sm:$0xff]   ;;  %v8006_v1 = vld [vmem:[%s11056_s7 + $0x1ec] ss:$16 sps:$4 sm:$0xff]  }
 0x4ca   : > { %v3014_v7 = vmax.f32 %v3006_v0, 0.0  ;;  %v3009_v8 = vadd.f32 %v7682_v3, %v2960_v62  ;;  %v3000_v9 = vpop.f32.mrb[51].mxu1 }
 0x4cb   : > { %v3012_v10 = vmax.f32 %v2998_v2, 0.0  ;;  %v3001_v11 = vadd.f32 %v3000_v9, %v2952_v53  ;;  %v7997_v53 = vld [vmem:[%s11056_s7 + $0x1ac] ss:$16 sps:$4 sm:$0xff]   ;;  %v8009_v2 = vld [vmem:[%s11056_s7 + $0x204] ss:$16 sps:$4 sm:$0xff]  }
 0x4cc   : > { %3018 = vst.msk [vmem:[#allocation6 + $0x10] sm:$0xff] %vm2237_vm15, %v3014_v7  ;;  %v3015_v14 = vmax.f32 %v3009_v8, 0.0  ;;  %6113 = vmatprep.subr.bf16.mxu1 %v7997_v53  ;;  %v8004_v7 = vld [vmem:[%s11056_s7 + $0x1e8] ss:$16 sps:$4 sm:$0xff]   ;;  %5841 = vmatprep.subr.bf16.mxu0 %v8009_v2  ;;  %v8012_v9 = vld [vmem:[%s11056_s7 + $0x20c] ss:$16 sps:$4 sm:$0xff]  }
 0x4cd   : > { %3016 = vst.msk [vmem:[#allocation6] sm:$0xff] %vm2237_vm15, %v3012_v10  ;;  %v3013_v18 = vmax.f32 %v3001_v11, 0.0  ;;  %6114 = vmatpush1.bf16.msra.mxu1 %v7995_v52  ;;  %v8028_v52 = vld [vmem:[%s11056_s7 + $0x268] ss:$16 sps:$4 sm:$0xff]   ;;  %v8033_v53 = vld [vmem:[%s11056_s7 + $0x284] ss:$16 sps:$4 sm:$0xff]  }
 0x4ce   : > { %3019 = vst.msk [vmem:[#allocation6 + $0x18] sm:$0x1] %vm2244_vm13, %v3015_v14  ;;  %6115 = vmatprep.subr.bf16.mxu1 %v8000_v57  ;;  %v8042_v57 = vld [vmem:[%s11056_s7 + $0x2ac] ss:$16 sps:$4 sm:$0xff]   ;;  %v8049_v2 = vld [vmem:[%s11056_s7 + $0x2e0] ss:$16 sps:$4 sm:$0xff]  }
 0x4cf   : > { %3017 = vst.msk [vmem:[#allocation6 + $0x8] sm:$0xff] %vm2237_vm15, %v3013_v18 }
 0x4d1   : > { %6116 = vmatpush1.bf16.msra.mxu1 %v7998_v61  ;;  %v8048_v61 = vld [vmem:[%s11056_s7 + $0x2cc] ss:$16 sps:$4 sm:$0xff]  }
 0x4d2   : > { %6117 = vmatprep.subr.bf16.mxu1 %v8006_v1  ;;  %v8054_v1 = vld [vmem:[%s11056_s7 + $0x2ec] ss:$16 sps:$4 sm:$0xff]  }
 0x4d3   : > { %v6931_v54 = vld.sshfl [vmem:[#allocation6 + $0x13] sm:$0x1 pattern:$0x75316420]  ;;  %v3225_v49 = vld [vmem:[#allocation6 + $0x12] sm:$0x1] }
 0x4d4   : > { %v6923_v27 = vld.sshfl [vmem:[#allocation6 + $0x3] sm:$0x1 pattern:$0x75316420]  ;;  %v3049_v28 = vld [vmem:[#allocation6 + $0x2] sm:$0x1]  ;;  %v3242_v3 = vrot.slane %v6931_v54, %v9712_v23 }
 0x4d5   : > { %v3291_v22 = vld [vmem:[#allocation6 + $0x18] sm:$0x1]  ;;  %v3066_v30 = vrot.slane %v6923_v27, %v9712_v23  ;;  %v6922_v31 = vld.sshfl [vmem:[#allocation6 + $0x1] sm:$0x1 pattern:$0x75316420]  ;;  %6118 = vmatpush1.bf16.msra.mxu1 %v8004_v7 }
 0x4d6   : > { %3050 = vst.msk [vmem:[#allocation7 + $0x1] sm:$0x1] %vm9715_vm9, %v3049_v28  ;;  %3292 = vst.msk [vmem:[#allocation7 + $0xc] sm:$0x1] %vm9715_vm9, %v3291_v22  ;;  %v3041_v32 = vrot.slane %v6922_v31, %v9712_v23  ;;  %v3020_v26 = vld [vmem:[#allocation6] sm:$0x1]  ;;  %6128 = vmatprep.subr.bf16.mxu1 %v8012_v9 }
 0x4d7   : > { %v6925_v33 = vld.sshfl [vmem:[#allocation6 + $0x7] sm:$0x1 pattern:$0x75316420]  ;;  %3067 = vrot.lane.b32.xlu1 %v3066_v30, %s8608_s13  ;;  %3025 = vst.msk [vmem:[#allocation7] sm:$0x1] %vm9715_vm9, %v3020_v26 }
 0x4d8   : > { %v6924_v34 = vld.sshfl [vmem:[#allocation6 + $0x5] sm:$0x1 pattern:$0x75316420]  ;;  %v3093_v35 = vld [vmem:[#allocation6 + $0x6] sm:$0x1]  ;;  %3042 = vrot.lane.b32.xlu0 %v3041_v32, %s8608_s13  ;;  %v3110_v37 = vrot.slane %v6925_v33, %v9712_v23 }
 0x4d9   : > { %3094 = vst.msk [vmem:[#allocation7 + $0x3] sm:$0x1] %vm9715_vm9, %v3093_v35  ;;  %v3071_v36 = vld [vmem:[#allocation6 + $0x4] sm:$0x1]  ;;  %v3137_v38 = vld [vmem:[#allocation6 + $0xa] sm:$0x1]  ;;  %v3088_v40 = vrot.slane %v6924_v34, %v9712_v23 }
 0x4da   : > { %3072 = vst.msk [vmem:[#allocation7 + $0x2] sm:$0x1] %vm9715_vm9, %v3071_v36  ;;  %v6927_v41 = vld.sshfl [vmem:[#allocation6 + $0xb] sm:$0x1 pattern:$0x75316420] }
 0x4db   : > { %3138 = vst.msk [vmem:[#allocation7 + $0x5] sm:$0x1] %vm9715_vm9, %v3137_v38  ;;  %v3115_v42 = vld [vmem:[#allocation6 + $0x8] sm:$0x1]  ;;  %3111 = vrot.lane.b32.xlu1 %v3110_v37, %s8608_s13  ;;  %v3154_v29 = vrot.slane %v6927_v41, %v9712_v23  ;;  %v3181_v50 = vld [vmem:[#allocation6 + $0xe] sm:$0x1] }
 0x4dc   : > { %v6926_v43 = vld.sshfl [vmem:[#allocation6 + $0x9] sm:$0x1 pattern:$0x75316420]  ;;  %3116 = vst.msk [vmem:[#allocation7 + $0x4] sm:$0x1] %vm9715_vm9, %v3115_v42  ;;  %3089 = vrot.lane.b32.xlu0 %v3088_v40, %s8608_s13 }
 0x4dd   : > { %v6929_v45 = vld.sshfl [vmem:[#allocation6 + $0xf] sm:$0x1 pattern:$0x75316420]  ;;  %v3132_v47 = vrot.slane %v6926_v43, %v9712_v23  ;;  %3182 = vst.msk [vmem:[#allocation7 + $0x7] sm:$0x1] %vm9715_vm9, %v3181_v50 }
 0x4de   : > { %v6928_v48 = vld.sshfl [vmem:[#allocation6 + $0xd] sm:$0x1 pattern:$0x75316420]  ;;  %v3159_v51 = vld [vmem:[#allocation6 + $0xc] sm:$0x1]  ;;  %v3198_v56 = vrot.slane %v6929_v45, %v9712_v23 }
 0x4df   : > { %3155 = vrot.lane.b32.xlu1 %v3154_v29, %s8608_s13  ;;  %3160 = vst.msk [vmem:[#allocation7 + $0x6] sm:$0x1] %vm9715_vm9, %v3159_v51  ;;  %v3203_v55 = vld [vmem:[#allocation6 + $0x10] sm:$0x1]  ;;  %3226 = vst.msk [vmem:[#allocation7 + $0x9] sm:$0x1] %vm9715_vm9, %v3225_v49  ;;  %v3176_v60 = vrot.slane %v6928_v48, %v9712_v23 }
 0x4e0   : > { %3133 = vrot.lane.b32.xlu0 %v3132_v47, %s8608_s13  ;;  %3204 = vst.msk [vmem:[#allocation7 + $0x8] sm:$0x1] %vm9715_vm9, %v3203_v55  ;;  %v3269_v62 = vld [vmem:[#allocation6 + $0x16] sm:$0x1]  ;;  %v3247_v63 = vld [vmem:[#allocation6 + $0x14] sm:$0x1] }
 0x4e1   : > { %v6930_v0 = vld.sshfl [vmem:[#allocation6 + $0x11] sm:$0x1 pattern:$0x75316420]  ;;  %3270 = vst.msk [vmem:[#allocation7 + $0xb] sm:$0x1] %vm9715_vm9, %v3269_v62 }
 0x4e2   : > { %3248 = vst.msk [vmem:[#allocation7 + $0xa] sm:$0x1] %vm9715_vm9, %v3247_v63  ;;  %v3220_v5 = vrot.slane %v6930_v0, %v9712_v23  ;;  %v6933_v6 = vld.sshfl [vmem:[#allocation6 + $0x17] sm:$0x1 pattern:$0x75316420] }
 0x4e3   : > { %3199 = vrot.lane.b32.xlu1 %v3198_v56, %s8608_s13  ;;  %v6932_v8 = vld.sshfl [vmem:[#allocation6 + $0x15] sm:$0x1 pattern:$0x75316420]  ;;  %v3286_v10 = vrot.slane %v6933_v6, %v9712_v23  ;;  %v9841_v27 = vsub.s32 0, %v9701_v17  ;;  %v9844_v28 = vsub.s32 3, %v9701_v17 }
 0x4e4   : > { %3177 = vrot.lane.b32.xlu0 %v3176_v60, %s8608_s13  ;;  %v3264_v11 = vrot.slane %v6932_v8, %v9712_v23  ;;  %v8007_v35 = vld [vmem:[%s11056_s7 + $0x200] ss:$16 sps:$4 sm:$0xff]   ;;  %v8010_v36 = vld [vmem:[%s11056_s7 + $0x208] ss:$16 sps:$4 sm:$0xff]   ;;  %v8015_v38 = vld [vmem:[%s11056_s7 + $0x224] ss:$16 sps:$4 sm:$0xff]  }
 0x4e5   : > { %v8013_v41 = vld [vmem:[%s11056_s7 + $0x220] ss:$16 sps:$4 sm:$0xff]   ;;  %v8016_v42 = vld [vmem:[%s11056_s7 + $0x228] ss:$16 sps:$4 sm:$0xff]   ;;  %v8021_v43 = vld [vmem:[%s11056_s7 + $0x244] ss:$16 sps:$4 sm:$0xff]  }
 0x4e6   : > { %v8022_v47 = vld [vmem:[%s11056_s7 + $0x248] ss:$16 sps:$4 sm:$0xff]   ;;  %v8027_v48 = vld [vmem:[%s11056_s7 + $0x264] ss:$16 sps:$4 sm:$0xff]   ;;  %v8030_v50 = vld [vmem:[%s11056_s7 + $0x26c] ss:$16 sps:$4 sm:$0xff]  }
 0x4e7   : > { %3243 = vrot.lane.b32.xlu1 %v3242_v3, %s8608_s13  ;;  %v8025_v51 = vld [vmem:[%s11056_s7 + $0x260] ss:$16 sps:$4 sm:$0xff]   ;;  %v8036_v54 = vld [vmem:[%s11056_s7 + $0x28c] ss:$16 sps:$4 sm:$0xff]   ;;  %v8034_v55 = vld [vmem:[%s11056_s7 + $0x288] ss:$16 sps:$4 sm:$0xff]  }
 0x4e8   : > { %3221 = vrot.lane.b32.xlu0 %v3220_v5, %s8608_s13  ;;  %v8031_v49 = vld [vmem:[%s11056_s7 + $0x280] ss:$16 sps:$4 sm:$0xff]   ;;  %v8039_v56 = vld [vmem:[%s11056_s7 + $0x2a4] ss:$16 sps:$4 sm:$0xff]   ;;  %v8046_v63 = vld [vmem:[%s11056_s7 + $0x2c8] ss:$16 sps:$4 sm:$0xff]  }
 0x4e9   : > { %v8045_v60 = vld [vmem:[%s11056_s7 + $0x2c4] ss:$16 sps:$4 sm:$0xff]   ;;  %v8043_v62 = vld [vmem:[%s11056_s7 + $0x2c0] ss:$16 sps:$4 sm:$0xff]   ;;  %v8052_v3 = vld [vmem:[%s11056_s7 + $0x2e8] ss:$16 sps:$4 sm:$0xff]  }
 0x4ea   : > { %v8051_v0 = vld [vmem:[%s11056_s7 + $0x2e4] ss:$16 sps:$4 sm:$0xff]   ;;  %v8060_v6 = vld [vmem:[%s11056_s7 + $0x30c] ss:$16 sps:$4 sm:$0xff]   ;;  %v8055_v7 = vld [vmem:[%s11056_s7 + $0x300] ss:$16 sps:$4 sm:$0xff]  }
 0x4eb   : > { %3287 = vrot.lane.b32.xlu1 %v3286_v10, %s8608_s13  ;;  %v8057_v5 = vld [vmem:[%s11056_s7 + $0x304] ss:$16 sps:$4 sm:$0xff]   ;;  %v8058_v8 = vld [vmem:[%s11056_s7 + $0x308] ss:$16 sps:$4 sm:$0xff]   ;;  %v8066_v10 = vld [vmem:[%s11056_s7 + $0x32c] ss:$16 sps:$4 sm:$0xff]  }
 0x4ec   : > { %3265 = vrot.lane.b32.xlu0 %v3264_v11, %s8608_s13  ;;  %v8063_v9 = vld [vmem:[%s11056_s7 + $0x324] ss:$16 sps:$4 sm:$0xff]   ;;  %v8061_v11 = vld [vmem:[%s11056_s7 + $0x320] ss:$16 sps:$4 sm:$0xff]   ;;  %s7369_s13 = sshll.u32 %s8695_s21, 4  ;;  %s8544_s21 = scalar_lea.vmem %s11009_s30, 16 }
 0x4ed   : > { %s11007_s14 = scalar_lea.hbm %s11060_s11, %s7369_s13  ;;  %p8545_p11 = scmp.ne.s32.totalorder %s11009_s30, %s8544_s21 }
 0x4ee   : > { %p8552_p1 = scmp.lt.s32.totalorder %s8550_s25, %s8544_s21 }
 0x4ef   : > { %p8546_p12 = pnand %p8545_p11, %p8712_p5 }
 0x4f0   : > { %p8553_p2 = por %p8552_p1, %p8551_p0 }
 0x4f1   : > { %p8547_p13 = pneg %p8546_p12 }
 0x4f3   : > { %p8554_p3 = pnand %p8553_p2, %p8547_p13 }
 0x549   : > { %v3068_v13 = vpop.permute.xlu1 %3067 }
 0x54a   : > { %3070 = vst.msk [vmem:[#allocation7 + $0x1] sm:$0x1] %vm9813_vm3, %v3068_v13  ;;  %v3043_v14 = vpop.permute.xlu0 %3042  ;;  %v8069_v13 = vld [vmem:[%s11056_s7 + $0x344] ss:$16 sps:$4 sm:$0xff]  }
 0x54b   : > { %3048 = vst.msk [vmem:[#allocation7] sm:$0x1] %vm9813_vm3, %v3043_v14  ;;  %v8072_v14 = vld [vmem:[%s11056_s7 + $0x34c] ss:$16 sps:$4 sm:$0xff]  }
 0x54d   : > { %v3112_v15 = vpop.permute.xlu1 %3111 }
 0x54e   : > { %3114 = vst.msk [vmem:[#allocation7 + $0x3] sm:$0x1] %vm9813_vm3, %v3112_v15  ;;  %v3090_v16 = vpop.permute.xlu0 %3089  ;;  %v8067_v15 = vld [vmem:[%s11056_s7 + $0x340] ss:$16 sps:$4 sm:$0xff]  }
 0x54f   : > { %3092 = vst.msk [vmem:[#allocation7 + $0x2] sm:$0x1] %vm9813_vm3, %v3090_v16  ;;  %v8070_v16 = vld [vmem:[%s11056_s7 + $0x348] ss:$16 sps:$4 sm:$0xff]  }
 0x551   : > { %v3156_v4 = vpop.permute.xlu1 %3155 }
 0x552   : > { %3158 = vst.msk [vmem:[#allocation7 + $0x5] sm:$0x1] %vm9813_vm3, %v3156_v4  ;;  %v3134_v18 = vpop.permute.xlu0 %3133  ;;  %v8075_v4 = vld [vmem:[%s11056_s7 + $0x364] ss:$16 sps:$4 sm:$0xff]  }
 0x553   : > { %3136 = vst.msk [vmem:[#allocation7 + $0x4] sm:$0x1] %vm9813_vm3, %v3134_v18  ;;  %v8078_v18 = vld [vmem:[%s11056_s7 + $0x36c] ss:$16 sps:$4 sm:$0xff]  }
 0x555   : > { %v3200_v19 = vpop.permute.xlu1 %3199 }
 0x556   : > { %3202 = vst.msk [vmem:[#allocation7 + $0x7] sm:$0x1] %vm9813_vm3, %v3200_v19  ;;  %v3178_v21 = vpop.permute.xlu0 %3177  ;;  %v8073_v19 = vld [vmem:[%s11056_s7 + $0x360] ss:$16 sps:$4 sm:$0xff]  }
 0x557   : > { %3180 = vst.msk [vmem:[#allocation7 + $0x6] sm:$0x1] %vm9813_vm3, %v3178_v21  ;;  %v8076_v21 = vld [vmem:[%s11056_s7 + $0x368] ss:$16 sps:$4 sm:$0xff]  }
 0x559   : > { %v3244_v20 = vpop.permute.xlu1 %3243 }
 0x55a   : > { %3246 = vst.msk [vmem:[#allocation7 + $0x9] sm:$0x1] %vm9813_vm3, %v3244_v20  ;;  %v3222_v23 = vpop.permute.xlu0 %3221  ;;  %v8081_v20 = vld [vmem:[%s11056_s7 + $0x384] ss:$16 sps:$4 sm:$0xff]  }
 0x55b   : > { %3224 = vst.msk [vmem:[#allocation7 + $0x8] sm:$0x1] %vm9813_vm3, %v3222_v23  ;;  %v8084_v23 = vld [vmem:[%s11056_s7 + $0x38c] ss:$16 sps:$4 sm:$0xff]  }
 0x55d   : > { %v3288_v22 = vpop.permute.xlu1 %3287 }
 0x55e   : > { %3290 = vst.msk [vmem:[#allocation7 + $0xb] sm:$0x1] %vm9813_vm3, %v3288_v22  ;;  %v3266_v30 = vpop.permute.xlu0 %3265  ;;  %v9848_v31 = vld [vmem:[#allocation7] sm:$0xff]  ;;  %v8079_v22 = vld [vmem:[%s11056_s7 + $0x380] ss:$16 sps:$4 sm:$0xff]  }
 0x55f   : > { %3268 = vst.msk [vmem:[#allocation7 + $0xa] sm:$0x1] %vm9813_vm3, %v3266_v30  ;;  %v3304_v32 = vrot.slane %v9848_v31, %v9838_v24  ;;  %v3300_v33 = vrot.slane %v9848_v31, %v9841_v27  ;;  %v3312_v26 = vrot.slane %v9848_v31, %v9844_v28  ;;  %v8082_v30 = vld [vmem:[%s11056_s7 + $0x388] ss:$16 sps:$4 sm:$0xff]  }
 0x561   : > { %v3363_v34 = vpack.c.bf16 %v3304_v32, %v3304_v32  ;;  %v3362_v37 = vpack.c.bf16 %v3300_v33, %v3300_v33  ;;  %v3365_v40 = vpack.c.bf16 %v3312_v26, %v3312_v26  ;;  %v8087_v32 = vld [vmem:[%s11056_s7 + $0x3a4] ss:$16 sps:$4 sm:$0xff]   ;;  %v8090_v33 = vld [vmem:[%s11056_s7 + $0x3ac] ss:$16 sps:$4 sm:$0xff]   ;;  %v8085_v26 = vld [vmem:[%s11056_s7 + $0x3a0] ss:$16 sps:$4 sm:$0xff]  }
 0x563   : > { %5832 = vmatprep.mubr.bf16.mxu0 %v3363_v34  ;;  %6119 = vmatprep.mubr.bf16.mxu1 %v3363_v34  ;;  %v8088_v34 = vld [vmem:[%s11056_s7 + $0x3a8] ss:$16 sps:$4 sm:$0xff]  }
 0x564   : > { %5833 = vmatmul.mubr.bf16.vlgmr.msra.gmra.mrb[64].mxu0 %v3362_v37  ;;  %6120 = vmatmul.mubr.bf16.vlgmr.msra.gmra.mrb[52].mxu1 %v3362_v37  ;;  %v8091_v37 = vld [vmem:[%s11056_s7 + $0x3c0] ss:$16 sps:$4 sm:$0xff]  }
 0x565   : > { %5842 = vmatpush1.bf16.msra.mxu0 %v8007_v35  ;;  %6129 = vmatpush1.bf16.msra.mxu1 %v8010_v36  ;;  %v8093_v35 = vld [vmem:[%s11056_s7 + $0x3c4] ss:$16 sps:$4 sm:$0xff]   ;;  %v8096_v36 = vld [vmem:[%s11056_s7 + $0x3cc] ss:$16 sps:$4 sm:$0xff]  }
 0x566   : > { %5873 = vmatprep.mubr.bf16.mxu0 %v3365_v40  ;;  %6160 = vmatprep.mubr.bf16.mxu1 %v3365_v40  ;;  %v9883_v29 = vld [vmem:[#allocation7 + $0x8] sm:$0x1f]  ;;  %v8102_v40 = vld [vmem:[%s11056_s7 + $0x3ec] ss:$16 sps:$4 sm:$0xff]  }
 0x567   : > { %5843 = vmatprep.subr.bf16.mxu0 %v8015_v38  ;;  %6130 = vmatprep.subr.bf16.mxu1 %v8018_v39  ;;  %v9888_v45 = vrot.slane %v9883_v29, %v3315_v25  ;;  %v8094_v38 = vld [vmem:[%s11056_s7 + $0x3c8] ss:$16 sps:$4 sm:$0xff]   ;;  %v8099_v39 = vld [vmem:[%s11056_s7 + $0x3e4] ss:$16 sps:$4 sm:$0xff]  }
 0x569   : > { %5844 = vmatpush1.bf16.msra.mxu0 %v8013_v41  ;;  %6131 = vmatpush1.bf16.msra.mxu1 %v8016_v42  ;;  %v10047_v41 = vsub.s32 2, %v9701_v17  ;;  %v3319_v42 = vsub.s32 5, %v9701_v17 }
 0x56a   : > { %5845 = vmatprep.subr.bf16.mxu0 %v8021_v43  ;;  %6132 = vmatprep.subr.bf16.mxu1 %v8024_v44  ;;  %v8097_v43 = vld [vmem:[%s11056_s7 + $0x3e0] ss:$16 sps:$4 sm:$0xff]   ;;  %v8100_v44 = vld [vmem:[%s11056_s7 + $0x3e8] ss:$16 sps:$4 sm:$0xff]  }
 0x56d   : > { %5846 = vmatpush1.bf16.msra.mxu0 %v8019_v46  ;;  %6133 = vmatpush1.bf16.msra.mxu1 %v8022_v47  ;;  %v3308_v46 = vrot.slane %v9848_v31, %v10047_v41  ;;  %v8105_v47 = vld [vmem:[%s11056_s7 + $0x404] ss:$16 sps:$4 sm:$0xff]  }
 0x56e   : > { %5847 = vmatprep.subr.bf16.mxu0 %v8027_v48  ;;  %6134 = vmatprep.subr.bf16.mxu1 %v8030_v50  ;;  %v8108_v48 = vld [vmem:[%s11056_s7 + $0x40c] ss:$16 sps:$4 sm:$0xff]   ;;  %v3320_v50 = vrot.slane %v9848_v31, %v3319_v42  ;;  %v8177_v42 = vld [vmem:[%s11056_s7 + $0x584] ss:$16 sps:$4 sm:$0xff]  }
 0x571   : > { %5848 = vmatpush1.bf16.msra.mxu0 %v8025_v51  ;;  %6135 = vmatpush1.bf16.msra.mxu1 %v8028_v52  ;;  %v8103_v51 = vld [vmem:[%s11056_s7 + $0x400] ss:$16 sps:$4 sm:$0xff]   ;;  %v3364_v52 = vpack.c.bf16 %v3308_v46, %v3308_v46  ;;  %v8178_v46 = vld [vmem:[%s11056_s7 + $0x588] ss:$16 sps:$4 sm:$0xff]  }
 0x572   : > { %5849 = vmatprep.subr.bf16.mxu0 %v8033_v53  ;;  %6136 = vmatprep.subr.bf16.mxu1 %v8036_v54  ;;  %v8106_v53 = vld [vmem:[%s11056_s7 + $0x408] ss:$16 sps:$4 sm:$0xff]   ;;  %v3367_v54 = vpack.c.bf16 %v3320_v50, %v3320_v50  ;;  %v8181_v50 = vld [vmem:[%s11056_s7 + $0x5a0] ss:$16 sps:$4 sm:$0xff]  }
 0x575   : > { %5850 = vmatpush1.bf16.msra.mxu0 %v8031_v49  ;;  %6137 = vmatpush1.bf16.msra.mxu1 %v8034_v55  ;;  %v8111_v49 = vld [vmem:[%s11056_s7 + $0x424] ss:$16 sps:$4 sm:$0xff]   ;;  %v8114_v55 = vld [vmem:[%s11056_s7 + $0x42c] ss:$16 sps:$4 sm:$0xff]  }
 0x576   : > { %5851 = vmatprep.subr.bf16.mxu0 %v8039_v56  ;;  %6138 = vmatprep.subr.bf16.mxu1 %v8042_v57  ;;  %v8109_v56 = vld [vmem:[%s11056_s7 + $0x420] ss:$16 sps:$4 sm:$0xff]   ;;  %v8112_v57 = vld [vmem:[%s11056_s7 + $0x428] ss:$16 sps:$4 sm:$0xff]  }
 0x579   : > { %5852 = vmatpush1.bf16.msra.mxu0 %v8037_v58  ;;  %6139 = vmatpush1.bf16.msra.mxu1 %v8040_v59  ;;  %v8117_v58 = vld [vmem:[%s11056_s7 + $0x444] ss:$16 sps:$4 sm:$0xff]   ;;  %v8120_v59 = vld [vmem:[%s11056_s7 + $0x44c] ss:$16 sps:$4 sm:$0xff]  }
 0x57a   : > { %5853 = vmatprep.subr.bf16.mxu0 %v8045_v60  ;;  %6140 = vmatprep.subr.bf16.mxu1 %v8048_v61  ;;  %v8115_v60 = vld [vmem:[%s11056_s7 + $0x440] ss:$16 sps:$4 sm:$0xff]   ;;  %v8118_v61 = vld [vmem:[%s11056_s7 + $0x448] ss:$16 sps:$4 sm:$0xff]  }
 0x57d   : > { %5854 = vmatpush1.bf16.msra.mxu0 %v8043_v62  ;;  %6141 = vmatpush1.bf16.msra.mxu1 %v8046_v63  ;;  %v8123_v62 = vld [vmem:[%s11056_s7 + $0x464] ss:$16 sps:$4 sm:$0xff]   ;;  %v8126_v63 = vld [vmem:[%s11056_s7 + $0x46c] ss:$16 sps:$4 sm:$0xff]  }
 0x57e   : > { %5855 = vmatprep.subr.bf16.mxu0 %v8051_v0  ;;  %6142 = vmatprep.subr.bf16.mxu1 %v8054_v1  ;;  %v8121_v0 = vld [vmem:[%s11056_s7 + $0x460] ss:$16 sps:$4 sm:$0xff]   ;;  %v8124_v1 = vld [vmem:[%s11056_s7 + $0x468] ss:$16 sps:$4 sm:$0xff]  }
 0x581   : > { %5856 = vmatpush1.bf16.msra.mxu0 %v8049_v2  ;;  %6143 = vmatpush1.bf16.msra.mxu1 %v8052_v3  ;;  %v8129_v2 = vld [vmem:[%s11056_s7 + $0x484] ss:$16 sps:$4 sm:$0xff]   ;;  %v8132_v3 = vld [vmem:[%s11056_s7 + $0x48c] ss:$16 sps:$4 sm:$0xff]  }
 0x582   : > { %5857 = vmatprep.subr.bf16.mxu0 %v8057_v5  ;;  %6144 = vmatprep.subr.bf16.mxu1 %v8060_v6  ;;  %v8127_v5 = vld [vmem:[%s11056_s7 + $0x480] ss:$16 sps:$4 sm:$0xff]   ;;  %v8130_v6 = vld [vmem:[%s11056_s7 + $0x488] ss:$16 sps:$4 sm:$0xff]  }
 0x585   : > { %5858 = vmatpush1.bf16.msra.mxu0 %v8055_v7  ;;  %6145 = vmatpush1.bf16.msra.mxu1 %v8058_v8  ;;  %v8135_v7 = vld [vmem:[%s11056_s7 + $0x4a4] ss:$16 sps:$4 sm:$0xff]   ;;  %v8138_v8 = vld [vmem:[%s11056_s7 + $0x4ac] ss:$16 sps:$4 sm:$0xff]  }
 0x586   : > { %5859 = vmatprep.subr.bf16.mxu0 %v8063_v9  ;;  %6146 = vmatprep.subr.bf16.mxu1 %v8066_v10  ;;  %v8133_v9 = vld [vmem:[%s11056_s7 + $0x4a0] ss:$16 sps:$4 sm:$0xff]   ;;  %v8136_v10 = vld [vmem:[%s11056_s7 + $0x4a8] ss:$16 sps:$4 sm:$0xff]  }
 0x589   : > { %5860 = vmatpush1.bf16.msra.mxu0 %v8061_v11  ;;  %6147 = vmatpush1.bf16.msra.mxu1 %v8064_v12  ;;  %v8141_v11 = vld [vmem:[%s11056_s7 + $0x4c4] ss:$16 sps:$4 sm:$0xff]   ;;  %v8144_v12 = vld [vmem:[%s11056_s7 + $0x4cc] ss:$16 sps:$4 sm:$0xff]  }
 0x58a   : > { %5861 = vmatprep.subr.bf16.mxu0 %v8069_v13  ;;  %6148 = vmatprep.subr.bf16.mxu1 %v8072_v14  ;;  %v8139_v13 = vld [vmem:[%s11056_s7 + $0x4c0] ss:$16 sps:$4 sm:$0xff]   ;;  %v8142_v14 = vld [vmem:[%s11056_s7 + $0x4c8] ss:$16 sps:$4 sm:$0xff]  }
 0x58d   : > { %5862 = vmatpush1.bf16.msra.mxu0 %v8067_v15  ;;  %6149 = vmatpush1.bf16.msra.mxu1 %v8070_v16  ;;  %v8147_v15 = vld [vmem:[%s11056_s7 + $0x4e4] ss:$16 sps:$4 sm:$0xff]   ;;  %v8150_v16 = vld [vmem:[%s11056_s7 + $0x4ec] ss:$16 sps:$4 sm:$0xff]  }
 0x58e   : > { %5863 = vmatprep.subr.bf16.mxu0 %v8075_v4  ;;  %6150 = vmatprep.subr.bf16.mxu1 %v8078_v18  ;;  %v8145_v4 = vld [vmem:[%s11056_s7 + $0x4e0] ss:$16 sps:$4 sm:$0xff]   ;;  %v8148_v18 = vld [vmem:[%s11056_s7 + $0x4e8] ss:$16 sps:$4 sm:$0xff]  }
 0x591   : > { %5864 = vmatpush1.bf16.msra.mxu0 %v8073_v19  ;;  %6151 = vmatpush1.bf16.msra.mxu1 %v8076_v21  ;;  %v8153_v19 = vld [vmem:[%s11056_s7 + $0x504] ss:$16 sps:$4 sm:$0xff]   ;;  %v8156_v21 = vld [vmem:[%s11056_s7 + $0x50c] ss:$16 sps:$4 sm:$0xff]  }
 0x592   : > { %5865 = vmatprep.subr.bf16.mxu0 %v8081_v20  ;;  %6152 = vmatprep.subr.bf16.mxu1 %v8084_v23  ;;  %v8151_v20 = vld [vmem:[%s11056_s7 + $0x500] ss:$16 sps:$4 sm:$0xff]   ;;  %v8154_v23 = vld [vmem:[%s11056_s7 + $0x508] ss:$16 sps:$4 sm:$0xff]  }
 0x595   : > { %5866 = vmatpush1.bf16.msra.mxu0 %v8079_v22  ;;  %6153 = vmatpush1.bf16.msra.mxu1 %v8082_v30  ;;  %v8159_v22 = vld [vmem:[%s11056_s7 + $0x524] ss:$16 sps:$4 sm:$0xff]   ;;  %v8162_v30 = vld [vmem:[%s11056_s7 + $0x52c] ss:$16 sps:$4 sm:$0xff]  }
 0x596   : > { %5867 = vmatprep.subr.bf16.mxu0 %v8087_v32  ;;  %6154 = vmatprep.subr.bf16.mxu1 %v8090_v33  ;;  %v8157_v32 = vld [vmem:[%s11056_s7 + $0x520] ss:$16 sps:$4 sm:$0xff]   ;;  %v8160_v33 = vld [vmem:[%s11056_s7 + $0x528] ss:$16 sps:$4 sm:$0xff]  }
 0x599   : > { %5868 = vmatpush1.bf16.msra.mxu0 %v8085_v26  ;;  %6155 = vmatpush1.bf16.msra.mxu1 %v8088_v34  ;;  %v8165_v26 = vld [vmem:[%s11056_s7 + $0x544] ss:$16 sps:$4 sm:$0xff]   ;;  %v8168_v34 = vld [vmem:[%s11056_s7 + $0x54c] ss:$16 sps:$4 sm:$0xff]  }
 0x59a   : > { %5869 = vmatprep.subr.bf16.mxu0 %v8093_v35  ;;  %6156 = vmatprep.subr.bf16.mxu1 %v8096_v36  ;;  %v8163_v35 = vld [vmem:[%s11056_s7 + $0x540] ss:$16 sps:$4 sm:$0xff]   ;;  %v8166_v36 = vld [vmem:[%s11056_s7 + $0x548] ss:$16 sps:$4 sm:$0xff]  }
 0x59d   : > { %5870 = vmatpush1.bf16.msra.mxu0 %v8091_v37  ;;  %6157 = vmatpush1.bf16.msra.mxu1 %v8094_v38  ;;  %v8171_v37 = vld [vmem:[%s11056_s7 + $0x564] ss:$16 sps:$4 sm:$0xff]   ;;  %v8174_v38 = vld [vmem:[%s11056_s7 + $0x56c] ss:$16 sps:$4 sm:$0xff]  }
 0x59e   : > { %5871 = vmatprep.subr.bf16.mxu0 %v8099_v39  ;;  %6158 = vmatprep.subr.bf16.mxu1 %v8102_v40  ;;  %v8169_v39 = vld [vmem:[%s11056_s7 + $0x560] ss:$16 sps:$4 sm:$0xff]   ;;  %v8172_v40 = vld [vmem:[%s11056_s7 + $0x568] ss:$16 sps:$4 sm:$0xff]  }
 0x5a1   : > { %5872 = vmatpush1.bf16.msra.mxu0 %v8097_v43  ;;  %6159 = vmatpush1.bf16.msra.mxu1 %v8100_v44  ;;  %v8180_v43 = vld [vmem:[%s11056_s7 + $0x58c] ss:$16 sps:$4 sm:$0xff]   ;;  %v8175_v44 = vld [vmem:[%s11056_s7 + $0x580] ss:$16 sps:$4 sm:$0xff]  }
 0x5a2   : > { %5882 = vmatprep.subr.bf16.mxu0 %v8105_v47  ;;  %6169 = vmatprep.subr.bf16.mxu1 %v8108_v48  ;;  %v8183_v47 = vld [vmem:[%s11056_s7 + $0x5a4] ss:$16 sps:$4 sm:$0xff]   ;;  %v8186_v48 = vld [vmem:[%s11056_s7 + $0x5ac] ss:$16 sps:$4 sm:$0xff]  }
 0x5a4   : > { %5874 = vmatmul.mubr.bf16.vlgmr.msra.gmra.mrb[64].mxu0 %v3364_v52  ;;  %6161 = vmatmul.mubr.bf16.vlgmr.msra.gmra.mrb[52].mxu1 %v3364_v52  ;;  %v8189_v52 = vld [vmem:[%s11056_s7 + $0x5c4] ss:$16 sps:$4 sm:$0xff]  }
 0x5a5   : > { %5883 = vmatpush1.bf16.msra.mxu0 %v8103_v51  ;;  %5914 = vmatprep.mubr.bf16.mxu0 %v3367_v54  ;;  %v8184_v51 = vld [vmem:[%s11056_s7 + $0x5a8] ss:$16 sps:$4 sm:$0xff]  }
 0x5a6   : > { %6170 = vmatpush1.bf16.msra.mxu1 %v8106_v53  ;;  %6201 = vmatprep.mubr.bf16.mxu1 %v3367_v54  ;;  %v8192_v53 = vld [vmem:[%s11056_s7 + $0x5cc] ss:$16 sps:$4 sm:$0xff]   ;;  %v8187_v54 = vld [vmem:[%s11056_s7 + $0x5c0] ss:$16 sps:$4 sm:$0xff]  }
 0x5a7   : > { %5884 = vmatprep.subr.bf16.mxu0 %v8111_v49  ;;  %6171 = vmatprep.subr.bf16.mxu1 %v8114_v55  ;;  %v8190_v49 = vld [vmem:[%s11056_s7 + $0x5c8] ss:$16 sps:$4 sm:$0xff]   ;;  %v8195_v55 = vld [vmem:[%s11056_s7 + $0x5e4] ss:$16 sps:$4 sm:$0xff]  }
 0x5a9   : > { %5885 = vmatpush1.bf16.msra.mxu0 %v8109_v56  ;;  %v8198_v56 = vld [vmem:[%s11056_s7 + $0x5ec] ss:$16 sps:$4 sm:$0xff]  }
 0x5aa   : > { %6172 = vmatpush1.bf16.msra.mxu1 %v8112_v57  ;;  %5886 = vmatprep.subr.bf16.mxu0 %v8117_v58  ;;  %v3327_v57 = vsub.s32 7, %v9701_v17  ;;  %v8193_v58 = vld [vmem:[%s11056_s7 + $0x5e0] ss:$16 sps:$4 sm:$0xff]  }
 0x5ab   : > { %6173 = vmatprep.subr.bf16.mxu1 %v8120_v59  ;;  %v8196_v59 = vld [vmem:[%s11056_s7 + $0x5e8] ss:$16 sps:$4 sm:$0xff]  }
 0x5ad   : > { %5887 = vmatpush1.bf16.msra.mxu0 %v8115_v60  ;;  %v3316_v60 = vrot.slane %v9848_v31, %v3315_v25  ;;  %v8202_v25 = vld [vmem:[%s11056_s7 + $0x608] ss:$16 sps:$4 sm:$0xff]  }
 0x5ae   : > { %6174 = vmatpush1.bf16.msra.mxu1 %v8118_v61  ;;  %5888 = vmatprep.subr.bf16.mxu0 %v8123_v62  ;;  %v8201_v61 = vld [vmem:[%s11056_s7 + $0x604] ss:$16 sps:$4 sm:$0xff]   ;;  %v8204_v62 = vld [vmem:[%s11056_s7 + $0x60c] ss:$16 sps:$4 sm:$0xff]  }
 0x5af   : > { %6175 = vmatprep.subr.bf16.mxu1 %v8126_v63  ;;  %v3328_v63 = vrot.slane %v9848_v31, %v3327_v57  ;;  %v8276_v57 = vld [vmem:[%s11056_s7 + $0x78c] ss:$16 sps:$4 sm:$0xff]  }
 0x5b1   : > { %5889 = vmatpush1.bf16.msra.mxu0 %v8121_v0  ;;  %v8199_v0 = vld [vmem:[%s11056_s7 + $0x600] ss:$16 sps:$4 sm:$0xff]  }
 0x5b2   : > { %6176 = vmatpush1.bf16.msra.mxu1 %v8124_v1  ;;  %5890 = vmatprep.subr.bf16.mxu0 %v8129_v2  ;;  %v3366_v1 = vpack.c.bf16 %v3316_v60, %v3316_v60  ;;  %v8207_v2 = vld [vmem:[%s11056_s7 + $0x624] ss:$16 sps:$4 sm:$0xff]  }
 0x5b3   : > { %6177 = vmatprep.subr.bf16.mxu1 %v8132_v3  ;;  %v3369_v3 = vpack.c.bf16 %v3328_v63, %v3328_v63  ;;  %v8279_v60 = vld [vmem:[%s11056_s7 + $0x7a4] ss:$16 sps:$4 sm:$0xff]   ;;  %v8280_v63 = vld [vmem:[%s11056_s7 + $0x7a8] ss:$16 sps:$4 sm:$0xff]  }
 0x5b5   : > { %5891 = vmatpush1.bf16.msra.mxu0 %v8127_v5  ;;  %v8210_v5 = vld [vmem:[%s11056_s7 + $0x62c] ss:$16 sps:$4 sm:$0xff]  }
 0x5b6   : > { %6178 = vmatpush1.bf16.msra.mxu1 %v8130_v6  ;;  %5892 = vmatprep.subr.bf16.mxu0 %v8135_v7  ;;  %v8205_v6 = vld [vmem:[%s11056_s7 + $0x620] ss:$16 sps:$4 sm:$0xff]   ;;  %v8208_v7 = vld [vmem:[%s11056_s7 + $0x628] ss:$16 sps:$4 sm:$0xff]  }
 0x5b7   : > { %6179 = vmatprep.subr.bf16.mxu1 %v8138_v8  ;;  %v8213_v8 = vld [vmem:[%s11056_s7 + $0x644] ss:$16 sps:$4 sm:$0xff]  }
 0x5b9   : > { %5893 = vmatpush1.bf16.msra.mxu0 %v8133_v9  ;;  %v8216_v9 = vld [vmem:[%s11056_s7 + $0x64c] ss:$16 sps:$4 sm:$0xff]  }
 0x5ba   : > { %6180 = vmatpush1.bf16.msra.mxu1 %v8136_v10  ;;  %5894 = vmatprep.subr.bf16.mxu0 %v8141_v11  ;;  %v8211_v10 = vld [vmem:[%s11056_s7 + $0x640] ss:$16 sps:$4 sm:$0xff]   ;;  %v8214_v11 = vld [vmem:[%s11056_s7 + $0x648] ss:$16 sps:$4 sm:$0xff]  }
 0x5bb   : > { %6181 = vmatprep.subr.bf16.mxu1 %v8144_v12  ;;  %v8219_v12 = vld [vmem:[%s11056_s7 + $0x664] ss:$16 sps:$4 sm:$0xff]  }
 0x5bd   : > { %5895 = vmatpush1.bf16.msra.mxu0 %v8139_v13  ;;  %v8222_v13 = vld [vmem:[%s11056_s7 + $0x66c] ss:$16 sps:$4 sm:$0xff]  }
 0x5be   : > { %6182 = vmatpush1.bf16.msra.mxu1 %v8142_v14  ;;  %5896 = vmatprep.subr.bf16.mxu0 %v8147_v15  ;;  %v8217_v14 = vld [vmem:[%s11056_s7 + $0x660] ss:$16 sps:$4 sm:$0xff]   ;;  %v8220_v15 = vld [vmem:[%s11056_s7 + $0x668] ss:$16 sps:$4 sm:$0xff]  }
 0x5bf   : > { %6183 = vmatprep.subr.bf16.mxu1 %v8150_v16  ;;  %v8225_v16 = vld [vmem:[%s11056_s7 + $0x684] ss:$16 sps:$4 sm:$0xff]  }
 0x5c1   : > { %5897 = vmatpush1.bf16.msra.mxu0 %v8145_v4  ;;  %v8228_v4 = vld [vmem:[%s11056_s7 + $0x68c] ss:$16 sps:$4 sm:$0xff]  }
 0x5c2   : > { %6184 = vmatpush1.bf16.msra.mxu1 %v8148_v18  ;;  %5898 = vmatprep.subr.bf16.mxu0 %v8153_v19  ;;  %v8223_v18 = vld [vmem:[%s11056_s7 + $0x680] ss:$16 sps:$4 sm:$0xff]   ;;  %v8226_v19 = vld [vmem:[%s11056_s7 + $0x688] ss:$16 sps:$4 sm:$0xff]  }
 0x5c3   : > { %6185 = vmatprep.subr.bf16.mxu1 %v8156_v21  ;;  %v8231_v21 = vld [vmem:[%s11056_s7 + $0x6a4] ss:$16 sps:$4 sm:$0xff]  }
 0x5c5   : > { %5899 = vmatpush1.bf16.msra.mxu0 %v8151_v20  ;;  %v8234_v20 = vld [vmem:[%s11056_s7 + $0x6ac] ss:$16 sps:$4 sm:$0xff]  }
 0x5c6   : > { %6186 = vmatpush1.bf16.msra.mxu1 %v8154_v23  ;;  %5900 = vmatprep.subr.bf16.mxu0 %v8159_v22  ;;  %v8229_v23 = vld [vmem:[%s11056_s7 + $0x6a0] ss:$16 sps:$4 sm:$0xff]   ;;  %v8232_v22 = vld [vmem:[%s11056_s7 + $0x6a8] ss:$16 sps:$4 sm:$0xff]  }
 0x5c7   : > { %6187 = vmatprep.subr.bf16.mxu1 %v8162_v30  ;;  %v8237_v30 = vld [vmem:[%s11056_s7 + $0x6c4] ss:$16 sps:$4 sm:$0xff]  }
 0x5c9   : > { %5901 = vmatpush1.bf16.msra.mxu0 %v8157_v32  ;;  %v8240_v32 = vld [vmem:[%s11056_s7 + $0x6cc] ss:$16 sps:$4 sm:$0xff]  }
 0x5ca   : > { %6188 = vmatpush1.bf16.msra.mxu1 %v8160_v33  ;;  %5902 = vmatprep.subr.bf16.mxu0 %v8165_v26  ;;  %v8235_v33 = vld [vmem:[%s11056_s7 + $0x6c0] ss:$16 sps:$4 sm:$0xff]   ;;  %v8238_v26 = vld [vmem:[%s11056_s7 + $0x6c8] ss:$16 sps:$4 sm:$0xff]  }
 0x5cb   : > { %6189 = vmatprep.subr.bf16.mxu1 %v8168_v34  ;;  %v8243_v34 = vld [vmem:[%s11056_s7 + $0x6e4] ss:$16 sps:$4 sm:$0xff]  }
 0x5cd   : > { %5903 = vmatpush1.bf16.msra.mxu0 %v8163_v35  ;;  %v8246_v35 = vld [vmem:[%s11056_s7 + $0x6ec] ss:$16 sps:$4 sm:$0xff]  }
 0x5ce   : > { %6190 = vmatpush1.bf16.msra.mxu1 %v8166_v36  ;;  %5904 = vmatprep.subr.bf16.mxu0 %v8171_v37  ;;  %v8241_v36 = vld [vmem:[%s11056_s7 + $0x6e0] ss:$16 sps:$4 sm:$0xff]   ;;  %v8244_v37 = vld [vmem:[%s11056_s7 + $0x6e8] ss:$16 sps:$4 sm:$0xff]  }
 0x5cf   : > { %6191 = vmatprep.subr.bf16.mxu1 %v8174_v38  ;;  %v8249_v38 = vld [vmem:[%s11056_s7 + $0x704] ss:$16 sps:$4 sm:$0xff]  }
 0x5d1   : > { %5905 = vmatpush1.bf16.msra.mxu0 %v8169_v39  ;;  %v8252_v39 = vld [vmem:[%s11056_s7 + $0x70c] ss:$16 sps:$4 sm:$0xff]  }
 0x5d2   : > { %6192 = vmatpush1.bf16.msra.mxu1 %v8172_v40  ;;  %5906 = vmatprep.subr.bf16.mxu0 %v8177_v42  ;;  %v8247_v40 = vld [vmem:[%s11056_s7 + $0x700] ss:$16 sps:$4 sm:$0xff]   ;;  %v8250_v42 = vld [vmem:[%s11056_s7 + $0x708] ss:$16 sps:$4 sm:$0xff]  }
 0x5d3   : > { %6193 = vmatprep.subr.bf16.mxu1 %v8180_v43  ;;  %v8255_v43 = vld [vmem:[%s11056_s7 + $0x724] ss:$16 sps:$4 sm:$0xff]  }
 0x5d5   : > { %5907 = vmatpush1.bf16.msra.mxu0 %v8175_v44  ;;  %v8258_v44 = vld [vmem:[%s11056_s7 + $0x72c] ss:$16 sps:$4 sm:$0xff]  }
 0x5d6   : > { %6194 = vmatpush1.bf16.msra.mxu1 %v8178_v46  ;;  %5908 = vmatprep.subr.bf16.mxu0 %v8183_v47  ;;  %v8253_v46 = vld [vmem:[%s11056_s7 + $0x720] ss:$16 sps:$4 sm:$0xff]   ;;  %v8256_v47 = vld [vmem:[%s11056_s7 + $0x728] ss:$16 sps:$4 sm:$0xff]  }
 0x5d7   : > { %6195 = vmatprep.subr.bf16.mxu1 %v8186_v48  ;;  %v8261_v48 = vld [vmem:[%s11056_s7 + $0x744] ss:$16 sps:$4 sm:$0xff]  }
 0x5d9   : > { %5909 = vmatpush1.bf16.msra.mxu0 %v8181_v50  ;;  %v8264_v50 = vld [vmem:[%s11056_s7 + $0x74c] ss:$16 sps:$4 sm:$0xff]  }
 0x5da   : > { %6196 = vmatpush1.bf16.msra.mxu1 %v8184_v51  ;;  %5910 = vmatprep.subr.bf16.mxu0 %v8189_v52  ;;  %v8259_v51 = vld [vmem:[%s11056_s7 + $0x740] ss:$16 sps:$4 sm:$0xff]   ;;  %v8262_v52 = vld [vmem:[%s11056_s7 + $0x748] ss:$16 sps:$4 sm:$0xff]  }
 0x5db   : > { %6197 = vmatprep.subr.bf16.mxu1 %v8192_v53  ;;  %v8267_v53 = vld [vmem:[%s11056_s7 + $0x764] ss:$16 sps:$4 sm:$0xff]  }
 0x5dd   : > { %5911 = vmatpush1.bf16.msra.mxu0 %v8187_v54  ;;  %v8270_v54 = vld [vmem:[%s11056_s7 + $0x76c] ss:$16 sps:$4 sm:$0xff]  }
 0x5de   : > { %6198 = vmatpush1.bf16.msra.mxu1 %v8190_v49  ;;  %5912 = vmatprep.subr.bf16.mxu0 %v8195_v55  ;;  %v8265_v49 = vld [vmem:[%s11056_s7 + $0x760] ss:$16 sps:$4 sm:$0xff]   ;;  %v8268_v55 = vld [vmem:[%s11056_s7 + $0x768] ss:$16 sps:$4 sm:$0xff]  }
 0x5df   : > { %6199 = vmatprep.subr.bf16.mxu1 %v8198_v56  ;;  %v8273_v56 = vld [vmem:[%s11056_s7 + $0x784] ss:$16 sps:$4 sm:$0xff]  }
 0x5e1   : > { %5913 = vmatpush1.bf16.msra.mxu0 %v8193_v58  ;;  %v8271_v58 = vld [vmem:[%s11056_s7 + $0x780] ss:$16 sps:$4 sm:$0xff]  }
 0x5e2   : > { %6200 = vmatpush1.bf16.msra.mxu1 %v8196_v59  ;;  %5923 = vmatprep.subr.bf16.mxu0 %v8201_v61  ;;  %v8274_v59 = vld [vmem:[%s11056_s7 + $0x788] ss:$16 sps:$4 sm:$0xff]   ;;  %v8282_v61 = vld [vmem:[%s11056_s7 + $0x7ac] ss:$16 sps:$4 sm:$0xff]  }
 0x5e3   : > { %6210 = vmatprep.subr.bf16.mxu1 %v8204_v62  ;;  %v8277_v62 = vld [vmem:[%s11056_s7 + $0x7a0] ss:$16 sps:$4 sm:$0xff]  }
 0x5e4   : > { %5915 = vmatmul.mubr.bf16.vlgmr.msra.gmra.mrb[64].mxu0 %v3366_v1 }
 0x5e5   : > { %6202 = vmatmul.mubr.bf16.vlgmr.msra.gmra.mrb[52].mxu1 %v3366_v1  ;;  %5924 = vmatpush1.bf16.msra.mxu0 %v8199_v0  ;;  %v8285_v0 = vld [vmem:[%s11056_s7 + $0x7c4] ss:$16 sps:$4 sm:$0xff]   ;;  %v8288_v1 = vld [vmem:[%s11056_s7 + $0x7cc] ss:$16 sps:$4 sm:$0xff]  }
 0x5e6   : > { %5955 = vmatprep.mubr.bf16.mxu0 %v3369_v3  ;;  %6211 = vmatpush1.bf16.msra.mxu1 %v8202_v25  ;;  %v8283_v25 = vld [vmem:[%s11056_s7 + $0x7c0] ss:$16 sps:$4 sm:$0xff]  }
 0x5e7   : > { %6242 = vmatprep.mubr.bf16.mxu1 %v3369_v3  ;;  %5925 = vmatprep.subr.bf16.mxu0 %v8207_v2  ;;  %v8286_v2 = vld [vmem:[%s11056_s7 + $0x7c8] ss:$16 sps:$4 sm:$0xff]   ;;  %v8291_v3 = vld [vmem:[%s11056_s7 + $0x7e4] ss:$16 sps:$4 sm:$0xff]  }
 0x5e8   : > { %6212 = vmatprep.subr.bf16.mxu1 %v8210_v5  ;;  %v3323_v5 = vsub.s32 6, %v9701_v17  ;;  %v8297_v17 = vld [vmem:[%s11056_s7 + $0x804] ss:$16 sps:$4 sm:$0xff]  }
 0x5e9   : > { %5926 = vmatpush1.bf16.msra.mxu0 %v8205_v6  ;;  %v8294_v6 = vld [vmem:[%s11056_s7 + $0x7ec] ss:$16 sps:$4 sm:$0xff]  }
 0x5ea   : > { %6213 = vmatpush1.bf16.msra.mxu1 %v8208_v7  ;;  %5927 = vmatprep.subr.bf16.mxu0 %v8213_v8  ;;  %v8289_v7 = vld [vmem:[%s11056_s7 + $0x7e0] ss:$16 sps:$4 sm:$0xff]   ;;  %v8292_v8 = vld [vmem:[%s11056_s7 + $0x7e8] ss:$16 sps:$4 sm:$0xff]  }
 0x5eb   : > { %6214 = vmatprep.subr.bf16.mxu1 %v8216_v9  ;;  %v3324_v9 = vrot.slane %v9848_v31, %v3323_v5  ;;  %v8298_v31 = vld [vmem:[%s11056_s7 + $0x808] ss:$16 sps:$4 sm:$0xff]  }
 0x5ec   : > { %v8370_v5 = vld [vmem:[%s11056_s7 + $0x988] ss:$16 sps:$4 sm:$0xff]  }
 0x5ed   : > { %5928 = vmatpush1.bf16.msra.mxu0 %v8211_v10  ;;  %v8300_v10 = vld [vmem:[%s11056_s7 + $0x80c] ss:$16 sps:$4 sm:$0xff]  }
 0x5ee   : > { %6215 = vmatpush1.bf16.msra.mxu1 %v8214_v11  ;;  %5929 = vmatprep.subr.bf16.mxu0 %v8219_v12  ;;  %v3336_v11 = vrot.slane %v9883_v29, %v9838_v24  ;;  %v8295_v12 = vld [vmem:[%s11056_s7 + $0x800] ss:$16 sps:$4 sm:$0xff]   ;;  %v8306_v29 = vld [vmem:[%s11056_s7 + $0x82c] ss:$16 sps:$4 sm:$0xff]  }
 0x5ef   : > { %6216 = vmatprep.subr.bf16.mxu1 %v8222_v13  ;;  %v3368_v13 = vpack.c.bf16 %v3324_v9, %v3324_v9  ;;  %v8376_v9 = vld [vmem:[%s11056_s7 + $0x9a8] ss:$16 sps:$4 sm:$0xff]  }
 0x5f1   : > { %5930 = vmatpush1.bf16.msra.mxu0 %v8217_v14  ;;  %v8303_v14 = vld [vmem:[%s11056_s7 + $0x824] ss:$16 sps:$4 sm:$0xff]  }
 0x5f2   : > { %6217 = vmatpush1.bf16.msra.mxu1 %v8220_v15  ;;  %5931 = vmatprep.subr.bf16.mxu0 %v8225_v16  ;;  %v3371_v15 = vpack.c.bf16 %v3336_v11, %v3336_v11  ;;  %v8301_v16 = vld [vmem:[%s11056_s7 + $0x820] ss:$16 sps:$4 sm:$0xff]  }
 0x5f3   : > { %6218 = vmatprep.subr.bf16.mxu1 %v8228_v4  ;;  %v8304_v4 = vld [vmem:[%s11056_s7 + $0x828] ss:$16 sps:$4 sm:$0xff]   ;;  %v8379_v11 = vld [vmem:[%s11056_s7 + $0x9c0] ss:$16 sps:$4 sm:$0xff]  }
 0x5f5   : > { %5932 = vmatpush1.bf16.msra.mxu0 %v8223_v18  ;;  %v8309_v18 = vld [vmem:[%s11056_s7 + $0x844] ss:$16 sps:$4 sm:$0xff]  }
 0x5f6   : > { %6219 = vmatpush1.bf16.msra.mxu1 %v8226_v19  ;;  %5933 = vmatprep.subr.bf16.mxu0 %v8231_v21  ;;  %v8312_v19 = vld [vmem:[%s11056_s7 + $0x84c] ss:$16 sps:$4 sm:$0xff]   ;;  %v8307_v21 = vld [vmem:[%s11056_s7 + $0x840] ss:$16 sps:$4 sm:$0xff]  }
 0x5f7   : > { %6220 = vmatprep.subr.bf16.mxu1 %v8234_v20  ;;  %v8310_v20 = vld [vmem:[%s11056_s7 + $0x848] ss:$16 sps:$4 sm:$0xff]  }
 0x5f9   : > { %5934 = vmatpush1.bf16.msra.mxu0 %v8229_v23  ;;  %v8315_v23 = vld [vmem:[%s11056_s7 + $0x864] ss:$16 sps:$4 sm:$0xff]  }
 0x5fa   : > { %6221 = vmatpush1.bf16.msra.mxu1 %v8232_v22  ;;  %5935 = vmatprep.subr.bf16.mxu0 %v8237_v30  ;;  %v8318_v22 = vld [vmem:[%s11056_s7 + $0x86c] ss:$16 sps:$4 sm:$0xff]   ;;  %v8313_v30 = vld [vmem:[%s11056_s7 + $0x860] ss:$16 sps:$4 sm:$0xff]  }
 0x5fb   : > { %6222 = vmatprep.subr.bf16.mxu1 %v8240_v32  ;;  %v8316_v32 = vld [vmem:[%s11056_s7 + $0x868] ss:$16 sps:$4 sm:$0xff]  }
 0x5fd   : > { %5936 = vmatpush1.bf16.msra.mxu0 %v8235_v33  ;;  %v8321_v33 = vld [vmem:[%s11056_s7 + $0x884] ss:$16 sps:$4 sm:$0xff]  }
 0x5fe   : > { %6223 = vmatpush1.bf16.msra.mxu1 %v8238_v26  ;;  %5937 = vmatprep.subr.bf16.mxu0 %v8243_v34  ;;  %v8324_v26 = vld [vmem:[%s11056_s7 + $0x88c] ss:$16 sps:$4 sm:$0xff]   ;;  %v8319_v34 = vld [vmem:[%s11056_s7 + $0x880] ss:$16 sps:$4 sm:$0xff]  }
 0x5ff   : > { %6224 = vmatprep.subr.bf16.mxu1 %v8246_v35  ;;  %v8322_v35 = vld [vmem:[%s11056_s7 + $0x888] ss:$16 sps:$4 sm:$0xff]  }
 0x601   : > { %5938 = vmatpush1.bf16.msra.mxu0 %v8241_v36  ;;  %v8327_v36 = vld [vmem:[%s11056_s7 + $0x8a4] ss:$16 sps:$4 sm:$0xff]  }
 0x602   : > { %6225 = vmatpush1.bf16.msra.mxu1 %v8244_v37  ;;  %5939 = vmatprep.subr.bf16.mxu0 %v8249_v38  ;;  %v8330_v37 = vld [vmem:[%s11056_s7 + $0x8ac] ss:$16 sps:$4 sm:$0xff]   ;;  %v8325_v38 = vld [vmem:[%s11056_s7 + $0x8a0] ss:$16 sps:$4 sm:$0xff]  }
 0x603   : > { %6226 = vmatprep.subr.bf16.mxu1 %v8252_v39  ;;  %v8328_v39 = vld [vmem:[%s11056_s7 + $0x8a8] ss:$16 sps:$4 sm:$0xff]  }
 0x605   : > { %5940 = vmatpush1.bf16.msra.mxu0 %v8247_v40  ;;  %v8333_v40 = vld [vmem:[%s11056_s7 + $0x8c4] ss:$16 sps:$4 sm:$0xff]  }
 0x606   : > { %6227 = vmatpush1.bf16.msra.mxu1 %v8250_v42  ;;  %5941 = vmatprep.subr.bf16.mxu0 %v8255_v43  ;;  %v8336_v42 = vld [vmem:[%s11056_s7 + $0x8cc] ss:$16 sps:$4 sm:$0xff]   ;;  %v8331_v43 = vld [vmem:[%s11056_s7 + $0x8c0] ss:$16 sps:$4 sm:$0xff]  }
 0x607   : > { %6228 = vmatprep.subr.bf16.mxu1 %v8258_v44  ;;  %v8334_v44 = vld [vmem:[%s11056_s7 + $0x8c8] ss:$16 sps:$4 sm:$0xff]  }
 0x609   : > { %5942 = vmatpush1.bf16.msra.mxu0 %v8253_v46  ;;  %v8339_v46 = vld [vmem:[%s11056_s7 + $0x8e4] ss:$16 sps:$4 sm:$0xff]  }
 0x60a   : > { %6229 = vmatpush1.bf16.msra.mxu1 %v8256_v47  ;;  %5943 = vmatprep.subr.bf16.mxu0 %v8261_v48  ;;  %v8342_v47 = vld [vmem:[%s11056_s7 + $0x8ec] ss:$16 sps:$4 sm:$0xff]   ;;  %v8337_v48 = vld [vmem:[%s11056_s7 + $0x8e0] ss:$16 sps:$4 sm:$0xff]  }
 0x60b   : > { %6230 = vmatprep.subr.bf16.mxu1 %v8264_v50  ;;  %v8340_v50 = vld [vmem:[%s11056_s7 + $0x8e8] ss:$16 sps:$4 sm:$0xff]  }
 0x60d   : > { %5944 = vmatpush1.bf16.msra.mxu0 %v8259_v51  ;;  %v8345_v51 = vld [vmem:[%s11056_s7 + $0x904] ss:$16 sps:$4 sm:$0xff]  }
 0x60e   : > { %6231 = vmatpush1.bf16.msra.mxu1 %v8262_v52  ;;  %5945 = vmatprep.subr.bf16.mxu0 %v8267_v53  ;;  %v8348_v52 = vld [vmem:[%s11056_s7 + $0x90c] ss:$16 sps:$4 sm:$0xff]   ;;  %v8343_v53 = vld [vmem:[%s11056_s7 + $0x900] ss:$16 sps:$4 sm:$0xff]  }
 0x60f   : > { %6232 = vmatprep.subr.bf16.mxu1 %v8270_v54  ;;  %v8346_v54 = vld [vmem:[%s11056_s7 + $0x908] ss:$16 sps:$4 sm:$0xff]  }
 0x611   : > { %5946 = vmatpush1.bf16.msra.mxu0 %v8265_v49  ;;  %v8351_v49 = vld [vmem:[%s11056_s7 + $0x924] ss:$16 sps:$4 sm:$0xff]  }
 0x612   : > { %6233 = vmatpush1.bf16.msra.mxu1 %v8268_v55  ;;  %5947 = vmatprep.subr.bf16.mxu0 %v8273_v56  ;;  %v8354_v55 = vld [vmem:[%s11056_s7 + $0x92c] ss:$16 sps:$4 sm:$0xff]   ;;  %v8349_v56 = vld [vmem:[%s11056_s7 + $0x920] ss:$16 sps:$4 sm:$0xff]  }
 0x613   : > { %6234 = vmatprep.subr.bf16.mxu1 %v8276_v57  ;;  %v8352_v57 = vld [vmem:[%s11056_s7 + $0x928] ss:$16 sps:$4 sm:$0xff]  }
 0x615   : > { %5948 = vmatpush1.bf16.msra.mxu0 %v8271_v58  ;;  %v8357_v58 = vld [vmem:[%s11056_s7 + $0x944] ss:$16 sps:$4 sm:$0xff]  }
 0x616   : > { %6235 = vmatpush1.bf16.msra.mxu1 %v8274_v59  ;;  %5949 = vmatprep.subr.bf16.mxu0 %v8279_v60  ;;  %v8360_v59 = vld [vmem:[%s11056_s7 + $0x94c] ss:$16 sps:$4 sm:$0xff]   ;;  %v8355_v60 = vld [vmem:[%s11056_s7 + $0x940] ss:$16 sps:$4 sm:$0xff]  }
 0x617   : > { %6236 = vmatprep.subr.bf16.mxu1 %v8282_v61  ;;  %v8358_v61 = vld [vmem:[%s11056_s7 + $0x948] ss:$16 sps:$4 sm:$0xff]  }
 0x619   : > { %5950 = vmatpush1.bf16.msra.mxu0 %v8277_v62  ;;  %v8363_v62 = vld [vmem:[%s11056_s7 + $0x964] ss:$16 sps:$4 sm:$0xff]  }
 0x61a   : > { %6237 = vmatpush1.bf16.msra.mxu1 %v8280_v63  ;;  %5951 = vmatprep.subr.bf16.mxu0 %v8285_v0  ;;  %v8366_v63 = vld [vmem:[%s11056_s7 + $0x96c] ss:$16 sps:$4 sm:$0xff]   ;;  %v8361_v0 = vld [vmem:[%s11056_s7 + $0x960] ss:$16 sps:$4 sm:$0xff]  }
 0x61b   : > { %6238 = vmatprep.subr.bf16.mxu1 %v8288_v1  ;;  %v8364_v1 = vld [vmem:[%s11056_s7 + $0x968] ss:$16 sps:$4 sm:$0xff]  }
 0x61d   : > { %5952 = vmatpush1.bf16.msra.mxu0 %v8283_v25  ;;  %v8369_v25 = vld [vmem:[%s11056_s7 + $0x984] ss:$16 sps:$4 sm:$0xff]  }
 0x61e   : > { %6239 = vmatpush1.bf16.msra.mxu1 %v8286_v2  ;;  %5953 = vmatprep.subr.bf16.mxu0 %v8291_v3  ;;  %v8372_v2 = vld [vmem:[%s11056_s7 + $0x98c] ss:$16 sps:$4 sm:$0xff]   ;;  %v8367_v3 = vld [vmem:[%s11056_s7 + $0x980] ss:$16 sps:$4 sm:$0xff]  }
 0x61f   : > { %6240 = vmatprep.subr.bf16.mxu1 %v8294_v6  ;;  %v8375_v6 = vld [vmem:[%s11056_s7 + $0x9a4] ss:$16 sps:$4 sm:$0xff]  }
 0x621   : > { %5954 = vmatpush1.bf16.msra.mxu0 %v8289_v7  ;;  %v8378_v7 = vld [vmem:[%s11056_s7 + $0x9ac] ss:$16 sps:$4 sm:$0xff]  }
 0x622   : > { %6241 = vmatpush1.bf16.msra.mxu1 %v8292_v8  ;;  %5964 = vmatprep.subr.bf16.mxu0 %v8297_v17  ;;  %v8373_v8 = vld [vmem:[%s11056_s7 + $0x9a0] ss:$16 sps:$4 sm:$0xff]   ;;  %v8381_v17 = vld [vmem:[%s11056_s7 + $0x9c4] ss:$16 sps:$4 sm:$0xff]  }
 0x623   : > { %6251 = vmatprep.subr.bf16.mxu1 %v8300_v10  ;;  %v8384_v10 = vld [vmem:[%s11056_s7 + $0x9cc] ss:$16 sps:$4 sm:$0xff]  }
 0x624   : > { %5956 = vmatmul.mubr.bf16.vlgmr.msra.gmra.mrb[64].mxu0 %v3368_v13 }
 0x625   : > { %6243 = vmatmul.mubr.bf16.vlgmr.msra.gmra.mrb[52].mxu1 %v3368_v13  ;;  %5965 = vmatpush1.bf16.msra.mxu0 %v8295_v12  ;;  %v8382_v12 = vld [vmem:[%s11056_s7 + $0x9c8] ss:$16 sps:$4 sm:$0xff]   ;;  %v8387_v13 = vld [vmem:[%s11056_s7 + $0x9e4] ss:$16 sps:$4 sm:$0xff]  }
 0x626   : > { %5996 = vmatprep.mubr.bf16.mxu0 %v3371_v15  ;;  %6252 = vmatpush1.bf16.msra.mxu1 %v8298_v31  ;;  %v8390_v31 = vld [vmem:[%s11056_s7 + $0x9ec] ss:$16 sps:$4 sm:$0xff]  }
 0x627   : > { %6283 = vmatprep.mubr.bf16.mxu1 %v3371_v15  ;;  %5966 = vmatprep.subr.bf16.mxu0 %v8303_v14  ;;  %v8385_v14 = vld [vmem:[%s11056_s7 + $0x9e0] ss:$16 sps:$4 sm:$0xff]   ;;  %v8388_v15 = vld [vmem:[%s11056_s7 + $0x9e8] ss:$16 sps:$4 sm:$0xff]  }
 0x628   : > { %6253 = vmatprep.subr.bf16.mxu1 %v8306_v29  ;;  %v10644_v29 = vld [vmem:[#allocation7 + $0x8] sm:$0x1f] }
 0x629   : > { %5967 = vmatpush1.bf16.msra.mxu0 %v8301_v16  ;;  %v3332_v16 = vrot.slane %v10644_v29, %v9841_v27 }
 0x62a   : > { %6254 = vmatpush1.bf16.msra.mxu1 %v8304_v4  ;;  %5968 = vmatprep.subr.bf16.mxu0 %v8309_v18  ;;  %v8393_v4 = vld [vmem:[%s11056_s7 + $0xa04] ss:$16 sps:$4 sm:$0xff]   ;;  %v8396_v18 = vld [vmem:[%s11056_s7 + $0xa0c] ss:$16 sps:$4 sm:$0xff]  }
 0x62b   : > { %6255 = vmatprep.subr.bf16.mxu1 %v8312_v19  ;;  %v3344_v19 = vrot.slane %v10644_v29, %v9844_v28 }
 0x62d   : > { %5969 = vmatpush1.bf16.msra.mxu0 %v8307_v21  ;;  %v8391_v21 = vld [vmem:[%s11056_s7 + $0xa00] ss:$16 sps:$4 sm:$0xff]  }
 0x62e   : > { %6256 = vmatpush1.bf16.msra.mxu1 %v8310_v20  ;;  %5970 = vmatprep.subr.bf16.mxu0 %v8315_v23  ;;  %v3370_v20 = vpack.c.bf16 %v3332_v16, %v3332_v16  ;;  %v8394_v23 = vld [vmem:[%s11056_s7 + $0xa08] ss:$16 sps:$4 sm:$0xff]   ;;  %v8469_v16 = vld [vmem:[%s11056_s7 + $0xba0] ss:$16 sps:$4 sm:$0xff]  }
 0x62f   : > { %6257 = vmatprep.subr.bf16.mxu1 %v8318_v22  ;;  %v8399_v22 = vld [vmem:[%s11056_s7 + $0xa24] ss:$16 sps:$4 sm:$0xff]  }
 0x631   : > { %5971 = vmatpush1.bf16.msra.mxu0 %v8313_v30  ;;  %v3373_v30 = vpack.c.bf16 %v3344_v19, %v3344_v19  ;;  %v8480_v19 = vld [vmem:[%s11056_s7 + $0xbcc] ss:$16 sps:$4 sm:$0xff]  }
 0x632   : > { %6258 = vmatpush1.bf16.msra.mxu1 %v8316_v32  ;;  %5972 = vmatprep.subr.bf16.mxu0 %v8321_v33  ;;  %v8402_v32 = vld [vmem:[%s11056_s7 + $0xa2c] ss:$16 sps:$4 sm:$0xff]   ;;  %v8397_v33 = vld [vmem:[%s11056_s7 + $0xa20] ss:$16 sps:$4 sm:$0xff]  }
 0x633   : > { %6259 = vmatprep.subr.bf16.mxu1 %v8324_v26  ;;  %v8400_v26 = vld [vmem:[%s11056_s7 + $0xa28] ss:$16 sps:$4 sm:$0xff]  }
 0x635   : > { %5973 = vmatpush1.bf16.msra.mxu0 %v8319_v34  ;;  %v8405_v34 = vld [vmem:[%s11056_s7 + $0xa44] ss:$16 sps:$4 sm:$0xff]  }
 0x636   : > { %6260 = vmatpush1.bf16.msra.mxu1 %v8322_v35  ;;  %5974 = vmatprep.subr.bf16.mxu0 %v8327_v36  ;;  %v8408_v35 = vld [vmem:[%s11056_s7 + $0xa4c] ss:$16 sps:$4 sm:$0xff]   ;;  %v8403_v36 = vld [vmem:[%s11056_s7 + $0xa40] ss:$16 sps:$4 sm:$0xff]  }
 0x637   : > { %6261 = vmatprep.subr.bf16.mxu1 %v8330_v37  ;;  %v8406_v37 = vld [vmem:[%s11056_s7 + $0xa48] ss:$16 sps:$4 sm:$0xff]  }
 0x639   : > { %5975 = vmatpush1.bf16.msra.mxu0 %v8325_v38  ;;  %v8411_v38 = vld [vmem:[%s11056_s7 + $0xa64] ss:$16 sps:$4 sm:$0xff]  }
 0x63a   : > { %6262 = vmatpush1.bf16.msra.mxu1 %v8328_v39  ;;  %5976 = vmatprep.subr.bf16.mxu0 %v8333_v40  ;;  %v8414_v39 = vld [vmem:[%s11056_s7 + $0xa6c] ss:$16 sps:$4 sm:$0xff]   ;;  %v8409_v40 = vld [vmem:[%s11056_s7 + $0xa60] ss:$16 sps:$4 sm:$0xff]  }
 0x63b   : > { %6263 = vmatprep.subr.bf16.mxu1 %v8336_v42  ;;  %v8412_v42 = vld [vmem:[%s11056_s7 + $0xa68] ss:$16 sps:$4 sm:$0xff]  }
 0x63d   : > { %5977 = vmatpush1.bf16.msra.mxu0 %v8331_v43  ;;  %v8417_v43 = vld [vmem:[%s11056_s7 + $0xa84] ss:$16 sps:$4 sm:$0xff]  }
 0x63e   : > { %6264 = vmatpush1.bf16.msra.mxu1 %v8334_v44  ;;  %5978 = vmatprep.subr.bf16.mxu0 %v8339_v46  ;;  %v8420_v44 = vld [vmem:[%s11056_s7 + $0xa8c] ss:$16 sps:$4 sm:$0xff]   ;;  %v8415_v46 = vld [vmem:[%s11056_s7 + $0xa80] ss:$16 sps:$4 sm:$0xff]  }
 0x63f   : > { %6265 = vmatprep.subr.bf16.mxu1 %v8342_v47  ;;  %v8418_v47 = vld [vmem:[%s11056_s7 + $0xa88] ss:$16 sps:$4 sm:$0xff]  }
 0x641   : > { %5979 = vmatpush1.bf16.msra.mxu0 %v8337_v48  ;;  %v8423_v48 = vld [vmem:[%s11056_s7 + $0xaa4] ss:$16 sps:$4 sm:$0xff]  }
 0x642   : > { %6266 = vmatpush1.bf16.msra.mxu1 %v8340_v50  ;;  %5980 = vmatprep.subr.bf16.mxu0 %v8345_v51  ;;  %v8426_v50 = vld [vmem:[%s11056_s7 + $0xaac] ss:$16 sps:$4 sm:$0xff]   ;;  %v8421_v51 = vld [vmem:[%s11056_s7 + $0xaa0] ss:$16 sps:$4 sm:$0xff]  }
 0x643   : > { %6267 = vmatprep.subr.bf16.mxu1 %v8348_v52  ;;  %v8424_v52 = vld [vmem:[%s11056_s7 + $0xaa8] ss:$16 sps:$4 sm:$0xff]  }
 0x645   : > { %5981 = vmatpush1.bf16.msra.mxu0 %v8343_v53  ;;  %v8429_v53 = vld [vmem:[%s11056_s7 + $0xac4] ss:$16 sps:$4 sm:$0xff]  }
 0x646   : > { %6268 = vmatpush1.bf16.msra.mxu1 %v8346_v54  ;;  %5982 = vmatprep.subr.bf16.mxu0 %v8351_v49  ;;  %v8432_v54 = vld [vmem:[%s11056_s7 + $0xacc] ss:$16 sps:$4 sm:$0xff]   ;;  %v8427_v49 = vld [vmem:[%s11056_s7 + $0xac0] ss:$16 sps:$4 sm:$0xff]  }
 0x647   : > { %6269 = vmatprep.subr.bf16.mxu1 %v8354_v55  ;;  %v8430_v55 = vld [vmem:[%s11056_s7 + $0xac8] ss:$16 sps:$4 sm:$0xff]  }
 0x649   : > { %5983 = vmatpush1.bf16.msra.mxu0 %v8349_v56  ;;  %v8435_v56 = vld [vmem:[%s11056_s7 + $0xae4] ss:$16 sps:$4 sm:$0xff]  }
 0x64a   : > { %6270 = vmatpush1.bf16.msra.mxu1 %v8352_v57  ;;  %5984 = vmatprep.subr.bf16.mxu0 %v8357_v58  ;;  %v8438_v57 = vld [vmem:[%s11056_s7 + $0xaec] ss:$16 sps:$4 sm:$0xff]   ;;  %v8433_v58 = vld [vmem:[%s11056_s7 + $0xae0] ss:$16 sps:$4 sm:$0xff]  }
 0x64b   : > { %6271 = vmatprep.subr.bf16.mxu1 %v8360_v59  ;;  %v8436_v59 = vld [vmem:[%s11056_s7 + $0xae8] ss:$16 sps:$4 sm:$0xff]  }
 0x64d   : > { %5985 = vmatpush1.bf16.msra.mxu0 %v8355_v60  ;;  %v8441_v60 = vld [vmem:[%s11056_s7 + $0xb04] ss:$16 sps:$4 sm:$0xff]  }
 0x64e   : > { %6272 = vmatpush1.bf16.msra.mxu1 %v8358_v61  ;;  %5986 = vmatprep.subr.bf16.mxu0 %v8363_v62  ;;  %v8444_v61 = vld [vmem:[%s11056_s7 + $0xb0c] ss:$16 sps:$4 sm:$0xff]   ;;  %v8439_v62 = vld [vmem:[%s11056_s7 + $0xb00] ss:$16 sps:$4 sm:$0xff]  }
 0x64f   : > { %6273 = vmatprep.subr.bf16.mxu1 %v8366_v63  ;;  %v8442_v63 = vld [vmem:[%s11056_s7 + $0xb08] ss:$16 sps:$4 sm:$0xff]  }
 0x651   : > { %5987 = vmatpush1.bf16.msra.mxu0 %v8361_v0  ;;  %v8447_v0 = vld [vmem:[%s11056_s7 + $0xb24] ss:$16 sps:$4 sm:$0xff]  }
 0x652   : > { %6274 = vmatpush1.bf16.msra.mxu1 %v8364_v1  ;;  %5988 = vmatprep.subr.bf16.mxu0 %v8369_v25  ;;  %v8450_v1 = vld [vmem:[%s11056_s7 + $0xb2c] ss:$16 sps:$4 sm:$0xff]   ;;  %v8445_v25 = vld [vmem:[%s11056_s7 + $0xb20] ss:$16 sps:$4 sm:$0xff]  }
 0x653   : > { %6275 = vmatprep.subr.bf16.mxu1 %v8372_v2  ;;  %v8448_v2 = vld [vmem:[%s11056_s7 + $0xb28] ss:$16 sps:$4 sm:$0xff]  }
 0x655   : > { %5989 = vmatpush1.bf16.msra.mxu0 %v8367_v3  ;;  %v8453_v3 = vld [vmem:[%s11056_s7 + $0xb44] ss:$16 sps:$4 sm:$0xff]  }
 0x656   : > { %6276 = vmatpush1.bf16.msra.mxu1 %v8370_v5  ;;  %5990 = vmatprep.subr.bf16.mxu0 %v8375_v6  ;;  %v8456_v5 = vld [vmem:[%s11056_s7 + $0xb4c] ss:$16 sps:$4 sm:$0xff]   ;;  %v8451_v6 = vld [vmem:[%s11056_s7 + $0xb40] ss:$16 sps:$4 sm:$0xff]  }
 0x657   : > { %6277 = vmatprep.subr.bf16.mxu1 %v8378_v7  ;;  %v8454_v7 = vld [vmem:[%s11056_s7 + $0xb48] ss:$16 sps:$4 sm:$0xff]  }
 0x659   : > { %5991 = vmatpush1.bf16.msra.mxu0 %v8373_v8  ;;  %v8459_v8 = vld [vmem:[%s11056_s7 + $0xb64] ss:$16 sps:$4 sm:$0xff]  }
 0x65a   : > { %6278 = vmatpush1.bf16.msra.mxu1 %v8376_v9  ;;  %5992 = vmatprep.subr.bf16.mxu0 %v8381_v17  ;;  %v8462_v9 = vld [vmem:[%s11056_s7 + $0xb6c] ss:$16 sps:$4 sm:$0xff]   ;;  %v8457_v17 = vld [vmem:[%s11056_s7 + $0xb60] ss:$16 sps:$4 sm:$0xff]  }
 0x65b   : > { %6279 = vmatprep.subr.bf16.mxu1 %v8384_v10  ;;  %v8460_v10 = vld [vmem:[%s11056_s7 + $0xb68] ss:$16 sps:$4 sm:$0xff]  }
 0x65d   : > { %5993 = vmatpush1.bf16.msra.mxu0 %v8379_v11  ;;  %v8465_v11 = vld [vmem:[%s11056_s7 + $0xb84] ss:$16 sps:$4 sm:$0xff]  }
 0x65e   : > { %6280 = vmatpush1.bf16.msra.mxu1 %v8382_v12  ;;  %5994 = vmatprep.subr.bf16.mxu0 %v8387_v13  ;;  %v8468_v12 = vld [vmem:[%s11056_s7 + $0xb8c] ss:$16 sps:$4 sm:$0xff]   ;;  %v8463_v13 = vld [vmem:[%s11056_s7 + $0xb80] ss:$16 sps:$4 sm:$0xff]  }
 0x65f   : > { %6281 = vmatprep.subr.bf16.mxu1 %v8390_v31  ;;  %v8466_v31 = vld [vmem:[%s11056_s7 + $0xb88] ss:$16 sps:$4 sm:$0xff]  }
 0x661   : > { %5995 = vmatpush1.bf16.msra.mxu0 %v8385_v14  ;;  %v8471_v14 = vld [vmem:[%s11056_s7 + $0xba4] ss:$16 sps:$4 sm:$0xff]  }
 0x662   : > { %6282 = vmatpush1.bf16.msra.mxu1 %v8388_v15  ;;  %6005 = vmatprep.subr.bf16.mxu0 %v8393_v4  ;;  %v8474_v15 = vld [vmem:[%s11056_s7 + $0xbac] ss:$16 sps:$4 sm:$0xff]   ;;  %v8472_v4 = vld [vmem:[%s11056_s7 + $0xba8] ss:$16 sps:$4 sm:$0xff]  }
 0x663   : > { %6292 = vmatprep.subr.bf16.mxu1 %v8396_v18  ;;  %v8477_v18 = vld [vmem:[%s11056_s7 + $0xbc4] ss:$16 sps:$4 sm:$0xff]  }
 0x664   : > { %5997 = vmatmul.mubr.bf16.vlgmr.msra.gmra.mrb[64].mxu0 %v3370_v20 }
 0x665   : > { %6284 = vmatmul.mubr.bf16.vlgmr.msra.gmra.mrb[52].mxu1 %v3370_v20  ;;  %6006 = vmatpush1.bf16.msra.mxu0 %v8391_v21  ;;  %v8475_v21 = vld [vmem:[%s11056_s7 + $0xbc0] ss:$16 sps:$4 sm:$0xff]   ;;  %v8478_v20 = vld [vmem:[%s11056_s7 + $0xbc8] ss:$16 sps:$4 sm:$0xff]  }
 0x666   : > { %6037 = vmatprep.mubr.bf16.mxu0 %v3373_v30  ;;  %6293 = vmatpush1.bf16.msra.mxu1 %v8394_v23  ;;  %v8483_v23 = vld [vmem:[%s11056_s7 + $0xbe4] ss:$16 sps:$4 sm:$0xff]  }
 0x667   : > { %6324 = vmatprep.mubr.bf16.mxu1 %v3373_v30  ;;  %6007 = vmatprep.subr.bf16.mxu0 %v8399_v22  ;;  %v8486_v22 = vld [vmem:[%s11056_s7 + $0xbec] ss:$16 sps:$4 sm:$0xff]   ;;  %v8481_v30 = vld [vmem:[%s11056_s7 + $0xbe0] ss:$16 sps:$4 sm:$0xff]  }
 0x668   : > { %6294 = vmatprep.subr.bf16.mxu1 %v8402_v32  ;;  %v8484_v32 = vld [vmem:[%s11056_s7 + $0xbe8] ss:$16 sps:$4 sm:$0xff]  }
 0x669   : > { %6008 = vmatpush1.bf16.msra.mxu0 %v8397_v33  ;;  %v3340_v33 = vrot.slane %v10644_v29, %v10047_v41  ;;  %v8490_v29 = vld [vmem:[%s11056_s7 + $0xc08] ss:$16 sps:$4 sm:$0xff]  }
 0x66a   : > { %6295 = vmatpush1.bf16.msra.mxu1 %v8400_v26  ;;  %6009 = vmatprep.subr.bf16.mxu0 %v8405_v34  ;;  %v8489_v26 = vld [vmem:[%s11056_s7 + $0xc04] ss:$16 sps:$4 sm:$0xff]   ;;  %v8492_v34 = vld [vmem:[%s11056_s7 + $0xc0c] ss:$16 sps:$4 sm:$0xff]  }
 0x66b   : > { %6296 = vmatprep.subr.bf16.mxu1 %v8408_v35  ;;  %v8487_v35 = vld [vmem:[%s11056_s7 + $0xc00] ss:$16 sps:$4 sm:$0xff]  }
 0x66d   : > { %6010 = vmatpush1.bf16.msra.mxu0 %v8403_v36  ;;  %v3372_v36 = vpack.c.bf16 %v3340_v33, %v3340_v33  ;;  %v8533_v33 = vld [vmem:[%s11058_s9 + $0xd8] sm:$0xff]  }
 0x66e   : > { %6297 = vmatpush1.bf16.msra.mxu1 %v8406_v37  ;;  %6011 = vmatprep.subr.bf16.mxu0 %v8411_v38  ;;  %v8495_v37 = vld [vmem:[%s11056_s7 + $0xc24] ss:$16 sps:$4 sm:$0xff]   ;;  %v8498_v38 = vld [vmem:[%s11056_s7 + $0xc2c] ss:$16 sps:$4 sm:$0xff]  }
 0x66f   : > { %6298 = vmatprep.subr.bf16.mxu1 %v8414_v39  ;;  %v8493_v39 = vld [vmem:[%s11056_s7 + $0xc20] ss:$16 sps:$4 sm:$0xff]  }
 0x671   : > { %6012 = vmatpush1.bf16.msra.mxu0 %v8409_v40  ;;  %v8496_v40 = vld [vmem:[%s11056_s7 + $0xc28] ss:$16 sps:$4 sm:$0xff]  }
 0x672   : > { %6299 = vmatpush1.bf16.msra.mxu1 %v8412_v42  ;;  %6013 = vmatprep.subr.bf16.mxu0 %v8417_v43  ;;  %v8501_v42 = vld [vmem:[%s11056_s7 + $0xc44] ss:$16 sps:$4 sm:$0xff]   ;;  %v8504_v43 = vld [vmem:[%s11056_s7 + $0xc4c] ss:$16 sps:$4 sm:$0xff]  }
 0x673   : > { %6300 = vmatprep.subr.bf16.mxu1 %v8420_v44  ;;  %v8612_v44 = vmov 0  }
 0x675   : > { %6014 = vmatpush1.bf16.msra.mxu0 %v8415_v46  ;;  %v8499_v46 = vld [vmem:[%s11056_s7 + $0xc40] ss:$16 sps:$4 sm:$0xff]  }
 0x676   : > { %6301 = vmatpush1.bf16.msra.mxu1 %v8418_v47  ;;  %6015 = vmatprep.subr.bf16.mxu0 %v8423_v48  ;;  %v8502_v47 = vld [vmem:[%s11056_s7 + $0xc48] ss:$16 sps:$4 sm:$0xff]   ;;  %v8507_v48 = vld [vmem:[%s11056_s7 + $0xc64] ss:$16 sps:$4 sm:$0xff]  }
 0x677   : > { %6302 = vmatprep.subr.bf16.mxu1 %v8426_v50  ;;  %v8510_v50 = vld [vmem:[%s11056_s7 + $0xc6c] ss:$16 sps:$4 sm:$0xff]  }
 0x679   : > { %6016 = vmatpush1.bf16.msra.mxu0 %v8421_v51  ;;  %v8505_v51 = vld [vmem:[%s11056_s7 + $0xc60] ss:$16 sps:$4 sm:$0xff]  }
 0x67a   : > { %6303 = vmatpush1.bf16.msra.mxu1 %v8424_v52  ;;  %6017 = vmatprep.subr.bf16.mxu0 %v8429_v53  ;;  %v8508_v52 = vld [vmem:[%s11056_s7 + $0xc68] ss:$16 sps:$4 sm:$0xff]   ;;  %v8511_v53 = vld [vmem:[%s11058_s9 + $0x40] sm:$0xff]  }
 0x67b   : > { %6304 = vmatprep.subr.bf16.mxu1 %v8432_v54  ;;  %v8512_v54 = vld [vmem:[%s11058_s9] sm:$0xff]  }
 0x67d   : > { %6018 = vmatpush1.bf16.msra.mxu0 %v8427_v49  ;;  %v3374_v49 = vpack.c.bf16 %v9888_v45, %v9888_v45  ;;  %v8516_v45 = vld [vmem:[%s11058_s9 + $0x10] sm:$0xff]  }
 0x67e   : > { %6305 = vmatpush1.bf16.msra.mxu1 %v8430_v55  ;;  %6019 = vmatprep.subr.bf16.mxu0 %v8435_v56  ;;  %v8513_v55 = vld [vmem:[%s11058_s9 + $0x48] sm:$0xff]  }
 0x67f   : > { %6306 = vmatprep.subr.bf16.mxu1 %v8438_v57  ;;  %v8514_v56 = vld [vmem:[%s11058_s9 + $0x8] sm:$0xff]   ;;  %v8515_v57 = vld [vmem:[%s11058_s9 + $0x50] sm:$0xff]  }
 0x681   : > { %6020 = vmatpush1.bf16.msra.mxu0 %v8433_v58  ;;  %v8517_v58 = vld [vmem:[%s11058_s9 + $0x58] sm:$0xff]  }
 0x682   : > { %6307 = vmatpush1.bf16.msra.mxu1 %v8436_v59  ;;  %6021 = vmatprep.subr.bf16.mxu0 %v8441_v60  ;;  %v8518_v59 = vld [vmem:[%s11058_s9 + $0x18] sm:$0xff]   ;;  %v8519_v60 = vld [vmem:[%s11058_s9 + $0x60] sm:$0xff]  }
 0x683   : > { %6308 = vmatprep.subr.bf16.mxu1 %v8444_v61  ;;  %v8520_v61 = vld [vmem:[%s11058_s9 + $0x20] sm:$0xff]  }
 0x685   : > { %6022 = vmatpush1.bf16.msra.mxu0 %v8439_v62  ;;  %v8521_v62 = vld [vmem:[%s11058_s9 + $0x68] sm:$0xff]  }
 0x686   : > { %6309 = vmatpush1.bf16.msra.mxu1 %v8442_v63  ;;  %6023 = vmatprep.subr.bf16.mxu0 %v8447_v0  ;;  %v8522_v63 = vld [vmem:[%s11058_s9 + $0x28] sm:$0xff]   ;;  %v8523_v0 = vld [vmem:[%s11058_s9 + $0x70] sm:$0xff]  }
 0x687   : > { %6310 = vmatprep.subr.bf16.mxu1 %v8450_v1  ;;  %v8524_v1 = vld [vmem:[%s11058_s9 + $0x30] sm:$0xff]  }
 0x689   : > { %6024 = vmatpush1.bf16.msra.mxu0 %v8445_v25  ;;  %v8525_v25 = vld [vmem:[%s11058_s9 + $0x78] sm:$0xff]  }
 0x68a   : > { %6311 = vmatpush1.bf16.msra.mxu1 %v8448_v2  ;;  %6025 = vmatprep.subr.bf16.mxu0 %v8453_v3  ;;  %v8526_v2 = vld [vmem:[%s11058_s9 + $0x38] sm:$0xff]   ;;  %v8527_v3 = vld [vmem:[%s11058_s9 + $0xc0] sm:$0xff]  }
 0x68b   : > { %6312 = vmatprep.subr.bf16.mxu1 %v8456_v5  ;;  %v3775_v5 = vld [vmem:[%s11057_s8] sm:$0xf] }
 0x68d   : > { %6026 = vmatpush1.bf16.msra.mxu0 %v8451_v6  ;;  %v3780_v6 = vrot.slane %v3775_v5, %v9841_v27 }
 0x68e   : > { %6313 = vmatpush1.bf16.msra.mxu1 %v8454_v7  ;;  %6027 = vmatprep.subr.bf16.mxu0 %v8459_v8  ;;  %v3784_v7 = vrot.slane %v3775_v5, %v9838_v24  ;;  %v3792_v8 = vrot.slane %v3775_v5, %v9844_v28  ;;  %v8528_v24 = vld [vmem:[%s11058_s9 + $0x80] sm:$0xff]   ;;  %v8529_v28 = vld [vmem:[%s11058_s9 + $0xc8] sm:$0xff]  }
 0x68f   : > { %6314 = vmatprep.subr.bf16.mxu1 %v8462_v9 }
 0x691   : > { %6028 = vmatpush1.bf16.msra.mxu0 %v8457_v17 }
 0x692   : > { %6315 = vmatpush1.bf16.msra.mxu1 %v8460_v10  ;;  %6029 = vmatprep.subr.bf16.mxu0 %v8465_v11 }
 0x693   : > { %6316 = vmatprep.subr.bf16.mxu1 %v8468_v12 }
 0x695   : > { %6030 = vmatpush1.bf16.msra.mxu0 %v8463_v13 }
 0x696   : > { %6317 = vmatpush1.bf16.msra.mxu1 %v8466_v31  ;;  %6031 = vmatprep.subr.bf16.mxu0 %v8471_v14 }
 0x697   : > { %6318 = vmatprep.subr.bf16.mxu1 %v8474_v15 }
 0x699   : > { %6032 = vmatpush1.bf16.msra.mxu0 %v8469_v16 }
 0x69a   : > { %6319 = vmatpush1.bf16.msra.mxu1 %v8472_v4  ;;  %6033 = vmatprep.subr.bf16.mxu0 %v8477_v18 }
 0x69b   : > { %6320 = vmatprep.subr.bf16.mxu1 %v8480_v19 }
 0x69d   : > { %6034 = vmatpush1.bf16.msra.mxu0 %v8475_v21 }
 0x69e   : > { %6321 = vmatpush1.bf16.msra.mxu1 %v8478_v20  ;;  %6035 = vmatprep.subr.bf16.mxu0 %v8483_v23 }
 0x69f   : > { %6322 = vmatprep.subr.bf16.mxu1 %v8486_v22  ;;  %v8530_v22 = vld [vmem:[%s11058_s9 + $0x88] sm:$0xff]  }
 0x6a1   : > { %6036 = vmatpush1.bf16.msra.mxu0 %v8481_v30  ;;  %v8531_v30 = vld [vmem:[%s11058_s9 + $0xd0] sm:$0xff]  }
 0x6a2   : > { %6323 = vmatpush1.bf16.msra.mxu1 %v8484_v32  ;;  %6046 = vmatprep.subr.bf16.mxu0 %v8489_v26  ;;  %v8532_v32 = vld [vmem:[%s11058_s9 + $0x90] sm:$0xff]   ;;  %v8534_v26 = vld [vmem:[%s11058_s9 + $0x98] sm:$0xff]  }
 0x6a3   : > { %6333 = vmatprep.subr.bf16.mxu1 %v8492_v34  ;;  %v8535_v34 = vld [vmem:[%s11058_s9 + $0xe0] sm:$0xff]  }
 0x6a4   : > { %6038 = vmatmul.mubr.bf16.vlgmr.msra.gmra.mrb[64].mxu0 %v3372_v36 }
 0x6a5   : > { %6325 = vmatmul.mubr.bf16.vlgmr.msra.gmra.mrb[52].mxu1 %v3372_v36  ;;  %6047 = vmatpush1.bf16.msra.mxu0 %v8487_v35  ;;  %v8536_v35 = vld [vmem:[%s11058_s9 + $0xa0] sm:$0xff]   ;;  %v8537_v36 = vld [vmem:[%s11058_s9 + $0xe8] sm:$0xff]  }
 0x6a6   : > { %6334 = vmatpush1.bf16.msra.mxu1 %v8490_v29  ;;  %6048 = vmatprep.subr.bf16.mxu0 %v8495_v37  ;;  %v8538_v29 = vld [vmem:[%s11058_s9 + $0xa8] sm:$0xff]   ;;  %v3788_v37 = vrot.slane %v3775_v5, %v10047_v41  ;;  %v8542_v41 = vld [vmem:[%s11058_s9 + $0xb8] sm:$0xff]  }
 0x6a7   : > { %6335 = vmatprep.subr.bf16.mxu1 %v8498_v38  ;;  %6078 = vmatprep.mubr.bf16.mxu0 %v8612_v44  ;;  %v8539_v38 = vld [vmem:[%s11058_s9 + $0xf0] sm:$0xff]  }
 0x6a8   : > { %6365 = vmatprep.mubr.bf16.mxu1 %v8612_v44 }
 0x6a9   : > { %6049 = vmatpush1.bf16.msra.mxu0 %v8493_v39  ;;  %v8540_v39 = vld [vmem:[%s11058_s9 + $0xb0] sm:$0xff]  }
 0x6aa   : > { %6336 = vmatpush1.bf16.msra.mxu1 %v8496_v40  ;;  %6050 = vmatprep.subr.bf16.mxu0 %v8501_v42  ;;  %v8541_v42 = vld [vmem:[%s11058_s9 + $0xf8] sm:$0xff]  }
 0x6ab   : > { %6337 = vmatprep.subr.bf16.mxu1 %v8504_v43 }
 0x6ad   : > { %6051 = vmatpush1.bf16.msra.mxu0 %v8499_v46 }
 0x6ae   : > { %6338 = vmatpush1.bf16.msra.mxu1 %v8502_v47  ;;  %6052 = vmatprep.subr.bf16.mxu0 %v8507_v48 }
 0x6af   : > { %6339 = vmatprep.subr.bf16.mxu1 %v8510_v50 }
 0x6b1   : > { %6053 = vmatpush1.bf16.msra.mxu0 %v8505_v51 }
 0x6b2   : > { %6340 = vmatpush1.bf16.msra.mxu1 %v8508_v52  ;;  %7627 = vmatprep.subr.bf16.mxu0 %v8511_v53  ;;  %v7336_v52 = vld [vmem:[%s11059_s10] ss:$0 sm:$0xff] }
 0x6b4   : > { %7334 = vmatmul.mubr.msk.bf16.vlgmr.msra.gmra.mrb[64].mxu0 %vm2237_vm15, %v3374_v49 }
 0x6b5   : > { %7335 = vmatmul.mubr.msk.bf16.vlgmr.msra.gmra.mrb[52].mxu1 %vm2237_vm15, %v3374_v49  ;;  %7628 = vmatpush3.bf16.msra.mxu0 %v8512_v54 }
 0x6b6   : > { %7629 = vmatprep.subr.bf16.mxu0 %v8513_v55 }
 0x6b9   : > { %7630 = vmatpush3.bf16.msra.mxu0 %v8514_v56 }
 0x6ba   : > { %7631 = vmatprep.subr.bf16.mxu0 %v8515_v57 }
 0x6bd   : > { %7632 = vmatpush3.bf16.msra.mxu0 %v8516_v45 }
 0x6be   : > { %7633 = vmatprep.subr.bf16.mxu0 %v8517_v58 }
 0x6c1   : > { %7634 = vmatpush3.bf16.msra.mxu0 %v8518_v59 }
 0x6c2   : > { %7635 = vmatprep.subr.bf16.mxu0 %v8519_v60 }
 0x6c5   : > { %7636 = vmatpush3.bf16.msra.mxu0 %v8520_v61 }
 0x6c6   : > { %7637 = vmatprep.subr.bf16.mxu0 %v8521_v62 }
 0x6c9   : > { %7638 = vmatpush3.bf16.msra.mxu0 %v8522_v63 }
 0x6ca   : > { %7639 = vmatprep.subr.bf16.mxu0 %v8523_v0 }
 0x6cd   : > { %7640 = vmatpush3.bf16.msra.mxu0 %v8524_v1 }
 0x6ce   : > { %7641 = vmatprep.subr.bf16.mxu0 %v8525_v25 }
 0x6d1   : > { %7642 = vmatpush3.bf16.msra.mxu0 %v8526_v2 }
 0x6d2   : > { %7649 = vmatprep.subr.bf16.mxu0 %v8527_v3 }
 0x787   : > { %v6080_v9 = vpop.f32.mrb[64].mxu0 }
 0x788   : > { %v7683_v17 = vadd.f32 %v6080_v9, %v3780_v6  ;;  %v6367_v10 = vpop.f32.mrb[52].mxu1  ;;  %v6082_v11 = vpop.f32.mrb[65].mxu0 }
 0x789   : > { %v7684_v12 = vadd.f32 %v6082_v11, %v3784_v7  ;;  %v6369_v13 = vpop.f32.mrb[53].mxu1  ;;  %v6084_v31 = vpop.f32.mrb[66].mxu0  ;;  %v7685_v40 = vadd.f32 %v6367_v10, %v3788_v37 }
 0x78a   : > { %v6374_v14 = vmax.f32 %v7683_v17, 0.0  ;;  %v7686_v15 = vadd.f32 %v6369_v13, %v3792_v8  ;;  %v6371_v16 = vpop.f32.mrb[54].mxu1  ;;  %v6085_v4 = vpop.f32.mrb[67].mxu0 }
 0x78b   : > { %v6375_v18 = vmax.f32 %v7684_v12, 0.0  ;;  %v6372_v19 = vpop.f32.mrb[55].mxu1  ;;  %v6376_v43 = vmax.f32 %v7685_v40, 0.0 }
 0x78c   : > { %v6377_v21 = vmax.f32 %v7686_v15, 0.0  ;;  %v6378_v27 = vpack.c.bf16 %v6374_v14, %v6374_v14 }
 0x78d   : > { %v6379_v20 = vpack.c.bf16 %v6375_v18, %v6375_v18  ;;  %v6380_v44 = vpack.c.bf16 %v6376_v43, %v6376_v43 }
 0x78e   : > { %v6381_v23 = vpack.c.bf16 %v6377_v21, %v6377_v21 }
 0x78f   : > { %6677 = vmatprep.mubr.bf16.mxu0 %v6379_v20 }
 0x790   : > { %6678 = vmatmul.mubr.bf16.vlgmr.msra.gmra.mrb[68].mxu0 %v6378_v27 }
 0x791   : > { %7650 = vmatpush3.bf16.msra.mxu0 %v8528_v24  ;;  %6717 = vmatprep.mubr.bf16.mxu0 %v6381_v23 }
 0x792   : > { %7651 = vmatprep.subr.bf16.mxu0 %v8529_v28 }
 0x795   : > { %7652 = vmatpush3.bf16.msra.mxu0 %v8530_v22 }
 0x796   : > { %7653 = vmatprep.subr.bf16.mxu0 %v8531_v30 }
 0x799   : > { %7654 = vmatpush3.bf16.msra.mxu0 %v8532_v32 }
 0x79a   : > { %7655 = vmatprep.subr.bf16.mxu0 %v8533_v33 }
 0x79d   : > { %7656 = vmatpush3.bf16.msra.mxu0 %v8534_v26 }
 0x79e   : > { %7657 = vmatprep.subr.bf16.mxu0 %v8535_v34 }
 0x7a1   : > { %7658 = vmatpush3.bf16.msra.mxu0 %v8536_v35 }
 0x7a2   : > { %7659 = vmatprep.subr.bf16.mxu0 %v8537_v36 }
 0x7a5   : > { %7660 = vmatpush3.bf16.msra.mxu0 %v8538_v29 }
 0x7a6   : > { %7661 = vmatprep.subr.bf16.mxu0 %v8539_v38 }
 0x7a9   : > { %7662 = vmatpush3.bf16.msra.mxu0 %v8540_v39 }
 0x7aa   : > { %7663 = vmatprep.subr.bf16.mxu0 %v8541_v42 }
 0x7ad   : > { %7664 = vmatpush3.bf16.msra.mxu0 %v8542_v41 }
 0x7b0   : > { %6718 = vmatmul.mubr.bf16.vlgmr.msra.gmra.mrb[72].mxu0 %v6380_v44 }
 0x863   : > { %v7643_v46 = vpop.f32.mrb[68].mxu0 }
 0x864   : > { %v7644_v47 = vpop.f32.mrb[69].mxu0 }
 0x865   : > { %v7645_v48 = vadd.f32 %v7644_v47, %v7643_v46  ;;  %v7646_v50 = vpop.f32.mrb[70].mxu0 }
 0x866   : > { %v7647_v51 = vpop.f32.mrb[71].mxu0 }
 0x867   : > { %v6680_v49 = vadd.f32 %v7645_v48, %v7336_v52 }
 0x883   : > { %v7665_v53 = vpop.f32.mrb[72].mxu0 }
 0x884   : > { %v7666_v54 = vpop.f32.mrb[73].mxu0 }
 0x885   : > { %v7667_v55 = vadd.f32 %v7666_v54, %v7665_v53  ;;  %v7668_v56 = vpop.f32.mrb[74].mxu0 }
 0x886   : > { %v7669_v57 = vpop.f32.mrb[75].mxu0 }
 0x887   : > { %v6720_v45 = vadd.f32 %v7667_v55, %v6680_v49 }
 0x889   : > { %6725 = vst [vmem:[%s381_s29] sm:$0x1] %v6720_v45 }
 0x88a   : > { %8557 = shalt.err (!%p8554_p3)
}
 0x88b   : > { %s8558_s12 = scalar_lea.hbm %s11007_s14, 16  ;;  %s8562_s26 = scalar_lea.hbm %s11060_s11, 64 }
 0x88c   : > { %p8559_p4 = scmp.ne.s32.totalorder %s11007_s14, %s8558_s12  ;;  %p8563_p9 = scmp.lt.u32.totalorder %s11007_s14, %s11060_s11 }
 0x88d   : > { %p8564_p10 = scmp.lt.u32.totalorder %s8562_s26, %s8558_s12  ;;  %p8566_p12 = scmp.lt.u32.totalorder %s8558_s12, %s11007_s14 }
 0x88e   : > { %p8560_p7 = pnand %p8559_p4, %p8712_p5 }
 0x88f   : > { %p8565_p11 = por %p8564_p10, %p8563_p9 }
 0x890   : > { %p8561_p8 = pneg %p8560_p7 }
 0x891   : > { %p8567_p13 = por %p8566_p12, %p8565_p11 }
 0x893   : > { %p8568_p0 = pnand %p8567_p13, %p8561_p8 }
 0x895   : > { %8571 = shalt.err (!%p8568_p0)
}
 0x896   : > { %7735 = dma.vmem_to_hbm [thread:$0]  (%p8712_p5), %s11009_s30, 16, %s11007_s14, %s6727_s15  }
 0x897 PF: > { %p7741_p1 = scmp.ge.s32.totalorder %s8606_s20, 2  ;;  %s6751_s21 = sand.u32 1, %s8594_s17  }
 0x898   : > { %s6752_s22 = scalar_lea.sflag [#allocation9], %s6751_s21 }
 0x899   : > { %p7738_p2 = pnand %p7741_p1, %p8716_p6 }
 0x89b   : > { %8589 = dma.done.wait (!%p7738_p2), %s6752_s22, 16  }
 0x89c   : > { %8591 = vsyncadd (!%p7738_p2), %s6752_s22, 4294967280  ;;  %s11171_s25 = sld [smem:[#allocation11_spill]]  ;;  %p21_p3 = scmp.ge.s32.totalorder %s8699_s23, 6  }
 0x89d   : > { %s11172_s17 = smov %s8598_s18  ;;  %s11173_s18 = smov %s8602_s19 }
 0x89e   : > { %s11175_s20 = smov %s8699_s23  ;;  %23 = sbr.rel (!%p21_p3) target bundleno = 3 (0x3), region = 99 }
 0x8a2   : > { %s11174_s19 = smov %s11171_s25 }
 0x8a5   :  { %6756 = vsyncpa [#allocation9], 1 }
 0x8a6   :  { %6758 = vsyncpa [#allocation9 + $0x1], 1 }

</bundles_post_ra>
